<compile_context>
chip_gen: v7x
topology: tpu7x:2x2x1
jax: 0.10.0
libtpu: 0.0.40
codegen_flags: <defaults>
</compile_context>

<pallas_src>
import functools

import jax
import jax.numpy as jnp
from jax.experimental import pallas as pl
from jax.experimental.pallas import tpu as pltpu


def _round_up(x, m):
    return (x + m - 1) // m * m


def _pick_tile(dim, candidates):
    for c in candidates:
        if dim % c == 0:
            return c
    return dim


def _choose_m_tile(M):
    """Pick TM that divides M exactly whenever possible (=> no pad copy)."""
    for c in (512, 256, 128, 64, 32, 16, 8):
        if M % c == 0:
            return c, M
    if M <= 512:
        return M, M                      # full-dim block, no padding
    TM = 256                             # rare fallback: pad M
    return TM, _round_up(M, TM)


# ----------------------------------------------------------------------------
# Weight packing: true-shape (K, N)-major bf16 weights + (1, N) f32 bias.
# Done ONCE at init — the forward path never pads or transposes weights.
# ----------------------------------------------------------------------------
def pack_linear(w_kn, b):
    return {"w": jnp.asarray(w_kn, jnp.bfloat16),
            "b": jnp.asarray(b, jnp.float32).reshape(1, -1)}


def pack_conv(w, b):
    """w: (Cout, Cin, kh, kw) -> (kh*kw*Cin, Cout), matching im2col tap order."""
    Cout, Cin, kh, kw = w.shape
    w_kn = jnp.transpose(w, (2, 3, 1, 0)).reshape(kh * kw * Cin, Cout)
    return pack_linear(w_kn, b)


# ----------------------------------------------------------------------------
# Pallas kernel: tiled  out = [relu](x @ W + b [+ residual])
#   bf16 operands on the MXU, f32 accumulator scratch, K tiled ("arbitrary").
#   Output is emitted in bf16 (inter-layer activation dtype).
# ----------------------------------------------------------------------------
def _matmul_kernel(*refs, relu, has_res):
    if has_res:
        x_ref, w_ref, b_ref, r_ref, o_ref, acc_ref = refs
    else:
        x_ref, w_ref, b_ref, o_ref, acc_ref = refs
        r_ref = None
    kk = pl.program_id(2)

    @pl.when(kk == 0)
    def _():
        acc_ref[...] = jnp.zeros_like(acc_ref)

    acc_ref[...] += jnp.dot(x_ref[...], w_ref[...],
                            preferred_element_type=jnp.float32)

    @pl.when(kk == pl.num_programs(2) - 1)
    def _():
        out = acc_ref[...] + b_ref[...]
        if r_ref is not None:
            out = out + r_ref[...].astype(jnp.float32)   # fused residual add
        if relu:
            out = jnp.maximum(out, 0.0)                  # fused ReLU
        o_ref[...] = out.astype(o_ref.dtype)


def pallas_linear(x, pk, relu=False, residual=None, out_dtype=jnp.bfloat16):
    """x: (M, K) -> (M, N) using pre-packed weights `pk` (true shapes)."""
    M, K = x.shape
    w, b = pk["w"], pk["b"]
    assert w.shape[0] == K, (w.shape, K)
    N = w.shape[1]

    TM, Mp = _choose_m_tile(M)
    TN = _pick_tile(N, (256, 128)) if N % 128 == 0 else N
    TK = _pick_tile(K, (512, 384, 256, 128)) if K % 128 == 0 else K

    # v7x megacore: try to expose >= 2 parallel output blocks.
    if (Mp // TM) * (N // TN) == 1:
        if TN % 256 == 0:
            TN //= 2
        elif TM % 16 == 0:
            TM //= 2

    xb = x.astype(jnp.bfloat16)
    if Mp != M:                       # rare fallback path, never hit at test shapes
        xb = jnp.zeros((Mp, K), jnp.bfloat16).at[:M].set(xb)

    has_res = residual is not None
    inputs = [xb, w, b]
    in_specs = [
        pl.BlockSpec((TM, TK), lambda i, j, k: (i, k)),
        pl.BlockSpec((TK, TN), lambda i, j, k: (k, j)),
        pl.BlockSpec((1, TN), lambda i, j, k: (0, j)),
    ]
    res_bytes = 0
    if has_res:
        r = residual.astype(jnp.bfloat16)
        if Mp != M:
            r = jnp.zeros((Mp, N), jnp.bfloat16).at[:M].set(r)
        inputs.append(r)
        in_specs.append(pl.BlockSpec((TM, TN), lambda i, j, k: (i, j)))
        res_bytes = Mp * N * 2

    out_bytes = Mp * N * jnp.dtype(out_dtype).itemsize
    cost = pl.CostEstimate(
        flops=int(2 * Mp * N * K),
        transcendentals=0,
        bytes_accessed=int(Mp * K * 2 + K * N * 2 + N * 4 + out_bytes + res_bytes))

    out = pl.pallas_call(
        functools.partial(_matmul_kernel, relu=relu, has_res=has_res),
        out_shape=jax.ShapeDtypeStruct((Mp, N), out_dtype),
        grid=(Mp // TM, N // TN, K // TK),
        in_specs=in_specs,
        out_specs=pl.BlockSpec((TM, TN), lambda i, j, k: (i, j)),
        scratch_shapes=[pltpu.VMEM((TM, TN), jnp.float32)],
        compiler_params=pltpu.CompilerParams(
            dimension_semantics=("parallel", "parallel", "arbitrary")),
        cost_estimate=cost,
    )(*inputs)

    if Mp != M:
        out = out[:M]
    return out


# ----------------------------------------------------------------------------
# Conv / pool helpers — NHWC, bf16 activations end-to-end.
# ----------------------------------------------------------------------------
def conv2d(x, pk, k, stride=1, pad=0, relu=False, residual=None):
    """x: (B, H, W, C) NHWC -> (B, Ho, Wo, Cout) bf16."""
    B, H, W, C = x.shape
    Ho = (H + 2 * pad - k) // stride + 1
    Wo = (W + 2 * pad - k) // stride + 1
    if k == 1 and pad == 0:
        patches = x[:, :stride * Ho:stride, :stride * Wo:stride, :]
        patches = patches.reshape(B * Ho * Wo, C)
    else:
        # TODO(synk): fold the shifted-window gather into the kernel (K-axis over
        # the kh*kw taps with index_map offsets) to drop the im2col materialization.
        xp = jnp.pad(x, ((0, 0), (pad, pad), (pad, pad), (0, 0)))
        cols = [xp[:, i:i + stride * Ho:stride, j:j + stride * Wo:stride, :]
                for i in range(k) for j in range(k)]
        patches = jnp.concatenate(cols, axis=-1).reshape(B * Ho * Wo, C * k * k)
    n = pk["w"].shape[1]
    out = pallas_linear(patches, pk, relu=relu, residual=residual)
    return out.reshape(B, Ho, Wo, n)


def maxpool2d(x, k=3, stride=2, pad=1):
    # TODO(synk): tiny pooling reduction kept in plain JAX (running max fold).
    B, H, W, C = x.shape
    xp = jnp.pad(x, ((0, 0), (pad, pad), (pad, pad), (0, 0)),
                 constant_values=-jnp.inf)
    Ho = (H + 2 * pad - k) // stride + 1
    Wo = (W + 2 * pad - k) // stride + 1
    out = None
    for i in range(k):
        for j in range(k):
            v = xp[:, i:i + stride * Ho:stride, j:j + stride * Wo:stride, :]
            out = v if out is None else jnp.maximum(out, v)
    return out


# ----------------------------------------------------------------------------
# ResNet18 image encoder (NHWC)
# ----------------------------------------------------------------------------
def basic_block(x, blk, stride):
    out = conv2d(x, blk["conv1"], 3, stride=stride, pad=1, relu=True)
    if "down" in blk:
        identity = conv2d(x, blk["down"], 1, stride=stride, pad=0)
    else:
        identity = x
    B, Ho, Wo, C = identity.shape
    # residual add + final ReLU fused into conv2's matmul kernel
    return conv2d(out, blk["conv2"], 3, stride=1, pad=1, relu=True,
                  residual=identity.reshape(B * Ho * Wo, C))


def image_encoder(p, x):
    x = conv2d(x, p["conv1"], 7, stride=2, pad=3, relu=True)
    x = maxpool2d(x, 3, 2, 1)
    for blocks, stride in zip(p["layers"], (1, 2, 2, 2)):
        x = basic_block(x, blocks[0], stride)
        x = basic_block(x, blocks[1], 1)
    x = jnp.mean(x.astype(jnp.float32), axis=(1, 2))     # global avg pool -> (B, 512)
    return pallas_linear(x, p["fc"])                      # (B, embedding_dim) bf16


# ----------------------------------------------------------------------------
# Fused text head: fusion Linear (split weight, no concat) + output Linear,
# tiled over (M, vocab); fusion result lives in a VMEM scratch and is reused
# across vocab tiles (pl.when(j == 0) recompute-per-M-tile).
# ----------------------------------------------------------------------------
def _head_kernel(img_ref, txt_ref, wi_ref, wt_ref, bf_ref, wo_ref, bo_ref,
                 o_ref, fused_ref):
    j = pl.program_id(1)

    @pl.when(j == 0)
    def _():
        fused_ref[...] = (
            jnp.dot(img_ref[...], wi_ref[...], preferred_element_type=jnp.float32)
            + jnp.dot(txt_ref[...], wt_ref[...], preferred_element_type=jnp.float32)
            + bf_ref[...])

    # keep the inter-linear activation in f32 (matches the PyTorch reference)
    out = jnp.dot(fused_ref[...], wo_ref[...].astype(jnp.float32),
                  preferred_element_type=jnp.float32) + bo_ref[...]
    o_ref[...] = out


def fused_head(img_feat, txt_feat, hp):
    B, T, E = txt_feat.shape
    M = B * T
    V = hp["wo"].shape[1]

    TM, Mp = _choose_m_tile(M)
    TN = _pick_tile(V, (512, 256, 128)) if V % 128 == 0 else V

    img = jnp.broadcast_to(img_feat[:, None, :], (B, T, E)).reshape(M, E)
    img = img.astype(jnp.bfloat16)
    txt = txt_feat.reshape(M, E).astype(jnp.bfloat16)
    if Mp != M:
        img = jnp.zeros((Mp, E), jnp.bfloat16).at[:M].set(img)
        txt = jnp.zeros((Mp, E), jnp.bfloat16).at[:M].set(txt)

    cost = pl.CostEstimate(
        flops=int(2 * Mp * E * (2 * E + V)),
        transcendentals=0,
        bytes_accessed=int(2 * Mp * E * 2 + 2 * E * E * 2 + E * V * 2
                           + Mp * V * 4 + (E + V) * 4))

    out = pl.pallas_call(
        _head_kernel,
        out_shape=jax.ShapeDtypeStruct((Mp, V), jnp.float32),
        grid=(Mp // TM, V // TN),
        in_specs=[
            pl.BlockSpec((TM, E), lambda i, j: (i, 0)),
            pl.BlockSpec((TM, E), lambda i, j: (i, 0)),
            pl.BlockSpec((E, E), lambda i, j: (0, 0)),
            pl.BlockSpec((E, E), lambda i, j: (0, 0)),
            pl.BlockSpec((1, E), lambda i, j: (0, 0)),
            pl.BlockSpec((E, TN), lambda i, j: (0, j)),
            pl.BlockSpec((1, TN), lambda i, j: (0, j)),
        ],
        out_specs=pl.BlockSpec((TM, TN), lambda i, j: (i, j)),
        scratch_shapes=[pltpu.VMEM((TM, E), jnp.float32)],
        compiler_params=pltpu.CompilerParams(
            dimension_semantics=("parallel", "arbitrary")),
        cost_estimate=cost,
    )(img, txt, hp["wi"], hp["wt"], hp["bf"], hp["wo"], hp["bo"])

    if Mp != M:
        out = out[:M]
    return out.reshape(B, T, V)


# ----------------------------------------------------------------------------
# Full CustomModel forward
# ----------------------------------------------------------------------------
def custom_model_forward(params, image, text):
    x = jnp.transpose(image, (0, 2, 3, 1)).astype(jnp.bfloat16)  # NCHW -> NHWC once
    img_feat = image_encoder(params, x)                          # (B, E)
    # TODO(synk): embedding gather left to XLA (jnp.take), no Pallas gather kernel.
    txt_feat = jnp.take(params["emb"], text, axis=0)             # (B, T, E)
    return fused_head(img_feat, txt_feat, params["head"])        # (B, T, vocab) f32


# ----------------------------------------------------------------------------
# Deterministic parameter init (shapes follow torchvision resnet18 + the module)
# ----------------------------------------------------------------------------
def init_params(key, embedding_dim, vocab_size):
    keys = iter(jax.random.split(key, 128))
    nk = lambda: next(keys)
    BN_EPS = 1e-5

    def conv_bn_packed(cout, cin, k):
        fan_in = cin * k * k
        w = jax.random.normal(nk(), (cout, cin, k, k), jnp.float32) * (2.0 / fan_in) ** 0.5
        gamma = 1.0 + 0.05 * jax.random.normal(nk(), (cout,), jnp.float32)
        beta = 0.05 * jax.random.normal(nk(), (cout,), jnp.float32)
        # fold inference-mode BN (running_mean=0, running_var=1, eps) into the conv
        scale = gamma / jnp.sqrt(1.0 + BN_EPS)
        return pack_conv(w * scale[:, None, None, None], beta)

    def linear_raw(cout, cin):
        w = jax.random.normal(nk(), (cout, cin), jnp.float32) * (1.0 / cin) ** 0.5
        b = 0.05 * jax.random.normal(nk(), (cout,), jnp.float32)
        return w, b

    p = {"conv1": conv_bn_packed(64, 3, 7)}
    layers = []
    cin = 64
    for cout, stride in [(64, 1), (128, 2), (256, 2), (512, 2)]:
        blocks = []
        for bi in range(2):
            s = stride if bi == 0 else 1
            blk = {
                "conv1": conv_bn_packed(cout, cin if bi == 0 else cout, 3),
                "conv2": conv_bn_packed(cout, cout, 3),
            }
            if bi == 0 and (s != 1 or cin != cout):
                blk["down"] = conv_bn_packed(cout, cin, 1)
            blocks.append(blk)
        layers.append(blocks)
        cin = cout
    p["layers"] = layers

    fc_w, fc_b = linear_raw(embedding_dim, 512)
    p["fc"] = pack_linear(fc_w.T, fc_b)

    p["emb"] = jax.random.normal(nk(), (vocab_size, embedding_dim), jnp.float32) * 0.1

    # fusion: nn.Linear(2E, E) split into image / text halves (cat order:
    # [image, text]); output: nn.Linear(E, V).  All bf16, true shapes.
    E, V = embedding_dim, vocab_size
    fus_w, fus_b = linear_raw(E, 2 * E)
    out_w, out_b = linear_raw(V, E)
    p["head"] = {
        "wi": fus_w[:, :E].T.astype(jnp.bfloat16),      # (E, E)
        "wt": fus_w[:, E:].T.astype(jnp.bfloat16),      # (E, E)
        "bf": fus_b.reshape(1, E).astype(jnp.float32),
        "wo": out_w.T.astype(jnp.bfloat16),             # (E, V)
        "bo": out_b.reshape(1, V).astype(jnp.float32),
    }
    return p


# ----------------------------------------------------------------------------
if __name__ == "__main__":
    embedding_dim, vocab_size = 32, 50
    B, T = 2, 8

    key = jax.random.PRNGKey(0)
    pkey, ikey, tkey = jax.random.split(key, 3)

    params = init_params(pkey, embedding_dim, vocab_size)
    image = jax.random.normal(ikey, (B, 3, 16, 16), jnp.float32)   # NCHW, like PyTorch
    text = jax.random.randint(tkey, (B, T), 0, vocab_size, dtype=jnp.int32)

    out = jax.jit(custom_model_forward)(params, image, text)
    out = jax.block_until_ready(out)

    assert out.shape == (B, T, vocab_size), out.shape
    assert bool(jnp.all(jnp.isfinite(out)))
    print("KERNEL_OK")
</pallas_src>

<mosaic_0001>
module attributes {stable_mosaic.version = 11 : i64} {
  func.func @_matmul_kernel(%arg0: i32, %arg1: i32, %arg2: i32, %arg3: memref<64x147xbf16, #tpu.memory_space<vmem>>, %arg4: memref<147x64xbf16, #tpu.memory_space<vmem>>, %arg5: memref<1x64xf32, #tpu.memory_space<vmem>>, %arg6: memref<64x64xbf16, #tpu.memory_space<vmem>>, %arg7: memref<64x64xf32, #tpu.memory_space<vmem>>) attributes {dimension_semantics = [#tpu.dimension_semantics<parallel>, #tpu.dimension_semantics<parallel>, #tpu.dimension_semantics<arbitrary>], iteration_bounds = array<i64: 2, 1, 1>, scalar_prefetch = 0 : i64, scratch_operands = 1 : i64, tpu.core_type = #tpu.core_type<tc>, window_params = [{transform_indices = @transform_0, window_bounds = array<i64: 64, 147>}, {transform_indices = @transform_1, window_bounds = array<i64: 147, 64>}, {transform_indices = @transform_2, window_bounds = array<i64: 1, 64>}, {transform_indices = @transform_3, window_bounds = array<i64: 64, 64>}]} {
    %c0_i32 = arith.constant 0 : i32
    %0 = arith.cmpi eq, %arg2, %c0_i32 : i32
    %1 = arith.extui %0 : i1 to i32
    %c0_i32_0 = arith.constant 0 : i32
    %2 = arith.cmpi ne, %1, %c0_i32_0 : i32
    scf.if %2 {
      %cst_10 = arith.constant 0.000000e+00 : f32
      %12 = vector.broadcast %cst_10 : f32 to vector<64x64xf32>
      %c0_11 = arith.constant 0 : index
      %c0_12 = arith.constant 0 : index
      %13 = vector.load %arg7[%c0_11, %c0_12] : memref<64x64xf32, #tpu.memory_space<vmem>>, vector<64x64xf32>
      tpu.vector_store %arg7[%c0_11, %c0_12], %12 {strides = array<i32>} : memref<64x64xf32, #tpu.memory_space<vmem>>, vector<64x64xf32>,
    } else {
    }
    %c0 = arith.constant 0 : index
    %c0_1 = arith.constant 0 : index
    %3 = vector.load %arg7[%c0, %c0_1] : memref<64x64xf32, #tpu.memory_space<vmem>>, vector<64x64xf32>
    %c0_2 = arith.constant 0 : index
    %c0_3 = arith.constant 0 : index
    %4 = vector.load %arg3[%c0_2, %c0_3] : memref<64x147xbf16, #tpu.memory_space<vmem>>, vector<64x147xbf16>
    %c0_4 = arith.constant 0 : index
    %c0_5 = arith.constant 0 : index
    %5 = vector.load %arg4[%c0_4, %c0_5] : memref<147x64xbf16, #tpu.memory_space<vmem>>, vector<147x64xbf16>
    %cst = arith.constant dense<0.000000e+00> : vector<64x64xf32>
    %6 = tpu.matmul %4, %5, %cst {dimension_numbers = #tpu.dot_dimension_numbers<[1], [0], [0], [1], [0, 0, 1, 1], [], []>} : vector<64x147xbf16>, vector<147x64xbf16>, vector<64x64xf32> -> vector<64x64xf32>
    %7 = arith.addf %3, %6 : vector<64x64xf32>
    %c0_6 = arith.constant 0 : index
    %c0_7 = arith.constant 0 : index
    %8 = vector.load %arg7[%c0_6, %c0_7] : memref<64x64xf32, #tpu.memory_space<vmem>>, vector<64x64xf32>
    tpu.vector_store %arg7[%c0_6, %c0_7], %7 {strides = array<i32>} : memref<64x64xf32, #tpu.memory_space<vmem>>, vector<64x64xf32>,
    %c0_i32_8 = arith.constant 0 : i32
    %9 = arith.cmpi eq, %arg2, %c0_i32_8 : i32
    %10 = arith.extui %9 : i1 to i32
    %c0_i32_9 = arith.constant 0 : i32
    %11 = arith.cmpi ne, %10, %c0_i32_9 : i32
    scf.if %11 {
      %c0_10 = arith.constant 0 : index
      %c0_11 = arith.constant 0 : index
      %12 = vector.load %arg7[%c0_10, %c0_11] : memref<64x64xf32, #tpu.memory_space<vmem>>, vector<64x64xf32>
      %c0_12 = arith.constant 0 : index
      %c0_13 = arith.constant 0 : index
      %13 = vector.load %arg5[%c0_12, %c0_13] : memref<1x64xf32, #tpu.memory_space<vmem>>, vector<1x64xf32>
      %14 = vector.broadcast %13 : vector<1x64xf32> to vector<64x64xf32>
      %15 = arith.addf %12, %14 : vector<64x64xf32>
      %cst_14 = arith.constant 0.000000e+00 : f32
      %16 = vector.broadcast %cst_14 : f32 to vector<64x64xf32>
      %17 = arith.maximumf %15, %16 : vector<64x64xf32>
      %18 = arith.truncf %17 : vector<64x64xf32> to vector<64x64xbf16>
      %c0_15 = arith.constant 0 : index
      %c0_16 = arith.constant 0 : index
      %19 = vector.load %arg6[%c0_15, %c0_16] : memref<64x64xbf16, #tpu.memory_space<vmem>>, vector<64x64xbf16>
      tpu.vector_store %arg6[%c0_15, %c0_16], %18 {strides = array<i32>} : memref<64x64xbf16, #tpu.memory_space<vmem>>, vector<64x64xbf16>,
    } else {
    }
    return
  }
  func.func @transform_0(%arg0: i32, %arg1: i32, %arg2: i32) -> (i32, i32) {
    %c0_i32 = arith.constant 0 : i32
    return %arg0, %arg2 : i32, i32
  }
  func.func @transform_1(%arg0: i32, %arg1: i32, %arg2: i32) -> (i32, i32) {
    %c0_i32 = arith.constant 0 : i32
    return %arg2, %arg1 : i32, i32
  }
  func.func @transform_2(%arg0: i32, %arg1: i32, %arg2: i32) -> (i32, i32) {
    %c0_i32 = arith.constant 0 : i32
    %c0_i32_0 = arith.constant 0 : i32
    return %c0_i32, %arg1 : i32, i32
  }
  func.func @transform_3(%arg0: i32, %arg1: i32, %arg2: i32) -> (i32, i32) {
    %c0_i32 = arith.constant 0 : i32
    return %arg0, %arg1 : i32, i32
  }
}

module attributes {stable_mosaic.version = 11 : i64} {
  func.func @_matmul_kernel(%arg0: i32, %arg1: i32, %arg2: i32, %arg3: memref<16x576xbf16, #tpu.memory_space<vmem>>, %arg4: memref<576x64xbf16, #tpu.memory_space<vmem>>, %arg5: memref<1x64xf32, #tpu.memory_space<vmem>>, %arg6: memref<16x64xbf16, #tpu.memory_space<vmem>>, %arg7: memref<16x64xf32, #tpu.memory_space<vmem>>) attributes {dimension_semantics = [#tpu.dimension_semantics<parallel>, #tpu.dimension_semantics<parallel>, #tpu.dimension_semantics<arbitrary>], iteration_bounds = array<i64: 2, 1, 1>, scalar_prefetch = 0 : i64, scratch_operands = 1 : i64, tpu.core_type = #tpu.core_type<tc>, window_params = [{transform_indices = @transform_0, window_bounds = array<i64: 16, 576>}, {transform_indices = @transform_1, window_bounds = array<i64: 576, 64>}, {transform_indices = @transform_2, window_bounds = array<i64: 1, 64>}, {transform_indices = @transform_3, window_bounds = array<i64: 16, 64>}]} {
    %c0_i32 = arith.constant 0 : i32
    %0 = arith.cmpi eq, %arg2, %c0_i32 : i32
    %1 = arith.extui %0 : i1 to i32
    %c0_i32_0 = arith.constant 0 : i32
    %2 = arith.cmpi ne, %1, %c0_i32_0 : i32
    scf.if %2 {
      %cst_10 = arith.constant 0.000000e+00 : f32
      %12 = vector.broadcast %cst_10 : f32 to vector<16x64xf32>
      %c0_11 = arith.constant 0 : index
      %c0_12 = arith.constant 0 : index
      %13 = vector.load %arg7[%c0_11, %c0_12] : memref<16x64xf32, #tpu.memory_space<vmem>>, vector<16x64xf32>
      tpu.vector_store %arg7[%c0_11, %c0_12], %12 {strides = array<i32>} : memref<16x64xf32, #tpu.memory_space<vmem>>, vector<16x64xf32>,
    } else {
    }
    %c0 = arith.constant 0 : index
    %c0_1 = arith.constant 0 : index
    %3 = vector.load %arg7[%c0, %c0_1] : memref<16x64xf32, #tpu.memory_space<vmem>>, vector<16x64xf32>
    %c0_2 = arith.constant 0 : index
    %c0_3 = arith.constant 0 : index
    %4 = vector.load %arg3[%c0_2, %c0_3] : memref<16x576xbf16, #tpu.memory_space<vmem>>, vector<16x576xbf16>
    %c0_4 = arith.constant 0 : index
    %c0_5 = arith.constant 0 : index
    %5 = vector.load %arg4[%c0_4, %c0_5] : memref<576x64xbf16, #tpu.memory_space<vmem>>, vector<576x64xbf16>
    %cst = arith.constant dense<0.000000e+00> : vector<16x64xf32>
    %6 = tpu.matmul %4, %5, %cst {dimension_numbers = #tpu.dot_dimension_numbers<[1], [0], [0], [1], [0, 0, 1, 1], [], []>} : vector<16x576xbf16>, vector<576x64xbf16>, vector<16x64xf32> -> vector<16x64xf32>
    %7 = arith.addf %3, %6 : vector<16x64xf32>
    %c0_6 = arith.constant 0 : index
    %c0_7 = arith.constant 0 : index
    %8 = vector.load %arg7[%c0_6, %c0_7] : memref<16x64xf32, #tpu.memory_space<vmem>>, vector<16x64xf32>
    tpu.vector_store %arg7[%c0_6, %c0_7], %7 {strides = array<i32>} : memref<16x64xf32, #tpu.memory_space<vmem>>, vector<16x64xf32>,
    %c0_i32_8 = arith.constant 0 : i32
    %9 = arith.cmpi eq, %arg2, %c0_i32_8 : i32
    %10 = arith.extui %9 : i1 to i32
    %c0_i32_9 = arith.constant 0 : i32
    %11 = arith.cmpi ne, %10, %c0_i32_9 : i32
    scf.if %11 {
      %c0_10 = arith.constant 0 : index
      %c0_11 = arith.constant 0 : index
      %12 = vector.load %arg7[%c0_10, %c0_11] : memref<16x64xf32, #tpu.memory_space<vmem>>, vector<16x64xf32>
      %c0_12 = arith.constant 0 : index
      %c0_13 = arith.constant 0 : index
      %13 = vector.load %arg5[%c0_12, %c0_13] : memref<1x64xf32, #tpu.memory_space<vmem>>, vector<1x64xf32>
      %14 = vector.broadcast %13 : vector<1x64xf32> to vector<16x64xf32>
      %15 = arith.addf %12, %14 : vector<16x64xf32>
      %cst_14 = arith.constant 0.000000e+00 : f32
      %16 = vector.broadcast %cst_14 : f32 to vector<16x64xf32>
      %17 = arith.maximumf %15, %16 : vector<16x64xf32>
      %18 = arith.truncf %17 : vector<16x64xf32> to vector<16x64xbf16>
      %c0_15 = arith.constant 0 : index
      %c0_16 = arith.constant 0 : index
      %19 = vector.load %arg6[%c0_15, %c0_16] : memref<16x64xbf16, #tpu.memory_space<vmem>>, vector<16x64xbf16>
      tpu.vector_store %arg6[%c0_15, %c0_16], %18 {strides = array<i32>} : memref<16x64xbf16, #tpu.memory_space<vmem>>, vector<16x64xbf16>,
    } else {
    }
    return
  }
  func.func @transform_0(%arg0: i32, %arg1: i32, %arg2: i32) -> (i32, i32) {
    %c0_i32 = arith.constant 0 : i32
    return %arg0, %arg2 : i32, i32
  }
  func.func @transform_1(%arg0: i32, %arg1: i32, %arg2: i32) -> (i32, i32) {
    %c0_i32 = arith.constant 0 : i32
    return %arg2, %arg1 : i32, i32
  }
  func.func @transform_2(%arg0: i32, %arg1: i32, %arg2: i32) -> (i32, i32) {
    %c0_i32 = arith.constant 0 : i32
    %c0_i32_0 = arith.constant 0 : i32
    return %c0_i32, %arg1 : i32, i32
  }
  func.func @transform_3(%arg0: i32, %arg1: i32, %arg2: i32) -> (i32, i32) {
    %c0_i32 = arith.constant 0 : i32
    return %arg0, %arg1 : i32, i32
  }
}

module attributes {stable_mosaic.version = 11 : i64} {
  func.func @_matmul_kernel(%arg0: i32, %arg1: i32, %arg2: i32, %arg3: memref<16x576xbf16, #tpu.memory_space<vmem>>, %arg4: memref<576x64xbf16, #tpu.memory_space<vmem>>, %arg5: memref<1x64xf32, #tpu.memory_space<vmem>>, %arg6: memref<16x64xbf16, #tpu.memory_space<vmem>>, %arg7: memref<16x64xbf16, #tpu.memory_space<vmem>>, %arg8: memref<16x64xf32, #tpu.memory_space<vmem>>) attributes {dimension_semantics = [#tpu.dimension_semantics<parallel>, #tpu.dimension_semantics<parallel>, #tpu.dimension_semantics<arbitrary>], iteration_bounds = array<i64: 2, 1, 1>, scalar_prefetch = 0 : i64, scratch_operands = 1 : i64, tpu.core_type = #tpu.core_type<tc>, window_params = [{transform_indices = @transform_0, window_bounds = array<i64: 16, 576>}, {transform_indices = @transform_1, window_bounds = array<i64: 576, 64>}, {transform_indices = @transform_2, window_bounds = array<i64: 1, 64>}, {transform_indices = @transform_3, window_bounds = array<i64: 16, 64>}, {transform_indices = @transform_4, window_bounds = array<i64: 16, 64>}]} {
    %c0_i32 = arith.constant 0 : i32
    %0 = arith.cmpi eq, %arg2, %c0_i32 : i32
    %1 = arith.extui %0 : i1 to i32
    %c0_i32_0 = arith.constant 0 : i32
    %2 = arith.cmpi ne, %1, %c0_i32_0 : i32
    scf.if %2 {
      %cst_10 = arith.constant 0.000000e+00 : f32
      %12 = vector.broadcast %cst_10 : f32 to vector<16x64xf32>
      %c0_11 = arith.constant 0 : index
      %c0_12 = arith.constant 0 : index
      %13 = vector.load %arg8[%c0_11, %c0_12] : memref<16x64xf32, #tpu.memory_space<vmem>>, vector<16x64xf32>
      tpu.vector_store %arg8[%c0_11, %c0_12], %12 {strides = array<i32>} : memref<16x64xf32, #tpu.memory_space<vmem>>, vector<16x64xf32>,
    } else {
    }
    %c0 = arith.constant 0 : index
    %c0_1 = arith.constant 0 : index
    %3 = vector.load %arg8[%c0, %c0_1] : memref<16x64xf32, #tpu.memory_space<vmem>>, vector<16x64xf32>
    %c0_2 = arith.constant 0 : index
    %c0_3 = arith.constant 0 : index
    %4 = vector.load %arg3[%c0_2, %c0_3] : memref<16x576xbf16, #tpu.memory_space<vmem>>, vector<16x576xbf16>
    %c0_4 = arith.constant 0 : index
    %c0_5 = arith.constant 0 : index
    %5 = vector.load %arg4[%c0_4, %c0_5] : memref<576x64xbf16, #tpu.memory_space<vmem>>, vector<576x64xbf16>
    %cst = arith.constant dense<0.000000e+00> : vector<16x64xf32>
    %6 = tpu.matmul %4, %5, %cst {dimension_numbers = #tpu.dot_dimension_numbers<[1], [0], [0], [1], [0, 0, 1, 1], [], []>} : vector<16x576xbf16>, vector<576x64xbf16>, vector<16x64xf32> -> vector<16x64xf32>
    %7 = arith.addf %3, %6 : vector<16x64xf32>
    %c0_6 = arith.constant 0 : index
    %c0_7 = arith.constant 0 : index
    %8 = vector.load %arg8[%c0_6, %c0_7] : memref<16x64xf32, #tpu.memory_space<vmem>>, vector<16x64xf32>
    tpu.vector_store %arg8[%c0_6, %c0_7], %7 {strides = array<i32>} : memref<16x64xf32, #tpu.memory_space<vmem>>, vector<16x64xf32>,
    %c0_i32_8 = arith.constant 0 : i32
    %9 = arith.cmpi eq, %arg2, %c0_i32_8 : i32
    %10 = arith.extui %9 : i1 to i32
    %c0_i32_9 = arith.constant 0 : i32
    %11 = arith.cmpi ne, %10, %c0_i32_9 : i32
    scf.if %11 {
      %c0_10 = arith.constant 0 : index
      %c0_11 = arith.constant 0 : index
      %12 = vector.load %arg8[%c0_10, %c0_11] : memref<16x64xf32, #tpu.memory_space<vmem>>, vector<16x64xf32>
      %c0_12 = arith.constant 0 : index
      %c0_13 = arith.constant 0 : index
      %13 = vector.load %arg5[%c0_12, %c0_13] : memref<1x64xf32, #tpu.memory_space<vmem>>, vector<1x64xf32>
      %14 = vector.broadcast %13 : vector<1x64xf32> to vector<16x64xf32>
      %15 = arith.addf %12, %14 : vector<16x64xf32>
      %c0_14 = arith.constant 0 : index
      %c0_15 = arith.constant 0 : index
      %16 = vector.load %arg6[%c0_14, %c0_15] : memref<16x64xbf16, #tpu.memory_space<vmem>>, vector<16x64xbf16>
      %17 = arith.extf %16 : vector<16x64xbf16> to vector<16x64xf32>
      %18 = arith.addf %15, %17 : vector<16x64xf32>
      %cst_16 = arith.constant 0.000000e+00 : f32
      %19 = vector.broadcast %cst_16 : f32 to vector<16x64xf32>
      %20 = arith.maximumf %18, %19 : vector<16x64xf32>
      %21 = arith.truncf %20 : vector<16x64xf32> to vector<16x64xbf16>
      %c0_17 = arith.constant 0 : index
      %c0_18 = arith.constant 0 : index
      %22 = vector.load %arg7[%c0_17, %c0_18] : memref<16x64xbf16, #tpu.memory_space<vmem>>, vector<16x64xbf16>
      tpu.vector_store %arg7[%c0_17, %c0_18], %21 {strides = array<i32>} : memref<16x64xbf16, #tpu.memory_space<vmem>>, vector<16x64xbf16>,
    } else {
    }
    return
  }
  func.func @transform_0(%arg0: i32, %arg1: i32, %arg2: i32) -> (i32, i32) {
    %c0_i32 = arith.constant 0 : i32
    return %arg0, %arg2 : i32, i32
  }
  func.func @transform_1(%arg0: i32, %arg1: i32, %arg2: i32) -> (i32, i32) {
    %c0_i32 = arith.constant 0 : i32
    return %arg2, %arg1 : i32, i32
  }
  func.func @transform_2(%arg0: i32, %arg1: i32, %arg2: i32) -> (i32, i32) {
    %c0_i32 = arith.constant 0 : i32
    %c0_i32_0 = arith.constant 0 : i32
    return %c0_i32, %arg1 : i32, i32
  }
  func.func @transform_3(%arg0: i32, %arg1: i32, %arg2: i32) -> (i32, i32) {
    %c0_i32 = arith.constant 0 : i32
    return %arg0, %arg1 : i32, i32
  }
  func.func @transform_4(%arg0: i32, %arg1: i32, %arg2: i32) -> (i32, i32) {
    %c0_i32 = arith.constant 0 : i32
    return %arg0, %arg1 : i32, i32
  }
}

module attributes {stable_mosaic.version = 11 : i64} {
  func.func @_matmul_kernel(%arg0: i32, %arg1: i32, %arg2: i32, %arg3: memref<16x576xbf16, #tpu.memory_space<vmem>>, %arg4: memref<576x64xbf16, #tpu.memory_space<vmem>>, %arg5: memref<1x64xf32, #tpu.memory_space<vmem>>, %arg6: memref<16x64xbf16, #tpu.memory_space<vmem>>, %arg7: memref<16x64xbf16, #tpu.memory_space<vmem>>, %arg8: memref<16x64xf32, #tpu.memory_space<vmem>>) attributes {dimension_semantics = [#tpu.dimension_semantics<parallel>, #tpu.dimension_semantics<parallel>, #tpu.dimension_semantics<arbitrary>], iteration_bounds = array<i64: 2, 1, 1>, scalar_prefetch = 0 : i64, scratch_operands = 1 : i64, tpu.core_type = #tpu.core_type<tc>, window_params = [{transform_indices = @transform_0, window_bounds = array<i64: 16, 576>}, {transform_indices = @transform_1, window_bounds = array<i64: 576, 64>}, {transform_indices = @transform_2, window_bounds = array<i64: 1, 64>}, {transform_indices = @transform_3, window_bounds = array<i64: 16, 64>}, {transform_indices = @transform_4, window_bounds = array<i64: 16, 64>}]} {
    %c0_i32 = arith.constant 0 : i32
    %0 = arith.cmpi eq, %arg2, %c0_i32 : i32
    %1 = arith.extui %0 : i1 to i32
    %c0_i32_0 = arith.constant 0 : i32
    %2 = arith.cmpi ne, %1, %c0_i32_0 : i32
    scf.if %2 {
      %cst_10 = arith.constant 0.000000e+00 : f32
      %12 = vector.broadcast %cst_10 : f32 to vector<16x64xf32>
      %c0_11 = arith.constant 0 : index
      %c0_12 = arith.constant 0 : index
      %13 = vector.load %arg8[%c0_11, %c0_12] : memref<16x64xf32, #tpu.memory_space<vmem>>, vector<16x64xf32>
      tpu.vector_store %arg8[%c0_11, %c0_12], %12 {strides = array<i32>} : memref<16x64xf32, #tpu.memory_space<vmem>>, vector<16x64xf32>,
    } else {
    }
    %c0 = arith.constant 0 : index
    %c0_1 = arith.constant 0 : index
    %3 = vector.load %arg8[%c0, %c0_1] : memref<16x64xf32, #tpu.memory_space<vmem>>, vector<16x64xf32>
    %c0_2 = arith.constant 0 : index
    %c0_3 = arith.constant 0 : index
    %4 = vector.load %arg3[%c0_2, %c0_3] : memref<16x576xbf16, #tpu.memory_space<vmem>>, vector<16x576xbf16>
    %c0_4 = arith.constant 0 : index
    %c0_5 = arith.constant 0 : index
    %5 = vector.load %arg4[%c0_4, %c0_5] : memref<576x64xbf16, #tpu.memory_space<vmem>>, vector<576x64xbf16>
    %cst = arith.constant dense<0.000000e+00> : vector<16x64xf32>
    %6 = tpu.matmul %4, %5, %cst {dimension_numbers = #tpu.dot_dimension_numbers<[1], [0], [0], [1], [0, 0, 1, 1], [], []>} : vector<16x576xbf16>, vector<576x64xbf16>, vector<16x64xf32> -> vector<16x64xf32>
    %7 = arith.addf %3, %6 : vector<16x64xf32>
    %c0_6 = arith.constant 0 : index
    %c0_7 = arith.constant 0 : index
    %8 = vector.load %arg8[%c0_6, %c0_7] : memref<16x64xf32, #tpu.memory_space<vmem>>, vector<16x64xf32>
    tpu.vector_store %arg8[%c0_6, %c0_7], %7 {strides = array<i32>} : memref<16x64xf32, #tpu.memory_space<vmem>>, vector<16x64xf32>,
    %c0_i32_8 = arith.constant 0 : i32
    %9 = arith.cmpi eq, %arg2, %c0_i32_8 : i32
    %10 = arith.extui %9 : i1 to i32
    %c0_i32_9 = arith.constant 0 : i32
    %11 = arith.cmpi ne, %10, %c0_i32_9 : i32
    scf.if %11 {
      %c0_10 = arith.constant 0 : index
      %c0_11 = arith.constant 0 : index
      %12 = vector.load %arg8[%c0_10, %c0_11] : memref<16x64xf32, #tpu.memory_space<vmem>>, vector<16x64xf32>
      %c0_12 = arith.constant 0 : index
      %c0_13 = arith.constant 0 : index
      %13 = vector.load %arg5[%c0_12, %c0_13] : memref<1x64xf32, #tpu.memory_space<vmem>>, vector<1x64xf32>
      %14 = vector.broadcast %13 : vector<1x64xf32> to vector<16x64xf32>
      %15 = arith.addf %12, %14 : vector<16x64xf32>
      %c0_14 = arith.constant 0 : index
      %c0_15 = arith.constant 0 : index
      %16 = vector.load %arg6[%c0_14, %c0_15] : memref<16x64xbf16, #tpu.memory_space<vmem>>, vector<16x64xbf16>
      %17 = arith.extf %16 : vector<16x64xbf16> to vector<16x64xf32>
      %18 = arith.addf %15, %17 : vector<16x64xf32>
      %cst_16 = arith.constant 0.000000e+00 : f32
      %19 = vector.broadcast %cst_16 : f32 to vector<16x64xf32>
      %20 = arith.maximumf %18, %19 : vector<16x64xf32>
      %21 = arith.truncf %20 : vector<16x64xf32> to vector<16x64xbf16>
      %c0_17 = arith.constant 0 : index
      %c0_18 = arith.constant 0 : index
      %22 = vector.load %arg7[%c0_17, %c0_18] : memref<16x64xbf16, #tpu.memory_space<vmem>>, vector<16x64xbf16>
      tpu.vector_store %arg7[%c0_17, %c0_18], %21 {strides = array<i32>} : memref<16x64xbf16, #tpu.memory_space<vmem>>, vector<16x64xbf16>,
    } else {
    }
    return
  }
  func.func @transform_0(%arg0: i32, %arg1: i32, %arg2: i32) -> (i32, i32) {
    %c0_i32 = arith.constant 0 : i32
    return %arg0, %arg2 : i32, i32
  }
  func.func @transform_1(%arg0: i32, %arg1: i32, %arg2: i32) -> (i32, i32) {
    %c0_i32 = arith.constant 0 : i32
    return %arg2, %arg1 : i32, i32
  }
  func.func @transform_2(%arg0: i32, %arg1: i32, %arg2: i32) -> (i32, i32) {
    %c0_i32 = arith.constant 0 : i32
    %c0_i32_0 = arith.constant 0 : i32
    return %c0_i32, %arg1 : i32, i32
  }
  func.func @transform_3(%arg0: i32, %arg1: i32, %arg2: i32) -> (i32, i32) {
    %c0_i32 = arith.constant 0 : i32
    return %arg0, %arg1 : i32, i32
  }
  func.func @transform_4(%arg0: i32, %arg1: i32, %arg2: i32) -> (i32, i32) {
    %c0_i32 = arith.constant 0 : i32
    return %arg0, %arg1 : i32, i32
  }
}

module attributes {stable_mosaic.version = 11 : i64} {
  func.func @_matmul_kernel(%arg0: i32, %arg1: i32, %arg2: i32, %arg3: memref<8x576xbf16, #tpu.memory_space<vmem>>, %arg4: memref<576x128xbf16, #tpu.memory_space<vmem>>, %arg5: memref<1x128xf32, #tpu.memory_space<vmem>>, %arg6: memref<8x128xbf16, #tpu.memory_space<vmem>>, %arg7: memref<8x128xf32, #tpu.memory_space<vmem>>) attributes {dimension_semantics = [#tpu.dimension_semantics<parallel>, #tpu.dimension_semantics<parallel>, #tpu.dimension_semantics<arbitrary>], iteration_bounds = array<i64: 1, 1, 1>, scalar_prefetch = 0 : i64, scratch_operands = 1 : i64, tpu.core_type = #tpu.core_type<tc>, window_params = [{transform_indices = @transform_0, window_bounds = array<i64: 8, 576>}, {transform_indices = @transform_1, window_bounds = array<i64: 576, 128>}, {transform_indices = @transform_2, window_bounds = array<i64: 1, 128>}, {transform_indices = @transform_3, window_bounds = array<i64: 8, 128>}]} {
    %c0_i32 = arith.constant 0 : i32
    %0 = arith.cmpi eq, %arg2, %c0_i32 : i32
    %1 = arith.extui %0 : i1 to i32
    %c0_i32_0 = arith.constant 0 : i32
    %2 = arith.cmpi ne, %1, %c0_i32_0 : i32
    scf.if %2 {
      %cst_10 = arith.constant 0.000000e+00 : f32
      %12 = vector.broadcast %cst_10 : f32 to vector<8x128xf32>
      %c0_11 = arith.constant 0 : index
      %c0_12 = arith.constant 0 : index
      %13 = vector.load %arg7[%c0_11, %c0_12] : memref<8x128xf32, #tpu.memory_space<vmem>>, vector<8x128xf32>
      tpu.vector_store %arg7[%c0_11, %c0_12], %12 {strides = array<i32>} : memref<8x128xf32, #tpu.memory_space<vmem>>, vector<8x128xf32>,
    } else {
    }
    %c0 = arith.constant 0 : index
    %c0_1 = arith.constant 0 : index
    %3 = vector.load %arg7[%c0, %c0_1] : memref<8x128xf32, #tpu.memory_space<vmem>>, vector<8x128xf32>
    %c0_2 = arith.constant 0 : index
    %c0_3 = arith.constant 0 : index
    %4 = vector.load %arg3[%c0_2, %c0_3] : memref<8x576xbf16, #tpu.memory_space<vmem>>, vector<8x576xbf16>
    %c0_4 = arith.constant 0 : index
    %c0_5 = arith.constant 0 : index
    %5 = vector.load %arg4[%c0_4, %c0_5] : memref<576x128xbf16, #tpu.memory_space<vmem>>, vector<576x128xbf16>
    %cst = arith.constant dense<0.000000e+00> : vector<8x128xf32>
    %6 = tpu.matmul %4, %5, %cst {dimension_numbers = #tpu.dot_dimension_numbers<[1], [0], [0], [1], [0, 0, 1, 1], [], []>} : vector<8x576xbf16>, vector<576x128xbf16>, vector<8x128xf32> -> vector<8x128xf32>
    %7 = arith.addf %3, %6 : vector<8x128xf32>
    %c0_6 = arith.constant 0 : index
    %c0_7 = arith.constant 0 : index
    %8 = vector.load %arg7[%c0_6, %c0_7] : memref<8x128xf32, #tpu.memory_space<vmem>>, vector<8x128xf32>
    tpu.vector_store %arg7[%c0_6, %c0_7], %7 {strides = array<i32>} : memref<8x128xf32, #tpu.memory_space<vmem>>, vector<8x128xf32>,
    %c0_i32_8 = arith.constant 0 : i32
    %9 = arith.cmpi eq, %arg2, %c0_i32_8 : i32
    %10 = arith.extui %9 : i1 to i32
    %c0_i32_9 = arith.constant 0 : i32
    %11 = arith.cmpi ne, %10, %c0_i32_9 : i32
    scf.if %11 {
      %c0_10 = arith.constant 0 : index
      %c0_11 = arith.constant 0 : index
      %12 = vector.load %arg7[%c0_10, %c0_11] : memref<8x128xf32, #tpu.memory_space<vmem>>, vector<8x128xf32>
      %c0_12 = arith.constant 0 : index
      %c0_13 = arith.constant 0 : index
      %13 = vector.load %arg5[%c0_12, %c0_13] : memref<1x128xf32, #tpu.memory_space<vmem>>, vector<1x128xf32>
      %14 = vector.broadcast %13 : vector<1x128xf32> to vector<8x128xf32>
      %15 = arith.addf %12, %14 : vector<8x128xf32>
      %cst_14 = arith.constant 0.000000e+00 : f32
      %16 = vector.broadcast %cst_14 : f32 to vector<8x128xf32>
      %17 = arith.maximumf %15, %16 : vector<8x128xf32>
      %18 = arith.truncf %17 : vector<8x128xf32> to vector<8x128xbf16>
      %c0_15 = arith.constant 0 : index
      %c0_16 = arith.constant 0 : index
      %19 = vector.load %arg6[%c0_15, %c0_16] : memref<8x128xbf16, #tpu.memory_space<vmem>>, vector<8x128xbf16>
      tpu.vector_store %arg6[%c0_15, %c0_16], %18 {strides = array<i32>} : memref<8x128xbf16, #tpu.memory_space<vmem>>, vector<8x128xbf16>,
    } else {
    }
    return
  }
  func.func @transform_0(%arg0: i32, %arg1: i32, %arg2: i32) -> (i32, i32) {
    %c0_i32 = arith.constant 0 : i32
    return %arg0, %arg2 : i32, i32
  }
  func.func @transform_1(%arg0: i32, %arg1: i32, %arg2: i32) -> (i32, i32) {
    %c0_i32 = arith.constant 0 : i32
    return %arg2, %arg1 : i32, i32
  }
  func.func @transform_2(%arg0: i32, %arg1: i32, %arg2: i32) -> (i32, i32) {
    %c0_i32 = arith.constant 0 : i32
    %c0_i32_0 = arith.constant 0 : i32
    return %c0_i32, %arg1 : i32, i32
  }
  func.func @transform_3(%arg0: i32, %arg1: i32, %arg2: i32) -> (i32, i32) {
    %c0_i32 = arith.constant 0 : i32
    return %arg0, %arg1 : i32, i32
  }
}

module attributes {stable_mosaic.version = 11 : i64} {
  func.func @_matmul_kernel(%arg0: i32, %arg1: i32, %arg2: i32, %arg3: memref<8x384xbf16, #tpu.memory_space<vmem>>, %arg4: memref<384x128xbf16, #tpu.memory_space<vmem>>, %arg5: memref<1x128xf32, #tpu.memory_space<vmem>>, %arg6: memref<8x128xbf16, #tpu.memory_space<vmem>>, %arg7: memref<8x128xbf16, #tpu.memory_space<vmem>>, %arg8: memref<8x128xf32, #tpu.memory_space<vmem>>) attributes {dimension_semantics = [#tpu.dimension_semantics<parallel>, #tpu.dimension_semantics<parallel>, #tpu.dimension_semantics<arbitrary>], iteration_bounds = array<i64: 1, 1, 3>, scalar_prefetch = 0 : i64, scratch_operands = 1 : i64, tpu.core_type = #tpu.core_type<tc>, window_params = [{transform_indices = @transform_0, window_bounds = array<i64: 8, 384>}, {transform_indices = @transform_1, window_bounds = array<i64: 384, 128>}, {transform_indices = @transform_2, window_bounds = array<i64: 1, 128>}, {transform_indices = @transform_3, window_bounds = array<i64: 8, 128>}, {transform_indices = @transform_4, window_bounds = array<i64: 8, 128>}]} {
    %c0_i32 = arith.constant 0 : i32
    %0 = arith.cmpi eq, %arg2, %c0_i32 : i32
    %1 = arith.extui %0 : i1 to i32
    %c0_i32_0 = arith.constant 0 : i32
    %2 = arith.cmpi ne, %1, %c0_i32_0 : i32
    scf.if %2 {
      %cst_9 = arith.constant 0.000000e+00 : f32
      %12 = vector.broadcast %cst_9 : f32 to vector<8x128xf32>
      %c0_10 = arith.constant 0 : index
      %c0_11 = arith.constant 0 : index
      %13 = vector.load %arg8[%c0_10, %c0_11] : memref<8x128xf32, #tpu.memory_space<vmem>>, vector<8x128xf32>
      tpu.vector_store %arg8[%c0_10, %c0_11], %12 {strides = array<i32>} : memref<8x128xf32, #tpu.memory_space<vmem>>, vector<8x128xf32>,
    } else {
    }
    %c0 = arith.constant 0 : index
    %c0_1 = arith.constant 0 : index
    %3 = vector.load %arg8[%c0, %c0_1] : memref<8x128xf32, #tpu.memory_space<vmem>>, vector<8x128xf32>
    %c0_2 = arith.constant 0 : index
    %c0_3 = arith.constant 0 : index
    %4 = vector.load %arg3[%c0_2, %c0_3] : memref<8x384xbf16, #tpu.memory_space<vmem>>, vector<8x384xbf16>
    %c0_4 = arith.constant 0 : index
    %c0_5 = arith.constant 0 : index
    %5 = vector.load %arg4[%c0_4, %c0_5] : memref<384x128xbf16, #tpu.memory_space<vmem>>, vector<384x128xbf16>
    %cst = arith.constant dense<0.000000e+00> : vector<8x128xf32>
    %6 = tpu.matmul %4, %5, %cst {dimension_numbers = #tpu.dot_dimension_numbers<[1], [0], [0], [1], [0, 0, 1, 1], [], []>} : vector<8x384xbf16>, vector<384x128xbf16>, vector<8x128xf32> -> vector<8x128xf32>
    %7 = arith.addf %3, %6 : vector<8x128xf32>
    %c0_6 = arith.constant 0 : index
    %c0_7 = arith.constant 0 : index
    %8 = vector.load %arg8[%c0_6, %c0_7] : memref<8x128xf32, #tpu.memory_space<vmem>>, vector<8x128xf32>
    tpu.vector_store %arg8[%c0_6, %c0_7], %7 {strides = array<i32>} : memref<8x128xf32, #tpu.memory_space<vmem>>, vector<8x128xf32>,
    %c2_i32 = arith.constant 2 : i32
    %9 = arith.cmpi eq, %arg2, %c2_i32 : i32
    %10 = arith.extui %9 : i1 to i32
    %c0_i32_8 = arith.constant 0 : i32
    %11 = arith.cmpi ne, %10, %c0_i32_8 : i32
    scf.if %11 {
      %c0_9 = arith.constant 0 : index
      %c0_10 = arith.constant 0 : index
      %12 = vector.load %arg8[%c0_9, %c0_10] : memref<8x128xf32, #tpu.memory_space<vmem>>, vector<8x128xf32>
      %c0_11 = arith.constant 0 : index
      %c0_12 = arith.constant 0 : index
      %13 = vector.load %arg5[%c0_11, %c0_12] : memref<1x128xf32, #tpu.memory_space<vmem>>, vector<1x128xf32>
      %14 = vector.broadcast %13 : vector<1x128xf32> to vector<8x128xf32>
      %15 = arith.addf %12, %14 : vector<8x128xf32>
      %c0_13 = arith.constant 0 : index
      %c0_14 = arith.constant 0 : index
      %16 = vector.load %arg6[%c0_13, %c0_14] : memref<8x128xbf16, #tpu.memory_space<vmem>>, vector<8x128xbf16>
      %17 = arith.extf %16 : vector<8x128xbf16> to vector<8x128xf32>
      %18 = arith.addf %15, %17 : vector<8x128xf32>
      %cst_15 = arith.constant 0.000000e+00 : f32
      %19 = vector.broadcast %cst_15 : f32 to vector<8x128xf32>
      %20 = arith.maximumf %18, %19 : vector<8x128xf32>
      %21 = arith.truncf %20 : vector<8x128xf32> to vector<8x128xbf16>
      %c0_16 = arith.constant 0 : index
      %c0_17 = arith.constant 0 : index
      %22 = vector.load %arg7[%c0_16, %c0_17] : memref<8x128xbf16, #tpu.memory_space<vmem>>, vector<8x128xbf16>
      tpu.vector_store %arg7[%c0_16, %c0_17], %21 {strides = array<i32>} : memref<8x128xbf16, #tpu.memory_space<vmem>>, vector<8x128xbf16>,
    } else {
    }
    return
  }
  func.func @transform_0(%arg0: i32, %arg1: i32, %arg2: i32) -> (i32, i32) {
    %c0_i32 = arith.constant 0 : i32
    return %arg0, %arg2 : i32, i32
  }
  func.func @transform_1(%arg0: i32, %arg1: i32, %arg2: i32) -> (i32, i32) {
    %c0_i32 = arith.constant 0 : i32
    return %arg2, %arg1 : i32, i32
  }
  func.func @transform_2(%arg0: i32, %arg1: i32, %arg2: i32) -> (i32, i32) {
    %c0_i32 = arith.constant 0 : i32
    %c0_i32_0 = arith.constant 0 : i32
    return %c0_i32, %arg1 : i32, i32
  }
  func.func @transform_3(%arg0: i32, %arg1: i32, %arg2: i32) -> (i32, i32) {
    %c0_i32 = arith.constant 0 : i32
    return %arg0, %arg1 : i32, i32
  }
  func.func @transform_4(%arg0: i32, %arg1: i32, %arg2: i32) -> (i32, i32) {
    %c0_i32 = arith.constant 0 : i32
    return %arg0, %arg1 : i32, i32
  }
}

module attributes {stable_mosaic.version = 11 : i64} {
  func.func @_matmul_kernel(%arg0: i32, %arg1: i32, %arg2: i32, %arg3: memref<8x64xbf16, #tpu.memory_space<vmem>>, %arg4: memref<64x128xbf16, #tpu.memory_space<vmem>>, %arg5: memref<1x128xf32, #tpu.memory_space<vmem>>, %arg6: memref<8x128xbf16, #tpu.memory_space<vmem>>, %arg7: memref<8x128xf32, #tpu.memory_space<vmem>>) attributes {dimension_semantics = [#tpu.dimension_semantics<parallel>, #tpu.dimension_semantics<parallel>, #tpu.dimension_semantics<arbitrary>], iteration_bounds = array<i64: 1, 1, 1>, scalar_prefetch = 0 : i64, scratch_operands = 1 : i64, tpu.core_type = #tpu.core_type<tc>, window_params = [{transform_indices = @transform_0, window_bounds = array<i64: 8, 64>}, {transform_indices = @transform_1, window_bounds = array<i64: 64, 128>}, {transform_indices = @transform_2, window_bounds = array<i64: 1, 128>}, {transform_indices = @transform_3, window_bounds = array<i64: 8, 128>}]} {
    %c0_i32 = arith.constant 0 : i32
    %0 = arith.cmpi eq, %arg2, %c0_i32 : i32
    %1 = arith.extui %0 : i1 to i32
    %c0_i32_0 = arith.constant 0 : i32
    %2 = arith.cmpi ne, %1, %c0_i32_0 : i32
    scf.if %2 {
      %cst_10 = arith.constant 0.000000e+00 : f32
      %12 = vector.broadcast %cst_10 : f32 to vector<8x128xf32>
      %c0_11 = arith.constant 0 : index
      %c0_12 = arith.constant 0 : index
      %13 = vector.load %arg7[%c0_11, %c0_12] : memref<8x128xf32, #tpu.memory_space<vmem>>, vector<8x128xf32>
      tpu.vector_store %arg7[%c0_11, %c0_12], %12 {strides = array<i32>} : memref<8x128xf32, #tpu.memory_space<vmem>>, vector<8x128xf32>,
    } else {
    }
    %c0 = arith.constant 0 : index
    %c0_1 = arith.constant 0 : index
    %3 = vector.load %arg7[%c0, %c0_1] : memref<8x128xf32, #tpu.memory_space<vmem>>, vector<8x128xf32>
    %c0_2 = arith.constant 0 : index
    %c0_3 = arith.constant 0 : index
    %4 = vector.load %arg3[%c0_2, %c0_3] : memref<8x64xbf16, #tpu.memory_space<vmem>>, vector<8x64xbf16>
    %c0_4 = arith.constant 0 : index
    %c0_5 = arith.constant 0 : index
    %5 = vector.load %arg4[%c0_4, %c0_5] : memref<64x128xbf16, #tpu.memory_space<vmem>>, vector<64x128xbf16>
    %cst = arith.constant dense<0.000000e+00> : vector<8x128xf32>
    %6 = tpu.matmul %4, %5, %cst {dimension_numbers = #tpu.dot_dimension_numbers<[1], [0], [0], [1], [0, 0, 1, 1], [], []>} : vector<8x64xbf16>, vector<64x128xbf16>, vector<8x128xf32> -> vector<8x128xf32>
    %7 = arith.addf %3, %6 : vector<8x128xf32>
    %c0_6 = arith.constant 0 : index
    %c0_7 = arith.constant 0 : index
    %8 = vector.load %arg7[%c0_6, %c0_7] : memref<8x128xf32, #tpu.memory_space<vmem>>, vector<8x128xf32>
    tpu.vector_store %arg7[%c0_6, %c0_7], %7 {strides = array<i32>} : memref<8x128xf32, #tpu.memory_space<vmem>>, vector<8x128xf32>,
    %c0_i32_8 = arith.constant 0 : i32
    %9 = arith.cmpi eq, %arg2, %c0_i32_8 : i32
    %10 = arith.extui %9 : i1 to i32
    %c0_i32_9 = arith.constant 0 : i32
    %11 = arith.cmpi ne, %10, %c0_i32_9 : i32
    scf.if %11 {
      %c0_10 = arith.constant 0 : index
      %c0_11 = arith.constant 0 : index
      %12 = vector.load %arg7[%c0_10, %c0_11] : memref<8x128xf32, #tpu.memory_space<vmem>>, vector<8x128xf32>
      %c0_12 = arith.constant 0 : index
      %c0_13 = arith.constant 0 : index
      %13 = vector.load %arg5[%c0_12, %c0_13] : memref<1x128xf32, #tpu.memory_space<vmem>>, vector<1x128xf32>
      %14 = vector.broadcast %13 : vector<1x128xf32> to vector<8x128xf32>
      %15 = arith.addf %12, %14 : vector<8x128xf32>
      %16 = arith.truncf %15 : vector<8x128xf32> to vector<8x128xbf16>
      %c0_14 = arith.constant 0 : index
      %c0_15 = arith.constant 0 : index
      %17 = vector.load %arg6[%c0_14, %c0_15] : memref<8x128xbf16, #tpu.memory_space<vmem>>, vector<8x128xbf16>
      tpu.vector_store %arg6[%c0_14, %c0_15], %16 {strides = array<i32>} : memref<8x128xbf16, #tpu.memory_space<vmem>>, vector<8x128xbf16>,
    } else {
    }
    return
  }
  func.func @transform_0(%arg0: i32, %arg1: i32, %arg2: i32) -> (i32, i32) {
    %c0_i32 = arith.constant 0 : i32
    return %arg0, %arg2 : i32, i32
  }
  func.func @transform_1(%arg0: i32, %arg1: i32, %arg2: i32) -> (i32, i32) {
    %c0_i32 = arith.constant 0 : i32
    return %arg2, %arg1 : i32, i32
  }
  func.func @transform_2(%arg0: i32, %arg1: i32, %arg2: i32) -> (i32, i32) {
    %c0_i32 = arith.constant 0 : i32
    %c0_i32_0 = arith.constant 0 : i32
    return %c0_i32, %arg1 : i32, i32
  }
  func.func @transform_3(%arg0: i32, %arg1: i32, %arg2: i32) -> (i32, i32) {
    %c0_i32 = arith.constant 0 : i32
    return %arg0, %arg1 : i32, i32
  }
}

module attributes {stable_mosaic.version = 11 : i64} {
  func.func @_matmul_kernel(%arg0: i32, %arg1: i32, %arg2: i32, %arg3: memref<8x384xbf16, #tpu.memory_space<vmem>>, %arg4: memref<384x128xbf16, #tpu.memory_space<vmem>>, %arg5: memref<1x128xf32, #tpu.memory_space<vmem>>, %arg6: memref<8x128xbf16, #tpu.memory_space<vmem>>, %arg7: memref<8x128xf32, #tpu.memory_space<vmem>>) attributes {dimension_semantics = [#tpu.dimension_semantics<parallel>, #tpu.dimension_semantics<parallel>, #tpu.dimension_semantics<arbitrary>], iteration_bounds = array<i64: 1, 1, 3>, scalar_prefetch = 0 : i64, scratch_operands = 1 : i64, tpu.core_type = #tpu.core_type<tc>, window_params = [{transform_indices = @transform_0, window_bounds = array<i64: 8, 384>}, {transform_indices = @transform_1, window_bounds = array<i64: 384, 128>}, {transform_indices = @transform_2, window_bounds = array<i64: 1, 128>}, {transform_indices = @transform_3, window_bounds = array<i64: 8, 128>}]} {
    %c0_i32 = arith.constant 0 : i32
    %0 = arith.cmpi eq, %arg2, %c0_i32 : i32
    %1 = arith.extui %0 : i1 to i32
    %c0_i32_0 = arith.constant 0 : i32
    %2 = arith.cmpi ne, %1, %c0_i32_0 : i32
    scf.if %2 {
      %cst_9 = arith.constant 0.000000e+00 : f32
      %12 = vector.broadcast %cst_9 : f32 to vector<8x128xf32>
      %c0_10 = arith.constant 0 : index
      %c0_11 = arith.constant 0 : index
      %13 = vector.load %arg7[%c0_10, %c0_11] : memref<8x128xf32, #tpu.memory_space<vmem>>, vector<8x128xf32>
      tpu.vector_store %arg7[%c0_10, %c0_11], %12 {strides = array<i32>} : memref<8x128xf32, #tpu.memory_space<vmem>>, vector<8x128xf32>,
    } else {
    }
    %c0 = arith.constant 0 : index
    %c0_1 = arith.constant 0 : index
    %3 = vector.load %arg7[%c0, %c0_1] : memref<8x128xf32, #tpu.memory_space<vmem>>, vector<8x128xf32>
    %c0_2 = arith.constant 0 : index
    %c0_3 = arith.constant 0 : index
    %4 = vector.load %arg3[%c0_2, %c0_3] : memref<8x384xbf16, #tpu.memory_space<vmem>>, vector<8x384xbf16>
    %c0_4 = arith.constant 0 : index
    %c0_5 = arith.constant 0 : index
    %5 = vector.load %arg4[%c0_4, %c0_5] : memref<384x128xbf16, #tpu.memory_space<vmem>>, vector<384x128xbf16>
    %cst = arith.constant dense<0.000000e+00> : vector<8x128xf32>
    %6 = tpu.matmul %4, %5, %cst {dimension_numbers = #tpu.dot_dimension_numbers<[1], [0], [0], [1], [0, 0, 1, 1], [], []>} : vector<8x384xbf16>, vector<384x128xbf16>, vector<8x128xf32> -> vector<8x128xf32>
    %7 = arith.addf %3, %6 : vector<8x128xf32>
    %c0_6 = arith.constant 0 : index
    %c0_7 = arith.constant 0 : index
    %8 = vector.load %arg7[%c0_6, %c0_7] : memref<8x128xf32, #tpu.memory_space<vmem>>, vector<8x128xf32>
    tpu.vector_store %arg7[%c0_6, %c0_7], %7 {strides = array<i32>} : memref<8x128xf32, #tpu.memory_space<vmem>>, vector<8x128xf32>,
    %c2_i32 = arith.constant 2 : i32
    %9 = arith.cmpi eq, %arg2, %c2_i32 : i32
    %10 = arith.extui %9 : i1 to i32
    %c0_i32_8 = arith.constant 0 : i32
    %11 = arith.cmpi ne, %10, %c0_i32_8 : i32
    scf.if %11 {
      %c0_9 = arith.constant 0 : index
      %c0_10 = arith.constant 0 : index
      %12 = vector.load %arg7[%c0_9, %c0_10] : memref<8x128xf32, #tpu.memory_space<vmem>>, vector<8x128xf32>
      %c0_11 = arith.constant 0 : index
      %c0_12 = arith.constant 0 : index
      %13 = vector.load %arg5[%c0_11, %c0_12] : memref<1x128xf32, #tpu.memory_space<vmem>>, vector<1x128xf32>
      %14 = vector.broadcast %13 : vector<1x128xf32> to vector<8x128xf32>
      %15 = arith.addf %12, %14 : vector<8x128xf32>
      %cst_13 = arith.constant 0.000000e+00 : f32
      %16 = vector.broadcast %cst_13 : f32 to vector<8x128xf32>
      %17 = arith.maximumf %15, %16 : vector<8x128xf32>
      %18 = arith.truncf %17 : vector<8x128xf32> to vector<8x128xbf16>
      %c0_14 = arith.constant 0 : index
      %c0_15 = arith.constant 0 : index
      %19 = vector.load %arg6[%c0_14, %c0_15] : memref<8x128xbf16, #tpu.memory_space<vmem>>, vector<8x128xbf16>
      tpu.vector_store %arg6[%c0_14, %c0_15], %18 {strides = array<i32>} : memref<8x128xbf16, #tpu.memory_space<vmem>>, vector<8x128xbf16>,
    } else {
    }
    return
  }
  func.func @transform_0(%arg0: i32, %arg1: i32, %arg2: i32) -> (i32, i32) {
    %c0_i32 = arith.constant 0 : i32
    return %arg0, %arg2 : i32, i32
  }
  func.func @transform_1(%arg0: i32, %arg1: i32, %arg2: i32) -> (i32, i32) {
    %c0_i32 = arith.constant 0 : i32
    return %arg2, %arg1 : i32, i32
  }
  func.func @transform_2(%arg0: i32, %arg1: i32, %arg2: i32) -> (i32, i32) {
    %c0_i32 = arith.constant 0 : i32
    %c0_i32_0 = arith.constant 0 : i32
    return %c0_i32, %arg1 : i32, i32
  }
  func.func @transform_3(%arg0: i32, %arg1: i32, %arg2: i32) -> (i32, i32) {
    %c0_i32 = arith.constant 0 : i32
    return %arg0, %arg1 : i32, i32
  }
}

module attributes {stable_mosaic.version = 11 : i64} {
  func.func @_matmul_kernel(%arg0: i32, %arg1: i32, %arg2: i32, %arg3: memref<2x384xbf16, #tpu.memory_space<vmem>>, %arg4: memref<384x128xbf16, #tpu.memory_space<vmem>>, %arg5: memref<1x128xf32, #tpu.memory_space<vmem>>, %arg6: memref<2x128xbf16, #tpu.memory_space<vmem>>, %arg7: memref<2x128xf32, #tpu.memory_space<vmem>>) attributes {dimension_semantics = [#tpu.dimension_semantics<parallel>, #tpu.dimension_semantics<parallel>, #tpu.dimension_semantics<arbitrary>], iteration_bounds = array<i64: 1, 2, 3>, scalar_prefetch = 0 : i64, scratch_operands = 1 : i64, tpu.core_type = #tpu.core_type<tc>, window_params = [{transform_indices = @transform_0, window_bounds = array<i64: 2, 384>}, {transform_indices = @transform_1, window_bounds = array<i64: 384, 128>}, {transform_indices = @transform_2, window_bounds = array<i64: 1, 128>}, {transform_indices = @transform_3, window_bounds = array<i64: 2, 128>}]} {
    %c0_i32 = arith.constant 0 : i32
    %0 = arith.cmpi eq, %arg2, %c0_i32 : i32
    %1 = arith.extui %0 : i1 to i32
    %c0_i32_0 = arith.constant 0 : i32
    %2 = arith.cmpi ne, %1, %c0_i32_0 : i32
    scf.if %2 {
      %cst_9 = arith.constant 0.000000e+00 : f32
      %12 = vector.broadcast %cst_9 : f32 to vector<2x128xf32>
      %c0_10 = arith.constant 0 : index
      %c0_11 = arith.constant 0 : index
      %13 = vector.load %arg7[%c0_10, %c0_11] : memref<2x128xf32, #tpu.memory_space<vmem>>, vector<2x128xf32>
      tpu.vector_store %arg7[%c0_10, %c0_11], %12 {strides = array<i32>} : memref<2x128xf32, #tpu.memory_space<vmem>>, vector<2x128xf32>,
    } else {
    }
    %c0 = arith.constant 0 : index
    %c0_1 = arith.constant 0 : index
    %3 = vector.load %arg7[%c0, %c0_1] : memref<2x128xf32, #tpu.memory_space<vmem>>, vector<2x128xf32>
    %c0_2 = arith.constant 0 : index
    %c0_3 = arith.constant 0 : index
    %4 = vector.load %arg3[%c0_2, %c0_3] : memref<2x384xbf16, #tpu.memory_space<vmem>>, vector<2x384xbf16>
    %c0_4 = arith.constant 0 : index
    %c0_5 = arith.constant 0 : index
    %5 = vector.load %arg4[%c0_4, %c0_5] : memref<384x128xbf16, #tpu.memory_space<vmem>>, vector<384x128xbf16>
    %cst = arith.constant dense<0.000000e+00> : vector<2x128xf32>
    %6 = tpu.matmul %4, %5, %cst {dimension_numbers = #tpu.dot_dimension_numbers<[1], [0], [0], [1], [0, 0, 1, 1], [], []>} : vector<2x384xbf16>, vector<384x128xbf16>, vector<2x128xf32> -> vector<2x128xf32>
    %7 = arith.addf %3, %6 : vector<2x128xf32>
    %c0_6 = arith.constant 0 : index
    %c0_7 = arith.constant 0 : index
    %8 = vector.load %arg7[%c0_6, %c0_7] : memref<2x128xf32, #tpu.memory_space<vmem>>, vector<2x128xf32>
    tpu.vector_store %arg7[%c0_6, %c0_7], %7 {strides = array<i32>} : memref<2x128xf32, #tpu.memory_space<vmem>>, vector<2x128xf32>,
    %c2_i32 = arith.constant 2 : i32
    %9 = arith.cmpi eq, %arg2, %c2_i32 : i32
    %10 = arith.extui %9 : i1 to i32
    %c0_i32_8 = arith.constant 0 : i32
    %11 = arith.cmpi ne, %10, %c0_i32_8 : i32
    scf.if %11 {
      %c0_9 = arith.constant 0 : index
      %c0_10 = arith.constant 0 : index
      %12 = vector.load %arg7[%c0_9, %c0_10] : memref<2x128xf32, #tpu.memory_space<vmem>>, vector<2x128xf32>
      %c0_11 = arith.constant 0 : index
      %c0_12 = arith.constant 0 : index
      %13 = vector.load %arg5[%c0_11, %c0_12] : memref<1x128xf32, #tpu.memory_space<vmem>>, vector<1x128xf32>
      %14 = vector.broadcast %13 : vector<1x128xf32> to vector<2x128xf32>
      %15 = arith.addf %12, %14 : vector<2x128xf32>
      %cst_13 = arith.constant 0.000000e+00 : f32
      %16 = vector.broadcast %cst_13 : f32 to vector<2x128xf32>
      %17 = arith.maximumf %15, %16 : vector<2x128xf32>
      %18 = arith.truncf %17 : vector<2x128xf32> to vector<2x128xbf16>
      %c0_14 = arith.constant 0 : index
      %c0_15 = arith.constant 0 : index
      %19 = vector.load %arg6[%c0_14, %c0_15] : memref<2x128xbf16, #tpu.memory_space<vmem>>, vector<2x128xbf16>
      tpu.vector_store %arg6[%c0_14, %c0_15], %18 {strides = array<i32>} : memref<2x128xbf16, #tpu.memory_space<vmem>>, vector<2x128xbf16>,
    } else {
    }
    return
  }
  func.func @transform_0(%arg0: i32, %arg1: i32, %arg2: i32) -> (i32, i32) {
    %c0_i32 = arith.constant 0 : i32
    return %arg0, %arg2 : i32, i32
  }
  func.func @transform_1(%arg0: i32, %arg1: i32, %arg2: i32) -> (i32, i32) {
    %c0_i32 = arith.constant 0 : i32
    return %arg2, %arg1 : i32, i32
  }
  func.func @transform_2(%arg0: i32, %arg1: i32, %arg2: i32) -> (i32, i32) {
    %c0_i32 = arith.constant 0 : i32
    %c0_i32_0 = arith.constant 0 : i32
    return %c0_i32, %arg1 : i32, i32
  }
  func.func @transform_3(%arg0: i32, %arg1: i32, %arg2: i32) -> (i32, i32) {
    %c0_i32 = arith.constant 0 : i32
    return %arg0, %arg1 : i32, i32
  }
}

module attributes {stable_mosaic.version = 11 : i64} {
  func.func @_matmul_kernel(%arg0: i32, %arg1: i32, %arg2: i32, %arg3: memref<2x128xbf16, #tpu.memory_space<vmem>>, %arg4: memref<128x128xbf16, #tpu.memory_space<vmem>>, %arg5: memref<1x128xf32, #tpu.memory_space<vmem>>, %arg6: memref<2x128xbf16, #tpu.memory_space<vmem>>, %arg7: memref<2x128xf32, #tpu.memory_space<vmem>>) attributes {dimension_semantics = [#tpu.dimension_semantics<parallel>, #tpu.dimension_semantics<parallel>, #tpu.dimension_semantics<arbitrary>], iteration_bounds = array<i64: 1, 2, 1>, scalar_prefetch = 0 : i64, scratch_operands = 1 : i64, tpu.core_type = #tpu.core_type<tc>, window_params = [{transform_indices = @transform_0, window_bounds = array<i64: 2, 128>}, {transform_indices = @transform_1, window_bounds = array<i64: 128, 128>}, {transform_indices = @transform_2, window_bounds = array<i64: 1, 128>}, {transform_indices = @transform_3, window_bounds = array<i64: 2, 128>}]} {
    %c0_i32 = arith.constant 0 : i32
    %0 = arith.cmpi eq, %arg2, %c0_i32 : i32
    %1 = arith.extui %0 : i1 to i32
    %c0_i32_0 = arith.constant 0 : i32
    %2 = arith.cmpi ne, %1, %c0_i32_0 : i32
    scf.if %2 {
      %cst_10 = arith.constant 0.000000e+00 : f32
      %12 = vector.broadcast %cst_10 : f32 to vector<2x128xf32>
      %c0_11 = arith.constant 0 : index
      %c0_12 = arith.constant 0 : index
      %13 = vector.load %arg7[%c0_11, %c0_12] : memref<2x128xf32, #tpu.memory_space<vmem>>, vector<2x128xf32>
      tpu.vector_store %arg7[%c0_11, %c0_12], %12 {strides = array<i32>} : memref<2x128xf32, #tpu.memory_space<vmem>>, vector<2x128xf32>,
    } else {
    }
    %c0 = arith.constant 0 : index
    %c0_1 = arith.constant 0 : index
    %3 = vector.load %arg7[%c0, %c0_1] : memref<2x128xf32, #tpu.memory_space<vmem>>, vector<2x128xf32>
    %c0_2 = arith.constant 0 : index
    %c0_3 = arith.constant 0 : index
    %4 = vector.load %arg3[%c0_2, %c0_3] : memref<2x128xbf16, #tpu.memory_space<vmem>>, vector<2x128xbf16>
    %c0_4 = arith.constant 0 : index
    %c0_5 = arith.constant 0 : index
    %5 = vector.load %arg4[%c0_4, %c0_5] : memref<128x128xbf16, #tpu.memory_space<vmem>>, vector<128x128xbf16>
    %cst = arith.constant dense<0.000000e+00> : vector<2x128xf32>
    %6 = tpu.matmul %4, %5, %cst {dimension_numbers = #tpu.dot_dimension_numbers<[1], [0], [0], [1], [0, 0, 1, 1], [], []>} : vector<2x128xbf16>, vector<128x128xbf16>, vector<2x128xf32> -> vector<2x128xf32>
    %7 = arith.addf %3, %6 : vector<2x128xf32>
    %c0_6 = arith.constant 0 : index
    %c0_7 = arith.constant 0 : index
    %8 = vector.load %arg7[%c0_6, %c0_7] : memref<2x128xf32, #tpu.memory_space<vmem>>, vector<2x128xf32>
    tpu.vector_store %arg7[%c0_6, %c0_7], %7 {strides = array<i32>} : memref<2x128xf32, #tpu.memory_space<vmem>>, vector<2x128xf32>,
    %c0_i32_8 = arith.constant 0 : i32
    %9 = arith.cmpi eq, %arg2, %c0_i32_8 : i32
    %10 = arith.extui %9 : i1 to i32
    %c0_i32_9 = arith.constant 0 : i32
    %11 = arith.cmpi ne, %10, %c0_i32_9 : i32
    scf.if %11 {
      %c0_10 = arith.constant 0 : index
      %c0_11 = arith.constant 0 : index
      %12 = vector.load %arg7[%c0_10, %c0_11] : memref<2x128xf32, #tpu.memory_space<vmem>>, vector<2x128xf32>
      %c0_12 = arith.constant 0 : index
      %c0_13 = arith.constant 0 : index
      %13 = vector.load %arg5[%c0_12, %c0_13] : memref<1x128xf32, #tpu.memory_space<vmem>>, vector<1x128xf32>
      %14 = vector.broadcast %13 : vector<1x128xf32> to vector<2x128xf32>
      %15 = arith.addf %12, %14 : vector<2x128xf32>
      %16 = arith.truncf %15 : vector<2x128xf32> to vector<2x128xbf16>
      %c0_14 = arith.constant 0 : index
      %c0_15 = arith.constant 0 : index
      %17 = vector.load %arg6[%c0_14, %c0_15] : memref<2x128xbf16, #tpu.memory_space<vmem>>, vector<2x128xbf16>
      tpu.vector_store %arg6[%c0_14, %c0_15], %16 {strides = array<i32>} : memref<2x128xbf16, #tpu.memory_space<vmem>>, vector<2x128xbf16>,
    } else {
    }
    return
  }
  func.func @transform_0(%arg0: i32, %arg1: i32, %arg2: i32) -> (i32, i32) {
    %c0_i32 = arith.constant 0 : i32
    return %arg0, %arg2 : i32, i32
  }
  func.func @transform_1(%arg0: i32, %arg1: i32, %arg2: i32) -> (i32, i32) {
    %c0_i32 = arith.constant 0 : i32
    return %arg2, %arg1 : i32, i32
  }
  func.func @transform_2(%arg0: i32, %arg1: i32, %arg2: i32) -> (i32, i32) {
    %c0_i32 = arith.constant 0 : i32
    %c0_i32_0 = arith.constant 0 : i32
    return %c0_i32, %arg1 : i32, i32
  }
  func.func @transform_3(%arg0: i32, %arg1: i32, %arg2: i32) -> (i32, i32) {
    %c0_i32 = arith.constant 0 : i32
    return %arg0, %arg1 : i32, i32
  }
}

module attributes {stable_mosaic.version = 11 : i64} {
  func.func @_matmul_kernel(%arg0: i32, %arg1: i32, %arg2: i32, %arg3: memref<2x384xbf16, #tpu.memory_space<vmem>>, %arg4: memref<384x128xbf16, #tpu.memory_space<vmem>>, %arg5: memref<1x128xf32, #tpu.memory_space<vmem>>, %arg6: memref<2x128xbf16, #tpu.memory_space<vmem>>, %arg7: memref<2x128xbf16, #tpu.memory_space<vmem>>, %arg8: memref<2x128xf32, #tpu.memory_space<vmem>>) attributes {dimension_semantics = [#tpu.dimension_semantics<parallel>, #tpu.dimension_semantics<parallel>, #tpu.dimension_semantics<arbitrary>], iteration_bounds = array<i64: 1, 2, 6>, scalar_prefetch = 0 : i64, scratch_operands = 1 : i64, tpu.core_type = #tpu.core_type<tc>, window_params = [{transform_indices = @transform_0, window_bounds = array<i64: 2, 384>}, {transform_indices = @transform_1, window_bounds = array<i64: 384, 128>}, {transform_indices = @transform_2, window_bounds = array<i64: 1, 128>}, {transform_indices = @transform_3, window_bounds = array<i64: 2, 128>}, {transform_indices = @transform_4, window_bounds = array<i64: 2, 128>}]} {
    %c0_i32 = arith.constant 0 : i32
    %0 = arith.cmpi eq, %arg2, %c0_i32 : i32
    %1 = arith.extui %0 : i1 to i32
    %c0_i32_0 = arith.constant 0 : i32
    %2 = arith.cmpi ne, %1, %c0_i32_0 : i32
    scf.if %2 {
      %cst_9 = arith.constant 0.000000e+00 : f32
      %12 = vector.broadcast %cst_9 : f32 to vector<2x128xf32>
      %c0_10 = arith.constant 0 : index
      %c0_11 = arith.constant 0 : index
      %13 = vector.load %arg8[%c0_10, %c0_11] : memref<2x128xf32, #tpu.memory_space<vmem>>, vector<2x128xf32>
      tpu.vector_store %arg8[%c0_10, %c0_11], %12 {strides = array<i32>} : memref<2x128xf32, #tpu.memory_space<vmem>>, vector<2x128xf32>,
    } else {
    }
    %c0 = arith.constant 0 : index
    %c0_1 = arith.constant 0 : index
    %3 = vector.load %arg8[%c0, %c0_1] : memref<2x128xf32, #tpu.memory_space<vmem>>, vector<2x128xf32>
    %c0_2 = arith.constant 0 : index
    %c0_3 = arith.constant 0 : index
    %4 = vector.load %arg3[%c0_2, %c0_3] : memref<2x384xbf16, #tpu.memory_space<vmem>>, vector<2x384xbf16>
    %c0_4 = arith.constant 0 : index
    %c0_5 = arith.constant 0 : index
    %5 = vector.load %arg4[%c0_4, %c0_5] : memref<384x128xbf16, #tpu.memory_space<vmem>>, vector<384x128xbf16>
    %cst = arith.constant dense<0.000000e+00> : vector<2x128xf32>
    %6 = tpu.matmul %4, %5, %cst {dimension_numbers = #tpu.dot_dimension_numbers<[1], [0], [0], [1], [0, 0, 1, 1], [], []>} : vector<2x384xbf16>, vector<384x128xbf16>, vector<2x128xf32> -> vector<2x128xf32>
    %7 = arith.addf %3, %6 : vector<2x128xf32>
    %c0_6 = arith.constant 0 : index
    %c0_7 = arith.constant 0 : index
    %8 = vector.load %arg8[%c0_6, %c0_7] : memref<2x128xf32, #tpu.memory_space<vmem>>, vector<2x128xf32>
    tpu.vector_store %arg8[%c0_6, %c0_7], %7 {strides = array<i32>} : memref<2x128xf32, #tpu.memory_space<vmem>>, vector<2x128xf32>,
    %c5_i32 = arith.constant 5 : i32
    %9 = arith.cmpi eq, %arg2, %c5_i32 : i32
    %10 = arith.extui %9 : i1 to i32
    %c0_i32_8 = arith.constant 0 : i32
    %11 = arith.cmpi ne, %10, %c0_i32_8 : i32
    scf.if %11 {
      %c0_9 = arith.constant 0 : index
      %c0_10 = arith.constant 0 : index
      %12 = vector.load %arg8[%c0_9, %c0_10] : memref<2x128xf32, #tpu.memory_space<vmem>>, vector<2x128xf32>
      %c0_11 = arith.constant 0 : index
      %c0_12 = arith.constant 0 : index
      %13 = vector.load %arg5[%c0_11, %c0_12] : memref<1x128xf32, #tpu.memory_space<vmem>>, vector<1x128xf32>
      %14 = vector.broadcast %13 : vector<1x128xf32> to vector<2x128xf32>
      %15 = arith.addf %12, %14 : vector<2x128xf32>
      %c0_13 = arith.constant 0 : index
      %c0_14 = arith.constant 0 : index
      %16 = vector.load %arg6[%c0_13, %c0_14] : memref<2x128xbf16, #tpu.memory_space<vmem>>, vector<2x128xbf16>
      %17 = arith.extf %16 : vector<2x128xbf16> to vector<2x128xf32>
      %18 = arith.addf %15, %17 : vector<2x128xf32>
      %cst_15 = arith.constant 0.000000e+00 : f32
      %19 = vector.broadcast %cst_15 : f32 to vector<2x128xf32>
      %20 = arith.maximumf %18, %19 : vector<2x128xf32>
      %21 = arith.truncf %20 : vector<2x128xf32> to vector<2x128xbf16>
      %c0_16 = arith.constant 0 : index
      %c0_17 = arith.constant 0 : index
      %22 = vector.load %arg7[%c0_16, %c0_17] : memref<2x128xbf16, #tpu.memory_space<vmem>>, vector<2x128xbf16>
      tpu.vector_store %arg7[%c0_16, %c0_17], %21 {strides = array<i32>} : memref<2x128xbf16, #tpu.memory_space<vmem>>, vector<2x128xbf16>,
    } else {
    }
    return
  }
  func.func @transform_0(%arg0: i32, %arg1: i32, %arg2: i32) -> (i32, i32) {
    %c0_i32 = arith.constant 0 : i32
    return %arg0, %arg2 : i32, i32
  }
  func.func @transform_1(%arg0: i32, %arg1: i32, %arg2: i32) -> (i32, i32) {
    %c0_i32 = arith.constant 0 : i32
    return %arg2, %arg1 : i32, i32
  }
  func.func @transform_2(%arg0: i32, %arg1: i32, %arg2: i32) -> (i32, i32) {
    %c0_i32 = arith.constant 0 : i32
    %c0_i32_0 = arith.constant 0 : i32
    return %c0_i32, %arg1 : i32, i32
  }
  func.func @transform_3(%arg0: i32, %arg1: i32, %arg2: i32) -> (i32, i32) {
    %c0_i32 = arith.constant 0 : i32
    return %arg0, %arg1 : i32, i32
  }
  func.func @transform_4(%arg0: i32, %arg1: i32, %arg2: i32) -> (i32, i32) {
    %c0_i32 = arith.constant 0 : i32
    return %arg0, %arg1 : i32, i32
  }
}

module attributes {stable_mosaic.version = 11 : i64} {
  func.func @_matmul_kernel(%arg0: i32, %arg1: i32, %arg2: i32, %arg3: memref<2x384xbf16, #tpu.memory_space<vmem>>, %arg4: memref<384x128xbf16, #tpu.memory_space<vmem>>, %arg5: memref<1x128xf32, #tpu.memory_space<vmem>>, %arg6: memref<2x128xbf16, #tpu.memory_space<vmem>>, %arg7: memref<2x128xf32, #tpu.memory_space<vmem>>) attributes {dimension_semantics = [#tpu.dimension_semantics<parallel>, #tpu.dimension_semantics<parallel>, #tpu.dimension_semantics<arbitrary>], iteration_bounds = array<i64: 1, 2, 6>, scalar_prefetch = 0 : i64, scratch_operands = 1 : i64, tpu.core_type = #tpu.core_type<tc>, window_params = [{transform_indices = @transform_0, window_bounds = array<i64: 2, 384>}, {transform_indices = @transform_1, window_bounds = array<i64: 384, 128>}, {transform_indices = @transform_2, window_bounds = array<i64: 1, 128>}, {transform_indices = @transform_3, window_bounds = array<i64: 2, 128>}]} {
    %c0_i32 = arith.constant 0 : i32
    %0 = arith.cmpi eq, %arg2, %c0_i32 : i32
    %1 = arith.extui %0 : i1 to i32
    %c0_i32_0 = arith.constant 0 : i32
    %2 = arith.cmpi ne, %1, %c0_i32_0 : i32
    scf.if %2 {
      %cst_9 = arith.constant 0.000000e+00 : f32
      %12 = vector.broadcast %cst_9 : f32 to vector<2x128xf32>
      %c0_10 = arith.constant 0 : index
      %c0_11 = arith.constant 0 : index
      %13 = vector.load %arg7[%c0_10, %c0_11] : memref<2x128xf32, #tpu.memory_space<vmem>>, vector<2x128xf32>
      tpu.vector_store %arg7[%c0_10, %c0_11], %12 {strides = array<i32>} : memref<2x128xf32, #tpu.memory_space<vmem>>, vector<2x128xf32>,
    } else {
    }
    %c0 = arith.constant 0 : index
    %c0_1 = arith.constant 0 : index
    %3 = vector.load %arg7[%c0, %c0_1] : memref<2x128xf32, #tpu.memory_space<vmem>>, vector<2x128xf32>
    %c0_2 = arith.constant 0 : index
    %c0_3 = arith.constant 0 : index
    %4 = vector.load %arg3[%c0_2, %c0_3] : memref<2x384xbf16, #tpu.memory_space<vmem>>, vector<2x384xbf16>
    %c0_4 = arith.constant 0 : index
    %c0_5 = arith.constant 0 : index
    %5 = vector.load %arg4[%c0_4, %c0_5] : memref<384x128xbf16, #tpu.memory_space<vmem>>, vector<384x128xbf16>
    %cst = arith.constant dense<0.000000e+00> : vector<2x128xf32>
    %6 = tpu.matmul %4, %5, %cst {dimension_numbers = #tpu.dot_dimension_numbers<[1], [0], [0], [1], [0, 0, 1, 1], [], []>} : vector<2x384xbf16>, vector<384x128xbf16>, vector<2x128xf32> -> vector<2x128xf32>
    %7 = arith.addf %3, %6 : vector<2x128xf32>
    %c0_6 = arith.constant 0 : index
    %c0_7 = arith.constant 0 : index
    %8 = vector.load %arg7[%c0_6, %c0_7] : memref<2x128xf32, #tpu.memory_space<vmem>>, vector<2x128xf32>
    tpu.vector_store %arg7[%c0_6, %c0_7], %7 {strides = array<i32>} : memref<2x128xf32, #tpu.memory_space<vmem>>, vector<2x128xf32>,
    %c5_i32 = arith.constant 5 : i32
    %9 = arith.cmpi eq, %arg2, %c5_i32 : i32
    %10 = arith.extui %9 : i1 to i32
    %c0_i32_8 = arith.constant 0 : i32
    %11 = arith.cmpi ne, %10, %c0_i32_8 : i32
    scf.if %11 {
      %c0_9 = arith.constant 0 : index
      %c0_10 = arith.constant 0 : index
      %12 = vector.load %arg7[%c0_9, %c0_10] : memref<2x128xf32, #tpu.memory_space<vmem>>, vector<2x128xf32>
      %c0_11 = arith.constant 0 : index
      %c0_12 = arith.constant 0 : index
      %13 = vector.load %arg5[%c0_11, %c0_12] : memref<1x128xf32, #tpu.memory_space<vmem>>, vector<1x128xf32>
      %14 = vector.broadcast %13 : vector<1x128xf32> to vector<2x128xf32>
      %15 = arith.addf %12, %14 : vector<2x128xf32>
      %cst_13 = arith.constant 0.000000e+00 : f32
      %16 = vector.broadcast %cst_13 : f32 to vector<2x128xf32>
      %17 = arith.maximumf %15, %16 : vector<2x128xf32>
      %18 = arith.truncf %17 : vector<2x128xf32> to vector<2x128xbf16>
      %c0_14 = arith.constant 0 : index
      %c0_15 = arith.constant 0 : index
      %19 = vector.load %arg6[%c0_14, %c0_15] : memref<2x128xbf16, #tpu.memory_space<vmem>>, vector<2x128xbf16>
      tpu.vector_store %arg6[%c0_14, %c0_15], %18 {strides = array<i32>} : memref<2x128xbf16, #tpu.memory_space<vmem>>, vector<2x128xbf16>,
    } else {
    }
    return
  }
  func.func @transform_0(%arg0: i32, %arg1: i32, %arg2: i32) -> (i32, i32) {
    %c0_i32 = arith.constant 0 : i32
    return %arg0, %arg2 : i32, i32
  }
  func.func @transform_1(%arg0: i32, %arg1: i32, %arg2: i32) -> (i32, i32) {
    %c0_i32 = arith.constant 0 : i32
    return %arg2, %arg1 : i32, i32
  }
  func.func @transform_2(%arg0: i32, %arg1: i32, %arg2: i32) -> (i32, i32) {
    %c0_i32 = arith.constant 0 : i32
    %c0_i32_0 = arith.constant 0 : i32
    return %c0_i32, %arg1 : i32, i32
  }
  func.func @transform_3(%arg0: i32, %arg1: i32, %arg2: i32) -> (i32, i32) {
    %c0_i32 = arith.constant 0 : i32
    return %arg0, %arg1 : i32, i32
  }
}

module attributes {stable_mosaic.version = 11 : i64} {
  func.func @_matmul_kernel(%arg0: i32, %arg1: i32, %arg2: i32, %arg3: memref<2x384xbf16, #tpu.memory_space<vmem>>, %arg4: memref<384x256xbf16, #tpu.memory_space<vmem>>, %arg5: memref<1x256xf32, #tpu.memory_space<vmem>>, %arg6: memref<2x256xbf16, #tpu.memory_space<vmem>>, %arg7: memref<2x256xf32, #tpu.memory_space<vmem>>) attributes {dimension_semantics = [#tpu.dimension_semantics<parallel>, #tpu.dimension_semantics<parallel>, #tpu.dimension_semantics<arbitrary>], iteration_bounds = array<i64: 1, 2, 6>, scalar_prefetch = 0 : i64, scratch_operands = 1 : i64, tpu.core_type = #tpu.core_type<tc>, window_params = [{transform_indices = @transform_0, window_bounds = array<i64: 2, 384>}, {transform_indices = @transform_1, window_bounds = array<i64: 384, 256>}, {transform_indices = @transform_2, window_bounds = array<i64: 1, 256>}, {transform_indices = @transform_3, window_bounds = array<i64: 2, 256>}]} {
    %c0_i32 = arith.constant 0 : i32
    %0 = arith.cmpi eq, %arg2, %c0_i32 : i32
    %1 = arith.extui %0 : i1 to i32
    %c0_i32_0 = arith.constant 0 : i32
    %2 = arith.cmpi ne, %1, %c0_i32_0 : i32
    scf.if %2 {
      %cst_9 = arith.constant 0.000000e+00 : f32
      %12 = vector.broadcast %cst_9 : f32 to vector<2x256xf32>
      %c0_10 = arith.constant 0 : index
      %c0_11 = arith.constant 0 : index
      %13 = vector.load %arg7[%c0_10, %c0_11] : memref<2x256xf32, #tpu.memory_space<vmem>>, vector<2x256xf32>
      tpu.vector_store %arg7[%c0_10, %c0_11], %12 {strides = array<i32>} : memref<2x256xf32, #tpu.memory_space<vmem>>, vector<2x256xf32>,
    } else {
    }
    %c0 = arith.constant 0 : index
    %c0_1 = arith.constant 0 : index
    %3 = vector.load %arg7[%c0, %c0_1] : memref<2x256xf32, #tpu.memory_space<vmem>>, vector<2x256xf32>
    %c0_2 = arith.constant 0 : index
    %c0_3 = arith.constant 0 : index
    %4 = vector.load %arg3[%c0_2, %c0_3] : memref<2x384xbf16, #tpu.memory_space<vmem>>, vector<2x384xbf16>
    %c0_4 = arith.constant 0 : index
    %c0_5 = arith.constant 0 : index
    %5 = vector.load %arg4[%c0_4, %c0_5] : memref<384x256xbf16, #tpu.memory_space<vmem>>, vector<384x256xbf16>
    %cst = arith.constant dense<0.000000e+00> : vector<2x256xf32>
    %6 = tpu.matmul %4, %5, %cst {dimension_numbers = #tpu.dot_dimension_numbers<[1], [0], [0], [1], [0, 0, 1, 1], [], []>} : vector<2x384xbf16>, vector<384x256xbf16>, vector<2x256xf32> -> vector<2x256xf32>
    %7 = arith.addf %3, %6 : vector<2x256xf32>
    %c0_6 = arith.constant 0 : index
    %c0_7 = arith.constant 0 : index
    %8 = vector.load %arg7[%c0_6, %c0_7] : memref<2x256xf32, #tpu.memory_space<vmem>>, vector<2x256xf32>
    tpu.vector_store %arg7[%c0_6, %c0_7], %7 {strides = array<i32>} : memref<2x256xf32, #tpu.memory_space<vmem>>, vector<2x256xf32>,
    %c5_i32 = arith.constant 5 : i32
    %9 = arith.cmpi eq, %arg2, %c5_i32 : i32
    %10 = arith.extui %9 : i1 to i32
    %c0_i32_8 = arith.constant 0 : i32
    %11 = arith.cmpi ne, %10, %c0_i32_8 : i32
    scf.if %11 {
      %c0_9 = arith.constant 0 : index
      %c0_10 = arith.constant 0 : index
      %12 = vector.load %arg7[%c0_9, %c0_10] : memref<2x256xf32, #tpu.memory_space<vmem>>, vector<2x256xf32>
      %c0_11 = arith.constant 0 : index
      %c0_12 = arith.constant 0 : index
      %13 = vector.load %arg5[%c0_11, %c0_12] : memref<1x256xf32, #tpu.memory_space<vmem>>, vector<1x256xf32>
      %14 = vector.broadcast %13 : vector<1x256xf32> to vector<2x256xf32>
      %15 = arith.addf %12, %14 : vector<2x256xf32>
      %cst_13 = arith.constant 0.000000e+00 : f32
      %16 = vector.broadcast %cst_13 : f32 to vector<2x256xf32>
      %17 = arith.maximumf %15, %16 : vector<2x256xf32>
      %18 = arith.truncf %17 : vector<2x256xf32> to vector<2x256xbf16>
      %c0_14 = arith.constant 0 : index
      %c0_15 = arith.constant 0 : index
      %19 = vector.load %arg6[%c0_14, %c0_15] : memref<2x256xbf16, #tpu.memory_space<vmem>>, vector<2x256xbf16>
      tpu.vector_store %arg6[%c0_14, %c0_15], %18 {strides = array<i32>} : memref<2x256xbf16, #tpu.memory_space<vmem>>, vector<2x256xbf16>,
    } else {
    }
    return
  }
  func.func @transform_0(%arg0: i32, %arg1: i32, %arg2: i32) -> (i32, i32) {
    %c0_i32 = arith.constant 0 : i32
    return %arg0, %arg2 : i32, i32
  }
  func.func @transform_1(%arg0: i32, %arg1: i32, %arg2: i32) -> (i32, i32) {
    %c0_i32 = arith.constant 0 : i32
    return %arg2, %arg1 : i32, i32
  }
  func.func @transform_2(%arg0: i32, %arg1: i32, %arg2: i32) -> (i32, i32) {
    %c0_i32 = arith.constant 0 : i32
    %c0_i32_0 = arith.constant 0 : i32
    return %c0_i32, %arg1 : i32, i32
  }
  func.func @transform_3(%arg0: i32, %arg1: i32, %arg2: i32) -> (i32, i32) {
    %c0_i32 = arith.constant 0 : i32
    return %arg0, %arg1 : i32, i32
  }
}

module attributes {stable_mosaic.version = 11 : i64} {
  func.func @_matmul_kernel(%arg0: i32, %arg1: i32, %arg2: i32, %arg3: memref<2x256xbf16, #tpu.memory_space<vmem>>, %arg4: memref<256x256xbf16, #tpu.memory_space<vmem>>, %arg5: memref<1x256xf32, #tpu.memory_space<vmem>>, %arg6: memref<2x256xbf16, #tpu.memory_space<vmem>>, %arg7: memref<2x256xf32, #tpu.memory_space<vmem>>) attributes {dimension_semantics = [#tpu.dimension_semantics<parallel>, #tpu.dimension_semantics<parallel>, #tpu.dimension_semantics<arbitrary>], iteration_bounds = array<i64: 1, 2, 1>, scalar_prefetch = 0 : i64, scratch_operands = 1 : i64, tpu.core_type = #tpu.core_type<tc>, window_params = [{transform_indices = @transform_0, window_bounds = array<i64: 2, 256>}, {transform_indices = @transform_1, window_bounds = array<i64: 256, 256>}, {transform_indices = @transform_2, window_bounds = array<i64: 1, 256>}, {transform_indices = @transform_3, window_bounds = array<i64: 2, 256>}]} {
    %c0_i32 = arith.constant 0 : i32
    %0 = arith.cmpi eq, %arg2, %c0_i32 : i32
    %1 = arith.extui %0 : i1 to i32
    %c0_i32_0 = arith.constant 0 : i32
    %2 = arith.cmpi ne, %1, %c0_i32_0 : i32
    scf.if %2 {
      %cst_10 = arith.constant 0.000000e+00 : f32
      %12 = vector.broadcast %cst_10 : f32 to vector<2x256xf32>
      %c0_11 = arith.constant 0 : index
      %c0_12 = arith.constant 0 : index
      %13 = vector.load %arg7[%c0_11, %c0_12] : memref<2x256xf32, #tpu.memory_space<vmem>>, vector<2x256xf32>
      tpu.vector_store %arg7[%c0_11, %c0_12], %12 {strides = array<i32>} : memref<2x256xf32, #tpu.memory_space<vmem>>, vector<2x256xf32>,
    } else {
    }
    %c0 = arith.constant 0 : index
    %c0_1 = arith.constant 0 : index
    %3 = vector.load %arg7[%c0, %c0_1] : memref<2x256xf32, #tpu.memory_space<vmem>>, vector<2x256xf32>
    %c0_2 = arith.constant 0 : index
    %c0_3 = arith.constant 0 : index
    %4 = vector.load %arg3[%c0_2, %c0_3] : memref<2x256xbf16, #tpu.memory_space<vmem>>, vector<2x256xbf16>
    %c0_4 = arith.constant 0 : index
    %c0_5 = arith.constant 0 : index
    %5 = vector.load %arg4[%c0_4, %c0_5] : memref<256x256xbf16, #tpu.memory_space<vmem>>, vector<256x256xbf16>
    %cst = arith.constant dense<0.000000e+00> : vector<2x256xf32>
    %6 = tpu.matmul %4, %5, %cst {dimension_numbers = #tpu.dot_dimension_numbers<[1], [0], [0], [1], [0, 0, 1, 1], [], []>} : vector<2x256xbf16>, vector<256x256xbf16>, vector<2x256xf32> -> vector<2x256xf32>
    %7 = arith.addf %3, %6 : vector<2x256xf32>
    %c0_6 = arith.constant 0 : index
    %c0_7 = arith.constant 0 : index
    %8 = vector.load %arg7[%c0_6, %c0_7] : memref<2x256xf32, #tpu.memory_space<vmem>>, vector<2x256xf32>
    tpu.vector_store %arg7[%c0_6, %c0_7], %7 {strides = array<i32>} : memref<2x256xf32, #tpu.memory_space<vmem>>, vector<2x256xf32>,
    %c0_i32_8 = arith.constant 0 : i32
    %9 = arith.cmpi eq, %arg2, %c0_i32_8 : i32
    %10 = arith.extui %9 : i1 to i32
    %c0_i32_9 = arith.constant 0 : i32
    %11 = arith.cmpi ne, %10, %c0_i32_9 : i32
    scf.if %11 {
      %c0_10 = arith.constant 0 : index
      %c0_11 = arith.constant 0 : index
      %12 = vector.load %arg7[%c0_10, %c0_11] : memref<2x256xf32, #tpu.memory_space<vmem>>, vector<2x256xf32>
      %c0_12 = arith.constant 0 : index
      %c0_13 = arith.constant 0 : index
      %13 = vector.load %arg5[%c0_12, %c0_13] : memref<1x256xf32, #tpu.memory_space<vmem>>, vector<1x256xf32>
      %14 = vector.broadcast %13 : vector<1x256xf32> to vector<2x256xf32>
      %15 = arith.addf %12, %14 : vector<2x256xf32>
      %16 = arith.truncf %15 : vector<2x256xf32> to vector<2x256xbf16>
      %c0_14 = arith.constant 0 : index
      %c0_15 = arith.constant 0 : index
      %17 = vector.load %arg6[%c0_14, %c0_15] : memref<2x256xbf16, #tpu.memory_space<vmem>>, vector<2x256xbf16>
      tpu.vector_store %arg6[%c0_14, %c0_15], %16 {strides = array<i32>} : memref<2x256xbf16, #tpu.memory_space<vmem>>, vector<2x256xbf16>,
    } else {
    }
    return
  }
  func.func @transform_0(%arg0: i32, %arg1: i32, %arg2: i32) -> (i32, i32) {
    %c0_i32 = arith.constant 0 : i32
    return %arg0, %arg2 : i32, i32
  }
  func.func @transform_1(%arg0: i32, %arg1: i32, %arg2: i32) -> (i32, i32) {
    %c0_i32 = arith.constant 0 : i32
    return %arg2, %arg1 : i32, i32
  }
  func.func @transform_2(%arg0: i32, %arg1: i32, %arg2: i32) -> (i32, i32) {
    %c0_i32 = arith.constant 0 : i32
    %c0_i32_0 = arith.constant 0 : i32
    return %c0_i32, %arg1 : i32, i32
  }
  func.func @transform_3(%arg0: i32, %arg1: i32, %arg2: i32) -> (i32, i32) {
    %c0_i32 = arith.constant 0 : i32
    return %arg0, %arg1 : i32, i32
  }
}

module attributes {stable_mosaic.version = 11 : i64} {
  func.func @_matmul_kernel(%arg0: i32, %arg1: i32, %arg2: i32, %arg3: memref<2x512xbf16, #tpu.memory_space<vmem>>, %arg4: memref<512x256xbf16, #tpu.memory_space<vmem>>, %arg5: memref<1x256xf32, #tpu.memory_space<vmem>>, %arg6: memref<2x256xbf16, #tpu.memory_space<vmem>>, %arg7: memref<2x256xbf16, #tpu.memory_space<vmem>>, %arg8: memref<2x256xf32, #tpu.memory_space<vmem>>) attributes {dimension_semantics = [#tpu.dimension_semantics<parallel>, #tpu.dimension_semantics<parallel>, #tpu.dimension_semantics<arbitrary>], iteration_bounds = array<i64: 1, 2, 9>, scalar_prefetch = 0 : i64, scratch_operands = 1 : i64, tpu.core_type = #tpu.core_type<tc>, window_params = [{transform_indices = @transform_0, window_bounds = array<i64: 2, 512>}, {transform_indices = @transform_1, window_bounds = array<i64: 512, 256>}, {transform_indices = @transform_2, window_bounds = array<i64: 1, 256>}, {transform_indices = @transform_3, window_bounds = array<i64: 2, 256>}, {transform_indices = @transform_4, window_bounds = array<i64: 2, 256>}]} {
    %c0_i32 = arith.constant 0 : i32
    %0 = arith.cmpi eq, %arg2, %c0_i32 : i32
    %1 = arith.extui %0 : i1 to i32
    %c0_i32_0 = arith.constant 0 : i32
    %2 = arith.cmpi ne, %1, %c0_i32_0 : i32
    scf.if %2 {
      %cst_9 = arith.constant 0.000000e+00 : f32
      %12 = vector.broadcast %cst_9 : f32 to vector<2x256xf32>
      %c0_10 = arith.constant 0 : index
      %c0_11 = arith.constant 0 : index
      %13 = vector.load %arg8[%c0_10, %c0_11] : memref<2x256xf32, #tpu.memory_space<vmem>>, vector<2x256xf32>
      tpu.vector_store %arg8[%c0_10, %c0_11], %12 {strides = array<i32>} : memref<2x256xf32, #tpu.memory_space<vmem>>, vector<2x256xf32>,
    } else {
    }
    %c0 = arith.constant 0 : index
    %c0_1 = arith.constant 0 : index
    %3 = vector.load %arg8[%c0, %c0_1] : memref<2x256xf32, #tpu.memory_space<vmem>>, vector<2x256xf32>
    %c0_2 = arith.constant 0 : index
    %c0_3 = arith.constant 0 : index
    %4 = vector.load %arg3[%c0_2, %c0_3] : memref<2x512xbf16, #tpu.memory_space<vmem>>, vector<2x512xbf16>
    %c0_4 = arith.constant 0 : index
    %c0_5 = arith.constant 0 : index
    %5 = vector.load %arg4[%c0_4, %c0_5] : memref<512x256xbf16, #tpu.memory_space<vmem>>, vector<512x256xbf16>
    %cst = arith.constant dense<0.000000e+00> : vector<2x256xf32>
    %6 = tpu.matmul %4, %5, %cst {dimension_numbers = #tpu.dot_dimension_numbers<[1], [0], [0], [1], [0, 0, 1, 1], [], []>} : vector<2x512xbf16>, vector<512x256xbf16>, vector<2x256xf32> -> vector<2x256xf32>
    %7 = arith.addf %3, %6 : vector<2x256xf32>
    %c0_6 = arith.constant 0 : index
    %c0_7 = arith.constant 0 : index
    %8 = vector.load %arg8[%c0_6, %c0_7] : memref<2x256xf32, #tpu.memory_space<vmem>>, vector<2x256xf32>
    tpu.vector_store %arg8[%c0_6, %c0_7], %7 {strides = array<i32>} : memref<2x256xf32, #tpu.memory_space<vmem>>, vector<2x256xf32>,
    %c8_i32 = arith.constant 8 : i32
    %9 = arith.cmpi eq, %arg2, %c8_i32 : i32
    %10 = arith.extui %9 : i1 to i32
    %c0_i32_8 = arith.constant 0 : i32
    %11 = arith.cmpi ne, %10, %c0_i32_8 : i32
    scf.if %11 {
      %c0_9 = arith.constant 0 : index
      %c0_10 = arith.constant 0 : index
      %12 = vector.load %arg8[%c0_9, %c0_10] : memref<2x256xf32, #tpu.memory_space<vmem>>, vector<2x256xf32>
      %c0_11 = arith.constant 0 : index
      %c0_12 = arith.constant 0 : index
      %13 = vector.load %arg5[%c0_11, %c0_12] : memref<1x256xf32, #tpu.memory_space<vmem>>, vector<1x256xf32>
      %14 = vector.broadcast %13 : vector<1x256xf32> to vector<2x256xf32>
      %15 = arith.addf %12, %14 : vector<2x256xf32>
      %c0_13 = arith.constant 0 : index
      %c0_14 = arith.constant 0 : index
      %16 = vector.load %arg6[%c0_13, %c0_14] : memref<2x256xbf16, #tpu.memory_space<vmem>>, vector<2x256xbf16>
      %17 = arith.extf %16 : vector<2x256xbf16> to vector<2x256xf32>
      %18 = arith.addf %15, %17 : vector<2x256xf32>
      %cst_15 = arith.constant 0.000000e+00 : f32
      %19 = vector.broadcast %cst_15 : f32 to vector<2x256xf32>
      %20 = arith.maximumf %18, %19 : vector<2x256xf32>
      %21 = arith.truncf %20 : vector<2x256xf32> to vector<2x256xbf16>
      %c0_16 = arith.constant 0 : index
      %c0_17 = arith.constant 0 : index
      %22 = vector.load %arg7[%c0_16, %c0_17] : memref<2x256xbf16, #tpu.memory_space<vmem>>, vector<2x256xbf16>
      tpu.vector_store %arg7[%c0_16, %c0_17], %21 {strides = array<i32>} : memref<2x256xbf16, #tpu.memory_space<vmem>>, vector<2x256xbf16>,
    } else {
    }
    return
  }
  func.func @transform_0(%arg0: i32, %arg1: i32, %arg2: i32) -> (i32, i32) {
    %c0_i32 = arith.constant 0 : i32
    return %arg0, %arg2 : i32, i32
  }
  func.func @transform_1(%arg0: i32, %arg1: i32, %arg2: i32) -> (i32, i32) {
    %c0_i32 = arith.constant 0 : i32
    return %arg2, %arg1 : i32, i32
  }
  func.func @transform_2(%arg0: i32, %arg1: i32, %arg2: i32) -> (i32, i32) {
    %c0_i32 = arith.constant 0 : i32
    %c0_i32_0 = arith.constant 0 : i32
    return %c0_i32, %arg1 : i32, i32
  }
  func.func @transform_3(%arg0: i32, %arg1: i32, %arg2: i32) -> (i32, i32) {
    %c0_i32 = arith.constant 0 : i32
    return %arg0, %arg1 : i32, i32
  }
  func.func @transform_4(%arg0: i32, %arg1: i32, %arg2: i32) -> (i32, i32) {
    %c0_i32 = arith.constant 0 : i32
    return %arg0, %arg1 : i32, i32
  }
}

module attributes {stable_mosaic.version = 11 : i64} {
  func.func @_matmul_kernel(%arg0: i32, %arg1: i32, %arg2: i32, %arg3: memref<2x512xbf16, #tpu.memory_space<vmem>>, %arg4: memref<512x256xbf16, #tpu.memory_space<vmem>>, %arg5: memref<1x256xf32, #tpu.memory_space<vmem>>, %arg6: memref<2x256xbf16, #tpu.memory_space<vmem>>, %arg7: memref<2x256xf32, #tpu.memory_space<vmem>>) attributes {dimension_semantics = [#tpu.dimension_semantics<parallel>, #tpu.dimension_semantics<parallel>, #tpu.dimension_semantics<arbitrary>], iteration_bounds = array<i64: 1, 2, 9>, scalar_prefetch = 0 : i64, scratch_operands = 1 : i64, tpu.core_type = #tpu.core_type<tc>, window_params = [{transform_indices = @transform_0, window_bounds = array<i64: 2, 512>}, {transform_indices = @transform_1, window_bounds = array<i64: 512, 256>}, {transform_indices = @transform_2, window_bounds = array<i64: 1, 256>}, {transform_indices = @transform_3, window_bounds = array<i64: 2, 256>}]} {
    %c0_i32 = arith.constant 0 : i32
    %0 = arith.cmpi eq, %arg2, %c0_i32 : i32
    %1 = arith.extui %0 : i1 to i32
    %c0_i32_0 = arith.constant 0 : i32
    %2 = arith.cmpi ne, %1, %c0_i32_0 : i32
    scf.if %2 {
      %cst_9 = arith.constant 0.000000e+00 : f32
      %12 = vector.broadcast %cst_9 : f32 to vector<2x256xf32>
      %c0_10 = arith.constant 0 : index
      %c0_11 = arith.constant 0 : index
      %13 = vector.load %arg7[%c0_10, %c0_11] : memref<2x256xf32, #tpu.memory_space<vmem>>, vector<2x256xf32>
      tpu.vector_store %arg7[%c0_10, %c0_11], %12 {strides = array<i32>} : memref<2x256xf32, #tpu.memory_space<vmem>>, vector<2x256xf32>,
    } else {
    }
    %c0 = arith.constant 0 : index
    %c0_1 = arith.constant 0 : index
    %3 = vector.load %arg7[%c0, %c0_1] : memref<2x256xf32, #tpu.memory_space<vmem>>, vector<2x256xf32>
    %c0_2 = arith.constant 0 : index
    %c0_3 = arith.constant 0 : index
    %4 = vector.load %arg3[%c0_2, %c0_3] : memref<2x512xbf16, #tpu.memory_space<vmem>>, vector<2x512xbf16>
    %c0_4 = arith.constant 0 : index
    %c0_5 = arith.constant 0 : index
    %5 = vector.load %arg4[%c0_4, %c0_5] : memref<512x256xbf16, #tpu.memory_space<vmem>>, vector<512x256xbf16>
    %cst = arith.constant dense<0.000000e+00> : vector<2x256xf32>
    %6 = tpu.matmul %4, %5, %cst {dimension_numbers = #tpu.dot_dimension_numbers<[1], [0], [0], [1], [0, 0, 1, 1], [], []>} : vector<2x512xbf16>, vector<512x256xbf16>, vector<2x256xf32> -> vector<2x256xf32>
    %7 = arith.addf %3, %6 : vector<2x256xf32>
    %c0_6 = arith.constant 0 : index
    %c0_7 = arith.constant 0 : index
    %8 = vector.load %arg7[%c0_6, %c0_7] : memref<2x256xf32, #tpu.memory_space<vmem>>, vector<2x256xf32>
    tpu.vector_store %arg7[%c0_6, %c0_7], %7 {strides = array<i32>} : memref<2x256xf32, #tpu.memory_space<vmem>>, vector<2x256xf32>,
    %c8_i32 = arith.constant 8 : i32
    %9 = arith.cmpi eq, %arg2, %c8_i32 : i32
    %10 = arith.extui %9 : i1 to i32
    %c0_i32_8 = arith.constant 0 : i32
    %11 = arith.cmpi ne, %10, %c0_i32_8 : i32
    scf.if %11 {
      %c0_9 = arith.constant 0 : index
      %c0_10 = arith.constant 0 : index
      %12 = vector.load %arg7[%c0_9, %c0_10] : memref<2x256xf32, #tpu.memory_space<vmem>>, vector<2x256xf32>
      %c0_11 = arith.constant 0 : index
      %c0_12 = arith.constant 0 : index
      %13 = vector.load %arg5[%c0_11, %c0_12] : memref<1x256xf32, #tpu.memory_space<vmem>>, vector<1x256xf32>
      %14 = vector.broadcast %13 : vector<1x256xf32> to vector<2x256xf32>
      %15 = arith.addf %12, %14 : vector<2x256xf32>
      %cst_13 = arith.constant 0.000000e+00 : f32
      %16 = vector.broadcast %cst_13 : f32 to vector<2x256xf32>
      %17 = arith.maximumf %15, %16 : vector<2x256xf32>
      %18 = arith.truncf %17 : vector<2x256xf32> to vector<2x256xbf16>
      %c0_14 = arith.constant 0 : index
      %c0_15 = arith.constant 0 : index
      %19 = vector.load %arg6[%c0_14, %c0_15] : memref<2x256xbf16, #tpu.memory_space<vmem>>, vector<2x256xbf16>
      tpu.vector_store %arg6[%c0_14, %c0_15], %18 {strides = array<i32>} : memref<2x256xbf16, #tpu.memory_space<vmem>>, vector<2x256xbf16>,
    } else {
    }
    return
  }
  func.func @transform_0(%arg0: i32, %arg1: i32, %arg2: i32) -> (i32, i32) {
    %c0_i32 = arith.constant 0 : i32
    return %arg0, %arg2 : i32, i32
  }
  func.func @transform_1(%arg0: i32, %arg1: i32, %arg2: i32) -> (i32, i32) {
    %c0_i32 = arith.constant 0 : i32
    return %arg2, %arg1 : i32, i32
  }
  func.func @transform_2(%arg0: i32, %arg1: i32, %arg2: i32) -> (i32, i32) {
    %c0_i32 = arith.constant 0 : i32
    %c0_i32_0 = arith.constant 0 : i32
    return %c0_i32, %arg1 : i32, i32
  }
  func.func @transform_3(%arg0: i32, %arg1: i32, %arg2: i32) -> (i32, i32) {
    %c0_i32 = arith.constant 0 : i32
    return %arg0, %arg1 : i32, i32
  }
}

module attributes {stable_mosaic.version = 11 : i64} {
  func.func @_matmul_kernel(%arg0: i32, %arg1: i32, %arg2: i32, %arg3: memref<2x512xbf16, #tpu.memory_space<vmem>>, %arg4: memref<512x256xbf16, #tpu.memory_space<vmem>>, %arg5: memref<1x256xf32, #tpu.memory_space<vmem>>, %arg6: memref<2x256xbf16, #tpu.memory_space<vmem>>, %arg7: memref<2x256xbf16, #tpu.memory_space<vmem>>, %arg8: memref<2x256xf32, #tpu.memory_space<vmem>>) attributes {dimension_semantics = [#tpu.dimension_semantics<parallel>, #tpu.dimension_semantics<parallel>, #tpu.dimension_semantics<arbitrary>], iteration_bounds = array<i64: 1, 2, 9>, scalar_prefetch = 0 : i64, scratch_operands = 1 : i64, tpu.core_type = #tpu.core_type<tc>, window_params = [{transform_indices = @transform_0, window_bounds = array<i64: 2, 512>}, {transform_indices = @transform_1, window_bounds = array<i64: 512, 256>}, {transform_indices = @transform_2, window_bounds = array<i64: 1, 256>}, {transform_indices = @transform_3, window_bounds = array<i64: 2, 256>}, {transform_indices = @transform_4, window_bounds = array<i64: 2, 256>}]} {
    %c0_i32 = arith.constant 0 : i32
    %0 = arith.cmpi eq, %arg2, %c0_i32 : i32
    %1 = arith.extui %0 : i1 to i32
    %c0_i32_0 = arith.constant 0 : i32
    %2 = arith.cmpi ne, %1, %c0_i32_0 : i32
    scf.if %2 {
      %cst_9 = arith.constant 0.000000e+00 : f32
      %12 = vector.broadcast %cst_9 : f32 to vector<2x256xf32>
      %c0_10 = arith.constant 0 : index
      %c0_11 = arith.constant 0 : index
      %13 = vector.load %arg8[%c0_10, %c0_11] : memref<2x256xf32, #tpu.memory_space<vmem>>, vector<2x256xf32>
      tpu.vector_store %arg8[%c0_10, %c0_11], %12 {strides = array<i32>} : memref<2x256xf32, #tpu.memory_space<vmem>>, vector<2x256xf32>,
    } else {
    }
    %c0 = arith.constant 0 : index
    %c0_1 = arith.constant 0 : index
    %3 = vector.load %arg8[%c0, %c0_1] : memref<2x256xf32, #tpu.memory_space<vmem>>, vector<2x256xf32>
    %c0_2 = arith.constant 0 : index
    %c0_3 = arith.constant 0 : index
    %4 = vector.load %arg3[%c0_2, %c0_3] : memref<2x512xbf16, #tpu.memory_space<vmem>>, vector<2x512xbf16>
    %c0_4 = arith.constant 0 : index
    %c0_5 = arith.constant 0 : index
    %5 = vector.load %arg4[%c0_4, %c0_5] : memref<512x256xbf16, #tpu.memory_space<vmem>>, vector<512x256xbf16>
    %cst = arith.constant dense<0.000000e+00> : vector<2x256xf32>
    %6 = tpu.matmul %4, %5, %cst {dimension_numbers = #tpu.dot_dimension_numbers<[1], [0], [0], [1], [0, 0, 1, 1], [], []>} : vector<2x512xbf16>, vector<512x256xbf16>, vector<2x256xf32> -> vector<2x256xf32>
    %7 = arith.addf %3, %6 : vector<2x256xf32>
    %c0_6 = arith.constant 0 : index
    %c0_7 = arith.constant 0 : index
    %8 = vector.load %arg8[%c0_6, %c0_7] : memref<2x256xf32, #tpu.memory_space<vmem>>, vector<2x256xf32>
    tpu.vector_store %arg8[%c0_6, %c0_7], %7 {strides = array<i32>} : memref<2x256xf32, #tpu.memory_space<vmem>>, vector<2x256xf32>,
    %c8_i32 = arith.constant 8 : i32
    %9 = arith.cmpi eq, %arg2, %c8_i32 : i32
    %10 = arith.extui %9 : i1 to i32
    %c0_i32_8 = arith.constant 0 : i32
    %11 = arith.cmpi ne, %10, %c0_i32_8 : i32
    scf.if %11 {
      %c0_9 = arith.constant 0 : index
      %c0_10 = arith.constant 0 : index
      %12 = vector.load %arg8[%c0_9, %c0_10] : memref<2x256xf32, #tpu.memory_space<vmem>>, vector<2x256xf32>
      %c0_11 = arith.constant 0 : index
      %c0_12 = arith.constant 0 : index
      %13 = vector.load %arg5[%c0_11, %c0_12] : memref<1x256xf32, #tpu.memory_space<vmem>>, vector<1x256xf32>
      %14 = vector.broadcast %13 : vector<1x256xf32> to vector<2x256xf32>
      %15 = arith.addf %12, %14 : vector<2x256xf32>
      %c0_13 = arith.constant 0 : index
      %c0_14 = arith.constant 0 : index
      %16 = vector.load %arg6[%c0_13, %c0_14] : memref<2x256xbf16, #tpu.memory_space<vmem>>, vector<2x256xbf16>
      %17 = arith.extf %16 : vector<2x256xbf16> to vector<2x256xf32>
      %18 = arith.addf %15, %17 : vector<2x256xf32>
      %cst_15 = arith.constant 0.000000e+00 : f32
      %19 = vector.broadcast %cst_15 : f32 to vector<2x256xf32>
      %20 = arith.maximumf %18, %19 : vector<2x256xf32>
      %21 = arith.truncf %20 : vector<2x256xf32> to vector<2x256xbf16>
      %c0_16 = arith.constant 0 : index
      %c0_17 = arith.constant 0 : index
      %22 = vector.load %arg7[%c0_16, %c0_17] : memref<2x256xbf16, #tpu.memory_space<vmem>>, vector<2x256xbf16>
      tpu.vector_store %arg7[%c0_16, %c0_17], %21 {strides = array<i32>} : memref<2x256xbf16, #tpu.memory_space<vmem>>, vector<2x256xbf16>,
    } else {
    }
    return
  }
  func.func @transform_0(%arg0: i32, %arg1: i32, %arg2: i32) -> (i32, i32) {
    %c0_i32 = arith.constant 0 : i32
    return %arg0, %arg2 : i32, i32
  }
  func.func @transform_1(%arg0: i32, %arg1: i32, %arg2: i32) -> (i32, i32) {
    %c0_i32 = arith.constant 0 : i32
    return %arg2, %arg1 : i32, i32
  }
  func.func @transform_2(%arg0: i32, %arg1: i32, %arg2: i32) -> (i32, i32) {
    %c0_i32 = arith.constant 0 : i32
    %c0_i32_0 = arith.constant 0 : i32
    return %c0_i32, %arg1 : i32, i32
  }
  func.func @transform_3(%arg0: i32, %arg1: i32, %arg2: i32) -> (i32, i32) {
    %c0_i32 = arith.constant 0 : i32
    return %arg0, %arg1 : i32, i32
  }
  func.func @transform_4(%arg0: i32, %arg1: i32, %arg2: i32) -> (i32, i32) {
    %c0_i32 = arith.constant 0 : i32
    return %arg0, %arg1 : i32, i32
  }
}

module attributes {stable_mosaic.version = 11 : i64} {
  func.func @_matmul_kernel(%arg0: i32, %arg1: i32, %arg2: i32, %arg3: memref<2x512xbf16, #tpu.memory_space<vmem>>, %arg4: memref<512x32xbf16, #tpu.memory_space<vmem>>, %arg5: memref<1x32xf32, #tpu.memory_space<vmem>>, %arg6: memref<2x32xbf16, #tpu.memory_space<vmem>>, %arg7: memref<2x32xf32, #tpu.memory_space<vmem>>) attributes {dimension_semantics = [#tpu.dimension_semantics<parallel>, #tpu.dimension_semantics<parallel>, #tpu.dimension_semantics<arbitrary>], iteration_bounds = array<i64: 1, 1, 1>, scalar_prefetch = 0 : i64, scratch_operands = 1 : i64, tpu.core_type = #tpu.core_type<tc>, window_params = [{transform_indices = @transform_0, window_bounds = array<i64: 2, 512>}, {transform_indices = @transform_1, window_bounds = array<i64: 512, 32>}, {transform_indices = @transform_2, window_bounds = array<i64: 1, 32>}, {transform_indices = @transform_3, window_bounds = array<i64: 2, 32>}]} {
    %c0_i32 = arith.constant 0 : i32
    %0 = arith.cmpi eq, %arg2, %c0_i32 : i32
    %1 = arith.extui %0 : i1 to i32
    %c0_i32_0 = arith.constant 0 : i32
    %2 = arith.cmpi ne, %1, %c0_i32_0 : i32
    scf.if %2 {
      %cst_10 = arith.constant 0.000000e+00 : f32
      %12 = vector.broadcast %cst_10 : f32 to vector<2x32xf32>
      %c0_11 = arith.constant 0 : index
      %c0_12 = arith.constant 0 : index
      %13 = vector.load %arg7[%c0_11, %c0_12] : memref<2x32xf32, #tpu.memory_space<vmem>>, vector<2x32xf32>
      tpu.vector_store %arg7[%c0_11, %c0_12], %12 {strides = array<i32>} : memref<2x32xf32, #tpu.memory_space<vmem>>, vector<2x32xf32>,
    } else {
    }
    %c0 = arith.constant 0 : index
    %c0_1 = arith.constant 0 : index
    %3 = vector.load %arg7[%c0, %c0_1] : memref<2x32xf32, #tpu.memory_space<vmem>>, vector<2x32xf32>
    %c0_2 = arith.constant 0 : index
    %c0_3 = arith.constant 0 : index
    %4 = vector.load %arg3[%c0_2, %c0_3] : memref<2x512xbf16, #tpu.memory_space<vmem>>, vector<2x512xbf16>
    %c0_4 = arith.constant 0 : index
    %c0_5 = arith.constant 0 : index
    %5 = vector.load %arg4[%c0_4, %c0_5] : memref<512x32xbf16, #tpu.memory_space<vmem>>, vector<512x32xbf16>
    %cst = arith.constant dense<0.000000e+00> : vector<2x32xf32>
    %6 = tpu.matmul %4, %5, %cst {dimension_numbers = #tpu.dot_dimension_numbers<[1], [0], [0], [1], [0, 0, 1, 1], [], []>} : vector<2x512xbf16>, vector<512x32xbf16>, vector<2x32xf32> -> vector<2x32xf32>
    %7 = arith.addf %3, %6 : vector<2x32xf32>
    %c0_6 = arith.constant 0 : index
    %c0_7 = arith.constant 0 : index
    %8 = vector.load %arg7[%c0_6, %c0_7] : memref<2x32xf32, #tpu.memory_space<vmem>>, vector<2x32xf32>
    tpu.vector_store %arg7[%c0_6, %c0_7], %7 {strides = array<i32>} : memref<2x32xf32, #tpu.memory_space<vmem>>, vector<2x32xf32>,
    %c0_i32_8 = arith.constant 0 : i32
    %9 = arith.cmpi eq, %arg2, %c0_i32_8 : i32
    %10 = arith.extui %9 : i1 to i32
    %c0_i32_9 = arith.constant 0 : i32
    %11 = arith.cmpi ne, %10, %c0_i32_9 : i32
    scf.if %11 {
      %c0_10 = arith.constant 0 : index
      %c0_11 = arith.constant 0 : index
      %12 = vector.load %arg7[%c0_10, %c0_11] : memref<2x32xf32, #tpu.memory_space<vmem>>, vector<2x32xf32>
      %c0_12 = arith.constant 0 : index
      %c0_13 = arith.constant 0 : index
      %13 = vector.load %arg5[%c0_12, %c0_13] : memref<1x32xf32, #tpu.memory_space<vmem>>, vector<1x32xf32>
      %14 = vector.broadcast %13 : vector<1x32xf32> to vector<2x32xf32>
      %15 = arith.addf %12, %14 : vector<2x32xf32>
      %16 = arith.truncf %15 : vector<2x32xf32> to vector<2x32xbf16>
      %c0_14 = arith.constant 0 : index
      %c0_15 = arith.constant 0 : index
      %17 = vector.load %arg6[%c0_14, %c0_15] : memref<2x32xbf16, #tpu.memory_space<vmem>>, vector<2x32xbf16>
      tpu.vector_store %arg6[%c0_14, %c0_15], %16 {strides = array<i32>} : memref<2x32xbf16, #tpu.memory_space<vmem>>, vector<2x32xbf16>,
    } else {
    }
    return
  }
  func.func @transform_0(%arg0: i32, %arg1: i32, %arg2: i32) -> (i32, i32) {
    %c0_i32 = arith.constant 0 : i32
    return %arg0, %arg2 : i32, i32
  }
  func.func @transform_1(%arg0: i32, %arg1: i32, %arg2: i32) -> (i32, i32) {
    %c0_i32 = arith.constant 0 : i32
    return %arg2, %arg1 : i32, i32
  }
  func.func @transform_2(%arg0: i32, %arg1: i32, %arg2: i32) -> (i32, i32) {
    %c0_i32 = arith.constant 0 : i32
    %c0_i32_0 = arith.constant 0 : i32
    return %c0_i32, %arg1 : i32, i32
  }
  func.func @transform_3(%arg0: i32, %arg1: i32, %arg2: i32) -> (i32, i32) {
    %c0_i32 = arith.constant 0 : i32
    return %arg0, %arg1 : i32, i32
  }
}

module attributes {stable_mosaic.version = 11 : i64} {
  func.func @_head_kernel(%arg0: i32, %arg1: i32, %arg2: memref<16x32xbf16, #tpu.memory_space<vmem>>, %arg3: memref<16x32xbf16, #tpu.memory_space<vmem>>, %arg4: memref<32x32xbf16, #tpu.memory_space<vmem>>, %arg5: memref<32x32xbf16, #tpu.memory_space<vmem>>, %arg6: memref<1x32xf32, #tpu.memory_space<vmem>>, %arg7: memref<32x50xbf16, #tpu.memory_space<vmem>>, %arg8: memref<1x50xf32, #tpu.memory_space<vmem>>, %arg9: memref<16x50xf32, #tpu.memory_space<vmem>>, %arg10: memref<16x32xf32, #tpu.memory_space<vmem>>) attributes {dimension_semantics = [#tpu.dimension_semantics<parallel>, #tpu.dimension_semantics<arbitrary>], iteration_bounds = array<i64: 1, 1>, scalar_prefetch = 0 : i64, scratch_operands = 1 : i64, tpu.core_type = #tpu.core_type<tc>, window_params = [{transform_indices = @transform_0, window_bounds = array<i64: 16, 32>}, {transform_indices = @transform_1, window_bounds = array<i64: 16, 32>}, {pipeline_mode = #tpu.pipeline_mode<synchronous>, transform_indices = @transform_2, window_bounds = array<i64: 32, 32>}, {pipeline_mode = #tpu.pipeline_mode<synchronous>, transform_indices = @transform_3, window_bounds = array<i64: 32, 32>}, {pipeline_mode = #tpu.pipeline_mode<synchronous>, transform_indices = @transform_4, window_bounds = array<i64: 1, 32>}, {transform_indices = @transform_5, window_bounds = array<i64: 32, 50>}, {transform_indices = @transform_6, window_bounds = array<i64: 1, 50>}, {transform_indices = @transform_7, window_bounds = array<i64: 16, 50>}]} {
    %c0_i32 = arith.constant 0 : i32
    %0 = arith.cmpi eq, %arg1, %c0_i32 : i32
    %1 = arith.extui %0 : i1 to i32
    %c0_i32_0 = arith.constant 0 : i32
    %2 = arith.cmpi ne, %1, %c0_i32_0 : i32
    scf.if %2 {
      %c0_8 = arith.constant 0 : index
      %c0_9 = arith.constant 0 : index
      %11 = vector.load %arg2[%c0_8, %c0_9] : memref<16x32xbf16, #tpu.memory_space<vmem>>, vector<16x32xbf16>
      %c0_10 = arith.constant 0 : index
      %c0_11 = arith.constant 0 : index
      %12 = vector.load %arg4[%c0_10, %c0_11] : memref<32x32xbf16, #tpu.memory_space<vmem>>, vector<32x32xbf16>
      %cst_12 = arith.constant dense<0.000000e+00> : vector<16x32xf32>
      %13 = tpu.matmul %11, %12, %cst_12 {dimension_numbers = #tpu.dot_dimension_numbers<[1], [0], [0], [1], [0, 0, 1, 1], [], []>} : vector<16x32xbf16>, vector<32x32xbf16>, vector<16x32xf32> -> vector<16x32xf32>
      %c0_13 = arith.constant 0 : index
      %c0_14 = arith.constant 0 : index
      %14 = vector.load %arg3[%c0_13, %c0_14] : memref<16x32xbf16, #tpu.memory_space<vmem>>, vector<16x32xbf16>
      %c0_15 = arith.constant 0 : index
      %c0_16 = arith.constant 0 : index
      %15 = vector.load %arg5[%c0_15, %c0_16] : memref<32x32xbf16, #tpu.memory_space<vmem>>, vector<32x32xbf16>
      %cst_17 = arith.constant dense<0.000000e+00> : vector<16x32xf32>
      %16 = tpu.matmul %14, %15, %cst_17 {dimension_numbers = #tpu.dot_dimension_numbers<[1], [0], [0], [1], [0, 0, 1, 1], [], []>} : vector<16x32xbf16>, vector<32x32xbf16>, vector<16x32xf32> -> vector<16x32xf32>
      %17 = arith.addf %13, %16 : vector<16x32xf32>
      %c0_18 = arith.constant 0 : index
      %c0_19 = arith.constant 0 : index
      %18 = vector.load %arg6[%c0_18, %c0_19] : memref<1x32xf32, #tpu.memory_space<vmem>>, vector<1x32xf32>
      %19 = vector.broadcast %18 : vector<1x32xf32> to vector<16x32xf32>
      %20 = arith.addf %17, %19 : vector<16x32xf32>
      %c0_20 = arith.constant 0 : index
      %c0_21 = arith.constant 0 : index
      %21 = vector.load %arg10[%c0_20, %c0_21] : memref<16x32xf32, #tpu.memory_space<vmem>>, vector<16x32xf32>
      tpu.vector_store %arg10[%c0_20, %c0_21], %20 {strides = array<i32>} : memref<16x32xf32, #tpu.memory_space<vmem>>, vector<16x32xf32>,
    } else {
    }
    %c0 = arith.constant 0 : index
    %c0_1 = arith.constant 0 : index
    %3 = vector.load %arg10[%c0, %c0_1] : memref<16x32xf32, #tpu.memory_space<vmem>>, vector<16x32xf32>
    %c0_2 = arith.constant 0 : index
    %c0_3 = arith.constant 0 : index
    %4 = vector.load %arg7[%c0_2, %c0_3] : memref<32x50xbf16, #tpu.memory_space<vmem>>, vector<32x50xbf16>
    %5 = arith.extf %4 : vector<32x50xbf16> to vector<32x50xf32>
    %cst = arith.constant dense<0.000000e+00> : vector<16x50xf32>
    %6 = tpu.matmul %3, %5, %cst {dimension_numbers = #tpu.dot_dimension_numbers<[1], [0], [0], [1], [0, 0, 1, 1], [], []>} : vector<16x32xf32>, vector<32x50xf32>, vector<16x50xf32> -> vector<16x50xf32>
    %c0_4 = arith.constant 0 : index
    %c0_5 = arith.constant 0 : index
    %7 = vector.load %arg8[%c0_4, %c0_5] : memref<1x50xf32, #tpu.memory_space<vmem>>, vector<1x50xf32>
    %8 = vector.broadcast %7 : vector<1x50xf32> to vector<16x50xf32>
    %9 = arith.addf %6, %8 : vector<16x50xf32>
    %c0_6 = arith.constant 0 : index
    %c0_7 = arith.constant 0 : index
    %10 = vector.load %arg9[%c0_6, %c0_7] : memref<16x50xf32, #tpu.memory_space<vmem>>, vector<16x50xf32>
    tpu.vector_store %arg9[%c0_6, %c0_7], %9 {strides = array<i32>} : memref<16x50xf32, #tpu.memory_space<vmem>>, vector<16x50xf32>,
    return
  }
  func.func @transform_0(%arg0: i32, %arg1: i32) -> (i32, i32) {
    %c0_i32 = arith.constant 0 : i32
    %c0_i32_0 = arith.constant 0 : i32
    return %arg0, %c0_i32 : i32, i32
  }
  func.func @transform_1(%arg0: i32, %arg1: i32) -> (i32, i32) {
    %c0_i32 = arith.constant 0 : i32
    %c0_i32_0 = arith.constant 0 : i32
    return %arg0, %c0_i32 : i32, i32
  }
  func.func @transform_2(%arg0: i32, %arg1: i32) -> (i32, i32) {
    %c0_i32 = arith.constant 0 : i32
    %c0_i32_0 = arith.constant 0 : i32
    %c0_i32_1 = arith.constant 0 : i32
    return %c0_i32, %c0_i32_0 : i32, i32
  }
  func.func @transform_3(%arg0: i32, %arg1: i32) -> (i32, i32) {
    %c0_i32 = arith.constant 0 : i32
    %c0_i32_0 = arith.constant 0 : i32
    %c0_i32_1 = arith.constant 0 : i32
    return %c0_i32, %c0_i32_0 : i32, i32
  }
  func.func @transform_4(%arg0: i32, %arg1: i32) -> (i32, i32) {
    %c0_i32 = arith.constant 0 : i32
    %c0_i32_0 = arith.constant 0 : i32
    %c0_i32_1 = arith.constant 0 : i32
    return %c0_i32, %c0_i32_0 : i32, i32
  }
  func.func @transform_5(%arg0: i32, %arg1: i32) -> (i32, i32) {
    %c0_i32 = arith.constant 0 : i32
    %c0_i32_0 = arith.constant 0 : i32
    return %c0_i32, %arg1 : i32, i32
  }
  func.func @transform_6(%arg0: i32, %arg1: i32) -> (i32, i32) {
    %c0_i32 = arith.constant 0 : i32
    %c0_i32_0 = arith.constant 0 : i32
    return %c0_i32, %arg1 : i32, i32
  }
  func.func @transform_7(%arg0: i32, %arg1: i32) -> (i32, i32) {
    %c0_i32 = arith.constant 0 : i32
    return %arg0, %arg1 : i32, i32
  }
}

</mosaic_0001>

<bundles_post_ra>
// kernel: custom_model_forward.22
= control target key start
LH: loop header
LB: loop body
LE: loop exit
PB: predicated region body
PF: predicated region fallthrough
CT: control target
= control target key end

     0   :  { %s870_s12 = smov 0   ;;  %s872_s13 = smov 0   ;;  %s1008_s0 = inlined_call_operand.vmem [shape: bf16[128,147], index: 0, kind: input, shape index: {}]   ;;  %s1009_s1 = inlined_call_operand.vmem [shape: bf16[147,64], index: 1, kind: input, shape index: {}]   ;;  %s1010_s2 = inlined_call_operand.vmem [shape: f32[1,64], index: 2, kind: input, shape index: {}]   ;;  %s1011_s3 = inlined_call_operand.vmem [shape: bf16[128,64], index: 3, kind: output, shape index: {}]  }
   0x1   :  { %s874_s14 = smov 0  }
   0x2 LB: > { %s32_s15 = sadd.s32 1, %s841_s13  ;;  %p706_p0 = scmp.ge.s32.totalorder %s845_s14, 1  ;;  %s845_s14 = sphi %s874_s14, %s13_s14   ;;  %s841_s13 = sphi %s872_s13, %s1013_s13   ;;  %s837_s12 = sphi %s870_s12, %s1012_s12  }
   0x3   : > { %p34_p1 = scmp.ge.s32.totalorder %s32_s15, 2  ;;  %p191_p2 = scmp.lt.s32.totalorder %s845_s14, 3 }
   0x5   : > { %s1015_s15 = smov (%p34_p1, %s32_s15), 0  ;;  %p192_p3 = pnand %p706_p0, %p191_p2 }
   0x6   : > { %v801_v0 = vld [vmem:[%s1009_s1] sm:$0xff] (!%p192_p3)   ;;  %v847_v1 = vmov (!%p192_p3), 0   ;;  %v802_v2 = vld [vmem:[%s1009_s1 + $0x8] sm:$0xff] (!%p192_p3)   ;;  %v803_v3 = vld [vmem:[%s1009_s1 + $0x10] sm:$0xff] (!%p192_p3)   ;;  %s707_s22 = sshll.u32 (!%p192_p3), %s837_s12, 3  ;;  %vm272_vm0 = vcmask (!%p192_p3), 523264  }
   0x7   : > { %195 = sbr.rel (%p192_p3) target bundleno = 287 (0x11f), region = 32  ;;  %429 = vmatprep.subr.bf16.mxu0 (!%p192_p3), %v847_v1  ;;  %754 = vmatprep.subr.bf16.mxu1 (!%p192_p3), %v847_v1  ;;  %p236_p4 = scmp.lt.s32.totalorder (!%p192_p3), %s707_s22, 15  ;;  %v804_v4 = vld [vmem:[%s1009_s1 + $0x18] sm:$0xff] (!%p192_p3)   ;;  %v848_v5 = vmov (!%p192_p3), 0.0   ;;  %v805_v6 = vld [vmem:[%s1009_s1 + $0x20] sm:$0xff] (!%p192_p3)   ;;  %vm409_vm1 = vcmask (!%p192_p3), 154624  }
   0x8   : > { %430 = vmatpush1.bf16.msra.mxu0 (!%p192_p3), %v801_v0  ;;  %764 = vmatpush1.bf16.msra.mxu1 (!%p192_p3), %v801_v0  ;;  %273 = vst.msk [vmem:[#allocation2] sm:$0xff] (!%p192_p3), %vm272_vm0, %v848_v5  ;;  %274 = vst.msk [vmem:[#allocation2 + $0x8] sm:$0xff] (!%p192_p3), %vm272_vm0, %v848_v5  ;;  %v806_v9 = vld [vmem:[%s1009_s1 + $0x28] sm:$0xff] (!%p192_p3)   ;;  %v807_v10 = vld [vmem:[%s1009_s1 + $0x30] sm:$0xff] (!%p192_p3)   ;;  %vm422_vm2 = vcmask (!%p192_p3), 1040384   ;;  %vm423_vm3 = vcmask (!%p192_p3), 1041408  }
   0x9   : > { %431 = vmatprep.subr.bf16.mxu0 (!%p192_p3), %v847_v1  ;;  %755 = vmatprep.subr.bf16.mxu1 (!%p192_p3), %v847_v1  ;;  %275 = vst.msk [vmem:[#allocation2 + $0x10] sm:$0xff] (!%p192_p3), %vm272_vm0, %v848_v5  ;;  %276 = vst.msk [vmem:[#allocation2 + $0x18] sm:$0xff] (!%p192_p3), %vm272_vm0, %v848_v5  ;;  %v808_v11 = vld [vmem:[%s1009_s1 + $0x38] sm:$0xff] (!%p192_p3)   ;;  %v849_v12 = vmov (!%p192_p3), 65535   ;;  %v809_v14 = vld [vmem:[%s1009_s1 + $0x40] sm:$0xff] (!%p192_p3)   ;;  %vm577_vm4 = vcmask (!%p192_p3), 519168  }
   0xa   : > { %277 = vst.msk [vmem:[#allocation2 + $0x20] sm:$0xff] (!%p192_p3), %vm272_vm0, %v848_v5  ;;  %278 = vst.msk [vmem:[#allocation2 + $0x28] sm:$0xff] (!%p192_p3), %vm272_vm0, %v848_v5  ;;  %v424_v13 = vsel (!%p192_p3), %vm422_vm2, 4294967295, %v849_v12  ;;  %v810_v15 = vld [vmem:[%s1009_s1 + $0x48] ss:$0 sps:$4 sm:$0x33] (!%p192_p3)  }
   0xb   : > { %279 = vst.msk [vmem:[#allocation2 + $0x30] sm:$0xff] (!%p192_p3), %vm272_vm0, %v848_v5  ;;  %280 = vst.msk [vmem:[#allocation2 + $0x38] sm:$0xff] (!%p192_p3), %vm272_vm0, %v848_v5  ;;  %v425_v16 = vsel (!%p192_p3), %vm423_vm3, %v424_v13, 0  ;;  %v734_v42 = vld [vmem:[%s1010_s2] ss:$0 sm:$0xff] (!%p192_p3) }
   0xc   : > { %432 = vmatpush1.bf16.msra.mxu0 (!%p192_p3), %v802_v2  ;;  %765 = vmatpush1.bf16.msra.mxu1 (!%p192_p3), %v802_v2  ;;  %v427_v17 = vand.u32 (!%p192_p3), %v810_v15, %v425_v16 }
   0xd   : > { %433 = vmatprep.subr.bf16.mxu0 (!%p192_p3), %v847_v1  ;;  %756 = vmatprep.subr.bf16.mxu1 (!%p192_p3), %v847_v1 }
   0xe   : > { %s1017_s22 = smov (!%p236_p4, %s707_s22), 15 }
   0xf   : > { %s745_s25 = sshll.u32 %s1017_s22, 3  ;;  %v281_v24 = vld [vmem:[#allocation2] sm:$0xff]  ;;  %v282_v28 = vld [vmem:[#allocation2 + $0x8] sm:$0xff]  ;;  %s711_s19 = sshll.u32 %s1017_s22, 2 }
  0x10   : > { %434 = vmatpush1.bf16.msra.mxu0 %v803_v3  ;;  %766 = vmatpush1.bf16.msra.mxu1 %v803_v3  ;;  %s922_s28 = scalar_lea.vmem %s1008_s0, %s745_s25  ;;  %v283_v40 = vld [vmem:[#allocation2 + $0x10] sm:$0xff]  ;;  %v284_v45 = vld [vmem:[#allocation2 + $0x18] sm:$0xff]  ;;  %s981_s22 = scalar_lea.vmem %s1011_s3, %s711_s19 }
  0x11   : > { %435 = vmatprep.subr.bf16.mxu0 %v847_v1  ;;  %757 = vmatprep.subr.bf16.mxu1 %v847_v1  ;;  %v813_v7 = vld [vmem:[%s922_s28 + $0x4] ss:$8 sps:$4 sm:$0xff]   ;;  %v811_v18 = vld [vmem:[%s922_s28] ss:$8 sps:$4 sm:$0xff]   ;;  %v817_v20 = vld [vmem:[%s922_s28 + $0x14] ss:$8 sps:$4 sm:$0xff]  }
  0x12   : > { %v816_v8 = vld [vmem:[%s922_s28 + $0x24] ss:$8 sps:$4 sm:$0xff]   ;;  %730 = vmatprep.mubr.msk.bf16.mxu0 %vm409_vm1, %v813_v7  ;;  %v814_v19 = vld [vmem:[%s922_s28 + $0x20] ss:$8 sps:$4 sm:$0xff]   ;;  %v819_v21 = vld [vmem:[%s922_s28 + $0x34] ss:$8 sps:$4 sm:$0xff]  }
  0x13   : > { %732 = vmatprep.mubr.msk.bf16.mxu1 %vm409_vm1, %v816_v8  ;;  %v821_v22 = vld [vmem:[%s922_s28 + $0x10] ss:$8 sps:$4 sm:$0xff]   ;;  %v285_v25 = vld [vmem:[#allocation2 + $0x20] sm:$0xff]  ;;  %v286_v29 = vld [vmem:[#allocation2 + $0x28] sm:$0xff] }
  0x14   : > { %436 = vmatpush1.bf16.msra.mxu0 %v804_v4  ;;  %767 = vmatpush1.bf16.msra.mxu1 %v804_v4  ;;  %v822_v23 = vld [vmem:[%s922_s28 + $0x30] ss:$8 sps:$4 sm:$0xff]  }
  0x15   : > { %437 = vmatprep.subr.bf16.mxu0 %v847_v1  ;;  %758 = vmatprep.subr.bf16.mxu1 %v847_v1  ;;  %v287_v41 = vld [vmem:[#allocation2 + $0x30] sm:$0xff]  ;;  %v288_v46 = vld [vmem:[#allocation2 + $0x38] sm:$0xff] }
  0x18   : > { %438 = vmatpush1.bf16.msra.mxu0 %v805_v6  ;;  %768 = vmatpush1.bf16.msra.mxu1 %v805_v6 }
  0x19   : > { %439 = vmatprep.subr.bf16.mxu0 %v847_v1  ;;  %759 = vmatprep.subr.bf16.mxu1 %v847_v1 }
  0x1c   : > { %440 = vmatpush1.bf16.msra.mxu0 %v806_v9  ;;  %769 = vmatpush1.bf16.msra.mxu1 %v806_v9 }
  0x1d   : > { %441 = vmatprep.subr.bf16.mxu0 %v847_v1  ;;  %760 = vmatprep.subr.bf16.mxu1 %v847_v1 }
  0x20   : > { %442 = vmatpush1.bf16.msra.mxu0 %v807_v10  ;;  %770 = vmatpush1.bf16.msra.mxu1 %v807_v10 }
  0x21   : > { %443 = vmatprep.subr.bf16.mxu0 %v847_v1  ;;  %761 = vmatprep.subr.bf16.mxu1 %v847_v1 }
  0x24   : > { %444 = vmatpush1.bf16.msra.mxu0 %v808_v11  ;;  %771 = vmatpush1.bf16.msra.mxu1 %v808_v11 }
  0x25   : > { %445 = vmatprep.subr.bf16.mxu0 %v847_v1  ;;  %762 = vmatprep.subr.bf16.mxu1 %v847_v1 }
  0x28   : > { %446 = vmatpush1.bf16.msra.mxu0 %v809_v14  ;;  %772 = vmatpush1.bf16.msra.mxu1 %v809_v14 }
  0x29   : > { %447 = vmatprep.subr.bf16.mxu0 %v847_v1  ;;  %763 = vmatprep.subr.bf16.mxu1 %v847_v1 }
  0x2c   : > { %448 = vmatpush1.bf16.msra.mxu0 %v427_v17  ;;  %773 = vmatpush1.bf16.msra.mxu1 %v427_v17 }
  0x2f   : > { %462 = vmatmul.mubr.bf16.vlgmr.msra.gmra.mrb[0].mxu0 %v811_v18  ;;  %478 = vmatmul.mubr.bf16.vlgmr.msra.gmra.mrb[0].mxu1 %v814_v19 }
  0x30   : > { %731 = vmatprep.mubr.msk.bf16.mxu0 %vm409_vm1, %v817_v20  ;;  %733 = vmatprep.mubr.msk.bf16.mxu1 %vm409_vm1, %v819_v21 }
  0x37   : > { %470 = vmatmul.mubr.bf16.gmra.mrb[4].mxu0 %v821_v22  ;;  %486 = vmatmul.mubr.bf16.gmra.mrb[4].mxu1 %v822_v23 }
 0x102   : > { %v463_v26 = vpop.f32.mrb[0].mxu0  ;;  %v479_v27 = vpop.f32.mrb[0].mxu1 }
 0x103   : > { %v494_v30 = vadd.f32 %v463_v26, %v281_v24  ;;  %v498_v31 = vadd.f32 %v479_v27, %v285_v25  ;;  %v465_v32 = vpop.f32.mrb[1].mxu0  ;;  %v481_v33 = vpop.f32.mrb[1].mxu1 }
 0x104   : > { %v466_v34 = vpop.f32.mrb[2].mxu0  ;;  %v482_v35 = vpop.f32.mrb[2].mxu1 }
 0x105   : > { %503 = vst.msk [vmem:[#allocation2] sm:$0xff] %vm272_vm0, %v494_v30  ;;  %507 = vst.msk [vmem:[#allocation2 + $0x20] sm:$0xff] %vm272_vm0, %v498_v31  ;;  %v495_v36 = vadd.f32 %v466_v34, %v282_v28  ;;  %v499_v37 = vadd.f32 %v482_v35, %v286_v29  ;;  %v468_v38 = vpop.f32.mrb[3].mxu0  ;;  %v484_v39 = vpop.f32.mrb[3].mxu1 }
 0x107   : > { %504 = vst.msk [vmem:[#allocation2 + $0x8] sm:$0xff] %vm272_vm0, %v495_v36  ;;  %508 = vst.msk [vmem:[#allocation2 + $0x28] sm:$0xff] %vm272_vm0, %v499_v37 }
 0x10a   : > { %v471_v43 = vpop.f32.mrb[4].mxu0  ;;  %v487_v44 = vpop.f32.mrb[4].mxu1 }
 0x10b   : > { %v496_v47 = vadd.f32 %v471_v43, %v283_v40  ;;  %v500_v48 = vadd.f32 %v487_v44, %v287_v41  ;;  %v473_v49 = vpop.f32.mrb[5].mxu0  ;;  %v489_v50 = vpop.f32.mrb[5].mxu1 }
 0x10c   : > { %v514_v51 = vld [vmem:[#allocation2] sm:$0xff]  ;;  %v474_v53 = vpop.f32.mrb[6].mxu0  ;;  %v490_v54 = vpop.f32.mrb[6].mxu1 }
 0x10d   : > { %v518_v52 = vld [vmem:[#allocation2 + $0x20] sm:$0xff]  ;;  %v529_v55 = vadd.f32 %v734_v42, %v514_v51  ;;  %505 = vst.msk [vmem:[#allocation2 + $0x10] sm:$0xff] %vm272_vm0, %v496_v47  ;;  %509 = vst.msk [vmem:[#allocation2 + $0x30] sm:$0xff] %vm272_vm0, %v500_v48  ;;  %v497_v57 = vadd.f32 %v474_v53, %v284_v45  ;;  %v501_v58 = vadd.f32 %v490_v54, %v288_v46  ;;  %v476_v59 = vpop.f32.mrb[7].mxu0  ;;  %v492_v60 = vpop.f32.mrb[7].mxu1 }
 0x10e   : > { %v533_v56 = vadd.f32 %v734_v42, %v518_v52  ;;  %v515_v61 = vld [vmem:[#allocation2 + $0x8] sm:$0xff] }
 0x10f   : > { %v519_v62 = vld [vmem:[#allocation2 + $0x28] sm:$0xff]  ;;  %v537_v63 = vmax.f32 %v529_v55, 0.0  ;;  %v530_v1 = vadd.f32 %v734_v42, %v515_v61  ;;  %506 = vst.msk [vmem:[#allocation2 + $0x18] sm:$0xff] %vm272_vm0, %v497_v57  ;;  %510 = vst.msk [vmem:[#allocation2 + $0x38] sm:$0xff] %vm272_vm0, %v501_v58 }
 0x110   : > { %v541_v0 = vmax.f32 %v533_v56, 0.0  ;;  %v534_v2 = vadd.f32 %v734_v42, %v519_v62 }
 0x111   : > { %v746_v3 = vpack.c.bf16 %v537_v63, %v537_v63  ;;  %v538_v5 = vmax.f32 %v530_v1, 0.0 }
 0x112   : > { %v750_v4 = vpack.c.bf16 %v541_v0, %v541_v0  ;;  %v542_v6 = vmax.f32 %v534_v2, 0.0 }
 0x113   : > { %578 = vst.msk [vmem:[%s981_s22] sm:$0xf] %vm577_vm4, %v746_v3  ;;  %v747_v7 = vpack.c.bf16 %v538_v5, %v538_v5 }
 0x114   : > { %582 = vst.msk [vmem:[%s981_s22 + $0x10] sm:$0xf] %vm577_vm4, %v750_v4  ;;  %v751_v8 = vpack.c.bf16 %v542_v6, %v542_v6  ;;  %v516_v9 = vld [vmem:[#allocation2 + $0x10] sm:$0xff] }
 0x115   : > { %v520_v10 = vld [vmem:[#allocation2 + $0x30] sm:$0xff]  ;;  %579 = vst.msk [vmem:[%s981_s22 + $0x4] sm:$0xf] %vm577_vm4, %v747_v7  ;;  %v531_v11 = vadd.f32 %v734_v42, %v516_v9 }
 0x116   : > { %583 = vst.msk [vmem:[%s981_s22 + $0x14] sm:$0xf] %vm577_vm4, %v751_v8  ;;  %v535_v12 = vadd.f32 %v734_v42, %v520_v10  ;;  %v517_v13 = vld [vmem:[#allocation2 + $0x18] sm:$0xff] }
 0x117   : > { %v521_v14 = vld [vmem:[#allocation2 + $0x38] sm:$0xff]  ;;  %v539_v15 = vmax.f32 %v531_v11, 0.0  ;;  %v532_v17 = vadd.f32 %v734_v42, %v517_v13 }
 0x118   : > { %v543_v16 = vmax.f32 %v535_v12, 0.0  ;;  %v536_v18 = vadd.f32 %v734_v42, %v521_v14 }
 0x119   : > { %v748_v19 = vpack.c.bf16 %v539_v15, %v539_v15  ;;  %v540_v21 = vmax.f32 %v532_v17, 0.0 }
 0x11a   : > { %v752_v20 = vpack.c.bf16 %v543_v16, %v543_v16  ;;  %v544_v22 = vmax.f32 %v536_v18, 0.0 }
 0x11b   : > { %580 = vst.msk [vmem:[%s981_s22 + $0x8] sm:$0xf] %vm577_vm4, %v748_v19  ;;  %v749_v23 = vpack.c.bf16 %v540_v21, %v540_v21 }
 0x11c   : > { %584 = vst.msk [vmem:[%s981_s22 + $0x18] sm:$0xf] %vm577_vm4, %v752_v20  ;;  %v753_v24 = vpack.c.bf16 %v544_v22, %v544_v22 }
 0x11d   : > { %581 = vst.msk [vmem:[%s981_s22 + $0xc] sm:$0xf] %vm577_vm4, %v749_v23 }
 0x11e   : > { %585 = vst.msk [vmem:[%s981_s22 + $0x1c] sm:$0xf] %vm577_vm4, %v753_v24 }
 0x11f PF: > { %s13_s14 = sadd.s32 1, %s845_s14   ;;  %s1012_s12 = smov %s841_s13 }
 0x120   : > { %p10_p5 = scmp.ge.s32.totalorder %s13_s14, 4   ;;  %s1013_s13 = smov %s1015_s15 }
 0x122   :  { %12 = sbr.rel (!%p10_p5) target bundleno = 2 (0x2), region = 76 }

// kernel: custom_model_forward.23
= control target key start
LH: loop header
LB: loop body
LE: loop exit
PB: predicated region body
PF: predicated region fallthrough
CT: control target
= control target key end

     0   :  { %s1105_s12 = smov 0   ;;  %s1107_s13 = smov 0   ;;  %s1268_s0 = inlined_call_operand.vmem [shape: bf16[32,576], index: 0, kind: input, shape index: {}]   ;;  %s1269_s1 = inlined_call_operand.vmem [shape: bf16[576,64], index: 1, kind: input, shape index: {}]   ;;  %s1270_s2 = inlined_call_operand.vmem [shape: f32[1,64], index: 2, kind: input, shape index: {}]   ;;  %s1271_s3 = inlined_call_operand.vmem [shape: bf16[32,64], index: 3, kind: output, shape index: {}]  }
   0x1   :  { %s1109_s14 = smov 0  }
   0x2 LB: > { %s32_s15 = sadd.s32 1, %s1077_s13  ;;  %p874_p0 = scmp.ge.s32.totalorder %s1081_s14, 1  ;;  %s1081_s14 = sphi %s1109_s14, %s13_s14   ;;  %s1077_s13 = sphi %s1107_s13, %s1273_s13   ;;  %s1073_s12 = sphi %s1105_s12, %s1272_s12  }
   0x3   : > { %p34_p1 = scmp.ge.s32.totalorder %s32_s15, 2  ;;  %p191_p2 = scmp.lt.s32.totalorder %s1081_s14, 3 }
   0x5   : > { %s1275_s15 = smov (%p34_p1, %s32_s15), 0  ;;  %p192_p3 = pnand %p874_p0, %p191_p2 }
   0x6   : > { %v1016_v0 = vld [vmem:[%s1269_s1 + $0x40] sm:$0xff] (!%p192_p3)   ;;  %v1020_v4 = vld [vmem:[%s1269_s1 + $0x48] sm:$0xff] (!%p192_p3)   ;;  %vm272_vm0 = vcmask (!%p192_p3), 523264   ;;  %v1024_v8 = vld [vmem:[%s1269_s1 + $0x50] sm:$0xff] (!%p192_p3)   ;;  %v1083_v9 = vmov (!%p192_p3), 0.0   ;;  %s875_s23 = sshll.u32 (!%p192_p3), %s1073_s12, 1 }
   0x7   : > { %195 = sbr.rel (%p192_p3) target bundleno = 289 (0x121), region = 32  ;;  %v1017_v1 = vld [vmem:[%s1269_s1 + $0xc0] sm:$0xff] (!%p192_p3)   ;;  %928 = vmatprep.subr.bf16.mxu0 (!%p192_p3), %v1016_v0  ;;  %v1021_v5 = vld [vmem:[%s1269_s1 + $0xc8] sm:$0xff] (!%p192_p3)   ;;  %273 = vst.msk [vmem:[#allocation2] sm:$0xff] (!%p192_p3), %vm272_vm0, %v1083_v9  ;;  %274 = vst.msk [vmem:[#allocation2 + $0x8] sm:$0xff] (!%p192_p3), %vm272_vm0, %v1083_v9  ;;  %p236_p4 = scmp.lt.s32.totalorder (!%p192_p3), %s875_s23, 3 }
   0x8   : > { %v1018_v2 = vld [vmem:[%s1269_s1] sm:$0xff] (!%p192_p3)   ;;  %950 = vmatprep.subr.bf16.mxu1 (!%p192_p3), %v1017_v1  ;;  %v1022_v6 = vld [vmem:[%s1269_s1 + $0x8] sm:$0xff] (!%p192_p3)   ;;  %v1025_v10 = vld [vmem:[%s1269_s1 + $0xd0] sm:$0xff] (!%p192_p3)   ;;  %vm1084_vm1 = vmmov (!%p192_p3), 0   ;;  %vm751_vm2 = vcmask (!%p192_p3), 519168  }
   0x9   : > { %v1019_v3 = vld [vmem:[%s1269_s1 + $0x80] sm:$0xff] (!%p192_p3)   ;;  %929 = vmatpush3.bf16.msra.mxu0 (!%p192_p3), %v1018_v2  ;;  %v1023_v7 = vld [vmem:[%s1269_s1 + $0x88] sm:$0xff] (!%p192_p3)   ;;  %v1026_v11 = vld [vmem:[%s1269_s1 + $0x10] sm:$0xff] (!%p192_p3)  }
   0xa   : > { %951 = vmatpush3.bf16.msra.mxu1 (!%p192_p3), %v1019_v3  ;;  %930 = vmatprep.subr.bf16.mxu0 (!%p192_p3), %v1020_v4  ;;  %v1027_v12 = vld [vmem:[%s1269_s1 + $0x90] sm:$0xff] (!%p192_p3)   ;;  %v1028_v13 = vld [vmem:[%s1269_s1 + $0x58] sm:$0xff] (!%p192_p3)   ;;  %v1032_v17 = vld [vmem:[%s1269_s1 + $0x60] sm:$0xff] (!%p192_p3)  }
   0xb   : > { %952 = vmatprep.subr.bf16.mxu1 (!%p192_p3), %v1021_v5  ;;  %v1029_v14 = vld [vmem:[%s1269_s1 + $0xd8] sm:$0xff] (!%p192_p3)   ;;  %v1033_v18 = vld [vmem:[%s1269_s1 + $0xe0] sm:$0xff] (!%p192_p3)   ;;  %v1036_v21 = vld [vmem:[%s1269_s1 + $0x68] sm:$0xff] (!%p192_p3)  }
   0xc   : > { %v1030_v15 = vld [vmem:[%s1269_s1 + $0x18] sm:$0xff] (!%p192_p3)   ;;  %v1034_v19 = vld [vmem:[%s1269_s1 + $0x20] sm:$0xff] (!%p192_p3)   ;;  %v1037_v22 = vld [vmem:[%s1269_s1 + $0xe8] sm:$0xff] (!%p192_p3)  }
   0xd   : > { %931 = vmatpush3.bf16.msra.mxu0 (!%p192_p3), %v1022_v6  ;;  %v1031_v16 = vld [vmem:[%s1269_s1 + $0x98] sm:$0xff] (!%p192_p3)   ;;  %v1035_v20 = vld [vmem:[%s1269_s1 + $0xa0] sm:$0xff] (!%p192_p3)   ;;  %v1038_v23 = vld [vmem:[%s1269_s1 + $0x28] sm:$0xff] (!%p192_p3)  }
   0xe   : > { %953 = vmatpush3.bf16.msra.mxu1 %v1023_v7  ;;  %932 = vmatprep.subr.bf16.mxu0 %v1024_v8  ;;  %s1277_s23 = smov (!%p236_p4, %s875_s23), 3  ;;  %v1039_v24 = vld [vmem:[%s1269_s1 + $0xa8] sm:$0xff]   ;;  %v1040_v25 = vld [vmem:[%s1269_s1 + $0x70] sm:$0xff]   ;;  %v1044_v29 = vld [vmem:[%s1269_s1 + $0x78] sm:$0xff]  }
   0xf   : > { %954 = vmatprep.subr.bf16.mxu1 %v1025_v10  ;;  %v1041_v26 = vld [vmem:[%s1269_s1 + $0xf0] sm:$0xff]   ;;  %s989_s22 = smul.u32 20, %s1277_s23  ;;  %v1045_v30 = vld [vmem:[%s1269_s1 + $0xf8] sm:$0xff]   ;;  %v1054_v37 = vld [vmem:[%s1269_s1 + $0x100] sm:$0xff]   ;;  %s878_s26 = sshll.u32 %s1277_s23, 2 }
  0x10   : > { %v1042_v27 = vld [vmem:[%s1269_s1 + $0x30] sm:$0xff]   ;;  %v1046_v31 = vld [vmem:[%s1269_s1 + $0x38] sm:$0xff]   ;;  %v1055_v38 = vld [vmem:[%s1269_s1 + $0x108] sm:$0xff]   ;;  %s265_s29 = scalar_lea.vmem %s1271_s3, %s878_s26 }
  0x11   : > { %933 = vmatpush3.bf16.msra.mxu0 %v1026_v11  ;;  %v1043_v28 = vld [vmem:[%s1269_s1 + $0xb0] sm:$0xff]   ;;  %s243_s6 = scalar_lea.vmem %s1268_s0, %s989_s22  ;;  %v1047_v32 = vld [vmem:[%s1269_s1 + $0xb8] sm:$0xff]   ;;  %v275_v56 = vld [vmem:[#allocation2] sm:$0xff] }
  0x12   : > { %955 = vmatpush3.bf16.msra.mxu1 %v1027_v12  ;;  %934 = vmatprep.subr.bf16.mxu0 %v1028_v13  ;;  %v1048_v33 = vld [vmem:[%s243_s6] ss:$20 sps:$4 sm:$0xff]   ;;  %v1050_v34 = vld [vmem:[%s243_s6 + $0x4] ss:$20 sps:$4 sm:$0xff]   ;;  %v1051_v35 = vld [vmem:[%s243_s6 + $0x8] ss:$20 sps:$4 sm:$0xff]  }
  0x13   : > { %956 = vmatprep.subr.bf16.mxu1 %v1029_v14  ;;  %v1053_v36 = vld [vmem:[%s243_s6 + $0xc] ss:$20 sps:$4 sm:$0xff]   ;;  %632 = vmatprep.mubr.bf16.mxu0 %v1050_v34  ;;  %v1056_v39 = vld [vmem:[%s1269_s1 + $0x110] sm:$0xff]   ;;  %v1057_v40 = vld [vmem:[%s1269_s1 + $0x118] sm:$0xff]  }
  0x14   : > { %673 = vmatprep.mubr.bf16.mxu1 %v1053_v36  ;;  %v1058_v41 = vld [vmem:[%s243_s6 + $0x10] ss:$20 sps:$4 sm:$0xff]   ;;  %v276_v60 = vld [vmem:[#allocation2 + $0x8] sm:$0xff]  ;;  %v921_v2 = vld [vmem:[%s1270_s2] ss:$0 sm:$0xff] }
  0x15   : > { %935 = vmatpush3.bf16.msra.mxu0 %v1030_v15 }
  0x16   : > { %957 = vmatpush3.bf16.msra.mxu1 %v1031_v16  ;;  %936 = vmatprep.subr.bf16.mxu0 %v1032_v17 }
  0x17   : > { %958 = vmatprep.subr.bf16.mxu1 %v1033_v18 }
  0x19   : > { %937 = vmatpush3.bf16.msra.mxu0 %v1034_v19 }
  0x1a   : > { %959 = vmatpush3.bf16.msra.mxu1 %v1035_v20  ;;  %938 = vmatprep.subr.bf16.mxu0 %v1036_v21 }
  0x1b   : > { %960 = vmatprep.subr.bf16.mxu1 %v1037_v22 }
  0x1d   : > { %939 = vmatpush3.bf16.msra.mxu0 %v1038_v23 }
  0x1e   : > { %961 = vmatpush3.bf16.msra.mxu1 %v1039_v24  ;;  %940 = vmatprep.subr.bf16.mxu0 %v1040_v25 }
  0x1f   : > { %962 = vmatprep.subr.bf16.mxu1 %v1041_v26 }
  0x21   : > { %941 = vmatpush3.bf16.msra.mxu0 %v1042_v27 }
  0x22   : > { %963 = vmatpush3.bf16.msra.mxu1 %v1043_v28  ;;  %942 = vmatprep.subr.bf16.mxu0 %v1044_v29 }
  0x23   : > { %964 = vmatprep.subr.bf16.mxu1 %v1045_v30 }
  0x25   : > { %943 = vmatpush3.bf16.msra.mxu0 %v1046_v31 }
  0x26   : > { %965 = vmatpush3.bf16.msra.mxu1 %v1047_v32  ;;  %977 = vmatprep.subr.bf16.mxu0 %v1083_v9 }
  0x28   : > { %633 = vmatmul.mubr.bf16.vlgmr.msra.gmra.mrb[0].mxu0 %v1048_v33 }
  0x29   : > { %674 = vmatmul.mubr.bf16.vlgmr.msra.gmra.mrb[0].mxu1 %v1051_v35  ;;  %978 = vmatpush3.bf16.msra.mxu0 %v1054_v37 }
  0x2a   : > { %979 = vmatprep.subr.bf16.mxu0 %v1083_v9  ;;  %985 = vmatprep.mubr.msk.bf16.mxu0 %vm1084_vm1, %v1083_v9 }
  0x2d   : > { %980 = vmatpush3.bf16.msra.mxu0 %v1055_v38 }
  0x2e   : > { %981 = vmatprep.subr.bf16.mxu0 %v1083_v9 }
  0x31   : > { %982 = vmatpush3.bf16.msra.mxu0 %v1056_v39 }
  0x32   : > { %983 = vmatprep.subr.bf16.mxu0 %v1083_v9 }
  0x35   : > { %984 = vmatpush3.bf16.msra.mxu0 %v1057_v40 }
  0x38   : > { %986 = vmatmul.mubr.msk.bf16.vlgmr.msra.gmra.mrb[4].mxu0 %vm272_vm0, %v1058_v41 }
  0xfb   : > { %v944_v42 = vpop.f32.mrb[0].mxu0 }
  0xfc   : > { %v966_v43 = vpop.f32.mrb[0].mxu1  ;;  %v945_v44 = vpop.f32.mrb[1].mxu0 }
  0xfd   : > { %v946_v45 = vadd.f32 %v945_v44, %v944_v42  ;;  %v967_v46 = vpop.f32.mrb[1].mxu1  ;;  %v947_v47 = vpop.f32.mrb[2].mxu0 }
  0xfe   : > { %v968_v48 = vadd.f32 %v967_v46, %v966_v43  ;;  %v969_v49 = vpop.f32.mrb[2].mxu1  ;;  %v948_v50 = vpop.f32.mrb[3].mxu0 }
  0xff   : > { %v949_v51 = vadd.f32 %v948_v50, %v947_v47  ;;  %v970_v52 = vpop.f32.mrb[3].mxu1 }
 0x100   : > { %v971_v53 = vadd.f32 %v970_v52, %v969_v49  ;;  %v676_v54 = vadd.f32 %v968_v48, %v946_v45 }
 0x102   : > { %v679_v55 = vadd.f32 %v971_v53, %v949_v51 }
 0x10b   : > { %v716_v57 = vpop.f32.mrb[4].mxu0 }
 0x10c   : > { %v717_v58 = vadd.f32 %v716_v57, %v676_v54  ;;  %v987_v59 = vpop.f32.mrb[5].mxu0 }
 0x10d   : > { %v719_v61 = vpop.f32.mrb[6].mxu0 }
 0x10e   : > { %v723_v62 = vadd.f32 %v717_v58, %v275_v56  ;;  %v720_v63 = vadd.f32 %v719_v61, %v679_v55  ;;  %v988_v0 = vpop.f32.mrb[7].mxu0 }
 0x110   : > { %725 = vst.msk [vmem:[#allocation2] sm:$0xff] %vm272_vm0, %v723_v62  ;;  %v724_v1 = vadd.f32 %v720_v63, %v276_v60 }
 0x112   : > { %726 = vst.msk [vmem:[#allocation2 + $0x8] sm:$0xff] %vm272_vm0, %v724_v1 }
 0x117   : > { %v730_v3 = vld [vmem:[#allocation2] sm:$0xff] }
 0x118   : > { %v739_v4 = vadd.f32 %v921_v2, %v730_v3 }
 0x119   : > { %v731_v5 = vld [vmem:[#allocation2 + $0x8] sm:$0xff] }
 0x11a   : > { %v741_v6 = vmax.f32 %v739_v4, 0.0  ;;  %v740_v7 = vadd.f32 %v921_v2, %v731_v5 }
 0x11c   : > { %v926_v8 = vpack.c.bf16 %v741_v6, %v741_v6  ;;  %v742_v9 = vmax.f32 %v740_v7, 0.0 }
 0x11e   : > { %752 = vst.msk [vmem:[%s265_s29] sm:$0xf] %vm751_vm2, %v926_v8  ;;  %v927_v10 = vpack.c.bf16 %v742_v9, %v742_v9 }
 0x120   : > { %753 = vst.msk [vmem:[%s265_s29 + $0x4] sm:$0xf] %vm751_vm2, %v927_v10 }
 0x121 PF: > { %s13_s14 = sadd.s32 1, %s1081_s14   ;;  %s1272_s12 = smov %s1077_s13 }
 0x122   : > { %p10_p5 = scmp.ge.s32.totalorder %s13_s14, 4   ;;  %s1273_s13 = smov %s1275_s15 }
 0x124   :  { %12 = sbr.rel (!%p10_p5) target bundleno = 2 (0x2), region = 76 }

// kernel: custom_model_forward.24
= control target key start
LH: loop header
LB: loop body
LE: loop exit
PB: predicated region body
PF: predicated region fallthrough
CT: control target
= control target key end

     0   :  { %s1197_s15 = smov 0   ;;  %s1199_s16 = smov 0   ;;  %s1363_s0 = inlined_call_operand.vmem [shape: bf16[32,576], index: 0, kind: input, shape index: {}]   ;;  %s1364_s1 = inlined_call_operand.vmem [shape: bf16[576,64], index: 1, kind: input, shape index: {}]   ;;  %s1365_s2 = inlined_call_operand.vmem [shape: f32[1,64], index: 2, kind: input, shape index: {}]   ;;  %s1366_s3 = inlined_call_operand.vmem [shape: bf16[32,64], index: 3, kind: input, shape index: {}]   ;;  %s1367_s4 = inlined_call_operand.vmem [shape: bf16[32,64], index: 4, kind: output, shape index: {}]  }
   0x1   :  { %s1201_s17 = smov 0  }
   0x2 LB: > { %s33_s18 = sadd.s32 1, %s1164_s16  ;;  %p955_p0 = scmp.ge.s32.totalorder %s1168_s17, 1  ;;  %s1168_s17 = sphi %s1201_s17, %s14_s17   ;;  %s1164_s16 = sphi %s1199_s16, %s1369_s16   ;;  %s1160_s15 = sphi %s1197_s15, %s1368_s15  }
   0x3   : > { %p35_p1 = scmp.ge.s32.totalorder %s33_s18, 2  ;;  %p232_p2 = scmp.lt.s32.totalorder %s1168_s17, 3 }
   0x5   : > { %s1371_s18 = smov (%p35_p1, %s33_s18), 0  ;;  %p233_p3 = pnand %p955_p0, %p232_p2 }
   0x6   : > { %v1103_v0 = vld [vmem:[%s1364_s1 + $0x40] sm:$0xff] (!%p233_p3)   ;;  %v1107_v4 = vld [vmem:[%s1364_s1 + $0x48] sm:$0xff] (!%p233_p3)   ;;  %vm332_vm0 = vcmask (!%p233_p3), 523264   ;;  %v1111_v8 = vld [vmem:[%s1364_s1 + $0x50] sm:$0xff] (!%p233_p3)   ;;  %v1170_v9 = vmov (!%p233_p3), 0.0   ;;  %s956_s27 = sshll.u32 (!%p233_p3), %s1160_s15, 1 }
   0x7   : > { %236 = sbr.rel (%p233_p3) target bundleno = 291 (0x123), region = 36  ;;  %v1104_v1 = vld [vmem:[%s1364_s1 + $0xc0] sm:$0xff] (!%p233_p3)   ;;  %1015 = vmatprep.subr.bf16.mxu0 (!%p233_p3), %v1103_v0  ;;  %v1108_v5 = vld [vmem:[%s1364_s1 + $0xc8] sm:$0xff] (!%p233_p3)   ;;  %333 = vst.msk [vmem:[#allocation2] sm:$0xff] (!%p233_p3), %vm332_vm0, %v1170_v9  ;;  %334 = vst.msk [vmem:[#allocation2 + $0x8] sm:$0xff] (!%p233_p3), %vm332_vm0, %v1170_v9  ;;  %p287_p4 = scmp.lt.s32.totalorder (!%p233_p3), %s956_s27, 3 }
   0x8   : > { %v1105_v2 = vld [vmem:[%s1364_s1] sm:$0xff] (!%p233_p3)   ;;  %1037 = vmatprep.subr.bf16.mxu1 (!%p233_p3), %v1104_v1  ;;  %v1109_v6 = vld [vmem:[%s1364_s1 + $0x8] sm:$0xff] (!%p233_p3)   ;;  %v1112_v10 = vld [vmem:[%s1364_s1 + $0xd0] sm:$0xff] (!%p233_p3)   ;;  %vm1171_vm1 = vmmov (!%p233_p3), 0   ;;  %vm817_vm2 = vcmask (!%p233_p3), 519168  }
   0x9   : > { %v1106_v3 = vld [vmem:[%s1364_s1 + $0x80] sm:$0xff] (!%p233_p3)   ;;  %1016 = vmatpush3.bf16.msra.mxu0 (!%p233_p3), %v1105_v2  ;;  %v1110_v7 = vld [vmem:[%s1364_s1 + $0x88] sm:$0xff] (!%p233_p3)   ;;  %v1113_v11 = vld [vmem:[%s1364_s1 + $0x10] sm:$0xff] (!%p233_p3)  }
   0xa   : > { %1038 = vmatpush3.bf16.msra.mxu1 (!%p233_p3), %v1106_v3  ;;  %1017 = vmatprep.subr.bf16.mxu0 (!%p233_p3), %v1107_v4  ;;  %v1114_v12 = vld [vmem:[%s1364_s1 + $0x90] sm:$0xff] (!%p233_p3)   ;;  %v1115_v13 = vld [vmem:[%s1364_s1 + $0x58] sm:$0xff] (!%p233_p3)   ;;  %v1119_v17 = vld [vmem:[%s1364_s1 + $0x60] sm:$0xff] (!%p233_p3)  }
   0xb   : > { %1039 = vmatprep.subr.bf16.mxu1 (!%p233_p3), %v1108_v5  ;;  %v1116_v14 = vld [vmem:[%s1364_s1 + $0xd8] sm:$0xff] (!%p233_p3)   ;;  %v1120_v18 = vld [vmem:[%s1364_s1 + $0xe0] sm:$0xff] (!%p233_p3)   ;;  %v1123_v21 = vld [vmem:[%s1364_s1 + $0x68] sm:$0xff] (!%p233_p3)  }
   0xc   : > { %v1117_v15 = vld [vmem:[%s1364_s1 + $0x18] sm:$0xff] (!%p233_p3)   ;;  %v1121_v19 = vld [vmem:[%s1364_s1 + $0x20] sm:$0xff] (!%p233_p3)   ;;  %v1124_v22 = vld [vmem:[%s1364_s1 + $0xe8] sm:$0xff] (!%p233_p3)  }
   0xd   : > { %1018 = vmatpush3.bf16.msra.mxu0 (!%p233_p3), %v1109_v6  ;;  %v1118_v16 = vld [vmem:[%s1364_s1 + $0x98] sm:$0xff] (!%p233_p3)   ;;  %v1122_v20 = vld [vmem:[%s1364_s1 + $0xa0] sm:$0xff] (!%p233_p3)   ;;  %v1125_v23 = vld [vmem:[%s1364_s1 + $0x28] sm:$0xff] (!%p233_p3)  }
   0xe   : > { %1040 = vmatpush3.bf16.msra.mxu1 %v1110_v7  ;;  %1019 = vmatprep.subr.bf16.mxu0 %v1111_v8  ;;  %s1373_s27 = smov (!%p287_p4, %s956_s27), 3  ;;  %v1126_v24 = vld [vmem:[%s1364_s1 + $0xa8] sm:$0xff]   ;;  %v1127_v25 = vld [vmem:[%s1364_s1 + $0x70] sm:$0xff]   ;;  %v1131_v29 = vld [vmem:[%s1364_s1 + $0x78] sm:$0xff]  }
   0xf   : > { %1041 = vmatprep.subr.bf16.mxu1 %v1112_v10  ;;  %v1128_v26 = vld [vmem:[%s1364_s1 + $0xf0] sm:$0xff]   ;;  %s1076_s28 = smul.u32 20, %s1373_s27  ;;  %v1132_v30 = vld [vmem:[%s1364_s1 + $0xf8] sm:$0xff]   ;;  %v1141_v37 = vld [vmem:[%s1364_s1 + $0x100] sm:$0xff]   ;;  %s959_s30 = sshll.u32 %s1373_s27, 2 }
  0x10   : > { %v1129_v27 = vld [vmem:[%s1364_s1 + $0x30] sm:$0xff]   ;;  %v1133_v31 = vld [vmem:[%s1364_s1 + $0x38] sm:$0xff]   ;;  %v1142_v38 = vld [vmem:[%s1364_s1 + $0x108] sm:$0xff]   ;;  %s316_s7 = scalar_lea.vmem %s1366_s3, %s959_s30  ;;  %s325_s10 = scalar_lea.vmem %s1367_s4, %s959_s30 }
  0x11   : > { %1020 = vmatpush3.bf16.msra.mxu0 %v1113_v11  ;;  %v1130_v28 = vld [vmem:[%s1364_s1 + $0xb0] sm:$0xff]   ;;  %s294_s12 = scalar_lea.vmem %s1363_s0, %s1076_s28  ;;  %v1134_v32 = vld [vmem:[%s1364_s1 + $0xb8] sm:$0xff]   ;;  %v335_v56 = vld [vmem:[#allocation2] sm:$0xff] }
  0x12   : > { %1042 = vmatpush3.bf16.msra.mxu1 %v1114_v12  ;;  %1021 = vmatprep.subr.bf16.mxu0 %v1115_v13  ;;  %v1135_v33 = vld [vmem:[%s294_s12] ss:$20 sps:$4 sm:$0xff]   ;;  %v1137_v34 = vld [vmem:[%s294_s12 + $0x4] ss:$20 sps:$4 sm:$0xff]   ;;  %v1138_v35 = vld [vmem:[%s294_s12 + $0x8] ss:$20 sps:$4 sm:$0xff]  }
  0x13   : > { %1043 = vmatprep.subr.bf16.mxu1 %v1116_v14  ;;  %v1140_v36 = vld [vmem:[%s294_s12 + $0xc] ss:$20 sps:$4 sm:$0xff]   ;;  %692 = vmatprep.mubr.bf16.mxu0 %v1137_v34  ;;  %v1143_v39 = vld [vmem:[%s1364_s1 + $0x110] sm:$0xff]   ;;  %v1144_v40 = vld [vmem:[%s1364_s1 + $0x118] sm:$0xff]  }
  0x14   : > { %733 = vmatprep.mubr.bf16.mxu1 %v1140_v36  ;;  %v1145_v41 = vld [vmem:[%s294_s12 + $0x10] ss:$20 sps:$4 sm:$0xff]   ;;  %v336_v60 = vld [vmem:[#allocation2 + $0x8] sm:$0xff]  ;;  %v1004_v3 = vld [vmem:[%s1365_s2] ss:$0 sm:$0xff] }
  0x15   : > { %1022 = vmatpush3.bf16.msra.mxu0 %v1117_v15  ;;  %v1012_v2 = vld [vmem:[%s316_s7] sm:$0xff]  }
  0x16   : > { %1044 = vmatpush3.bf16.msra.mxu1 %v1118_v16  ;;  %1023 = vmatprep.subr.bf16.mxu0 %v1119_v17  ;;  %v1013_v4 = vunpack.c.l.bf16 %v1012_v2  ;;  %v1014_v6 = vunpack.c.h.bf16 %v1012_v2 }
  0x17   : > { %1045 = vmatprep.subr.bf16.mxu1 %v1120_v18 }
  0x19   : > { %1024 = vmatpush3.bf16.msra.mxu0 %v1121_v19 }
  0x1a   : > { %1046 = vmatpush3.bf16.msra.mxu1 %v1122_v20  ;;  %1025 = vmatprep.subr.bf16.mxu0 %v1123_v21 }
  0x1b   : > { %1047 = vmatprep.subr.bf16.mxu1 %v1124_v22 }
  0x1d   : > { %1026 = vmatpush3.bf16.msra.mxu0 %v1125_v23 }
  0x1e   : > { %1048 = vmatpush3.bf16.msra.mxu1 %v1126_v24  ;;  %1027 = vmatprep.subr.bf16.mxu0 %v1127_v25 }
  0x1f   : > { %1049 = vmatprep.subr.bf16.mxu1 %v1128_v26 }
  0x21   : > { %1028 = vmatpush3.bf16.msra.mxu0 %v1129_v27 }
  0x22   : > { %1050 = vmatpush3.bf16.msra.mxu1 %v1130_v28  ;;  %1029 = vmatprep.subr.bf16.mxu0 %v1131_v29 }
  0x23   : > { %1051 = vmatprep.subr.bf16.mxu1 %v1132_v30 }
  0x25   : > { %1030 = vmatpush3.bf16.msra.mxu0 %v1133_v31 }
  0x26   : > { %1052 = vmatpush3.bf16.msra.mxu1 %v1134_v32  ;;  %1064 = vmatprep.subr.bf16.mxu0 %v1170_v9 }
  0x28   : > { %693 = vmatmul.mubr.bf16.vlgmr.msra.gmra.mrb[0].mxu0 %v1135_v33 }
  0x29   : > { %734 = vmatmul.mubr.bf16.vlgmr.msra.gmra.mrb[0].mxu1 %v1138_v35  ;;  %1065 = vmatpush3.bf16.msra.mxu0 %v1141_v37 }
  0x2a   : > { %1066 = vmatprep.subr.bf16.mxu0 %v1170_v9  ;;  %1072 = vmatprep.mubr.msk.bf16.mxu0 %vm1171_vm1, %v1170_v9 }
  0x2d   : > { %1067 = vmatpush3.bf16.msra.mxu0 %v1142_v38 }
  0x2e   : > { %1068 = vmatprep.subr.bf16.mxu0 %v1170_v9 }
  0x31   : > { %1069 = vmatpush3.bf16.msra.mxu0 %v1143_v39 }
  0x32   : > { %1070 = vmatprep.subr.bf16.mxu0 %v1170_v9 }
  0x35   : > { %1071 = vmatpush3.bf16.msra.mxu0 %v1144_v40 }
  0x38   : > { %1073 = vmatmul.mubr.msk.bf16.vlgmr.msra.gmra.mrb[4].mxu0 %vm332_vm0, %v1145_v41 }
  0xfb   : > { %v1031_v42 = vpop.f32.mrb[0].mxu0 }
  0xfc   : > { %v1053_v43 = vpop.f32.mrb[0].mxu1  ;;  %v1032_v44 = vpop.f32.mrb[1].mxu0 }
  0xfd   : > { %v1033_v45 = vadd.f32 %v1032_v44, %v1031_v42  ;;  %v1054_v46 = vpop.f32.mrb[1].mxu1  ;;  %v1034_v47 = vpop.f32.mrb[2].mxu0 }
  0xfe   : > { %v1055_v48 = vadd.f32 %v1054_v46, %v1053_v43  ;;  %v1056_v49 = vpop.f32.mrb[2].mxu1  ;;  %v1035_v50 = vpop.f32.mrb[3].mxu0 }
  0xff   : > { %v1036_v51 = vadd.f32 %v1035_v50, %v1034_v47  ;;  %v1057_v52 = vpop.f32.mrb[3].mxu1 }
 0x100   : > { %v1058_v53 = vadd.f32 %v1057_v52, %v1056_v49  ;;  %v736_v54 = vadd.f32 %v1055_v48, %v1033_v45 }
 0x102   : > { %v739_v55 = vadd.f32 %v1058_v53, %v1036_v51 }
 0x10b   : > { %v776_v57 = vpop.f32.mrb[4].mxu0 }
 0x10c   : > { %v777_v58 = vadd.f32 %v776_v57, %v736_v54  ;;  %v1074_v59 = vpop.f32.mrb[5].mxu0 }
 0x10d   : > { %v779_v61 = vpop.f32.mrb[6].mxu0 }
 0x10e   : > { %v783_v62 = vadd.f32 %v777_v58, %v335_v56  ;;  %v780_v63 = vadd.f32 %v779_v61, %v739_v55  ;;  %v1075_v0 = vpop.f32.mrb[7].mxu0 }
 0x110   : > { %785 = vst.msk [vmem:[#allocation2] sm:$0xff] %vm332_vm0, %v783_v62  ;;  %v784_v1 = vadd.f32 %v780_v63, %v336_v60 }
 0x112   : > { %786 = vst.msk [vmem:[#allocation2 + $0x8] sm:$0xff] %vm332_vm0, %v784_v1 }
 0x117   : > { %v790_v5 = vld [vmem:[#allocation2] sm:$0xff] }
 0x118   : > { %v799_v7 = vadd.f32 %v1004_v3, %v790_v5 }
 0x119   : > { %v791_v8 = vld [vmem:[#allocation2 + $0x8] sm:$0xff] }
 0x11a   : > { %v805_v9 = vadd.f32 %v1013_v4, %v799_v7  ;;  %v800_v10 = vadd.f32 %v1004_v3, %v791_v8 }
 0x11c   : > { %v807_v11 = vmax.f32 %v805_v9, 0.0  ;;  %v806_v12 = vadd.f32 %v1014_v6, %v800_v10 }
 0x11e   : > { %v1009_v13 = vpack.c.bf16 %v807_v11, %v807_v11  ;;  %v808_v14 = vmax.f32 %v806_v12, 0.0 }
 0x120   : > { %818 = vst.msk [vmem:[%s325_s10] sm:$0xf] %vm817_vm2, %v1009_v13  ;;  %v1010_v15 = vpack.c.bf16 %v808_v14, %v808_v14 }
 0x122   : > { %819 = vst.msk [vmem:[%s325_s10 + $0x4] sm:$0xf] %vm817_vm2, %v1010_v15 }
 0x123 PF: > { %s14_s17 = sadd.s32 1, %s1168_s17   ;;  %s1368_s15 = smov %s1164_s16 }
 0x124   : > { %p11_p5 = scmp.ge.s32.totalorder %s14_s17, 4   ;;  %s1369_s16 = smov %s1371_s18 }
 0x126   :  { %13 = sbr.rel (!%p11_p5) target bundleno = 2 (0x2), region = 83 }

// kernel: custom_model_forward.26
= control target key start
LH: loop header
LB: loop body
LE: loop exit
PB: predicated region body
PF: predicated region fallthrough
CT: control target
= control target key end

     0   :  { %9 = vsyncpa [#allocation4], 0  ;;  %s1250_s15 = smov 0   ;;  %s1252_s16 = smov 0   ;;  %s1452_s0 = inlined_call_operand.vmem [shape: bf16[32,576], index: 0, kind: input, shape index: {}]   ;;  %s1453_s1 = inlined_call_operand.vmem [shape: bf16[576,64], index: 1, kind: input, shape index: {}]   ;;  %s1454_s2 = inlined_call_operand.hbm [shape: f32[1,64], index: 2, kind: input, shape index: {}]   ;;  %s1455_s3 = inlined_call_operand.vmem [shape: bf16[32,64], index: 3, kind: input, shape index: {}]   ;;  %s1456_s4 = inlined_call_operand.vmem [shape: bf16[32,64], index: 4, kind: output, shape index: {}]  }
   0x1   :  { %s1254_s17 = smov 0  }
   0x2 LB: > { %s957_s18 = sadd.s32 4294967295, %s1220_s17   ;;  %s34_s19 = sadd.s32 1, %s1216_s16  ;;  %s1220_s17 = sphi %s1254_s17, %s15_s17   ;;  %s1216_s16 = sphi %s1252_s16, %s1466_s16   ;;  %s1212_s15 = sphi %s1250_s15, %s1465_s15  }
   0x3   : > { %p36_p0 = scmp.ge.s32.totalorder %s34_s19, 2  ;;  %p959_p1 = scmp.ge.s32.totalorder %s1220_s17, 1 }
   0x4   : > { %p177_p2 = scmp.lt.s32.totalorder %s1220_s17, 3  ;;  %p1275_p4 = scmp.eq.s32.totalorder %s957_s18, 0 }
   0x5   : > { %s1468_s19 = smov (%p36_p0, %s34_s19), 0  ;;  %s1222_s22 = smov [#allocation3]  }
   0x6   : > { %p1271_p3 = pnand %p959_p1, %p177_p2  ;;  %s204_s23 = sshll.u32 %s1222_s22, 4  ;;  %s205_s23 = int_to_ptr.vmem [resolvable:$true] %s204_s23 }
   0x7   : > { %s1461_s21 = scalar_select %p1275_p4, 1, 0 }
   0x8   : > { %s1460_s20 = scalar_select %p1271_p3, 1, 0 }
   0x9   : > { %p1090_p5 = pneg %p1271_p3  ;;  %s1166_s27 = scalar_lea.hbm %s1454_s2, 16 }
   0xa   : > { %p1167_p7 = scmp.ne.s32.totalorder %s1454_s2, %s1166_s27  ;;  %p1173_p11 = scmp.lt.u32.totalorder %s1166_s27, %s1454_s2 }
   0xb   : > { %p1283_p6 = pnand %p1275_p4, %p1090_p5 }
   0xd   : > { %p1168_p8 = pneg %p1283_p6 }
   0xf   : > { %p1169_p9 = pnand %p1168_p8, %p1167_p7 }
  0x11   : > { %p1170_p10 = pneg %p1169_p9 }
  0x13   : > { %p1175_p12 = pnand %p1173_p11, %p1170_p10 }
  0x15   : > { %1178 = shalt.err (!%p1175_p12)
}
  0x16   : > { %s1179_s6 = scalar_lea.vmem %s205_s23, 16  ;;  %s1186_s7 = scalar_lea.vmem %s205_s23, 32 }
  0x17   : > { %p1180_p13 = scmp.ne.s32.totalorder %s205_s23, %s1179_s6  ;;  %p1187_p2 = scmp.lt.s32.totalorder %s205_s23, %s205_s23 }
  0x18   : > { %p1188_p5 = scmp.lt.s32.totalorder %s1186_s7, %s1179_s6 }
  0x19   : > { %p1182_p0 = pnand %p1180_p13, %p1168_p8 }
  0x1a   : > { %p1189_p4 = por %p1188_p5, %p1187_p2 }
  0x1b   : > { %p1183_p1 = pneg %p1182_p0 }
  0x1d   : > { %p1190_p3 = pnand %p1189_p4, %p1183_p1 }
  0x1f   : > { %1193 = shalt.err (!%p1190_p3)
}
  0x20   : > { %1093 = dma.hbm_to_vmem [thread:$0]  (!%p1283_p6), %s1454_s2, 16, %s205_s23, [#allocation4]  }
  0x21   : > { %p1463_p7 = scmp.ne.s32.totalorder %s1460_s20, 0 }
  0x22   : > { %p1464_p9 = scmp.ne.s32.totalorder (!%p1463_p7), %s1461_s21, 0 }
  0x23   : > { %244 = sbr.rel (%p1463_p7) target bundleno = 328 (0x148), region = 36 }
  0x2a   : > { %1207 = dma.done.wait (%p1464_p9), [#allocation4], 16  }
  0x2b   : > { %1209 = vsyncadd (%p1464_p9), [#allocation4], 4294967280  ;;  %vm338_vm0 = vcmask 523264   ;;  %v1223_v0 = vmov 0.0   ;;  %v1123_v1 = vld [vmem:[%s1453_s1 + $0x40] sm:$0xff]   ;;  %v1127_v5 = vld [vmem:[%s1453_s1 + $0x48] sm:$0xff]  }
  0x2c   : > { %339 = vst.msk [vmem:[#allocation2] sm:$0xff] %vm338_vm0, %v1223_v0  ;;  %340 = vst.msk [vmem:[#allocation2 + $0x8] sm:$0xff] %vm338_vm0, %v1223_v0  ;;  %v1124_v2 = vld [vmem:[%s1453_s1 + $0xc0] sm:$0xff]   ;;  %1024 = vmatprep.subr.bf16.mxu0 %v1123_v1  ;;  %v1128_v6 = vld [vmem:[%s1453_s1 + $0xc8] sm:$0xff]   ;;  %s965_s22 = sshll.u32 %s1212_s15, 1  ;;  %vm1224_vm1 = vmmov 0  }
  0x2d   : > { %v1125_v3 = vld [vmem:[%s1453_s1] sm:$0xff]   ;;  %1046 = vmatprep.subr.bf16.mxu1 %v1124_v2  ;;  %v1129_v7 = vld [vmem:[%s1453_s1 + $0x8] sm:$0xff]   ;;  %v1131_v9 = vld [vmem:[%s1453_s1 + $0x50] sm:$0xff]   ;;  %p296_p3 = scmp.lt.s32.totalorder %s965_s22, 3  ;;  %vm823_vm2 = vcmask 519168  }
  0x2e   : > { %v1126_v4 = vld [vmem:[%s1453_s1 + $0x80] sm:$0xff]   ;;  %1025 = vmatpush3.bf16.msra.mxu0 %v1125_v3  ;;  %v1130_v8 = vld [vmem:[%s1453_s1 + $0x88] sm:$0xff]   ;;  %v1132_v10 = vld [vmem:[%s1453_s1 + $0xd0] sm:$0xff]  }
  0x2f   : > { %1047 = vmatpush3.bf16.msra.mxu1 %v1126_v4  ;;  %1026 = vmatprep.subr.bf16.mxu0 %v1127_v5  ;;  %v1133_v11 = vld [vmem:[%s1453_s1 + $0x10] sm:$0xff]   ;;  %v1135_v13 = vld [vmem:[%s1453_s1 + $0x58] sm:$0xff]   ;;  %v1139_v17 = vld [vmem:[%s1453_s1 + $0x60] sm:$0xff]   ;;  %s1470_s22 = smov (!%p296_p3, %s965_s22), 3 }
  0x30   : > { %1048 = vmatprep.subr.bf16.mxu1 %v1128_v6  ;;  %v1134_v12 = vld [vmem:[%s1453_s1 + $0x90] sm:$0xff]   ;;  %v1136_v14 = vld [vmem:[%s1453_s1 + $0xd8] sm:$0xff]   ;;  %v1140_v18 = vld [vmem:[%s1453_s1 + $0xe0] sm:$0xff]   ;;  %s1085_s23 = smul.u32 20, %s1470_s22  ;;  %s968_s25 = sshll.u32 %s1470_s22, 2 }
  0x31   : > { %v1137_v15 = vld [vmem:[%s1453_s1 + $0x18] sm:$0xff]   ;;  %v1141_v19 = vld [vmem:[%s1453_s1 + $0x20] sm:$0xff]   ;;  %v1143_v21 = vld [vmem:[%s1453_s1 + $0x68] sm:$0xff]   ;;  %s322_s28 = scalar_lea.vmem %s1455_s3, %s968_s25  ;;  %s331_s30 = scalar_lea.vmem %s1456_s4, %s968_s25 }
  0x32   : > { %1027 = vmatpush3.bf16.msra.mxu0 %v1129_v7  ;;  %v1138_v16 = vld [vmem:[%s1453_s1 + $0x98] sm:$0xff]   ;;  %v1142_v20 = vld [vmem:[%s1453_s1 + $0xa0] sm:$0xff]   ;;  %v1144_v22 = vld [vmem:[%s1453_s1 + $0xe8] sm:$0xff]   ;;  %s303_s7 = scalar_lea.vmem %s1452_s0, %s1085_s23 }
  0x33   : > { %1049 = vmatpush3.bf16.msra.mxu1 %v1130_v8  ;;  %1028 = vmatprep.subr.bf16.mxu0 %v1131_v9  ;;  %v1145_v23 = vld [vmem:[%s1453_s1 + $0x28] sm:$0xff]   ;;  %v1147_v25 = vld [vmem:[%s1453_s1 + $0x70] sm:$0xff]   ;;  %v1151_v29 = vld [vmem:[%s1453_s1 + $0x78] sm:$0xff]  }
  0x34   : > { %1050 = vmatprep.subr.bf16.mxu1 %v1132_v10  ;;  %v1146_v24 = vld [vmem:[%s1453_s1 + $0xa8] sm:$0xff]   ;;  %v1148_v26 = vld [vmem:[%s1453_s1 + $0xf0] sm:$0xff]   ;;  %v1152_v30 = vld [vmem:[%s1453_s1 + $0xf8] sm:$0xff]  }
  0x35   : > { %v1149_v27 = vld [vmem:[%s1453_s1 + $0x30] sm:$0xff]   ;;  %v1153_v31 = vld [vmem:[%s1453_s1 + $0x38] sm:$0xff]   ;;  %v1160_v36 = vld [vmem:[%s303_s7 + $0xc] ss:$20 sps:$4 sm:$0xff]  }
  0x36   : > { %1029 = vmatpush3.bf16.msra.mxu0 %v1133_v11  ;;  %v1150_v28 = vld [vmem:[%s1453_s1 + $0xb0] sm:$0xff]   ;;  %v1154_v32 = vld [vmem:[%s1453_s1 + $0xb8] sm:$0xff]   ;;  %v1161_v37 = vld [vmem:[%s1453_s1 + $0x100] sm:$0xff]   ;;  %739 = vmatprep.mubr.bf16.mxu1 %v1160_v36 }
  0x37   : > { %1051 = vmatpush3.bf16.msra.mxu1 %v1134_v12  ;;  %1030 = vmatprep.subr.bf16.mxu0 %v1135_v13  ;;  %v1155_v33 = vld [vmem:[%s303_s7] ss:$20 sps:$4 sm:$0xff]   ;;  %v1157_v34 = vld [vmem:[%s303_s7 + $0x4] ss:$20 sps:$4 sm:$0xff]   ;;  %v1158_v35 = vld [vmem:[%s303_s7 + $0x8] ss:$20 sps:$4 sm:$0xff]  }
  0x38   : > { %1052 = vmatprep.subr.bf16.mxu1 %v1136_v14  ;;  %698 = vmatprep.mubr.bf16.mxu0 %v1157_v34  ;;  %v1162_v38 = vld [vmem:[%s1453_s1 + $0x108] sm:$0xff]   ;;  %v1163_v39 = vld [vmem:[%s1453_s1 + $0x110] sm:$0xff]   ;;  %v1164_v40 = vld [vmem:[%s1453_s1 + $0x118] sm:$0xff]  }
  0x39   : > { %v1165_v41 = vld [vmem:[%s303_s7 + $0x10] ss:$20 sps:$4 sm:$0xff]   ;;  %v342_v60 = vld [vmem:[#allocation2 + $0x8] sm:$0xff] }
  0x3a   : > { %1031 = vmatpush3.bf16.msra.mxu0 %v1137_v15  ;;  %v341_v56 = vld [vmem:[#allocation2] sm:$0xff]  ;;  %v1013_v3 = vld [vmem:[#allocation3] ss:$0 sm:$0xff] }
  0x3b   : > { %1053 = vmatpush3.bf16.msra.mxu1 %v1138_v16  ;;  %1032 = vmatprep.subr.bf16.mxu0 %v1139_v17  ;;  %v1021_v2 = vld [vmem:[%s322_s28] sm:$0xff]  }
  0x3c   : > { %1054 = vmatprep.subr.bf16.mxu1 %v1140_v18  ;;  %v1022_v4 = vunpack.c.l.bf16 %v1021_v2  ;;  %v1023_v6 = vunpack.c.h.bf16 %v1021_v2 }
  0x3e   : > { %1033 = vmatpush3.bf16.msra.mxu0 %v1141_v19 }
  0x3f   : > { %1055 = vmatpush3.bf16.msra.mxu1 %v1142_v20  ;;  %1034 = vmatprep.subr.bf16.mxu0 %v1143_v21 }
  0x40   : > { %1056 = vmatprep.subr.bf16.mxu1 %v1144_v22 }
  0x42   : > { %1035 = vmatpush3.bf16.msra.mxu0 %v1145_v23 }
  0x43   : > { %1057 = vmatpush3.bf16.msra.mxu1 %v1146_v24  ;;  %1036 = vmatprep.subr.bf16.mxu0 %v1147_v25 }
  0x44   : > { %1058 = vmatprep.subr.bf16.mxu1 %v1148_v26 }
  0x46   : > { %1037 = vmatpush3.bf16.msra.mxu0 %v1149_v27 }
  0x47   : > { %1059 = vmatpush3.bf16.msra.mxu1 %v1150_v28  ;;  %1038 = vmatprep.subr.bf16.mxu0 %v1151_v29 }
  0x48   : > { %1060 = vmatprep.subr.bf16.mxu1 %v1152_v30 }
  0x4a   : > { %1039 = vmatpush3.bf16.msra.mxu0 %v1153_v31 }
  0x4b   : > { %1061 = vmatpush3.bf16.msra.mxu1 %v1154_v32  ;;  %1073 = vmatprep.subr.bf16.mxu0 %v1223_v0 }
  0x4d   : > { %699 = vmatmul.mubr.bf16.vlgmr.msra.gmra.mrb[0].mxu0 %v1155_v33 }
  0x4e   : > { %740 = vmatmul.mubr.bf16.vlgmr.msra.gmra.mrb[0].mxu1 %v1158_v35  ;;  %1074 = vmatpush3.bf16.msra.mxu0 %v1161_v37 }
  0x4f   : > { %1075 = vmatprep.subr.bf16.mxu0 %v1223_v0  ;;  %1081 = vmatprep.mubr.msk.bf16.mxu0 %vm1224_vm1, %v1223_v0 }
  0x52   : > { %1076 = vmatpush3.bf16.msra.mxu0 %v1162_v38 }
  0x53   : > { %1077 = vmatprep.subr.bf16.mxu0 %v1223_v0 }
  0x56   : > { %1078 = vmatpush3.bf16.msra.mxu0 %v1163_v39 }
  0x57   : > { %1079 = vmatprep.subr.bf16.mxu0 %v1223_v0 }
  0x5a   : > { %1080 = vmatpush3.bf16.msra.mxu0 %v1164_v40 }
  0x5d   : > { %1082 = vmatmul.mubr.msk.bf16.vlgmr.msra.gmra.mrb[4].mxu0 %vm338_vm0, %v1165_v41 }
 0x120   : > { %v1040_v42 = vpop.f32.mrb[0].mxu0 }
 0x121   : > { %v1062_v43 = vpop.f32.mrb[0].mxu1  ;;  %v1041_v44 = vpop.f32.mrb[1].mxu0 }
 0x122   : > { %v1042_v45 = vadd.f32 %v1041_v44, %v1040_v42  ;;  %v1063_v46 = vpop.f32.mrb[1].mxu1  ;;  %v1043_v47 = vpop.f32.mrb[2].mxu0 }
 0x123   : > { %v1064_v48 = vadd.f32 %v1063_v46, %v1062_v43  ;;  %v1065_v49 = vpop.f32.mrb[2].mxu1  ;;  %v1044_v50 = vpop.f32.mrb[3].mxu0 }
 0x124   : > { %v1045_v51 = vadd.f32 %v1044_v50, %v1043_v47  ;;  %v1066_v52 = vpop.f32.mrb[3].mxu1 }
 0x125   : > { %v1067_v53 = vadd.f32 %v1066_v52, %v1065_v49  ;;  %v742_v54 = vadd.f32 %v1064_v48, %v1042_v45 }
 0x127   : > { %v745_v55 = vadd.f32 %v1067_v53, %v1045_v51 }
 0x130   : > { %v782_v57 = vpop.f32.mrb[4].mxu0 }
 0x131   : > { %v783_v58 = vadd.f32 %v782_v57, %v742_v54  ;;  %v1083_v59 = vpop.f32.mrb[5].mxu0 }
 0x132   : > { %v785_v61 = vpop.f32.mrb[6].mxu0 }
 0x133   : > { %v789_v62 = vadd.f32 %v783_v58, %v341_v56  ;;  %v786_v63 = vadd.f32 %v785_v61, %v745_v55  ;;  %v1084_v0 = vpop.f32.mrb[7].mxu0 }
 0x135   : > { %791 = vst.msk [vmem:[#allocation2] sm:$0xff] %vm338_vm0, %v789_v62  ;;  %v790_v1 = vadd.f32 %v786_v63, %v342_v60 }
 0x137   : > { %792 = vst.msk [vmem:[#allocation2 + $0x8] sm:$0xff] %vm338_vm0, %v790_v1 }
 0x13c   : > { %v796_v5 = vld [vmem:[#allocation2] sm:$0xff] }
 0x13d   : > { %v805_v7 = vadd.f32 %v1013_v3, %v796_v5 }
 0x13e   : > { %v797_v8 = vld [vmem:[#allocation2 + $0x8] sm:$0xff] }
 0x13f   : > { %v811_v9 = vadd.f32 %v1022_v4, %v805_v7  ;;  %v806_v10 = vadd.f32 %v1013_v3, %v797_v8 }
 0x141   : > { %v813_v11 = vmax.f32 %v811_v9, 0.0  ;;  %v812_v12 = vadd.f32 %v1023_v6, %v806_v10 }
 0x143   : > { %v1018_v13 = vpack.c.bf16 %v813_v11, %v813_v11  ;;  %v814_v14 = vmax.f32 %v812_v12, 0.0 }
 0x145   : > { %824 = vst.msk [vmem:[%s331_s30] sm:$0xf] %vm823_vm2, %v1018_v13  ;;  %v1019_v15 = vpack.c.bf16 %v814_v14, %v814_v14 }
 0x147   : > { %825 = vst.msk [vmem:[%s331_s30 + $0x4] sm:$0xf] %vm823_vm2, %v1019_v15 }
 0x148 PF: > { %s15_s17 = sadd.s32 1, %s1220_s17   ;;  %s1465_s15 = smov %s1216_s16 }
 0x149   : > { %p12_p4 = scmp.ge.s32.totalorder %s15_s17, 4   ;;  %s1466_s16 = smov %s1468_s19 }
 0x14b   :  { %14 = sbr.rel (!%p12_p4) target bundleno = 2 (0x2), region = 86 }
 0x152   :  { %854 = vsyncpa [#allocation4], 1 }
 0x153   :  { %856 = vsyncpa [#allocation4 + $0x1], 1 }

// kernel: custom_model_forward.28
= control target key start
LH: loop header
LB: loop body
LE: loop exit
PB: predicated region body
PF: predicated region fallthrough
CT: control target
= control target key end

     0   :  { %8 = vsyncpa [#allocation4], 0  ;;  %s283_s0 = inlined_call_operand.vmem [shape: bf16[8,64], index: 0, kind: input, shape index: {}]   ;;  %s284_s1 = inlined_call_operand.hbm [shape: bf16[64,128], index: 1, kind: input, shape index: {}]   ;;  %s285_s2 = inlined_call_operand.hbm [shape: f32[1,128], index: 2, kind: input, shape index: {}]   ;;  %s286_s3 = inlined_call_operand.vmem [shape: bf16[8,128], index: 3, kind: output, shape index: {}]  }
   0x1   :  { %9 = vsyncpa [#allocation6], 0  ;;  %s227_s12 = smov [#allocation3]   ;;  %s179_s16 = scalar_lea.hbm %s284_s1, 512 }
   0x2   :  { %s17_s13 = sshll.u32 %s227_s12, 4  ;;  %p180_p0 = scmp.ne.s32.totalorder %s284_s1, %s179_s16  ;;  %s18_s13 = int_to_ptr.vmem [resolvable:$true] %s17_s13 }
   0x3   :  { %p183_p1 = scmp.lt.u32.totalorder %s179_s16, %s284_s1 }
   0x5   :  { %p185_p2 = pnand %p183_p1, %p180_p0 }
   0x7   :  { %188 = shalt.err (!%p185_p2)
}
   0x8   :  { %s189_s21 = scalar_lea.vmem %s18_s13, 512  ;;  %p194_p4 = scmp.lt.s32.totalorder %s18_s13, %s18_s13 }
   0x9   :  { %p190_p3 = scmp.ne.s32.totalorder %s18_s13, %s189_s21  ;;  %p195_p5 = scmp.lt.s32.totalorder %s189_s21, %s189_s21 }
   0xb   :  { %p196_p6 = por %p195_p5, %p194_p4 }
   0xd   :  { %p197_p7 = pnand %p196_p6, %p190_p3 }
   0xf   :  { %200 = shalt.err (!%p197_p7)
}
  0x10   :  { %s228_s22 = smov 64   ;;  %s229_s23 = smov 4  }
  0x11   :  { %23 = dma.hbm_to_vmem [thread:$0]  %s284_s1, 512, %s18_s13, [#allocation4], %s228_s22, %s228_s22, %s229_s23  }
  0x12   :  { %s230_s26 = smov [#allocation5]   ;;  %s201_s30 = scalar_lea.hbm %s285_s2, 16 }
  0x13   :  { %s30_s27 = sshll.u32 %s230_s26, 4  ;;  %p202_p8 = scmp.ne.s32.totalorder %s285_s2, %s201_s30  ;;  %s31_s27 = int_to_ptr.vmem [resolvable:$true] %s30_s27 }
  0x14   :  { %p205_p9 = scmp.lt.u32.totalorder %s201_s30, %s285_s2 }
  0x16   :  { %p207_p10 = pnand %p205_p9, %p202_p8 }
  0x18   :  { %210 = shalt.err (!%p207_p10)
}
  0x19   :  { %s211_s8 = scalar_lea.vmem %s31_s27, 16  ;;  %s215_s1 = scalar_lea.vmem %s31_s27, 32 }
  0x1a   :  { %p212_p11 = scmp.ne.s32.totalorder %s31_s27, %s211_s8  ;;  %p216_p12 = scmp.lt.s32.totalorder %s31_s27, %s31_s27 }
  0x1b   :  { %p217_p13 = scmp.lt.s32.totalorder %s215_s1, %s211_s8 }
  0x1d   :  { %p218_p0 = por %p217_p13, %p216_p12 }
  0x1f   :  { %p219_p1 = pnand %p218_p0, %p212_p11 }
  0x21   :  { %222 = shalt.err (!%p219_p1)
}
  0x22   :  { %33 = dma.hbm_to_vmem [thread:$0]  %s285_s2, 16, %s31_s27, [#allocation6]  }
  0x23   :  { %223 = dma.done.wait [#allocation4], 512  }
  0x24   :  { %224 = vsyncadd [#allocation4], 4294966784 }
  0x25   :  { %225 = dma.done.wait [#allocation6], 16  }
  0x26   :  { %226 = vsyncadd [#allocation6], 4294967280  ;;  %v231_v0 = vmov 0.0   ;;  %vm232_vm0 = vmmov 0   ;;  %v175_v1 = vld [vmem:[#allocation3] sm:$0xff]   ;;  %v176_v2 = vld [vmem:[#allocation3 + $0x8] sm:$0xff]  }
  0x27   :  { %157 = vmatprep.subr.bf16.mxu0 %v231_v0  ;;  %165 = vmatprep.mubr.msk.bf16.mxu0 %vm232_vm0, %v231_v0  ;;  %v177_v3 = vld [vmem:[#allocation3 + $0x10] sm:$0xff]   ;;  %v178_v4 = vld [vmem:[#allocation3 + $0x18] sm:$0xff]   ;;  %v47_v5 = vld [vmem:[%s283_s0] sm:$0xf]  ;;  %vm80_vm1 = vcmask 523264  }
  0x28   :  { %158 = vmatpush3.bf16.msra.mxu0 %v175_v1  ;;  %v151_v6 = vld [vmem:[#allocation5] ss:$0 sm:$0xff] }
  0x29   :  { %159 = vmatprep.subr.bf16.mxu0 %v231_v0 }
  0x2c   :  { %160 = vmatpush3.bf16.msra.mxu0 %v176_v2 }
  0x2d   :  { %161 = vmatprep.subr.bf16.mxu0 %v231_v0 }
  0x30   :  { %162 = vmatpush3.bf16.msra.mxu0 %v177_v3 }
  0x31   :  { %163 = vmatprep.subr.bf16.mxu0 %v231_v0 }
  0x34   :  { %164 = vmatpush3.bf16.msra.mxu0 %v178_v4 }
  0x37   :  { %166 = vmatmul.mubr.msk.bf16.vlgmr.msra.gmra.mrb[0].mxu0 %vm80_vm1, %v47_v5 }
 0x10a   :  { %v118_v7 = vpop.f32.mrb[0].mxu0 }
 0x10b   :  { %v137_v8 = vadd.f32 %v151_v6, %v118_v7  ;;  %v167_v9 = vpop.f32.mrb[1].mxu0 }
 0x10c   :  { %v121_v10 = vpop.f32.mrb[2].mxu0 }
 0x10d   :  { %v138_v11 = vpack.c.bf16 %v137_v8, %v137_v8  ;;  %v168_v12 = vpop.f32.mrb[3].mxu0 }
 0x10f   :  { %139 = vst [vmem:[%s286_s3] sm:$0xf] %v138_v11 }
 0x110   :  { %144 = vsyncpa [#allocation4], 1 }
 0x111   :  { %145 = vsyncpa [#allocation6], 1 }

// kernel: custom_model_forward.29
= control target key start
LH: loop header
LB: loop body
LE: loop exit
PB: predicated region body
PF: predicated region fallthrough
CT: control target
= control target key end

     0   :  { %9 = vsyncpa [#allocation4], 0  ;;  %s1001_s15 = smov 0   ;;  %s1003_s16 = smov 0   ;;  %s1115_s0 = inlined_call_operand.vmem [shape: bf16[8,1152], index: 0, kind: input, shape index: {}]   ;;  %s1116_s1 = inlined_call_operand.vmem [shape: bf16[1152,128], index: 1, kind: input, shape index: {}]   ;;  %s1117_s2 = inlined_call_operand.hbm [shape: f32[1,128], index: 2, kind: input, shape index: {}]   ;;  %s1118_s3 = inlined_call_operand.vmem [shape: bf16[8,128], index: 3, kind: input, shape index: {}]   ;;  %s1119_s4 = inlined_call_operand.vmem [shape: bf16[8,128], index: 4, kind: output, shape index: {}]  }
   0x1   :  { %s1005_s17 = smov 0  }
   0x2 LB: > { %s758_s18 = sadd.s32 4294967295, %s970_s17   ;;  %s27_s19 = sadd.s32 1, %s966_s16  ;;  %s970_s17 = sphi %s1005_s17, %s15_s17   ;;  %s966_s16 = sphi %s1003_s16, %s1129_s16   ;;  %s962_s15 = sphi %s1001_s15, %s1128_s15  }
   0x3   : > { %p28_p0 = scmp.ge.s32.totalorder %s27_s19, 3  ;;  %p759_p1 = scmp.ge.s32.totalorder %s970_s17, 1 }
   0x4   : > { %p177_p2 = scmp.lt.s32.totalorder %s970_s17, 4  ;;  %p1026_p4 = scmp.eq.s32.totalorder %s758_s18, 0 }
   0x5   : > { %s1131_s19 = smov (%p28_p0, %s27_s19), 0  ;;  %s972_s22 = smov [#allocation3]  }
   0x6   : > { %p1022_p3 = pnand %p759_p1, %p177_p2  ;;  %s192_s23 = sshll.u32 %s972_s22, 4  ;;  %s193_s23 = int_to_ptr.vmem [resolvable:$true] %s192_s23 }
   0x7   : > { %s1124_s21 = scalar_select %p1026_p4, 1, 0 }
   0x8   : > { %s1123_s20 = scalar_select %p1022_p3, 1, 0 }
   0x9   : > { %p855_p5 = pneg %p1022_p3  ;;  %s916_s27 = scalar_lea.hbm %s1117_s2, 16 }
   0xa   : > { %p917_p7 = scmp.ne.s32.totalorder %s1117_s2, %s916_s27  ;;  %p923_p11 = scmp.lt.u32.totalorder %s916_s27, %s1117_s2 }
   0xb   : > { %p1034_p6 = pnand %p1026_p4, %p855_p5 }
   0xd   : > { %p918_p8 = pneg %p1034_p6 }
   0xf   : > { %p919_p9 = pnand %p918_p8, %p917_p7 }
  0x11   : > { %p920_p10 = pneg %p919_p9 }
  0x13   : > { %p925_p12 = pnand %p923_p11, %p920_p10 }
  0x15   : > { %928 = shalt.err (!%p925_p12)
}
  0x16   : > { %s929_s6 = scalar_lea.vmem %s193_s23, 16  ;;  %s936_s7 = scalar_lea.vmem %s193_s23, 32 }
  0x17   : > { %p930_p13 = scmp.ne.s32.totalorder %s193_s23, %s929_s6  ;;  %p937_p2 = scmp.lt.s32.totalorder %s193_s23, %s193_s23 }
  0x18   : > { %p938_p5 = scmp.lt.s32.totalorder %s936_s7, %s929_s6 }
  0x19   : > { %p932_p0 = pnand %p930_p13, %p918_p8 }
  0x1a   : > { %p939_p4 = por %p938_p5, %p937_p2 }
  0x1b   : > { %p933_p1 = pneg %p932_p0 }
  0x1d   : > { %p940_p3 = pnand %p939_p4, %p933_p1 }
  0x1f   : > { %943 = shalt.err (!%p940_p3)
}
  0x20   : > { %858 = dma.hbm_to_vmem [thread:$0]  (!%p1034_p6), %s1117_s2, 16, %s193_s23, [#allocation4]  }
  0x21   : > { %p1126_p7 = scmp.ne.s32.totalorder %s1123_s20, 0 }
  0x22   : > { %p1127_p9 = scmp.ne.s32.totalorder (!%p1126_p7), %s1124_s21, 0 }
  0x23   : > { %240 = sbr.rel (%p1126_p7) target bundleno = 321 (0x141), region = 36 }
  0x2a   : > { %957 = dma.done.wait (%p1127_p9), [#allocation4], 16  }
  0x2b   : > { %959 = vsyncadd (%p1127_p9), [#allocation4], 4294967280  ;;  %s287_s10 = smul.u32 3, %s962_s15  ;;  %p767_p6 = scmp.ne.s32.totalorder %s962_s15, 0 }
  0x2c   : > { %s297_s11 = smul.u32 48, %s962_s15  ;;  %v973_v0 = vmov (!%p767_p6), 0.0  }
  0x2d   : > { %p290_p3 = scmp.lt.s32.totalorder %s287_s10, 8  ;;  %324 = sbr.rel (%p767_p6) target bundleno = 52 (0x34), region = 44  ;;  %325 = vst [vmem:[#allocation2] sm:$0xff] (!%p767_p6), %v973_v0 }
  0x2e   : > { %p298_p4 = scmp.lt.s32.totalorder %s297_s11, 143 }
  0x2f   : > { %s1133_s10 = smov (!%p290_p3, %s287_s10), 8 }
  0x30   : > { %s1135_s11 = smov (!%p298_p4, %s297_s11), 143  ;;  %s765_s12 = sshll.u32 %s1133_s10, 2 }
  0x31   : > { %s1065_s18 = scalar_lea.vmem %s1115_s0, %s765_s12  ;;  %s766_s20 = sshll.u32 %s1135_s11, 2 }
  0x32   : > { %s1070_s21 = scalar_lea.vmem %s1116_s1, %s766_s20 }
  0x34 PF: > { %v889_v1 = vld [vmem:[%s1070_s21 + $0x40] sm:$0xff]   ;;  %v974_v2 = vmov 0.0   ;;  %vm975_vm0 = vmmov 0   ;;  %v892_v5 = vld [vmem:[%s1070_s21 + $0x48] sm:$0xff]   ;;  %v895_v8 = vld [vmem:[%s1070_s21 + $0x50] sm:$0xff]   ;;  %p795_p8 = scmp.ne.s32.totalorder %s962_s15, 2 }
  0x35   : > { %831 = vmatprep.subr.bf16.mxu1 %v974_v2  ;;  %v890_v3 = vld [vmem:[%s1070_s21] sm:$0xff]   ;;  %800 = vmatprep.subr.bf16.mxu0 %v889_v1  ;;  %v893_v6 = vld [vmem:[%s1070_s21 + $0x8] sm:$0xff]   ;;  %v896_v9 = vld [vmem:[%s1070_s21 + $0x10] sm:$0xff]  }
  0x36   : > { %v891_v4 = vld [vmem:[%s1070_s21 + $0x80] sm:$0xff]   ;;  %847 = vmatprep.mubr.msk.bf16.mxu1 %vm975_vm0, %v974_v2  ;;  %801 = vmatpush3.bf16.msra.mxu0 %v890_v3  ;;  %v894_v7 = vld [vmem:[%s1070_s21 + $0x88] sm:$0xff]   ;;  %v897_v10 = vld [vmem:[%s1070_s21 + $0x90] sm:$0xff]  }
  0x37   : > { %832 = vmatpush3.bf16.msra.mxu1 %v891_v4  ;;  %802 = vmatprep.subr.bf16.mxu0 %v892_v5  ;;  %v898_v11 = vld [vmem:[%s1070_s21 + $0x58] sm:$0xff]   ;;  %v901_v14 = vld [vmem:[%s1070_s21 + $0x60] sm:$0xff]   ;;  %v904_v17 = vld [vmem:[%s1070_s21 + $0x68] sm:$0xff]  }
  0x38   : > { %833 = vmatprep.subr.bf16.mxu1 %v974_v2  ;;  %v899_v12 = vld [vmem:[%s1070_s21 + $0x18] sm:$0xff]   ;;  %v902_v15 = vld [vmem:[%s1070_s21 + $0x20] sm:$0xff]   ;;  %v905_v18 = vld [vmem:[%s1070_s21 + $0x28] sm:$0xff]  }
  0x39   : > { %v900_v13 = vld [vmem:[%s1070_s21 + $0x98] sm:$0xff]   ;;  %v903_v16 = vld [vmem:[%s1070_s21 + $0xa0] sm:$0xff]   ;;  %v906_v19 = vld [vmem:[%s1070_s21 + $0xa8] sm:$0xff]  }
  0x3a   : > { %803 = vmatpush3.bf16.msra.mxu0 %v893_v6  ;;  %v907_v20 = vld [vmem:[%s1070_s21 + $0x70] sm:$0xff]   ;;  %v910_v23 = vld [vmem:[%s1070_s21 + $0x78] sm:$0xff]   ;;  %v327_v24 = vld [vmem:[%s1065_s18] sm:$0xff] }
  0x3b   : > { %834 = vmatpush3.bf16.msra.mxu1 %v894_v7  ;;  %804 = vmatprep.subr.bf16.mxu0 %v895_v8  ;;  %v908_v21 = vld [vmem:[%s1070_s21 + $0x30] sm:$0xff]   ;;  %v769_v25 = vcombine.high %v327_v24, %v327_v24  ;;  %v911_v26 = vld [vmem:[%s1070_s21 + $0x38] sm:$0xff]   ;;  %v768_v28 = vcombine.low %v327_v24, %v327_v24  ;;  %v915_v29 = vld [vmem:[%s1065_s18 + $0x8] ss:$0 sps:$4 sm:$0xff]  }
  0x3c   : > { %835 = vmatprep.subr.bf16.mxu1 %v974_v2  ;;  %v909_v22 = vld [vmem:[%s1070_s21 + $0xb0] sm:$0xff]   ;;  %v912_v27 = vld [vmem:[%s1070_s21 + $0xb8] sm:$0xff]   ;;  %v326_v36 = vld [vmem:[#allocation2] sm:$0xff] }
  0x3d   : > { %564 = vmatprep.mubr.bf16.mxu0 %v769_v25  ;;  %v796_v43 = vld [vmem:[#allocation3] ss:$0 sm:$0xff] (!%p795_p8)  ;;  %v627_v44 = vld [vmem:[%s1118_s3] sm:$0xf] (!%p795_p8) }
  0x3e   : > { %805 = vmatpush3.bf16.msra.mxu0 %v896_v9  ;;  %v628_v46 = vunpack.c.l.bf16 (!%p795_p8), %v627_v44 }
  0x3f   : > { %836 = vmatpush3.bf16.msra.mxu1 %v897_v10  ;;  %806 = vmatprep.subr.bf16.mxu0 %v898_v11 }
  0x40   : > { %837 = vmatprep.subr.bf16.mxu1 %v974_v2 }
  0x42   : > { %807 = vmatpush3.bf16.msra.mxu0 %v899_v12 }
  0x43   : > { %838 = vmatpush3.bf16.msra.mxu1 %v900_v13  ;;  %808 = vmatprep.subr.bf16.mxu0 %v901_v14 }
  0x44   : > { %839 = vmatprep.subr.bf16.mxu1 %v974_v2 }
  0x46   : > { %809 = vmatpush3.bf16.msra.mxu0 %v902_v15 }
  0x47   : > { %840 = vmatpush3.bf16.msra.mxu1 %v903_v16  ;;  %810 = vmatprep.subr.bf16.mxu0 %v904_v17 }
  0x48   : > { %841 = vmatprep.subr.bf16.mxu1 %v974_v2 }
  0x4a   : > { %811 = vmatpush3.bf16.msra.mxu0 %v905_v18 }
  0x4b   : > { %842 = vmatpush3.bf16.msra.mxu1 %v906_v19  ;;  %812 = vmatprep.subr.bf16.mxu0 %v907_v20 }
  0x4c   : > { %843 = vmatprep.subr.bf16.mxu1 %v974_v2 }
  0x4e   : > { %813 = vmatpush3.bf16.msra.mxu0 %v908_v21 }
  0x4f   : > { %844 = vmatpush3.bf16.msra.mxu1 %v909_v22  ;;  %814 = vmatprep.subr.bf16.mxu0 %v910_v23 }
  0x50   : > { %845 = vmatprep.subr.bf16.mxu1 %v974_v2 }
  0x52   : > { %815 = vmatpush3.bf16.msra.mxu0 %v911_v26 }
  0x53   : > { %846 = vmatpush3.bf16.msra.mxu1 %v912_v27 }
  0x55   : > { %565 = vmatmul.mubr.bf16.vlgmr.msra.gmra.mrb[0].mxu0 %v768_v28 }
  0x56   : > { %848 = vmatmul.mubr.bf16.vlgmr.msra.gmra.mrb[0].mxu1 %v915_v29 }
 0x128   : > { %v816_v30 = vpop.f32.mrb[0].mxu0 }
 0x129   : > { %v606_v31 = vpop.f32.mrb[0].mxu1  ;;  %v817_v32 = vpop.f32.mrb[1].mxu0 }
 0x12a   : > { %v818_v33 = vadd.f32 %v817_v32, %v816_v30  ;;  %v849_v34 = vpop.f32.mrb[1].mxu1  ;;  %v819_v35 = vpop.f32.mrb[2].mxu0  ;;  %617 = sbr.rel (%p795_p8) target bundleno = 321 (0x141), region = 48 }
 0x12b   : > { %v609_v37 = vpop.f32.mrb[2].mxu1  ;;  %v820_v38 = vpop.f32.mrb[3].mxu0 }
 0x12c   : > { %v607_v39 = vadd.f32 %v818_v33, %v606_v31  ;;  %v850_v40 = vpop.f32.mrb[3].mxu1 }
 0x12e   : > { %v612_v41 = vadd.f32 %v607_v39, %v326_v36 }
 0x130   : > { %613 = vst [vmem:[#allocation2] sm:$0xff] %v612_v41 }
 0x137   : > { %v618_v42 = vld [vmem:[#allocation2] sm:$0xff] }
 0x138   : > { %v626_v45 = vadd.f32 %v796_v43, %v618_v42 }
 0x13a   : > { %v629_v47 = vadd.f32 %v628_v46, %v626_v45 }
 0x13c   : > { %v630_v48 = vmax.f32 %v629_v47, 0.0 }
 0x13e   : > { %v631_v49 = vpack.c.bf16 %v630_v48, %v630_v48 }
 0x140   : > { %632 = vst [vmem:[%s1119_s4] sm:$0xf] %v631_v49 }
 0x141 PF: > { %s15_s17 = sadd.s32 1, %s970_s17   ;;  %s1128_s15 = smov %s966_s16 }
 0x142   : > { %p12_p10 = scmp.ge.s32.totalorder %s15_s17, 5   ;;  %s1129_s16 = smov %s1131_s19 }
 0x144   :  { %14 = sbr.rel (!%p12_p10) target bundleno = 2 (0x2), region = 86 }
 0x14b   :  { %658 = vsyncpa [#allocation4], 1 }
 0x14c   :  { %660 = vsyncpa [#allocation4 + $0x1], 1 }

// kernel: custom_model_forward.30
= control target key start
LH: loop header
LB: loop body
LE: loop exit
PB: predicated region body
PF: predicated region fallthrough
CT: control target
= control target key end

     0   :  { %8 = vsyncpa [#allocation4], 0  ;;  %s919_s12 = smov 0   ;;  %s921_s13 = smov 0   ;;  %s1030_s0 = inlined_call_operand.vmem [shape: bf16[8,1152], index: 0, kind: input, shape index: {}]   ;;  %s1031_s1 = inlined_call_operand.vmem [shape: bf16[1152,128], index: 1, kind: input, shape index: {}]   ;;  %s1032_s2 = inlined_call_operand.hbm [shape: f32[1,128], index: 2, kind: input, shape index: {}]   ;;  %s1033_s3 = inlined_call_operand.vmem [shape: bf16[8,128], index: 3, kind: output, shape index: {}]  }
   0x1   :  { %s923_s14 = smov 0  }
   0x2 LB: > { %s682_s15 = sadd.s32 4294967295, %s893_s14   ;;  %s26_s16 = sadd.s32 1, %s889_s13  ;;  %s893_s14 = sphi %s923_s14, %s14_s14   ;;  %s889_s13 = sphi %s921_s13, %s1043_s13   ;;  %s885_s12 = sphi %s919_s12, %s1042_s12  }
   0x3   : > { %p27_p0 = scmp.ge.s32.totalorder %s26_s16, 3  ;;  %p683_p1 = scmp.ge.s32.totalorder %s893_s14, 1 }
   0x4   : > { %p148_p2 = scmp.lt.s32.totalorder %s893_s14, 4  ;;  %p944_p4 = scmp.eq.s32.totalorder %s682_s15, 0 }
   0x5   : > { %s1045_s16 = smov (%p27_p0, %s26_s16), 0  ;;  %s895_s19 = smov [#allocation3]  }
   0x6   : > { %p940_p3 = pnand %p683_p1, %p148_p2  ;;  %s163_s20 = sshll.u32 %s895_s19, 4  ;;  %s164_s20 = int_to_ptr.vmem [resolvable:$true] %s163_s20 }
   0x7   : > { %s1038_s18 = scalar_select %p944_p4, 1, 0 }
   0x8   : > { %s1037_s17 = scalar_select %p940_p3, 1, 0 }
   0x9   : > { %p778_p5 = pneg %p940_p3  ;;  %s839_s24 = scalar_lea.hbm %s1032_s2, 16 }
   0xa   : > { %p840_p7 = scmp.ne.s32.totalorder %s1032_s2, %s839_s24  ;;  %p846_p11 = scmp.lt.u32.totalorder %s839_s24, %s1032_s2 }
   0xb   : > { %p952_p6 = pnand %p944_p4, %p778_p5 }
   0xd   : > { %p841_p8 = pneg %p952_p6 }
   0xf   : > { %p842_p9 = pnand %p841_p8, %p840_p7 }
  0x11   : > { %p843_p10 = pneg %p842_p9 }
  0x13   : > { %p848_p12 = pnand %p846_p11, %p843_p10 }
  0x15   : > { %851 = shalt.err (!%p848_p12)
}
  0x16   : > { %s852_s29 = scalar_lea.vmem %s164_s20, 16  ;;  %s859_s30 = scalar_lea.vmem %s164_s20, 32 }
  0x17   : > { %p853_p13 = scmp.ne.s32.totalorder %s164_s20, %s852_s29  ;;  %p860_p2 = scmp.lt.s32.totalorder %s164_s20, %s164_s20 }
  0x18   : > { %p861_p5 = scmp.lt.s32.totalorder %s859_s30, %s852_s29 }
  0x19   : > { %p855_p0 = pnand %p853_p13, %p841_p8 }
  0x1a   : > { %p862_p4 = por %p861_p5, %p860_p2 }
  0x1b   : > { %p856_p1 = pneg %p855_p0 }
  0x1d   : > { %p863_p3 = pnand %p862_p4, %p856_p1 }
  0x1f   : > { %866 = shalt.err (!%p863_p3)
}
  0x20   : > { %781 = dma.hbm_to_vmem [thread:$0]  (!%p952_p6), %s1032_s2, 16, %s164_s20, [#allocation4]  }
  0x21   : > { %p1040_p7 = scmp.ne.s32.totalorder %s1037_s17, 0 }
  0x22   : > { %p1041_p9 = scmp.ne.s32.totalorder (!%p1040_p7), %s1038_s18, 0 }
  0x23   : > { %201 = sbr.rel (%p1040_p7) target bundleno = 319 (0x13f), region = 32 }
  0x2a   : > { %880 = dma.done.wait (%p1041_p9), [#allocation4], 16  }
  0x2b   : > { %882 = vsyncadd (%p1041_p9), [#allocation4], 4294967280  ;;  %s239_s6 = smul.u32 3, %s885_s12  ;;  %p690_p6 = scmp.ne.s32.totalorder %s885_s12, 0 }
  0x2c   : > { %s249_s7 = smul.u32 48, %s885_s12  ;;  %v896_v0 = vmov (!%p690_p6), 0.0  }
  0x2d   : > { %p242_p3 = scmp.lt.s32.totalorder %s239_s6, 8  ;;  %269 = sbr.rel (%p690_p6) target bundleno = 52 (0x34), region = 40  ;;  %270 = vst [vmem:[#allocation2] sm:$0xff] (!%p690_p6), %v896_v0 }
  0x2e   : > { %p250_p4 = scmp.lt.s32.totalorder %s249_s7, 143 }
  0x2f   : > { %s1047_s6 = smov (!%p242_p3, %s239_s6), 8 }
  0x30   : > { %s1049_s7 = smov (!%p250_p4, %s249_s7), 143  ;;  %s688_s8 = sshll.u32 %s1047_s6, 2 }
  0x31   : > { %s983_s11 = scalar_lea.vmem %s1030_s0, %s688_s8  ;;  %s689_s15 = sshll.u32 %s1049_s7, 2 }
  0x32   : > { %s988_s18 = scalar_lea.vmem %s1031_s1, %s689_s15 }
  0x34 PF: > { %v812_v1 = vld [vmem:[%s988_s18 + $0x40] sm:$0xff]   ;;  %v897_v2 = vmov 0.0   ;;  %vm898_vm0 = vmmov 0   ;;  %v815_v5 = vld [vmem:[%s988_s18 + $0x48] sm:$0xff]   ;;  %v818_v8 = vld [vmem:[%s988_s18 + $0x50] sm:$0xff]   ;;  %p718_p8 = scmp.ne.s32.totalorder %s885_s12, 2 }
  0x35   : > { %754 = vmatprep.subr.bf16.mxu1 %v897_v2  ;;  %v813_v3 = vld [vmem:[%s988_s18] sm:$0xff]   ;;  %723 = vmatprep.subr.bf16.mxu0 %v812_v1  ;;  %v816_v6 = vld [vmem:[%s988_s18 + $0x8] sm:$0xff]   ;;  %v819_v9 = vld [vmem:[%s988_s18 + $0x10] sm:$0xff]  }
  0x36   : > { %v814_v4 = vld [vmem:[%s988_s18 + $0x80] sm:$0xff]   ;;  %770 = vmatprep.mubr.msk.bf16.mxu1 %vm898_vm0, %v897_v2  ;;  %724 = vmatpush3.bf16.msra.mxu0 %v813_v3  ;;  %v817_v7 = vld [vmem:[%s988_s18 + $0x88] sm:$0xff]   ;;  %v820_v10 = vld [vmem:[%s988_s18 + $0x90] sm:$0xff]  }
  0x37   : > { %755 = vmatpush3.bf16.msra.mxu1 %v814_v4  ;;  %725 = vmatprep.subr.bf16.mxu0 %v815_v5  ;;  %v821_v11 = vld [vmem:[%s988_s18 + $0x58] sm:$0xff]   ;;  %v824_v14 = vld [vmem:[%s988_s18 + $0x60] sm:$0xff]   ;;  %v827_v17 = vld [vmem:[%s988_s18 + $0x68] sm:$0xff]  }
  0x38   : > { %756 = vmatprep.subr.bf16.mxu1 %v897_v2  ;;  %v822_v12 = vld [vmem:[%s988_s18 + $0x18] sm:$0xff]   ;;  %v825_v15 = vld [vmem:[%s988_s18 + $0x20] sm:$0xff]   ;;  %v828_v18 = vld [vmem:[%s988_s18 + $0x28] sm:$0xff]  }
  0x39   : > { %v823_v13 = vld [vmem:[%s988_s18 + $0x98] sm:$0xff]   ;;  %v826_v16 = vld [vmem:[%s988_s18 + $0xa0] sm:$0xff]   ;;  %v829_v19 = vld [vmem:[%s988_s18 + $0xa8] sm:$0xff]  }
  0x3a   : > { %726 = vmatpush3.bf16.msra.mxu0 %v816_v6  ;;  %v830_v20 = vld [vmem:[%s988_s18 + $0x70] sm:$0xff]   ;;  %v833_v23 = vld [vmem:[%s988_s18 + $0x78] sm:$0xff]   ;;  %v272_v24 = vld [vmem:[%s983_s11] sm:$0xff] }
  0x3b   : > { %757 = vmatpush3.bf16.msra.mxu1 %v817_v7  ;;  %727 = vmatprep.subr.bf16.mxu0 %v818_v8  ;;  %v831_v21 = vld [vmem:[%s988_s18 + $0x30] sm:$0xff]   ;;  %v692_v25 = vcombine.high %v272_v24, %v272_v24  ;;  %v834_v26 = vld [vmem:[%s988_s18 + $0x38] sm:$0xff]   ;;  %v691_v28 = vcombine.low %v272_v24, %v272_v24  ;;  %v838_v29 = vld [vmem:[%s983_s11 + $0x8] ss:$0 sps:$4 sm:$0xff]  }
  0x3c   : > { %758 = vmatprep.subr.bf16.mxu1 %v897_v2  ;;  %v832_v22 = vld [vmem:[%s988_s18 + $0xb0] sm:$0xff]   ;;  %v835_v27 = vld [vmem:[%s988_s18 + $0xb8] sm:$0xff]   ;;  %v271_v36 = vld [vmem:[#allocation2] sm:$0xff] }
  0x3d   : > { %509 = vmatprep.mubr.bf16.mxu0 %v692_v25  ;;  %v719_v43 = vld [vmem:[#allocation3] ss:$0 sm:$0xff] (!%p718_p8) }
  0x3e   : > { %728 = vmatpush3.bf16.msra.mxu0 %v819_v9 }
  0x3f   : > { %759 = vmatpush3.bf16.msra.mxu1 %v820_v10  ;;  %729 = vmatprep.subr.bf16.mxu0 %v821_v11 }
  0x40   : > { %760 = vmatprep.subr.bf16.mxu1 %v897_v2 }
  0x42   : > { %730 = vmatpush3.bf16.msra.mxu0 %v822_v12 }
  0x43   : > { %761 = vmatpush3.bf16.msra.mxu1 %v823_v13  ;;  %731 = vmatprep.subr.bf16.mxu0 %v824_v14 }
  0x44   : > { %762 = vmatprep.subr.bf16.mxu1 %v897_v2 }
  0x46   : > { %732 = vmatpush3.bf16.msra.mxu0 %v825_v15 }
  0x47   : > { %763 = vmatpush3.bf16.msra.mxu1 %v826_v16  ;;  %733 = vmatprep.subr.bf16.mxu0 %v827_v17 }
  0x48   : > { %764 = vmatprep.subr.bf16.mxu1 %v897_v2 }
  0x4a   : > { %734 = vmatpush3.bf16.msra.mxu0 %v828_v18 }
  0x4b   : > { %765 = vmatpush3.bf16.msra.mxu1 %v829_v19  ;;  %735 = vmatprep.subr.bf16.mxu0 %v830_v20 }
  0x4c   : > { %766 = vmatprep.subr.bf16.mxu1 %v897_v2 }
  0x4e   : > { %736 = vmatpush3.bf16.msra.mxu0 %v831_v21 }
  0x4f   : > { %767 = vmatpush3.bf16.msra.mxu1 %v832_v22  ;;  %737 = vmatprep.subr.bf16.mxu0 %v833_v23 }
  0x50   : > { %768 = vmatprep.subr.bf16.mxu1 %v897_v2 }
  0x52   : > { %738 = vmatpush3.bf16.msra.mxu0 %v834_v26 }
  0x53   : > { %769 = vmatpush3.bf16.msra.mxu1 %v835_v27 }
  0x55   : > { %510 = vmatmul.mubr.bf16.vlgmr.msra.gmra.mrb[0].mxu0 %v691_v28 }
  0x56   : > { %771 = vmatmul.mubr.bf16.vlgmr.msra.gmra.mrb[0].mxu1 %v838_v29 }
 0x128   : > { %v739_v30 = vpop.f32.mrb[0].mxu0 }
 0x129   : > { %v551_v31 = vpop.f32.mrb[0].mxu1  ;;  %v740_v32 = vpop.f32.mrb[1].mxu0 }
 0x12a   : > { %v741_v33 = vadd.f32 %v740_v32, %v739_v30  ;;  %v772_v34 = vpop.f32.mrb[1].mxu1  ;;  %v742_v35 = vpop.f32.mrb[2].mxu0  ;;  %562 = sbr.rel (%p718_p8) target bundleno = 319 (0x13f), region = 44 }
 0x12b   : > { %v554_v37 = vpop.f32.mrb[2].mxu1  ;;  %v743_v38 = vpop.f32.mrb[3].mxu0 }
 0x12c   : > { %v552_v39 = vadd.f32 %v741_v33, %v551_v31  ;;  %v773_v40 = vpop.f32.mrb[3].mxu1 }
 0x12e   : > { %v557_v41 = vadd.f32 %v552_v39, %v271_v36 }
 0x130   : > { %558 = vst [vmem:[#allocation2] sm:$0xff] %v557_v41 }
 0x137   : > { %v563_v42 = vld [vmem:[#allocation2] sm:$0xff] }
 0x138   : > { %v571_v44 = vadd.f32 %v719_v43, %v563_v42 }
 0x13a   : > { %v572_v45 = vmax.f32 %v571_v44, 0.0 }
 0x13c   : > { %v573_v46 = vpack.c.bf16 %v572_v45, %v572_v45 }
 0x13e   : > { %574 = vst [vmem:[%s1033_s3] sm:$0xf] %v573_v46 }
 0x13f PF: > { %s14_s14 = sadd.s32 1, %s893_s14   ;;  %s1042_s12 = smov %s889_s13 }
 0x140   : > { %p11_p10 = scmp.ge.s32.totalorder %s14_s14, 5   ;;  %s1043_s13 = smov %s1045_s16 }
 0x142   :  { %13 = sbr.rel (!%p11_p10) target bundleno = 2 (0x2), region = 79 }
 0x149   :  { %600 = vsyncpa [#allocation4], 1 }
 0x14a   :  { %602 = vsyncpa [#allocation4 + $0x1], 1 }

// kernel: custom_model_forward.27
= control target key start
LH: loop header
LB: loop body
LE: loop exit
PB: predicated region body
PF: predicated region fallthrough
CT: control target
= control target key end

     0   :  { %8 = vsyncpa [#allocation4], 0  ;;  %s659_s12 = smov [#allocation3]   ;;  %s814_s0 = inlined_call_operand.vmem [shape: bf16[8,576], index: 0, kind: input, shape index: {}]   ;;  %s815_s1 = inlined_call_operand.vmem [shape: bf16[576,128], index: 1, kind: input, shape index: {}]   ;;  %s816_s2 = inlined_call_operand.hbm [shape: f32[1,128], index: 2, kind: input, shape index: {}]   ;;  %s817_s3 = inlined_call_operand.vmem [shape: bf16[8,128], index: 3, kind: output, shape index: {}]  }
   0x1   :  { %s19_s13 = sshll.u32 %s659_s12, 4  ;;  %s635_s16 = scalar_lea.hbm %s816_s2, 16  ;;  %s20_s13 = int_to_ptr.vmem [resolvable:$true] %s19_s13 }
   0x2   :  { %p636_p0 = scmp.ne.s32.totalorder %s816_s2, %s635_s16  ;;  %p639_p1 = scmp.lt.u32.totalorder %s635_s16, %s816_s2 }
   0x4   :  { %p641_p2 = pnand %p639_p1, %p636_p0 }
   0x6   :  { %644 = shalt.err (!%p641_p2)
}
   0x7   :  { %s645_s21 = scalar_lea.vmem %s20_s13, 16  ;;  %s649_s22 = scalar_lea.vmem %s20_s13, 32 }
   0x8   :  { %p646_p3 = scmp.ne.s32.totalorder %s20_s13, %s645_s21  ;;  %p650_p4 = scmp.lt.s32.totalorder %s20_s13, %s20_s13 }
   0x9   :  { %p651_p5 = scmp.lt.s32.totalorder %s649_s22, %s645_s21 }
   0xb   :  { %p652_p6 = por %p651_p5, %p650_p4 }
   0xd   :  { %p653_p7 = pnand %p652_p6, %p646_p3 }
   0xf   :  { %656 = shalt.err (!%p653_p7)
}
  0x10   :  { %22 = dma.hbm_to_vmem [thread:$0]  %s816_s2, 16, %s20_s13, [#allocation4]  }
  0x11   :  { %657 = dma.done.wait [#allocation4], 16  }
  0x12   :  { %658 = vsyncadd [#allocation4], 4294967280  ;;  %v594_v0 = vld [vmem:[%s815_s1 + $0x40] sm:$0xff]   ;;  %v598_v4 = vld [vmem:[%s815_s1 + $0x48] sm:$0xff]   ;;  %v660_v39 = vmov 0.0   ;;  %vm661_vm0 = vmmov 0  }
  0x13   :  { %v595_v1 = vld [vmem:[%s815_s1 + $0xc0] sm:$0xff]   ;;  %530 = vmatprep.subr.bf16.mxu0 %v594_v0  ;;  %v599_v5 = vld [vmem:[%s815_s1 + $0xc8] sm:$0xff]   ;;  %v602_v8 = vld [vmem:[%s815_s1 + $0x50] sm:$0xff]   ;;  %vm341_vm1 = vcmask 523264  }
  0x14   :  { %v596_v2 = vld [vmem:[%s815_s1] sm:$0xff]   ;;  %552 = vmatprep.subr.bf16.mxu1 %v595_v1  ;;  %v600_v6 = vld [vmem:[%s815_s1 + $0x8] sm:$0xff]   ;;  %v603_v9 = vld [vmem:[%s815_s1 + $0xd0] sm:$0xff]  }
  0x15   :  { %v597_v3 = vld [vmem:[%s815_s1 + $0x80] sm:$0xff]   ;;  %531 = vmatpush3.bf16.msra.mxu0 %v596_v2  ;;  %v601_v7 = vld [vmem:[%s815_s1 + $0x88] sm:$0xff]   ;;  %v604_v10 = vld [vmem:[%s815_s1 + $0x10] sm:$0xff]  }
  0x16   :  { %553 = vmatpush3.bf16.msra.mxu1 %v597_v3  ;;  %532 = vmatprep.subr.bf16.mxu0 %v598_v4  ;;  %v605_v11 = vld [vmem:[%s815_s1 + $0x90] sm:$0xff]   ;;  %v606_v12 = vld [vmem:[%s815_s1 + $0x58] sm:$0xff]   ;;  %v610_v16 = vld [vmem:[%s815_s1 + $0x60] sm:$0xff]  }
  0x17   :  { %554 = vmatprep.subr.bf16.mxu1 %v599_v5  ;;  %v607_v13 = vld [vmem:[%s815_s1 + $0xd8] sm:$0xff]   ;;  %v611_v17 = vld [vmem:[%s815_s1 + $0xe0] sm:$0xff]   ;;  %v614_v20 = vld [vmem:[%s815_s1 + $0x68] sm:$0xff]  }
  0x18   :  { %v608_v14 = vld [vmem:[%s815_s1 + $0x18] sm:$0xff]   ;;  %v612_v18 = vld [vmem:[%s815_s1 + $0x20] sm:$0xff]   ;;  %v615_v21 = vld [vmem:[%s815_s1 + $0xe8] sm:$0xff]  }
  0x19   :  { %533 = vmatpush3.bf16.msra.mxu0 %v600_v6  ;;  %v609_v15 = vld [vmem:[%s815_s1 + $0x98] sm:$0xff]   ;;  %v613_v19 = vld [vmem:[%s815_s1 + $0xa0] sm:$0xff]   ;;  %v616_v22 = vld [vmem:[%s815_s1 + $0x28] sm:$0xff]  }
  0x1a   :  { %555 = vmatpush3.bf16.msra.mxu1 %v601_v7  ;;  %534 = vmatprep.subr.bf16.mxu0 %v602_v8  ;;  %v617_v23 = vld [vmem:[%s815_s1 + $0xa8] sm:$0xff]   ;;  %v618_v24 = vld [vmem:[%s815_s1 + $0x70] sm:$0xff]   ;;  %v622_v28 = vld [vmem:[%s815_s1 + $0x78] sm:$0xff]  }
  0x1b   :  { %556 = vmatprep.subr.bf16.mxu1 %v603_v9  ;;  %v619_v25 = vld [vmem:[%s815_s1 + $0xf0] sm:$0xff]   ;;  %v623_v29 = vld [vmem:[%s815_s1 + $0xf8] sm:$0xff]   ;;  %v33_v32 = vld [vmem:[%s814_s0] sm:$0xff] }
  0x1c   :  { %v620_v26 = vld [vmem:[%s815_s1 + $0x30] sm:$0xff]   ;;  %v624_v30 = vld [vmem:[%s815_s1 + $0x38] sm:$0xff]   ;;  %v34_v33 = vld [vmem:[%s814_s0 + $0x8] sm:$0xff]  ;;  %v487_v34 = vcombine.low %v33_v32, %v33_v32  ;;  %v488_v35 = vcombine.high %v33_v32, %v33_v32 }
  0x1d   :  { %535 = vmatpush3.bf16.msra.mxu0 %v604_v10  ;;  %v621_v27 = vld [vmem:[%s815_s1 + $0xb0] sm:$0xff]   ;;  %v625_v31 = vld [vmem:[%s815_s1 + $0xb8] sm:$0xff]   ;;  %v489_v36 = vcombine.low %v34_v33, %v34_v33  ;;  %v490_v37 = vcombine.high %v34_v33, %v34_v33  ;;  %v630_v38 = vld [vmem:[%s815_s1 + $0x100] sm:$0xff]  }
  0x1e   :  { %557 = vmatpush3.bf16.msra.mxu1 %v605_v11  ;;  %536 = vmatprep.subr.bf16.mxu0 %v606_v12  ;;  %v631_v40 = vld [vmem:[%s815_s1 + $0x108] sm:$0xff]   ;;  %v632_v41 = vld [vmem:[%s815_s1 + $0x110] sm:$0xff]   ;;  %v633_v42 = vld [vmem:[%s815_s1 + $0x118] sm:$0xff]  }
  0x1f   :  { %558 = vmatprep.subr.bf16.mxu1 %v607_v13  ;;  %377 = vmatprep.mubr.bf16.mxu0 %v488_v35  ;;  %v634_v43 = vld [vmem:[%s814_s0 + $0x10] ss:$0 sps:$4 sm:$0xff]   ;;  %v529_v56 = vld [vmem:[#allocation3] ss:$0 sm:$0xff] }
  0x20   :  { %417 = vmatprep.mubr.bf16.mxu1 %v490_v37 }
  0x21   :  { %537 = vmatpush3.bf16.msra.mxu0 %v608_v14 }
  0x22   :  { %559 = vmatpush3.bf16.msra.mxu1 %v609_v15  ;;  %538 = vmatprep.subr.bf16.mxu0 %v610_v16 }
  0x23   :  { %560 = vmatprep.subr.bf16.mxu1 %v611_v17 }
  0x25   :  { %539 = vmatpush3.bf16.msra.mxu0 %v612_v18 }
  0x26   :  { %561 = vmatpush3.bf16.msra.mxu1 %v613_v19  ;;  %540 = vmatprep.subr.bf16.mxu0 %v614_v20 }
  0x27   :  { %562 = vmatprep.subr.bf16.mxu1 %v615_v21 }
  0x29   :  { %541 = vmatpush3.bf16.msra.mxu0 %v616_v22 }
  0x2a   :  { %563 = vmatpush3.bf16.msra.mxu1 %v617_v23  ;;  %542 = vmatprep.subr.bf16.mxu0 %v618_v24 }
  0x2b   :  { %564 = vmatprep.subr.bf16.mxu1 %v619_v25 }
  0x2d   :  { %543 = vmatpush3.bf16.msra.mxu0 %v620_v26 }
  0x2e   :  { %565 = vmatpush3.bf16.msra.mxu1 %v621_v27  ;;  %544 = vmatprep.subr.bf16.mxu0 %v622_v28 }
  0x2f   :  { %566 = vmatprep.subr.bf16.mxu1 %v623_v29 }
  0x31   :  { %545 = vmatpush3.bf16.msra.mxu0 %v624_v30 }
  0x32   :  { %567 = vmatpush3.bf16.msra.mxu1 %v625_v31  ;;  %579 = vmatprep.subr.bf16.mxu0 %v660_v39 }
  0x34   :  { %378 = vmatmul.mubr.bf16.vlgmr.msra.gmra.mrb[0].mxu0 %v487_v34 }
  0x35   :  { %418 = vmatmul.mubr.bf16.vlgmr.msra.gmra.mrb[0].mxu1 %v489_v36  ;;  %580 = vmatpush3.bf16.msra.mxu0 %v630_v38 }
  0x36   :  { %587 = vmatprep.mubr.msk.bf16.mxu0 %vm661_vm0, %v660_v39  ;;  %581 = vmatprep.subr.bf16.mxu0 %v660_v39 }
  0x39   :  { %582 = vmatpush3.bf16.msra.mxu0 %v631_v40 }
  0x3a   :  { %583 = vmatprep.subr.bf16.mxu0 %v660_v39 }
  0x3d   :  { %584 = vmatpush3.bf16.msra.mxu0 %v632_v41 }
  0x3e   :  { %585 = vmatprep.subr.bf16.mxu0 %v660_v39 }
  0x41   :  { %586 = vmatpush3.bf16.msra.mxu0 %v633_v42 }
  0x44   :  { %588 = vmatmul.mubr.msk.bf16.vlgmr.msra.gmra.mrb[4].mxu0 %vm341_vm1, %v634_v43 }
 0x107   :  { %v546_v44 = vpop.f32.mrb[0].mxu0 }
 0x108   :  { %v568_v45 = vpop.f32.mrb[0].mxu1  ;;  %v547_v46 = vpop.f32.mrb[1].mxu0 }
 0x109   :  { %v569_v47 = vpop.f32.mrb[1].mxu1  ;;  %v548_v48 = vadd.f32 %v547_v46, %v546_v44  ;;  %v549_v50 = vpop.f32.mrb[2].mxu0 }
 0x10a   :  { %v570_v49 = vadd.f32 %v569_v47, %v568_v45  ;;  %v571_v51 = vpop.f32.mrb[2].mxu1  ;;  %v550_v52 = vpop.f32.mrb[3].mxu0 }
 0x10b   :  { %v572_v53 = vpop.f32.mrb[3].mxu1 }
 0x10c   :  { %v420_v54 = vadd.f32 %v570_v49, %v548_v48 }
 0x117   :  { %v459_v55 = vpop.f32.mrb[4].mxu0 }
 0x118   :  { %v460_v57 = vadd.f32 %v459_v55, %v420_v54  ;;  %v589_v58 = vpop.f32.mrb[5].mxu0 }
 0x119   :  { %v462_v59 = vpop.f32.mrb[6].mxu0 }
 0x11a   :  { %v478_v60 = vadd.f32 %v529_v56, %v460_v57  ;;  %v590_v61 = vpop.f32.mrb[7].mxu0 }
 0x11c   :  { %v479_v62 = vmax.f32 %v478_v60, 0.0 }
 0x11e   :  { %v480_v63 = vpack.c.bf16 %v479_v62, %v479_v62 }
 0x120   :  { %481 = vst [vmem:[%s817_s3] sm:$0xf] %v480_v63 }
 0x121   :  { %486 = vsyncpa [#allocation4], 1 }

// kernel: custom_model_forward.33
= control target key start
LH: loop header
LB: loop body
LE: loop exit
PB: predicated region body
PF: predicated region fallthrough
CT: control target
= control target key end

     0   :  { %8 = vsyncpa [#allocation4], 0  ;;  %s984_s0 = inlined_call_operand.vmem [shape: bf16[2,128], index: 0, kind: input, shape index: {}]   ;;  %s985_s1 = inlined_call_operand.hbm [shape: bf16[128,256], index: 1, kind: input, shape index: {}]   ;;  %s986_s2 = inlined_call_operand.hbm [shape: f32[1,256], index: 2, kind: input, shape index: {}]   ;;  %s987_s3 = inlined_call_operand.vmem [shape: bf16[2,256], index: 3, kind: output, shape index: {}]  }
   0x1   :  { %10 = vsyncpa [#allocation4 + $0x1], 0 }
   0x2   :  { %11 = vsyncpa [#allocation6], 0 }
   0x3   :  { %13 = vsyncpa [#allocation6 + $0x1], 0  ;;  %s797_s12 = smov 0   ;;  %s799_s13 = smov 0  }
   0x4   :  { %s801_s14 = smov 0   ;;  %s803_s15 = smov 0  }
   0x5   :  { %s805_s16 = smov 0   ;;  %s807_s17 = smov 0  }
   0x6 LB: > { %s531_s18 = sadd.s32 4294967295, %s768_s17   ;;  %s34_s19 = sadd.s32 1, %s764_s16  ;;  %s768_s17 = sphi %s807_s17, %s19_s17   ;;  %s764_s16 = sphi %s805_s16, %s1000_s16   ;;  %s760_s15 = sphi %s803_s15, %s999_s15   ;;  %s756_s14 = sphi %s801_s14, %s998_s14   ;;  %s752_s13 = sphi %s799_s13, %s997_s13   ;;  %s748_s12 = sphi %s797_s12, %s996_s12  }
   0x7   : > { %p36_p0 = scmp.ge.s32.totalorder %s34_s19, 2  ;;  %s75_s20 = sadd.s32 1, %s756_s14 }
   0x8   : > { %p82_p1 = scmp.ne.s32.totalorder %s756_s14, %s752_s13  ;;  %p83_p2 = scmp.eq.s32.totalorder %s768_s17, 0 }
   0x9   : > { %s1002_s19 = smov (%p36_p0, %s34_s19), 0  ;;  %p88_p4 = scmp.ne.s32.totalorder %s752_s13, %s748_s12 }
   0xa   : > { %p833_p3 = por %p83_p2, %p82_p1  ;;  %s71_s22 = ssub.s32 %s764_s16, %s1002_s19 }
   0xb   : > { %p89_p5 = scmp.eq.s32.totalorder %s531_s18, 0  ;;  %p73_p6 = scmp.eq.s32.totalorder %s71_s22, 0 }
   0xc   : > { %p592_p8 = scmp.lt.s32.totalorder %s768_s17, 2  ;;  %s849_s25 = sand.u32 1, %s756_s14  }
   0xd   : > { %p840_p7 = por %p89_p5, %p88_p4  ;;  %s537_s26 = sshll.u32 %s764_s16, 6 }
   0xe   : > { %s846_s24 = scalar_select %p73_p6, %s756_s14, %s75_s20  }
   0xf   : > { %s990_s23 = scalar_select %p840_p7, 1, 0 }
  0x10   : > { %s536_s27 = sshll.u32 %s849_s25, 6  ;;  %s856_s30 = scalar_lea.hbm %s985_s1, %s537_s26 }
  0x11   : > { %s179_s4 = scalar_lea.vmem [#allocation3], %s536_s27  ;;  %p860_p9 = pnand %p592_p8, %p833_p3 }
  0x12   : > { %s188_s5 = sshll.u32 %s179_s4, 4  ;;  %s176_s7 = scalar_lea.sflag [#allocation4], %s849_s25  ;;  %s864_s5 = int_to_ptr.vmem [resolvable:$true] %s188_s5 }
  0x13   : > { %s654_s8 = scalar_lea.hbm %s856_s30, 1024  ;;  %p656_p12 = pneg %p860_p9 }
  0x14   : > { %p655_p11 = scmp.ne.s32.totalorder %s856_s30, %s654_s8  ;;  %s659_s11 = scalar_lea.hbm %s985_s1, 2048 }
  0x15   : > { %p660_p1 = scmp.lt.u32.totalorder %s856_s30, %s985_s1  ;;  %p661_p2 = scmp.lt.u32.totalorder %s659_s11, %s654_s8 }
  0x16   : > { %p657_p13 = pnand %p656_p12, %p655_p11  ;;  %p663_p4 = scmp.lt.u32.totalorder %s654_s8, %s856_s30 }
  0x17   : > { %p662_p3 = por %p661_p2, %p660_p1 }
  0x18   : > { %p658_p0 = pneg %p657_p13 }
  0x19   : > { %p664_p5 = por %p663_p4, %p662_p3 }
  0x1b   : > { %p665_p6 = pnand %p664_p5, %p658_p0 }
  0x1d   : > { %668 = shalt.err (!%p665_p6)
}
  0x1e   : > { %s669_s20 = scalar_lea.vmem %s864_s5, 1024  ;;  %s770_s21 = smov [#allocation3]  }
  0x1f   : > { %p670_p8 = scmp.ne.s32.totalorder %s864_s5, %s669_s20  ;;  %s674_s22 = sshll.u32 %s770_s21, 4  ;;  %s675_s22 = int_to_ptr.vmem [resolvable:$false] %s674_s22 }
  0x20   : > { %s676_s26 = scalar_lea.vmem %s675_s22, 2048  ;;  %p677_p10 = scmp.lt.s32.totalorder %s864_s5, %s675_s22 }
  0x21   : > { %p672_p11 = pnand %p670_p8, %p656_p12  ;;  %p678_p1 = scmp.lt.s32.totalorder %s676_s26, %s669_s20 }
  0x23   : > { %p673_p13 = pneg %p672_p11  ;;  %p679_p2 = por %p678_p1, %p677_p10 }
  0x25   : > { %p680_p3 = pnand %p679_p2, %p673_p13 }
  0x27   : > { %683 = shalt.err (!%p680_p3)
}
  0x28   : > { %s771_s27 = smov 128   ;;  %s772_s28 = smov 64  }
  0x29   : > { %s773_s29 = smov 4   ;;  %p213_p0 = scmp.lt.s32.totalorder %s768_s17, 3 }
  0x2a   : > { %588 = dma.hbm_to_vmem [thread:$0]  (!%p860_p9), %s856_s30, 1024, %s864_s5, %s176_s7, %s771_s27, %s772_s28, %s773_s29  }
  0x2b   : > { %s538_s4 = sshll.u32 %s764_s16, 4  ;;  %p992_p10 = scmp.ge.s32.totalorder %s768_s17, 1 }
  0x2c   : > { %s906_s11 = scalar_lea.hbm %s986_s2, %s538_s4  ;;  %s201_s12 = scalar_lea.vmem [#allocation5], %s849_s25 }
  0x2d   : > { %p899_p4 = pnand %p992_p10, %p213_p0  ;;  %s208_s18 = sshll.u32 %s201_s12, 4  ;;  %s209_s18 = int_to_ptr.vmem [resolvable:$true] %s208_s18 }
  0x2e   : > { %s199_s30 = scalar_lea.sflag [#allocation6], %s849_s25  ;;  %s684_s5 = scalar_lea.hbm %s906_s11, 16 }
  0x2f   : > { %s993_s8 = scalar_select %p899_p4, 1, 0 }
  0x30   : > { %p685_p5 = scmp.ne.s32.totalorder %s906_s11, %s684_s5  ;;  %s689_s21 = scalar_lea.hbm %s986_s2, 32 }
  0x31   : > { %p690_p11 = scmp.lt.u32.totalorder %s906_s11, %s986_s2  ;;  %p691_p13 = scmp.lt.u32.totalorder %s689_s21, %s684_s5 }
  0x32   : > { %p687_p6 = pnand %p685_p5, %p656_p12  ;;  %p693_p2 = scmp.lt.u32.totalorder %s684_s5, %s906_s11 }
  0x33   : > { %p692_p1 = por %p691_p13, %p690_p11 }
  0x34   : > { %p688_p8 = pneg %p687_p6 }
  0x35   : > { %p694_p3 = por %p693_p2, %p692_p1 }
  0x37   : > { %p695_p0 = pnand %p694_p3, %p688_p8 }
  0x39   : > { %698 = shalt.err (!%p695_p0)
}
  0x3a   : > { %s699_s25 = scalar_lea.vmem %s209_s18, 16  ;;  %s774_s27 = smov [#allocation5]  }
  0x3b   : > { %p700_p10 = scmp.ne.s32.totalorder %s209_s18, %s699_s25  ;;  %s704_s28 = sshll.u32 %s774_s27, 4  ;;  %s705_s28 = int_to_ptr.vmem [resolvable:$false] %s704_s28 }
  0x3c   : > { %s706_s29 = scalar_lea.vmem %s705_s28, 32  ;;  %p707_p7 = scmp.lt.s32.totalorder %s209_s18, %s705_s28 }
  0x3d   : > { %p702_p5 = pnand %p700_p10, %p656_p12  ;;  %p708_p4 = scmp.lt.s32.totalorder %s706_s29, %s699_s25 }
  0x3f   : > { %p703_p6 = pneg %p702_p5  ;;  %p709_p11 = por %p708_p4, %p707_p7 }
  0x41   : > { %p710_p13 = pnand %p709_p11, %p703_p6 }
  0x43   : > { %713 = shalt.err (!%p710_p13)
}
  0x44   : > { %591 = dma.hbm_to_vmem [thread:$0]  (!%p860_p9), %s906_s11, 16, %s209_s18, %s199_s30  }
  0x45   : > { %p994_p8 = scmp.ne.s32.totalorder %s993_s8, 0 }
  0x46   : > { %s932_s4 = sand.u32 (!%p994_p8), 1, %s752_s13   ;;  %p995_p7 = scmp.ne.s32.totalorder (!%p994_p8), %s990_s23, 0 }
  0x47   : > { %217 = sbr.rel (%p994_p8) target bundleno = 341 (0x155), region = 32  ;;  %s540_s9 = sshll.u32 (!%p994_p8), %s932_s4, 6 }
  0x48   : > { %s220_s10 = scalar_lea.sflag (!%p994_p8), [#allocation4], %s932_s4  ;;  %s936_s12 = scalar_lea.vmem (!%p994_p8), [#allocation3], %s540_s9 }
  0x4e   : > { %739 = dma.done.wait (%p995_p7), %s220_s10, 1024  }
  0x4f   : > { %741 = vsyncadd (%p995_p7), %s220_s10, 4294966272  ;;  %s229_s6 = scalar_lea.sflag [#allocation6], %s932_s4  ;;  %s231_s8 = scalar_lea.vmem [#allocation5], %s932_s4 }
  0x50   : > { %743 = dma.done.wait (%p995_p7), %s229_s6, 16  }
  0x51   : > { %745 = vsyncadd (%p995_p7), %s229_s6, 4294967280  ;;  %v775_v0 = vmov 0.0   ;;  %vm776_vm0 = vmmov 0   ;;  %v646_v1 = vld [vmem:[%s936_s12] sm:$0xff]   ;;  %v647_v2 = vld [vmem:[%s936_s12 + $0x8] sm:$0xff]   ;;  %p275_p9 = scmp.lt.s32.totalorder %s760_s15, 1 }
  0x52   : > { %561 = vmatprep.subr.bf16.mxu0 %v775_v0  ;;  %285 = vst [vmem:[#allocation2] sm:$0x3] %v775_v0  ;;  %577 = vmatprep.mubr.msk.bf16.mxu0 %vm776_vm0, %v775_v0  ;;  %v648_v3 = vld [vmem:[%s936_s12 + $0x10] sm:$0xff]   ;;  %v649_v4 = vld [vmem:[%s936_s12 + $0x18] sm:$0xff]   ;;  %v650_v5 = vld [vmem:[%s936_s12 + $0x20] sm:$0xff]  }
  0x53   : > { %562 = vmatpush3.bf16.msra.mxu0 %v646_v1  ;;  %v651_v6 = vld [vmem:[%s936_s12 + $0x28] sm:$0xff]   ;;  %v652_v7 = vld [vmem:[%s936_s12 + $0x30] sm:$0xff]   ;;  %v653_v8 = vld [vmem:[%s936_s12 + $0x38] sm:$0xff]   ;;  %s1004_s15 = smov (!%p275_p9, %s760_s15), 1 }
  0x54   : > { %563 = vmatprep.subr.bf16.mxu0 %v775_v0  ;;  %v287_v9 = vld [vmem:[%s984_s0] sm:$0x1]  ;;  %s279_s5 = scalar_lea.vmem %s987_s3, %s1004_s15 }
  0x55   : > { %v549_v16 = vld [vmem:[%s231_s8] ss:$0 sm:$0xff] }
  0x57   : > { %564 = vmatpush3.bf16.msra.mxu0 %v647_v2 }
  0x58   : > { %565 = vmatprep.subr.bf16.mxu0 %v775_v0 }
  0x59   : > { %v286_v10 = vld [vmem:[#allocation2] sm:$0x3] }
  0x5b   : > { %566 = vmatpush3.bf16.msra.mxu0 %v648_v3 }
  0x5c   : > { %567 = vmatprep.subr.bf16.mxu0 %v775_v0 }
  0x5f   : > { %568 = vmatpush3.bf16.msra.mxu0 %v649_v4 }
  0x60   : > { %569 = vmatprep.subr.bf16.mxu0 %v775_v0 }
  0x63   : > { %570 = vmatpush3.bf16.msra.mxu0 %v650_v5 }
  0x64   : > { %571 = vmatprep.subr.bf16.mxu0 %v775_v0 }
  0x67   : > { %572 = vmatpush3.bf16.msra.mxu0 %v651_v6 }
  0x68   : > { %573 = vmatprep.subr.bf16.mxu0 %v775_v0 }
  0x6b   : > { %574 = vmatpush3.bf16.msra.mxu0 %v652_v7 }
  0x6c   : > { %575 = vmatprep.subr.bf16.mxu0 %v775_v0 }
  0x6f   : > { %576 = vmatpush3.bf16.msra.mxu0 %v653_v8 }
  0x72   : > { %578 = vmatmul.mubr.bf16.vlgmr.msra.gmra.mrb[0].mxu0 %v287_v9 }
 0x145   : > { %v386_v11 = vpop.f32.mrb[0].mxu0 }
 0x146   : > { %v392_v12 = vadd.f32 %v386_v11, %v286_v10  ;;  %v579_v13 = vpop.f32.mrb[1].mxu0 }
 0x147   : > { %v389_v14 = vpop.f32.mrb[2].mxu0 }
 0x148   : > { %393 = vst [vmem:[#allocation2] sm:$0x3] %v392_v12  ;;  %v580_v15 = vpop.f32.mrb[3].mxu0 }
 0x14f   : > { %v397_v17 = vld [vmem:[#allocation2] sm:$0x3] }
 0x150   : > { %v405_v18 = vadd.f32 %v549_v16, %v397_v17 }
 0x152   : > { %v406_v19 = vpack.c.bf16 %v405_v18, %v405_v18 }
 0x154   : > { %407 = vst [vmem:[%s279_s5] sm:$0x1] %v406_v19 }
 0x155 PF: > { %s19_s17 = sadd.s32 1, %s768_s17   ;;  %s996_s12 = smov %s752_s13 }
 0x156   : > { %p16_p12 = scmp.ge.s32.totalorder %s19_s17, 4   ;;  %s997_s13 = smov %s756_s14 }
 0x157   : > { %s998_s14 = smov %s846_s24  ;;  %s999_s15 = smov %s764_s16 }
 0x158   : > { %s1000_s16 = smov %s1002_s19  ;;  %18 = sbr.rel (!%p16_p12) target bundleno = 6 (0x6), region = 96 }
 0x15f   :  { %433 = vsyncpa [#allocation4], 1 }
 0x160   :  { %435 = vsyncpa [#allocation4 + $0x1], 1 }
 0x161   :  { %436 = vsyncpa [#allocation6], 1 }
 0x162   :  { %438 = vsyncpa [#allocation6 + $0x1], 1 }

// kernel: custom_model_forward.32
= control target key start
LH: loop header
LB: loop body
LE: loop exit
PB: predicated region body
PF: predicated region fallthrough
CT: control target
= control target key end

     0   :  { %8 = vsyncpa [#allocation5], 0  ;;  %s1599_s0 = inlined_call_operand.vmem [shape: bf16[2,1152], index: 0, kind: input, shape index: {}]   ;;  %s1600_s1 = inlined_call_operand.vmem [shape: bf16[1152,256], index: 1, kind: input, shape index: {}]   ;;  %s1601_s2 = inlined_call_operand.hbm [shape: f32[1,256], index: 2, kind: input, shape index: {}]   ;;  %s1602_s3 = inlined_call_operand.vmem [shape: bf16[2,256], index: 3, kind: output, shape index: {}]  }
   0x1   :  { %10 = vsyncpa [#allocation5 + $0x1], 0  ;;  %s1283_s12 = smov 0   ;;  %s1285_s13 = smov 0  }
   0x2   :  { %s1287_s14 = smov 0   ;;  %s1289_s15 = smov 0  }
   0x3   :  { %s1291_s16 = smov 0   ;;  %s1293_s17 = smov 0  }
   0x4   :  { %s1295_s18 = smov 0   ;;  %s1297_s19 = smov 0  }
   0x5   :  { %s1299_s20 = smov 0   ;;  %s1301_s21 = smov 0  }
   0x6 LB: > { %s944_s22 = sadd.s32 4294967295, %s1256_s21   ;;  %s28_s23 = sadd.s32 1, %s1248_s19  ;;  %s1256_s21 = sphi %s1301_s21, %s16_s21   ;;  %s1252_s20 = sphi %s1299_s20, %s1616_s20   ;;  %s1248_s19 = sphi %s1297_s19, %s1615_s19   ;;  %s1244_s18 = sphi %s1295_s18, %s1614_s18   ;;  %s1240_s17 = sphi %s1293_s17, %s1613_s17   ;;  %s1236_s16 = sphi %s1291_s16, %s1612_s16   ;;  %s1232_s15 = sphi %s1289_s15, %s1611_s15   ;;  %s1228_s14 = sphi %s1287_s14, %s1610_s14   ;;  %s1224_s13 = sphi %s1285_s13, %s1609_s13   ;;  %s1220_s12 = sphi %s1283_s12, %s1608_s12  }
   0x7   : > { %p29_p0 = scmp.ge.s32.totalorder %s28_s23, 3  ;;  %s31_s24 = sadd.s32 1, %s1252_s20 }
   0x8   : > { %s72_s25 = sadd.s32 1, %s1236_s16  ;;  %p79_p1 = scmp.ne.s32.totalorder %s1236_s16, %s1232_s15 }
   0x9   : > { %s1618_s23 = smov (%p29_p0, %s28_s23), 0  ;;  %s1620_s24 = smov (!%p29_p0, %s31_s24), %s1252_s20 }
   0xa   : > { %s67_s26 = ssub.s32 %s1248_s19, %s1618_s23  ;;  %p80_p2 = scmp.eq.s32.totalorder %s1256_s21, 0 }
   0xb   : > { %p33_p3 = scmp.ge.s32.totalorder %s1620_s24, 2  ;;  %s98_s27 = sadd.s32 1, %s1228_s14 }
   0xc   : > { %p1346_p4 = por %p80_p2, %p79_p1  ;;  %p105_p5 = scmp.ne.s32.totalorder %s1228_s14, %s1224_s13 }
   0xd   : > { %s1622_s24 = smov (%p33_p3, %s1620_s24), 0  ;;  %p111_p7 = scmp.ne.s32.totalorder %s1224_s13, %s1220_s12 }
   0xe   : > { %p1354_p6 = por %p105_p5, %p80_p2  ;;  %s68_s30 = ssub.s32 %s1252_s20, %s1622_s24 }
   0xf   : > { %p112_p8 = scmp.eq.s32.totalorder %s944_s22, 0  ;;  %s69_s4 = sor.u32 %s68_s30, %s67_s26 }
  0x10   : > { %p96_p9 = scmp.eq.s32.totalorder %s68_s30, 0  ;;  %p70_p10 = scmp.eq.s32.totalorder %s69_s4, 0 }
  0x11   : > { %p1362_p11 = por %p112_p8, %p111_p7  ;;  %p947_p12 = scmp.ge.s32.totalorder %s1256_s21, 6 }
  0x12   : > { %s1367_s6 = scalar_select %p96_p9, %s1228_s14, %s98_s27  }
  0x13   : > { %s1606_s5 = scalar_select %p1362_p11, 1, 0 }
  0x14   : > { %s1370_s7 = scalar_select %p70_p10, %s1236_s16, %s72_s25  }
  0x15   : > { %159 = sbr.rel (%p947_p12) target bundleno = 92 (0x5c), region = 16 }
  0x1c   : > { %174 = sbr.rel (!%p1346_p4) target bundleno = 67 (0x43), region = 24  ;;  %s176_s8 = sand.u32 (%p1346_p4), 1, %s1236_s16  }
  0x1d   : > { %s982_s9 = smul.u32 (%p1346_p4), 96, %s1248_s19 }
  0x1e   : > { %s1034_s10 = smul.u32 (%p1346_p4), 192, %s176_s8 }
  0x1f   : > { %s181_s11 = sadd.s32 (%p1346_p4), %s1252_s20, %s982_s9 }
  0x20   : > { %s949_s12 = sshll.u32 (%p1346_p4), %s181_s11, 2  ;;  %s1386_s25 = scalar_lea.vmem (%p1346_p4), [#allocation3], %s1034_s10 }
  0x21   : > { %s1381_s27 = scalar_lea.vmem (%p1346_p4), %s1600_s1, %s949_s12 }
  0x22   : > { %v199_v0 = vld [vmem:[%s1381_s27] sm:$0xf] (%p1346_p4)  ;;  %v201_v1 = vld [vmem:[%s1381_s27 + $0x8] sm:$0xf] (%p1346_p4)  ;;  %v203_v2 = vld [vmem:[%s1381_s27 + $0x10] sm:$0xf] (%p1346_p4) }
  0x23   : > { %200 = vst [vmem:[%s1386_s25] sm:$0xf] %v199_v0  ;;  %202 = vst [vmem:[%s1386_s25 + $0x4] sm:$0xf] %v201_v1  ;;  %v205_v3 = vld [vmem:[%s1381_s27 + $0x18] sm:$0xf] }
  0x24   : > { %204 = vst [vmem:[%s1386_s25 + $0x8] sm:$0xf] %v203_v2  ;;  %v207_v4 = vld [vmem:[%s1381_s27 + $0x20] sm:$0xf]  ;;  %v209_v5 = vld [vmem:[%s1381_s27 + $0x28] sm:$0xf] }
  0x25   : > { %206 = vst [vmem:[%s1386_s25 + $0xc] sm:$0xf] %v205_v3  ;;  %208 = vst [vmem:[%s1386_s25 + $0x10] sm:$0xf] %v207_v4  ;;  %v211_v6 = vld [vmem:[%s1381_s27 + $0x30] sm:$0xf] }
  0x26   : > { %210 = vst [vmem:[%s1386_s25 + $0x14] sm:$0xf] %v209_v5  ;;  %v213_v7 = vld [vmem:[%s1381_s27 + $0x38] sm:$0xf]  ;;  %v215_v8 = vld [vmem:[%s1381_s27 + $0x40] sm:$0xf] }
  0x27   : > { %212 = vst [vmem:[%s1386_s25 + $0x18] sm:$0xf] %v211_v6  ;;  %214 = vst [vmem:[%s1386_s25 + $0x1c] sm:$0xf] %v213_v7  ;;  %v217_v9 = vld [vmem:[%s1381_s27 + $0x48] sm:$0xf] }
  0x28   : > { %216 = vst [vmem:[%s1386_s25 + $0x20] sm:$0xf] %v215_v8  ;;  %v219_v10 = vld [vmem:[%s1381_s27 + $0x50] sm:$0xf]  ;;  %v221_v11 = vld [vmem:[%s1381_s27 + $0x58] sm:$0xf] }
  0x29   : > { %218 = vst [vmem:[%s1386_s25 + $0x24] sm:$0xf] %v217_v9  ;;  %220 = vst [vmem:[%s1386_s25 + $0x28] sm:$0xf] %v219_v10  ;;  %v223_v12 = vld [vmem:[%s1381_s27 + $0x60] sm:$0xf] }
  0x2a   : > { %222 = vst [vmem:[%s1386_s25 + $0x2c] sm:$0xf] %v221_v11  ;;  %v225_v13 = vld [vmem:[%s1381_s27 + $0x68] sm:$0xf]  ;;  %v227_v14 = vld [vmem:[%s1381_s27 + $0x70] sm:$0xf] }
  0x2b   : > { %224 = vst [vmem:[%s1386_s25 + $0x30] sm:$0xf] %v223_v12  ;;  %226 = vst [vmem:[%s1386_s25 + $0x34] sm:$0xf] %v225_v13  ;;  %v229_v15 = vld [vmem:[%s1381_s27 + $0x78] sm:$0xf] }
  0x2c   : > { %228 = vst [vmem:[%s1386_s25 + $0x38] sm:$0xf] %v227_v14  ;;  %v231_v16 = vld [vmem:[%s1381_s27 + $0x80] sm:$0xf]  ;;  %v233_v17 = vld [vmem:[%s1381_s27 + $0x88] sm:$0xf] }
  0x2d   : > { %230 = vst [vmem:[%s1386_s25 + $0x3c] sm:$0xf] %v229_v15  ;;  %232 = vst [vmem:[%s1386_s25 + $0x40] sm:$0xf] %v231_v16  ;;  %v235_v18 = vld [vmem:[%s1381_s27 + $0x90] sm:$0xf] }
  0x2e   : > { %234 = vst [vmem:[%s1386_s25 + $0x44] sm:$0xf] %v233_v17  ;;  %v237_v19 = vld [vmem:[%s1381_s27 + $0x98] sm:$0xf]  ;;  %v239_v20 = vld [vmem:[%s1381_s27 + $0xa0] sm:$0xf] }
  0x2f   : > { %236 = vst [vmem:[%s1386_s25 + $0x48] sm:$0xf] %v235_v18  ;;  %238 = vst [vmem:[%s1386_s25 + $0x4c] sm:$0xf] %v237_v19  ;;  %v241_v21 = vld [vmem:[%s1381_s27 + $0xa8] sm:$0xf] }
  0x30   : > { %240 = vst [vmem:[%s1386_s25 + $0x50] sm:$0xf] %v239_v20  ;;  %v243_v22 = vld [vmem:[%s1381_s27 + $0xb0] sm:$0xf]  ;;  %v245_v23 = vld [vmem:[%s1381_s27 + $0xb8] sm:$0xf] }
  0x31   : > { %242 = vst [vmem:[%s1386_s25 + $0x54] sm:$0xf] %v241_v21  ;;  %244 = vst [vmem:[%s1386_s25 + $0x58] sm:$0xf] %v243_v22  ;;  %v247_v24 = vld [vmem:[%s1381_s27 + $0xc0] sm:$0xf] }
  0x32   : > { %246 = vst [vmem:[%s1386_s25 + $0x5c] sm:$0xf] %v245_v23  ;;  %v249_v25 = vld [vmem:[%s1381_s27 + $0xc8] sm:$0xf]  ;;  %v251_v26 = vld [vmem:[%s1381_s27 + $0xd0] sm:$0xf] }
  0x33   : > { %248 = vst [vmem:[%s1386_s25 + $0x60] sm:$0xf] %v247_v24  ;;  %250 = vst [vmem:[%s1386_s25 + $0x64] sm:$0xf] %v249_v25  ;;  %v253_v27 = vld [vmem:[%s1381_s27 + $0xd8] sm:$0xf] }
  0x34   : > { %252 = vst [vmem:[%s1386_s25 + $0x68] sm:$0xf] %v251_v26  ;;  %v255_v28 = vld [vmem:[%s1381_s27 + $0xe0] sm:$0xf]  ;;  %v257_v29 = vld [vmem:[%s1381_s27 + $0xe8] sm:$0xf] }
  0x35   : > { %254 = vst [vmem:[%s1386_s25 + $0x6c] sm:$0xf] %v253_v27  ;;  %256 = vst [vmem:[%s1386_s25 + $0x70] sm:$0xf] %v255_v28  ;;  %v259_v30 = vld [vmem:[%s1381_s27 + $0xf0] sm:$0xf] }
  0x36   : > { %258 = vst [vmem:[%s1386_s25 + $0x74] sm:$0xf] %v257_v29  ;;  %v261_v31 = vld [vmem:[%s1381_s27 + $0xf8] sm:$0xf]  ;;  %v263_v32 = vld [vmem:[%s1381_s27 + $0x100] sm:$0xf] }
  0x37   : > { %260 = vst [vmem:[%s1386_s25 + $0x78] sm:$0xf] %v259_v30  ;;  %262 = vst [vmem:[%s1386_s25 + $0x7c] sm:$0xf] %v261_v31  ;;  %v265_v33 = vld [vmem:[%s1381_s27 + $0x108] sm:$0xf] }
  0x38   : > { %264 = vst [vmem:[%s1386_s25 + $0x80] sm:$0xf] %v263_v32  ;;  %v267_v34 = vld [vmem:[%s1381_s27 + $0x110] sm:$0xf]  ;;  %v269_v35 = vld [vmem:[%s1381_s27 + $0x118] sm:$0xf] }
  0x39   : > { %266 = vst [vmem:[%s1386_s25 + $0x84] sm:$0xf] %v265_v33  ;;  %268 = vst [vmem:[%s1386_s25 + $0x88] sm:$0xf] %v267_v34  ;;  %v271_v36 = vld [vmem:[%s1381_s27 + $0x120] sm:$0xf] }
  0x3a   : > { %270 = vst [vmem:[%s1386_s25 + $0x8c] sm:$0xf] %v269_v35  ;;  %v273_v37 = vld [vmem:[%s1381_s27 + $0x128] sm:$0xf]  ;;  %v275_v38 = vld [vmem:[%s1381_s27 + $0x130] sm:$0xf] }
  0x3b   : > { %272 = vst [vmem:[%s1386_s25 + $0x90] sm:$0xf] %v271_v36  ;;  %274 = vst [vmem:[%s1386_s25 + $0x94] sm:$0xf] %v273_v37  ;;  %v277_v39 = vld [vmem:[%s1381_s27 + $0x138] sm:$0xf] }
  0x3c   : > { %276 = vst [vmem:[%s1386_s25 + $0x98] sm:$0xf] %v275_v38  ;;  %v279_v40 = vld [vmem:[%s1381_s27 + $0x140] sm:$0xf]  ;;  %v281_v41 = vld [vmem:[%s1381_s27 + $0x148] sm:$0xf] }
  0x3d   : > { %278 = vst [vmem:[%s1386_s25 + $0x9c] sm:$0xf] %v277_v39  ;;  %280 = vst [vmem:[%s1386_s25 + $0xa0] sm:$0xf] %v279_v40  ;;  %v283_v42 = vld [vmem:[%s1381_s27 + $0x150] sm:$0xf] }
  0x3e   : > { %282 = vst [vmem:[%s1386_s25 + $0xa4] sm:$0xf] %v281_v41  ;;  %v285_v43 = vld [vmem:[%s1381_s27 + $0x158] sm:$0xf]  ;;  %v287_v44 = vld [vmem:[%s1381_s27 + $0x160] sm:$0xf] }
  0x3f   : > { %284 = vst [vmem:[%s1386_s25 + $0xa8] sm:$0xf] %v283_v42  ;;  %286 = vst [vmem:[%s1386_s25 + $0xac] sm:$0xf] %v285_v43  ;;  %v289_v45 = vld [vmem:[%s1381_s27 + $0x168] sm:$0xf] }
  0x40   : > { %288 = vst [vmem:[%s1386_s25 + $0xb0] sm:$0xf] %v287_v44  ;;  %v291_v46 = vld [vmem:[%s1381_s27 + $0x170] sm:$0xf]  ;;  %v293_v47 = vld [vmem:[%s1381_s27 + $0x178] sm:$0xf] }
  0x41   : > { %290 = vst [vmem:[%s1386_s25 + $0xb4] sm:$0xf] %v289_v45  ;;  %292 = vst [vmem:[%s1386_s25 + $0xb8] sm:$0xf] %v291_v46 }
  0x42   : > { %294 = vst [vmem:[%s1386_s25 + $0xbc] sm:$0xf] %v293_v47 }
  0x43 PF: > { %s414_s28 = sand.u32 1, %s1228_s14   ;;  %s950_s30 = sshll.u32 %s1252_s20, 4 }
  0x44   : > { %s1486_s9 = scalar_lea.hbm %s1601_s2, %s950_s30  ;;  %s417_s10 = scalar_lea.vmem [#allocation4], %s414_s28 }
  0x45   : > { %s424_s11 = sshll.u32 %s417_s10, 4  ;;  %s415_s12 = scalar_lea.sflag [#allocation5], %s414_s28  ;;  %s425_s11 = int_to_ptr.vmem [resolvable:$true] %s424_s11 }
  0x46   : > { %s1146_s22 = scalar_lea.hbm %s1486_s9, 16  ;;  %s1150_s25 = scalar_lea.hbm %s1601_s2, 32 }
  0x47   : > { %p1147_p13 = scmp.ne.s32.totalorder %s1486_s9, %s1146_s22  ;;  %p1151_p2 = scmp.lt.u32.totalorder %s1486_s9, %s1601_s2 }
  0x48   : > { %p1152_p3 = scmp.lt.u32.totalorder %s1150_s25, %s1146_s22  ;;  %p1154_p5 = scmp.lt.u32.totalorder %s1146_s22, %s1486_s9 }
  0x49   : > { %p1148_p0 = pnand %p1147_p13, %p1354_p6 }
  0x4a   : > { %p1153_p4 = por %p1152_p3, %p1151_p2 }
  0x4b   : > { %p1149_p1 = pneg %p1148_p0 }
  0x4c   : > { %p1155_p7 = por %p1154_p5, %p1153_p4 }
  0x4e   : > { %p1156_p8 = pnand %p1155_p7, %p1149_p1 }
  0x50   : > { %1159 = shalt.err (!%p1156_p8)
}
  0x51   : > { %s1160_s28 = scalar_lea.vmem %s425_s11, 16  ;;  %s1258_s8 = smov [#allocation4]  }
  0x52   : > { %p1161_p9 = scmp.ne.s32.totalorder %s425_s11, %s1160_s28  ;;  %s1164_s10 = sshll.u32 %s1258_s8, 4  ;;  %s1165_s10 = int_to_ptr.vmem [resolvable:$false] %s1164_s10 }
  0x53   : > { %s1166_s26 = scalar_lea.vmem %s1165_s10, 32  ;;  %p1167_p13 = scmp.lt.s32.totalorder %s425_s11, %s1165_s10 }
  0x54   : > { %p1162_p10 = pnand %p1161_p9, %p1354_p6  ;;  %p1168_p0 = scmp.lt.s32.totalorder %s1166_s26, %s1160_s28 }
  0x56   : > { %p1163_p12 = pneg %p1162_p10  ;;  %p1169_p11 = por %p1168_p0, %p1167_p13 }
  0x58   : > { %p1170_p2 = pnand %p1169_p11, %p1163_p12 }
  0x5a   : > { %1173 = shalt.err (!%p1170_p2)
}
  0x5b   : > { %1036 = dma.hbm_to_vmem [thread:$0]  (%p1354_p6), %s1486_s9, 16, %s425_s11, %s415_s12  }
  0x5c PF: > { %p951_p1 = scmp.ge.s32.totalorder %s1256_s21, 1  ;;  %p429_p3 = scmp.lt.s32.totalorder %s1256_s21, 7 }
  0x5e   : > { %p430_p4 = pnand %p951_p1, %p429_p3 }
  0x5f   : > { %s436_s22 = sand.u32 (!%p430_p4), 1, %s1232_s15   ;;  %s442_s27 = sand.u32 (!%p430_p4), 1, %s1224_s13  }
  0x60   : > { %433 = sbr.rel (%p430_p4) target bundleno = 381 (0x17d), region = 69  ;;  %s443_s30 = scalar_lea.sflag (!%p430_p4), [#allocation5], %s442_s27 }
  0x61   : > { %s1035_s25 = smul.u32 (!%p430_p4), 192, %s436_s22  ;;  %s1511_s28 = scalar_lea.vmem (!%p430_p4), [#allocation4], %s442_s27 }
  0x62   : > { %p1607_p11 = scmp.ne.s32.totalorder (!%p430_p4), %s1606_s5, 0 }
  0x63   : > { %s1509_s4 = scalar_lea.vmem (!%p430_p4), [#allocation3], %s1035_s25 }
  0x67   : > { %1215 = dma.done.wait (%p1607_p11), %s443_s30, 16  }
  0x68   : > { %1217 = vsyncadd (%p1607_p11), %s443_s30, 4294967280  ;;  %s481_s29 = smul.u32 3, %s1240_s17  ;;  %p493_p6 = scmp.lt.s32.totalorder %s1244_s18, 1 }
  0x69   : > { %p952_p7 = scmp.ne.s32.totalorder %s1240_s17, 0 }
  0x6a   : > { %p484_p5 = scmp.lt.s32.totalorder %s481_s29, 8  ;;  %s1624_s18 = smov (!%p493_p6, %s1244_s18), 1  ;;  %v1259_v48 = vmov (!%p952_p7), 0.0  }
  0x6b   : > { %s497_s11 = scalar_lea.vmem %s1602_s3, %s1624_s18  ;;  %502 = sbr.rel (%p952_p7) target bundleno = 114 (0x72), region = 81  ;;  %503 = vst [vmem:[#allocation2] sm:$0x3] (!%p952_p7), %v1259_v48 }
  0x6c   : > { %s1626_s29 = smov (!%p484_p5, %s481_s29), 8 }
  0x6d   : > { %s488_s5 = scalar_lea.vmem %s1599_s0, %s1626_s29 }
  0x72 PF: > { %v1122_v49 = vld [vmem:[%s1509_s4 + $0x40] sm:$0xff]   ;;  %v1260_v50 = vmov 0.0   ;;  %vm1261_vm0 = vmmov 0   ;;  %v1125_v53 = vld [vmem:[%s1509_s4 + $0x48] sm:$0xff]   ;;  %v1128_v56 = vld [vmem:[%s1509_s4 + $0x50] sm:$0xff]   ;;  %v566_v6 = vlaneseq  ;;  %p978_p8 = scmp.ne.s32.totalorder %s1240_s17, 2 }
  0x73   : > { %1014 = vmatprep.subr.bf16.mxu1 %v1260_v50  ;;  %v1123_v51 = vld [vmem:[%s1509_s4] sm:$0xff]   ;;  %983 = vmatprep.subr.bf16.mxu0 %v1122_v49  ;;  %v1126_v54 = vld [vmem:[%s1509_s4 + $0x8] sm:$0xff]   ;;  %v1129_v57 = vld [vmem:[%s1509_s4 + $0x10] sm:$0xff]   ;;  %v1262_v10 = vmov 1966171168  }
  0x74   : > { %v1124_v52 = vld [vmem:[%s1509_s4 + $0x80] sm:$0xff]   ;;  %1030 = vmatprep.mubr.msk.bf16.mxu1 %vm1261_vm0, %v1260_v50  ;;  %984 = vmatpush3.bf16.msra.mxu0 %v1123_v51  ;;  %v1127_v55 = vld [vmem:[%s1509_s4 + $0x88] sm:$0xff]   ;;  %v1130_v58 = vld [vmem:[%s1509_s4 + $0x90] sm:$0xff]   ;;  %v564_v11 = vunpack.c.l.s4 %v1262_v10  ;;  %v567_v12 = vshrl.u32 %v566_v6, 7 }
  0x75   : > { %1015 = vmatpush3.bf16.msra.mxu1 %v1124_v52  ;;  %985 = vmatprep.subr.bf16.mxu0 %v1125_v53  ;;  %v1131_v59 = vld [vmem:[%s1509_s4 + $0x58] sm:$0xff]   ;;  %v1134_v62 = vld [vmem:[%s1509_s4 + $0x60] sm:$0xff]   ;;  %v1137_v1 = vld [vmem:[%s1509_s4 + $0x68] sm:$0xff]  }
  0x76   : > { %1016 = vmatprep.subr.bf16.mxu1 %v1260_v50  ;;  %v1132_v60 = vld [vmem:[%s1509_s4 + $0x18] sm:$0xff]   ;;  %v1135_v63 = vld [vmem:[%s1509_s4 + $0x20] sm:$0xff]   ;;  %v1138_v2 = vld [vmem:[%s1509_s4 + $0x28] sm:$0xff]   ;;  %v565_v15 = vunpack.c.0.s8 %v564_v11 }
  0x77   : > { %v1133_v61 = vld [vmem:[%s1509_s4 + $0x98] sm:$0xff]   ;;  %v1136_v0 = vld [vmem:[%s1509_s4 + $0xa0] sm:$0xff]   ;;  %v1139_v3 = vld [vmem:[%s1509_s4 + $0xa8] sm:$0xff]  }
  0x78   : > { %986 = vmatpush3.bf16.msra.mxu0 %v1126_v54  ;;  %v1140_v4 = vld [vmem:[%s1509_s4 + $0x70] sm:$0xff]   ;;  %v1143_v8 = vld [vmem:[%s1509_s4 + $0x78] sm:$0xff]   ;;  %v568_v17 = vsub.s32 %v565_v15, %v567_v12 }
  0x79   : > { %1017 = vmatpush3.bf16.msra.mxu1 %v1127_v55  ;;  %987 = vmatprep.subr.bf16.mxu0 %v1128_v56  ;;  %v1141_v5 = vld [vmem:[%s1509_s4 + $0x30] sm:$0xff]   ;;  %v953_v9 = vld.sshfl [vmem:[%s488_s5] sm:$0x13 pattern:$0x75316420] }
  0x7a   : > { %1018 = vmatprep.subr.bf16.mxu1 %v1260_v50  ;;  %v1142_v7 = vld [vmem:[%s1509_s4 + $0xb0] sm:$0xff]   ;;  %v1144_v13 = vld [vmem:[%s1509_s4 + $0x38] sm:$0xff]   ;;  %v562_v14 = vcombine.high %v953_v9, %v953_v9  ;;  %v569_v19 = vrot.slane %v953_v9, %v568_v17 }
  0x7b   : > { %v1145_v16 = vld [vmem:[%s1509_s4 + $0xb8] sm:$0xff]  }
  0x7c   : > { %988 = vmatpush3.bf16.msra.mxu0 %v1129_v57  ;;  %v576_v18 = vrot.slane %v562_v14, %v568_v17  ;;  %v577_v20 = vcombine.high %v569_v19, %v569_v19  ;;  %v504_v27 = vld [vmem:[#allocation2] sm:$0x3] }
  0x7d   : > { %1019 = vmatpush3.bf16.msra.mxu1 %v1130_v58  ;;  %989 = vmatprep.subr.bf16.mxu0 %v1131_v59  ;;  %v979_v34 = vld [vmem:[%s1511_s28] ss:$0 sm:$0xff] (!%p978_p8) }
  0x7e   : > { %1020 = vmatprep.subr.bf16.mxu1 %v1260_v50  ;;  %757 = vmatprep.mubr.bf16.mxu0 %v576_v18 }
  0x80   : > { %990 = vmatpush3.bf16.msra.mxu0 %v1132_v60 }
  0x81   : > { %1021 = vmatpush3.bf16.msra.mxu1 %v1133_v61  ;;  %991 = vmatprep.subr.bf16.mxu0 %v1134_v62 }
  0x82   : > { %1022 = vmatprep.subr.bf16.mxu1 %v1260_v50 }
  0x84   : > { %992 = vmatpush3.bf16.msra.mxu0 %v1135_v63 }
  0x85   : > { %1023 = vmatpush3.bf16.msra.mxu1 %v1136_v0  ;;  %993 = vmatprep.subr.bf16.mxu0 %v1137_v1 }
  0x86   : > { %1024 = vmatprep.subr.bf16.mxu1 %v1260_v50 }
  0x88   : > { %994 = vmatpush3.bf16.msra.mxu0 %v1138_v2 }
  0x89   : > { %1025 = vmatpush3.bf16.msra.mxu1 %v1139_v3  ;;  %995 = vmatprep.subr.bf16.mxu0 %v1140_v4 }
  0x8a   : > { %1026 = vmatprep.subr.bf16.mxu1 %v1260_v50 }
  0x8c   : > { %996 = vmatpush3.bf16.msra.mxu0 %v1141_v5 }
  0x8d   : > { %1027 = vmatpush3.bf16.msra.mxu1 %v1142_v7  ;;  %997 = vmatprep.subr.bf16.mxu0 %v1143_v8 }
  0x8e   : > { %1028 = vmatprep.subr.bf16.mxu1 %v1260_v50 }
  0x90   : > { %998 = vmatpush3.bf16.msra.mxu0 %v1144_v13 }
  0x91   : > { %1029 = vmatpush3.bf16.msra.mxu1 %v1145_v16 }
  0x93   : > { %758 = vmatmul.mubr.bf16.vlgmr.msra.gmra.mrb[0].mxu0 %v569_v19 }
  0x94   : > { %1031 = vmatmul.mubr.bf16.vlgmr.msra.gmra.mrb[0].mxu1 %v577_v20 }
 0x166   : > { %v999_v21 = vpop.f32.mrb[0].mxu0 }
 0x167   : > { %v799_v22 = vpop.f32.mrb[0].mxu1  ;;  %v1000_v23 = vpop.f32.mrb[1].mxu0 }
 0x168   : > { %v1001_v24 = vadd.f32 %v1000_v23, %v999_v21  ;;  %v1032_v25 = vpop.f32.mrb[1].mxu1  ;;  %v1002_v26 = vpop.f32.mrb[2].mxu0  ;;  %810 = sbr.rel (%p978_p8) target bundleno = 381 (0x17d), region = 85 }
 0x169   : > { %v802_v28 = vpop.f32.mrb[2].mxu1  ;;  %v1003_v29 = vpop.f32.mrb[3].mxu0 }
 0x16a   : > { %v800_v30 = vadd.f32 %v1001_v24, %v799_v22  ;;  %v1033_v31 = vpop.f32.mrb[3].mxu1 }
 0x16c   : > { %v805_v32 = vadd.f32 %v800_v30, %v504_v27 }
 0x16e   : > { %806 = vst [vmem:[#allocation2] sm:$0x3] %v805_v32 }
 0x175   : > { %v811_v33 = vld [vmem:[#allocation2] sm:$0x3] }
 0x176   : > { %v819_v35 = vadd.f32 %v979_v34, %v811_v33 }
 0x178   : > { %v820_v36 = vmax.f32 %v819_v35, 0.0 }
 0x17a   : > { %v821_v37 = vpack.c.bf16 %v820_v36, %v820_v36 }
 0x17c   : > { %822 = vst [vmem:[%s497_s11] sm:$0x1] %v821_v37 }
 0x17d PF: > { %s16_s21 = sadd.s32 1, %s1256_s21   ;;  %s1608_s12 = smov %s1224_s13 }
 0x17e   : > { %p13_p9 = scmp.ge.s32.totalorder %s16_s21, 8   ;;  %s1609_s13 = smov %s1228_s14 }
 0x17f   : > { %s1610_s14 = smov %s1367_s6  ;;  %s1611_s15 = smov %s1236_s16 }
 0x180   : > { %s1612_s16 = smov %s1370_s7  ;;  %s1613_s17 = smov %s1248_s19 }
 0x181   : > { %s1614_s18 = smov %s1252_s20  ;;  %s1615_s19 = smov %s1618_s23 }
 0x182   : > { %s1616_s20 = smov %s1622_s24  ;;  %15 = sbr.rel (!%p13_p9) target bundleno = 6 (0x6), region = 132 }
 0x189   :  { %848 = vsyncpa [#allocation5], 1 }
 0x18a   :  { %850 = vsyncpa [#allocation5 + $0x1], 1 }

// kernel: custom_model_forward.34
= control target key start
LH: loop header
LB: loop body
LE: loop exit
PB: predicated region body
PF: predicated region fallthrough
CT: control target
= control target key end

     0   :  { %s1686_s0 = inlined_call_operand.vmem [shape: bf16[2,2304], index: 0, kind: input, shape index: {}]   ;;  %s1687_s1 = inlined_call_operand.vmem [shape: bf16[2304,256], index: 1, kind: input, shape index: {}]   ;;  %s1688_s2 = inlined_call_operand.hbm [shape: f32[1,256], index: 2, kind: input, shape index: {}]   ;;  %s1689_s3 = inlined_call_operand.vmem [shape: bf16[2,256], index: 3, kind: input, shape index: {}]   ;;  %s1690_s4 = inlined_call_operand.vmem [shape: bf16[2,256], index: 4, kind: output, shape index: {}]  }
   0x1   :  { %1692 = sst [smem:[#allocation7_spill]] %s1687_s1 }
   0x2   :  { %9 = vsyncpa [#allocation5], 0 }
   0x3   :  { %11 = vsyncpa [#allocation5 + $0x1], 0  ;;  %s1361_s15 = smov 0   ;;  %s1363_s16 = smov 0  }
   0x4   :  { %s1365_s17 = smov 0   ;;  %s1367_s18 = smov 0  }
   0x5   :  { %s1369_s19 = smov 0   ;;  %s1371_s20 = smov 0  }
   0x6   :  { %s1373_s21 = smov 0   ;;  %s1375_s22 = smov 0  }
   0x7   :  { %s1377_s23 = smov 0   ;;  %s1379_s24 = smov 0  }
   0x8 LB: > { %s1017_s25 = sadd.s32 4294967295, %s1329_s24   ;;  %s29_s26 = sadd.s32 1, %s1321_s22  ;;  %s1329_s24 = sphi %s1379_s24, %s17_s24   ;;  %s1325_s23 = sphi %s1377_s23, %s1706_s23   ;;  %s1321_s22 = sphi %s1375_s22, %s1705_s22   ;;  %s1317_s21 = sphi %s1373_s21, %s1704_s21   ;;  %s1313_s20 = sphi %s1371_s20, %s1703_s20   ;;  %s1309_s19 = sphi %s1369_s19, %s1702_s19   ;;  %s1305_s18 = sphi %s1367_s18, %s1701_s18   ;;  %s1301_s17 = sphi %s1365_s17, %s1700_s17   ;;  %s1297_s16 = sphi %s1363_s16, %s1699_s16   ;;  %s1293_s15 = sphi %s1361_s15, %s1698_s15  }
   0x9   : > { %p30_p0 = scmp.ge.s32.totalorder %s29_s26, 6  ;;  %s32_s27 = sadd.s32 1, %s1325_s23 }
   0xa   : > { %s73_s28 = sadd.s32 1, %s1309_s19  ;;  %p80_p1 = scmp.ne.s32.totalorder %s1309_s19, %s1305_s18 }
   0xb   : > { %s1708_s26 = smov (%p30_p0, %s29_s26), 0  ;;  %s1710_s27 = smov (!%p30_p0, %s32_s27), %s1325_s23 }
   0xc   : > { %s68_s29 = ssub.s32 %s1321_s22, %s1708_s26  ;;  %p81_p2 = scmp.eq.s32.totalorder %s1329_s24, 0 }
   0xd   : > { %p34_p3 = scmp.ge.s32.totalorder %s1710_s27, 2  ;;  %s99_s30 = sadd.s32 1, %s1301_s17 }
   0xe   : > { %p1424_p4 = por %p81_p2, %p80_p1  ;;  %p106_p5 = scmp.ne.s32.totalorder %s1301_s17, %s1297_s16 }
   0xf   : > { %s1712_s27 = smov (%p34_p3, %s1710_s27), 0  ;;  %p112_p7 = scmp.ne.s32.totalorder %s1297_s16, %s1293_s15 }
  0x10   : > { %p1432_p6 = por %p106_p5, %p81_p2  ;;  %s69_s7 = ssub.s32 %s1325_s23, %s1712_s27 }
  0x11   : > { %p113_p8 = scmp.eq.s32.totalorder %s1017_s25, 0  ;;  %s70_s8 = sor.u32 %s69_s7, %s68_s29 }
  0x12   : > { %p97_p9 = scmp.eq.s32.totalorder %s69_s7, 0  ;;  %p71_p10 = scmp.eq.s32.totalorder %s70_s8, 0 }
  0x13   : > { %p1440_p11 = por %p113_p8, %p112_p7  ;;  %p1020_p12 = scmp.ge.s32.totalorder %s1329_s24, 12 }
  0x14   : > { %s1445_s10 = scalar_select %p97_p9, %s1301_s17, %s99_s30  }
  0x15   : > { %s1695_s9 = scalar_select %p1440_p11, 1, 0 }
  0x16   : > { %s1448_s11 = scalar_select %p71_p10, %s1309_s19, %s73_s28  }
  0x17   : > { %188 = sbr.rel (%p1020_p12) target bundleno = 96 (0x60), region = 16 }
  0x1e   : > { %203 = sbr.rel (!%p1424_p4) target bundleno = 71 (0x47), region = 24  ;;  %s205_s12 = sand.u32 (%p1424_p4), 1, %s1309_s19  }
  0x1f   : > { %s1055_s13 = smul.u32 (%p1424_p4), 96, %s1321_s22  ;;  %s1696_s1 = sld [smem:[#allocation7_spill]] (%p1424_p4) }
  0x20   : > { %s1107_s14 = smul.u32 (%p1424_p4), 192, %s205_s12 }
  0x21   : > { %s210_s15 = sadd.s32 (%p1424_p4), %s1325_s23, %s1055_s13 }
  0x22   : > { %s1022_s25 = sshll.u32 (%p1424_p4), %s210_s15, 2  ;;  %s1464_s28 = scalar_lea.vmem (%p1424_p4), [#allocation3], %s1107_s14 }
  0x25   : > { %s1459_s30 = scalar_lea.vmem %s1696_s1, %s1022_s25 }
  0x26   : > { %v228_v0 = vld [vmem:[%s1459_s30] sm:$0xf]  ;;  %v230_v1 = vld [vmem:[%s1459_s30 + $0x8] sm:$0xf]  ;;  %v232_v2 = vld [vmem:[%s1459_s30 + $0x10] sm:$0xf] }
  0x27   : > { %229 = vst [vmem:[%s1464_s28] sm:$0xf] %v228_v0  ;;  %231 = vst [vmem:[%s1464_s28 + $0x4] sm:$0xf] %v230_v1  ;;  %v234_v3 = vld [vmem:[%s1459_s30 + $0x18] sm:$0xf] }
  0x28   : > { %233 = vst [vmem:[%s1464_s28 + $0x8] sm:$0xf] %v232_v2  ;;  %v236_v4 = vld [vmem:[%s1459_s30 + $0x20] sm:$0xf]  ;;  %v238_v5 = vld [vmem:[%s1459_s30 + $0x28] sm:$0xf] }
  0x29   : > { %235 = vst [vmem:[%s1464_s28 + $0xc] sm:$0xf] %v234_v3  ;;  %237 = vst [vmem:[%s1464_s28 + $0x10] sm:$0xf] %v236_v4  ;;  %v240_v6 = vld [vmem:[%s1459_s30 + $0x30] sm:$0xf] }
  0x2a   : > { %239 = vst [vmem:[%s1464_s28 + $0x14] sm:$0xf] %v238_v5  ;;  %v242_v7 = vld [vmem:[%s1459_s30 + $0x38] sm:$0xf]  ;;  %v244_v8 = vld [vmem:[%s1459_s30 + $0x40] sm:$0xf] }
  0x2b   : > { %241 = vst [vmem:[%s1464_s28 + $0x18] sm:$0xf] %v240_v6  ;;  %243 = vst [vmem:[%s1464_s28 + $0x1c] sm:$0xf] %v242_v7  ;;  %v246_v9 = vld [vmem:[%s1459_s30 + $0x48] sm:$0xf] }
  0x2c   : > { %245 = vst [vmem:[%s1464_s28 + $0x20] sm:$0xf] %v244_v8  ;;  %v248_v10 = vld [vmem:[%s1459_s30 + $0x50] sm:$0xf]  ;;  %v250_v11 = vld [vmem:[%s1459_s30 + $0x58] sm:$0xf] }
  0x2d   : > { %247 = vst [vmem:[%s1464_s28 + $0x24] sm:$0xf] %v246_v9  ;;  %249 = vst [vmem:[%s1464_s28 + $0x28] sm:$0xf] %v248_v10  ;;  %v252_v12 = vld [vmem:[%s1459_s30 + $0x60] sm:$0xf] }
  0x2e   : > { %251 = vst [vmem:[%s1464_s28 + $0x2c] sm:$0xf] %v250_v11  ;;  %v254_v13 = vld [vmem:[%s1459_s30 + $0x68] sm:$0xf]  ;;  %v256_v14 = vld [vmem:[%s1459_s30 + $0x70] sm:$0xf] }
  0x2f   : > { %253 = vst [vmem:[%s1464_s28 + $0x30] sm:$0xf] %v252_v12  ;;  %255 = vst [vmem:[%s1464_s28 + $0x34] sm:$0xf] %v254_v13  ;;  %v258_v15 = vld [vmem:[%s1459_s30 + $0x78] sm:$0xf] }
  0x30   : > { %257 = vst [vmem:[%s1464_s28 + $0x38] sm:$0xf] %v256_v14  ;;  %v260_v16 = vld [vmem:[%s1459_s30 + $0x80] sm:$0xf]  ;;  %v262_v17 = vld [vmem:[%s1459_s30 + $0x88] sm:$0xf] }
  0x31   : > { %259 = vst [vmem:[%s1464_s28 + $0x3c] sm:$0xf] %v258_v15  ;;  %261 = vst [vmem:[%s1464_s28 + $0x40] sm:$0xf] %v260_v16  ;;  %v264_v18 = vld [vmem:[%s1459_s30 + $0x90] sm:$0xf] }
  0x32   : > { %263 = vst [vmem:[%s1464_s28 + $0x44] sm:$0xf] %v262_v17  ;;  %v266_v19 = vld [vmem:[%s1459_s30 + $0x98] sm:$0xf]  ;;  %v268_v20 = vld [vmem:[%s1459_s30 + $0xa0] sm:$0xf] }
  0x33   : > { %265 = vst [vmem:[%s1464_s28 + $0x48] sm:$0xf] %v264_v18  ;;  %267 = vst [vmem:[%s1464_s28 + $0x4c] sm:$0xf] %v266_v19  ;;  %v270_v21 = vld [vmem:[%s1459_s30 + $0xa8] sm:$0xf] }
  0x34   : > { %269 = vst [vmem:[%s1464_s28 + $0x50] sm:$0xf] %v268_v20  ;;  %v272_v22 = vld [vmem:[%s1459_s30 + $0xb0] sm:$0xf]  ;;  %v274_v23 = vld [vmem:[%s1459_s30 + $0xb8] sm:$0xf] }
  0x35   : > { %271 = vst [vmem:[%s1464_s28 + $0x54] sm:$0xf] %v270_v21  ;;  %273 = vst [vmem:[%s1464_s28 + $0x58] sm:$0xf] %v272_v22  ;;  %v276_v24 = vld [vmem:[%s1459_s30 + $0xc0] sm:$0xf] }
  0x36   : > { %275 = vst [vmem:[%s1464_s28 + $0x5c] sm:$0xf] %v274_v23  ;;  %v278_v25 = vld [vmem:[%s1459_s30 + $0xc8] sm:$0xf]  ;;  %v280_v26 = vld [vmem:[%s1459_s30 + $0xd0] sm:$0xf] }
  0x37   : > { %277 = vst [vmem:[%s1464_s28 + $0x60] sm:$0xf] %v276_v24  ;;  %279 = vst [vmem:[%s1464_s28 + $0x64] sm:$0xf] %v278_v25  ;;  %v282_v27 = vld [vmem:[%s1459_s30 + $0xd8] sm:$0xf] }
  0x38   : > { %281 = vst [vmem:[%s1464_s28 + $0x68] sm:$0xf] %v280_v26  ;;  %v284_v28 = vld [vmem:[%s1459_s30 + $0xe0] sm:$0xf]  ;;  %v286_v29 = vld [vmem:[%s1459_s30 + $0xe8] sm:$0xf] }
  0x39   : > { %283 = vst [vmem:[%s1464_s28 + $0x6c] sm:$0xf] %v282_v27  ;;  %285 = vst [vmem:[%s1464_s28 + $0x70] sm:$0xf] %v284_v28  ;;  %v288_v30 = vld [vmem:[%s1459_s30 + $0xf0] sm:$0xf] }
  0x3a   : > { %287 = vst [vmem:[%s1464_s28 + $0x74] sm:$0xf] %v286_v29  ;;  %v290_v31 = vld [vmem:[%s1459_s30 + $0xf8] sm:$0xf]  ;;  %v292_v32 = vld [vmem:[%s1459_s30 + $0x100] sm:$0xf] }
  0x3b   : > { %289 = vst [vmem:[%s1464_s28 + $0x78] sm:$0xf] %v288_v30  ;;  %291 = vst [vmem:[%s1464_s28 + $0x7c] sm:$0xf] %v290_v31  ;;  %v294_v33 = vld [vmem:[%s1459_s30 + $0x108] sm:$0xf] }
  0x3c   : > { %293 = vst [vmem:[%s1464_s28 + $0x80] sm:$0xf] %v292_v32  ;;  %v296_v34 = vld [vmem:[%s1459_s30 + $0x110] sm:$0xf]  ;;  %v298_v35 = vld [vmem:[%s1459_s30 + $0x118] sm:$0xf] }
  0x3d   : > { %295 = vst [vmem:[%s1464_s28 + $0x84] sm:$0xf] %v294_v33  ;;  %297 = vst [vmem:[%s1464_s28 + $0x88] sm:$0xf] %v296_v34  ;;  %v300_v36 = vld [vmem:[%s1459_s30 + $0x120] sm:$0xf] }
  0x3e   : > { %299 = vst [vmem:[%s1464_s28 + $0x8c] sm:$0xf] %v298_v35  ;;  %v302_v37 = vld [vmem:[%s1459_s30 + $0x128] sm:$0xf]  ;;  %v304_v38 = vld [vmem:[%s1459_s30 + $0x130] sm:$0xf] }
  0x3f   : > { %301 = vst [vmem:[%s1464_s28 + $0x90] sm:$0xf] %v300_v36  ;;  %303 = vst [vmem:[%s1464_s28 + $0x94] sm:$0xf] %v302_v37  ;;  %v306_v39 = vld [vmem:[%s1459_s30 + $0x138] sm:$0xf] }
  0x40   : > { %305 = vst [vmem:[%s1464_s28 + $0x98] sm:$0xf] %v304_v38  ;;  %v308_v40 = vld [vmem:[%s1459_s30 + $0x140] sm:$0xf]  ;;  %v310_v41 = vld [vmem:[%s1459_s30 + $0x148] sm:$0xf] }
  0x41   : > { %307 = vst [vmem:[%s1464_s28 + $0x9c] sm:$0xf] %v306_v39  ;;  %309 = vst [vmem:[%s1464_s28 + $0xa0] sm:$0xf] %v308_v40  ;;  %v312_v42 = vld [vmem:[%s1459_s30 + $0x150] sm:$0xf] }
  0x42   : > { %311 = vst [vmem:[%s1464_s28 + $0xa4] sm:$0xf] %v310_v41  ;;  %v314_v43 = vld [vmem:[%s1459_s30 + $0x158] sm:$0xf]  ;;  %v316_v44 = vld [vmem:[%s1459_s30 + $0x160] sm:$0xf] }
  0x43   : > { %313 = vst [vmem:[%s1464_s28 + $0xa8] sm:$0xf] %v312_v42  ;;  %315 = vst [vmem:[%s1464_s28 + $0xac] sm:$0xf] %v314_v43  ;;  %v318_v45 = vld [vmem:[%s1459_s30 + $0x168] sm:$0xf] }
  0x44   : > { %317 = vst [vmem:[%s1464_s28 + $0xb0] sm:$0xf] %v316_v44  ;;  %v320_v46 = vld [vmem:[%s1459_s30 + $0x170] sm:$0xf]  ;;  %v322_v47 = vld [vmem:[%s1459_s30 + $0x178] sm:$0xf] }
  0x45   : > { %319 = vst [vmem:[%s1464_s28 + $0xb4] sm:$0xf] %v318_v45  ;;  %321 = vst [vmem:[%s1464_s28 + $0xb8] sm:$0xf] %v320_v46 }
  0x46   : > { %323 = vst [vmem:[%s1464_s28 + $0xbc] sm:$0xf] %v322_v47 }
  0x47 PF: > { %s443_s5 = sand.u32 1, %s1301_s17   ;;  %s1023_s8 = sshll.u32 %s1325_s23, 4 }
  0x48   : > { %s1564_s14 = scalar_lea.hbm %s1688_s2, %s1023_s8  ;;  %s446_s15 = scalar_lea.vmem [#allocation4], %s443_s5 }
  0x49   : > { %s453_s25 = sshll.u32 %s446_s15, 4  ;;  %s444_s29 = scalar_lea.sflag [#allocation5], %s443_s5  ;;  %s454_s25 = int_to_ptr.vmem [resolvable:$true] %s453_s25 }
  0x4a   : > { %s1219_s7 = scalar_lea.hbm %s1564_s14, 16  ;;  %s1223_s1 = scalar_lea.hbm %s1688_s2, 32 }
  0x4b   : > { %p1220_p13 = scmp.ne.s32.totalorder %s1564_s14, %s1219_s7  ;;  %p1224_p2 = scmp.lt.u32.totalorder %s1564_s14, %s1688_s2 }
  0x4c   : > { %p1225_p3 = scmp.lt.u32.totalorder %s1223_s1, %s1219_s7  ;;  %p1227_p5 = scmp.lt.u32.totalorder %s1219_s7, %s1564_s14 }
  0x4d   : > { %p1221_p0 = pnand %p1220_p13, %p1432_p6 }
  0x4e   : > { %p1226_p4 = por %p1225_p3, %p1224_p2 }
  0x4f   : > { %p1222_p1 = pneg %p1221_p0 }
  0x50   : > { %p1228_p7 = por %p1227_p5, %p1226_p4 }
  0x52   : > { %p1229_p8 = pnand %p1228_p7, %p1222_p1 }
  0x54   : > { %1232 = shalt.err (!%p1229_p8)
}
  0x55   : > { %s1233_s5 = scalar_lea.vmem %s454_s25, 16  ;;  %s1331_s13 = smov [#allocation4]  }
  0x56   : > { %p1234_p9 = scmp.ne.s32.totalorder %s454_s25, %s1233_s5  ;;  %s1237_s15 = sshll.u32 %s1331_s13, 4  ;;  %s1238_s15 = int_to_ptr.vmem [resolvable:$false] %s1237_s15 }
  0x57   : > { %s1239_s30 = scalar_lea.vmem %s1238_s15, 32  ;;  %p1240_p13 = scmp.lt.s32.totalorder %s454_s25, %s1238_s15 }
  0x58   : > { %p1235_p10 = pnand %p1234_p9, %p1432_p6  ;;  %p1241_p0 = scmp.lt.s32.totalorder %s1239_s30, %s1233_s5 }
  0x5a   : > { %p1236_p12 = pneg %p1235_p10  ;;  %p1242_p11 = por %p1241_p0, %p1240_p13 }
  0x5c   : > { %p1243_p2 = pnand %p1242_p11, %p1236_p12 }
  0x5e   : > { %1246 = shalt.err (!%p1243_p2)
}
  0x5f   : > { %1109 = dma.hbm_to_vmem [thread:$0]  (%p1432_p6), %s1564_s14, 16, %s454_s25, %s444_s29  }
  0x60 PF: > { %p1024_p1 = scmp.ge.s32.totalorder %s1329_s24, 1  ;;  %p468_p3 = scmp.lt.s32.totalorder %s1329_s24, 13 }
  0x62   : > { %p469_p4 = pnand %p1024_p1, %p468_p3 }
  0x63   : > { %s475_s1 = sand.u32 (!%p469_p4), 1, %s1305_s18   ;;  %s481_s7 = sand.u32 (!%p469_p4), 1, %s1297_s16  }
  0x64   : > { %472 = sbr.rel (%p469_p4) target bundleno = 388 (0x184), region = 73  ;;  %s482_s8 = scalar_lea.sflag (!%p469_p4), [#allocation5], %s481_s7 }
  0x65   : > { %s1108_s28 = smul.u32 (!%p469_p4), 192, %s475_s1  ;;  %s1589_s5 = scalar_lea.vmem (!%p469_p4), [#allocation4], %s481_s7 }
  0x66   : > { %p1697_p11 = scmp.ne.s32.totalorder (!%p469_p4), %s1695_s9, 0 }
  0x67   : > { %s1587_s12 = scalar_lea.vmem (!%p469_p4), [#allocation3], %s1108_s28 }
  0x6b   : > { %1288 = dma.done.wait (%p1697_p11), %s482_s8, 16  }
  0x6c   : > { %1290 = vsyncadd (%p1697_p11), %s482_s8, 4294967280  ;;  %s529_s6 = smul.u32 3, %s1313_s20  ;;  %p541_p6 = scmp.lt.s32.totalorder %s1317_s21, 1 }
  0x6d   : > { %p1025_p7 = scmp.ne.s32.totalorder %s1313_s20, 0 }
  0x6e   : > { %p532_p5 = scmp.lt.s32.totalorder %s529_s6, 17  ;;  %s1714_s21 = smov (!%p541_p6, %s1317_s21), 1  ;;  %v1332_v48 = vmov (!%p1025_p7), 0.0  }
  0x6f   : > { %s545_s25 = scalar_lea.vmem %s1689_s3, %s1714_s21  ;;  %s552_s13 = scalar_lea.vmem %s1690_s4, %s1714_s21  ;;  %558 = vst [vmem:[#allocation2] sm:$0x3] (!%p1025_p7), %v1332_v48 }
  0x70   : > { %s1716_s6 = smov (!%p532_p5, %s529_s6), 17  ;;  %557 = sbr.rel (%p1025_p7) target bundleno = 119 (0x77), region = 85 }
  0x71   : > { %s536_s1 = scalar_lea.vmem %s1686_s0, %s1716_s6 }
  0x77 PF: > { %v1195_v49 = vld [vmem:[%s1587_s12 + $0x40] sm:$0xff]   ;;  %v1333_v50 = vmov 0.0   ;;  %vm1334_vm0 = vmmov 0   ;;  %v1198_v53 = vld [vmem:[%s1587_s12 + $0x48] sm:$0xff]   ;;  %v1201_v56 = vld [vmem:[%s1587_s12 + $0x50] sm:$0xff]   ;;  %v621_v6 = vlaneseq  ;;  %p1051_p8 = scmp.ne.s32.totalorder %s1313_s20, 5 }
  0x78   : > { %1087 = vmatprep.subr.bf16.mxu1 %v1333_v50  ;;  %v1196_v51 = vld [vmem:[%s1587_s12] sm:$0xff]   ;;  %1056 = vmatprep.subr.bf16.mxu0 %v1195_v49  ;;  %v1199_v54 = vld [vmem:[%s1587_s12 + $0x8] sm:$0xff]   ;;  %v1202_v57 = vld [vmem:[%s1587_s12 + $0x10] sm:$0xff]   ;;  %v1335_v10 = vmov 1966171168  }
  0x79   : > { %v1197_v52 = vld [vmem:[%s1587_s12 + $0x80] sm:$0xff]   ;;  %1103 = vmatprep.mubr.msk.bf16.mxu1 %vm1334_vm0, %v1333_v50  ;;  %1057 = vmatpush3.bf16.msra.mxu0 %v1196_v51  ;;  %v1200_v55 = vld [vmem:[%s1587_s12 + $0x88] sm:$0xff]   ;;  %v1203_v58 = vld [vmem:[%s1587_s12 + $0x90] sm:$0xff]   ;;  %v619_v11 = vunpack.c.l.s4 %v1335_v10  ;;  %v622_v12 = vshrl.u32 %v621_v6, 7 }
  0x7a   : > { %1088 = vmatpush3.bf16.msra.mxu1 %v1197_v52  ;;  %1058 = vmatprep.subr.bf16.mxu0 %v1198_v53  ;;  %v1204_v59 = vld [vmem:[%s1587_s12 + $0x58] sm:$0xff]   ;;  %v1207_v62 = vld [vmem:[%s1587_s12 + $0x60] sm:$0xff]   ;;  %v1210_v1 = vld [vmem:[%s1587_s12 + $0x68] sm:$0xff]  }
  0x7b   : > { %1089 = vmatprep.subr.bf16.mxu1 %v1333_v50  ;;  %v1205_v60 = vld [vmem:[%s1587_s12 + $0x18] sm:$0xff]   ;;  %v1208_v63 = vld [vmem:[%s1587_s12 + $0x20] sm:$0xff]   ;;  %v1211_v2 = vld [vmem:[%s1587_s12 + $0x28] sm:$0xff]   ;;  %v620_v15 = vunpack.c.0.s8 %v619_v11 }
  0x7c   : > { %v1206_v61 = vld [vmem:[%s1587_s12 + $0x98] sm:$0xff]   ;;  %v1209_v0 = vld [vmem:[%s1587_s12 + $0xa0] sm:$0xff]   ;;  %v1212_v3 = vld [vmem:[%s1587_s12 + $0xa8] sm:$0xff]  }
  0x7d   : > { %1059 = vmatpush3.bf16.msra.mxu0 %v1199_v54  ;;  %v1213_v4 = vld [vmem:[%s1587_s12 + $0x70] sm:$0xff]   ;;  %v1216_v8 = vld [vmem:[%s1587_s12 + $0x78] sm:$0xff]   ;;  %v623_v17 = vsub.s32 %v620_v15, %v622_v12 }
  0x7e   : > { %1090 = vmatpush3.bf16.msra.mxu1 %v1200_v55  ;;  %1060 = vmatprep.subr.bf16.mxu0 %v1201_v56  ;;  %v1214_v5 = vld [vmem:[%s1587_s12 + $0x30] sm:$0xff]   ;;  %v1026_v9 = vld.sshfl [vmem:[%s536_s1] sm:$0x13 pattern:$0x75316420] }
  0x7f   : > { %1091 = vmatprep.subr.bf16.mxu1 %v1333_v50  ;;  %v1215_v7 = vld [vmem:[%s1587_s12 + $0xb0] sm:$0xff]   ;;  %v1217_v13 = vld [vmem:[%s1587_s12 + $0x38] sm:$0xff]   ;;  %v617_v14 = vcombine.high %v1026_v9, %v1026_v9  ;;  %v624_v19 = vrot.slane %v1026_v9, %v623_v17 }
  0x80   : > { %v1218_v16 = vld [vmem:[%s1587_s12 + $0xb8] sm:$0xff]  }
  0x81   : > { %1061 = vmatpush3.bf16.msra.mxu0 %v1202_v57  ;;  %v631_v18 = vrot.slane %v617_v14, %v623_v17  ;;  %v632_v20 = vcombine.high %v624_v19, %v624_v19  ;;  %v559_v27 = vld [vmem:[#allocation2] sm:$0x3] }
  0x82   : > { %1092 = vmatpush3.bf16.msra.mxu1 %v1203_v58  ;;  %1062 = vmatprep.subr.bf16.mxu0 %v1204_v59  ;;  %v1052_v34 = vld [vmem:[%s1589_s5] ss:$0 sm:$0xff] (!%p1051_p8) }
  0x83   : > { %1093 = vmatprep.subr.bf16.mxu1 %v1333_v50  ;;  %812 = vmatprep.mubr.bf16.mxu0 %v631_v18  ;;  %v875_v35 = vld [vmem:[%s545_s25] sm:$0x1] (!%p1051_p8) }
  0x84   : > { %v876_v37 = vunpack.c.l.bf16 (!%p1051_p8), %v875_v35 }
  0x85   : > { %1063 = vmatpush3.bf16.msra.mxu0 %v1205_v60 }
  0x86   : > { %1094 = vmatpush3.bf16.msra.mxu1 %v1206_v61  ;;  %1064 = vmatprep.subr.bf16.mxu0 %v1207_v62 }
  0x87   : > { %1095 = vmatprep.subr.bf16.mxu1 %v1333_v50 }
  0x89   : > { %1065 = vmatpush3.bf16.msra.mxu0 %v1208_v63 }
  0x8a   : > { %1096 = vmatpush3.bf16.msra.mxu1 %v1209_v0  ;;  %1066 = vmatprep.subr.bf16.mxu0 %v1210_v1 }
  0x8b   : > { %1097 = vmatprep.subr.bf16.mxu1 %v1333_v50 }
  0x8d   : > { %1067 = vmatpush3.bf16.msra.mxu0 %v1211_v2 }
  0x8e   : > { %1098 = vmatpush3.bf16.msra.mxu1 %v1212_v3  ;;  %1068 = vmatprep.subr.bf16.mxu0 %v1213_v4 }
  0x8f   : > { %1099 = vmatprep.subr.bf16.mxu1 %v1333_v50 }
  0x91   : > { %1069 = vmatpush3.bf16.msra.mxu0 %v1214_v5 }
  0x92   : > { %1100 = vmatpush3.bf16.msra.mxu1 %v1215_v7  ;;  %1070 = vmatprep.subr.bf16.mxu0 %v1216_v8 }
  0x93   : > { %1101 = vmatprep.subr.bf16.mxu1 %v1333_v50 }
  0x95   : > { %1071 = vmatpush3.bf16.msra.mxu0 %v1217_v13 }
  0x96   : > { %1102 = vmatpush3.bf16.msra.mxu1 %v1218_v16 }
  0x98   : > { %813 = vmatmul.mubr.bf16.vlgmr.msra.gmra.mrb[0].mxu0 %v624_v19 }
  0x99   : > { %1104 = vmatmul.mubr.bf16.vlgmr.msra.gmra.mrb[0].mxu1 %v632_v20 }
 0x16b   : > { %v1072_v21 = vpop.f32.mrb[0].mxu0 }
 0x16c   : > { %v854_v22 = vpop.f32.mrb[0].mxu1  ;;  %v1073_v23 = vpop.f32.mrb[1].mxu0 }
 0x16d   : > { %v1074_v24 = vadd.f32 %v1073_v23, %v1072_v21  ;;  %v1105_v25 = vpop.f32.mrb[1].mxu1  ;;  %v1075_v26 = vpop.f32.mrb[2].mxu0  ;;  %865 = sbr.rel (%p1051_p8) target bundleno = 388 (0x184), region = 89 }
 0x16e   : > { %v857_v28 = vpop.f32.mrb[2].mxu1  ;;  %v1076_v29 = vpop.f32.mrb[3].mxu0 }
 0x16f   : > { %v855_v30 = vadd.f32 %v1074_v24, %v854_v22  ;;  %v1106_v31 = vpop.f32.mrb[3].mxu1 }
 0x171   : > { %v860_v32 = vadd.f32 %v855_v30, %v559_v27 }
 0x173   : > { %861 = vst [vmem:[#allocation2] sm:$0x3] %v860_v32 }
 0x17a   : > { %v866_v33 = vld [vmem:[#allocation2] sm:$0x3] }
 0x17b   : > { %v874_v36 = vadd.f32 %v1052_v34, %v866_v33 }
 0x17d   : > { %v877_v38 = vadd.f32 %v876_v37, %v874_v36 }
 0x17f   : > { %v878_v39 = vmax.f32 %v877_v38, 0.0 }
 0x181   : > { %v879_v40 = vpack.c.bf16 %v878_v39, %v878_v39 }
 0x183   : > { %880 = vst [vmem:[%s552_s13] sm:$0x1] %v879_v40 }
 0x184 PF: > { %s17_s24 = sadd.s32 1, %s1329_s24   ;;  %s1698_s15 = smov %s1297_s16 }
 0x185   : > { %p14_p9 = scmp.ge.s32.totalorder %s17_s24, 14   ;;  %s1699_s16 = smov %s1301_s17 }
 0x186   : > { %s1700_s17 = smov %s1445_s10  ;;  %s1701_s18 = smov %s1309_s19 }
 0x187   : > { %s1702_s19 = smov %s1448_s11  ;;  %s1703_s20 = smov %s1321_s22 }
 0x188   : > { %s1704_s21 = smov %s1325_s23  ;;  %s1705_s22 = smov %s1708_s26 }
 0x189   : > { %s1706_s23 = smov %s1712_s27  ;;  %16 = sbr.rel (!%p14_p9) target bundleno = 8 (0x8), region = 139 }
 0x190   :  { %906 = vsyncpa [#allocation5], 1 }
 0x191   :  { %908 = vsyncpa [#allocation5 + $0x1], 1 }

// kernel: custom_model_forward.35
= control target key start
LH: loop header
LB: loop body
LE: loop exit
PB: predicated region body
PF: predicated region fallthrough
CT: control target
= control target key end

     0   :  { %8 = vsyncpa [#allocation5], 0  ;;  %s1599_s0 = inlined_call_operand.vmem [shape: bf16[2,2304], index: 0, kind: input, shape index: {}]   ;;  %s1600_s1 = inlined_call_operand.vmem [shape: bf16[2304,256], index: 1, kind: input, shape index: {}]   ;;  %s1601_s2 = inlined_call_operand.hbm [shape: f32[1,256], index: 2, kind: input, shape index: {}]   ;;  %s1602_s3 = inlined_call_operand.vmem [shape: bf16[2,256], index: 3, kind: output, shape index: {}]  }
   0x1   :  { %10 = vsyncpa [#allocation5 + $0x1], 0  ;;  %s1283_s12 = smov 0   ;;  %s1285_s13 = smov 0  }
   0x2   :  { %s1287_s14 = smov 0   ;;  %s1289_s15 = smov 0  }
   0x3   :  { %s1291_s16 = smov 0   ;;  %s1293_s17 = smov 0  }
   0x4   :  { %s1295_s18 = smov 0   ;;  %s1297_s19 = smov 0  }
   0x5   :  { %s1299_s20 = smov 0   ;;  %s1301_s21 = smov 0  }
   0x6 LB: > { %s944_s22 = sadd.s32 4294967295, %s1256_s21   ;;  %s28_s23 = sadd.s32 1, %s1248_s19  ;;  %s1256_s21 = sphi %s1301_s21, %s16_s21   ;;  %s1252_s20 = sphi %s1299_s20, %s1616_s20   ;;  %s1248_s19 = sphi %s1297_s19, %s1615_s19   ;;  %s1244_s18 = sphi %s1295_s18, %s1614_s18   ;;  %s1240_s17 = sphi %s1293_s17, %s1613_s17   ;;  %s1236_s16 = sphi %s1291_s16, %s1612_s16   ;;  %s1232_s15 = sphi %s1289_s15, %s1611_s15   ;;  %s1228_s14 = sphi %s1287_s14, %s1610_s14   ;;  %s1224_s13 = sphi %s1285_s13, %s1609_s13   ;;  %s1220_s12 = sphi %s1283_s12, %s1608_s12  }
   0x7   : > { %p29_p0 = scmp.ge.s32.totalorder %s28_s23, 6  ;;  %s31_s24 = sadd.s32 1, %s1252_s20 }
   0x8   : > { %s72_s25 = sadd.s32 1, %s1236_s16  ;;  %p79_p1 = scmp.ne.s32.totalorder %s1236_s16, %s1232_s15 }
   0x9   : > { %s1618_s23 = smov (%p29_p0, %s28_s23), 0  ;;  %s1620_s24 = smov (!%p29_p0, %s31_s24), %s1252_s20 }
   0xa   : > { %s67_s26 = ssub.s32 %s1248_s19, %s1618_s23  ;;  %p80_p2 = scmp.eq.s32.totalorder %s1256_s21, 0 }
   0xb   : > { %p33_p3 = scmp.ge.s32.totalorder %s1620_s24, 2  ;;  %s98_s27 = sadd.s32 1, %s1228_s14 }
   0xc   : > { %p1346_p4 = por %p80_p2, %p79_p1  ;;  %p105_p5 = scmp.ne.s32.totalorder %s1228_s14, %s1224_s13 }
   0xd   : > { %s1622_s24 = smov (%p33_p3, %s1620_s24), 0  ;;  %p111_p7 = scmp.ne.s32.totalorder %s1224_s13, %s1220_s12 }
   0xe   : > { %p1354_p6 = por %p105_p5, %p80_p2  ;;  %s68_s30 = ssub.s32 %s1252_s20, %s1622_s24 }
   0xf   : > { %p112_p8 = scmp.eq.s32.totalorder %s944_s22, 0  ;;  %s69_s4 = sor.u32 %s68_s30, %s67_s26 }
  0x10   : > { %p96_p9 = scmp.eq.s32.totalorder %s68_s30, 0  ;;  %p70_p10 = scmp.eq.s32.totalorder %s69_s4, 0 }
  0x11   : > { %p1362_p11 = por %p112_p8, %p111_p7  ;;  %p947_p12 = scmp.ge.s32.totalorder %s1256_s21, 12 }
  0x12   : > { %s1367_s6 = scalar_select %p96_p9, %s1228_s14, %s98_s27  }
  0x13   : > { %s1606_s5 = scalar_select %p1362_p11, 1, 0 }
  0x14   : > { %s1370_s7 = scalar_select %p70_p10, %s1236_s16, %s72_s25  }
  0x15   : > { %159 = sbr.rel (%p947_p12) target bundleno = 92 (0x5c), region = 16 }
  0x1c   : > { %174 = sbr.rel (!%p1346_p4) target bundleno = 67 (0x43), region = 24  ;;  %s176_s8 = sand.u32 (%p1346_p4), 1, %s1236_s16  }
  0x1d   : > { %s982_s9 = smul.u32 (%p1346_p4), 96, %s1248_s19 }
  0x1e   : > { %s1034_s10 = smul.u32 (%p1346_p4), 192, %s176_s8 }
  0x1f   : > { %s181_s11 = sadd.s32 (%p1346_p4), %s1252_s20, %s982_s9 }
  0x20   : > { %s949_s12 = sshll.u32 (%p1346_p4), %s181_s11, 2  ;;  %s1386_s25 = scalar_lea.vmem (%p1346_p4), [#allocation3], %s1034_s10 }
  0x21   : > { %s1381_s27 = scalar_lea.vmem (%p1346_p4), %s1600_s1, %s949_s12 }
  0x22   : > { %v199_v0 = vld [vmem:[%s1381_s27] sm:$0xf] (%p1346_p4)  ;;  %v201_v1 = vld [vmem:[%s1381_s27 + $0x8] sm:$0xf] (%p1346_p4)  ;;  %v203_v2 = vld [vmem:[%s1381_s27 + $0x10] sm:$0xf] (%p1346_p4) }
  0x23   : > { %200 = vst [vmem:[%s1386_s25] sm:$0xf] %v199_v0  ;;  %202 = vst [vmem:[%s1386_s25 + $0x4] sm:$0xf] %v201_v1  ;;  %v205_v3 = vld [vmem:[%s1381_s27 + $0x18] sm:$0xf] }
  0x24   : > { %204 = vst [vmem:[%s1386_s25 + $0x8] sm:$0xf] %v203_v2  ;;  %v207_v4 = vld [vmem:[%s1381_s27 + $0x20] sm:$0xf]  ;;  %v209_v5 = vld [vmem:[%s1381_s27 + $0x28] sm:$0xf] }
  0x25   : > { %206 = vst [vmem:[%s1386_s25 + $0xc] sm:$0xf] %v205_v3  ;;  %208 = vst [vmem:[%s1386_s25 + $0x10] sm:$0xf] %v207_v4  ;;  %v211_v6 = vld [vmem:[%s1381_s27 + $0x30] sm:$0xf] }
  0x26   : > { %210 = vst [vmem:[%s1386_s25 + $0x14] sm:$0xf] %v209_v5  ;;  %v213_v7 = vld [vmem:[%s1381_s27 + $0x38] sm:$0xf]  ;;  %v215_v8 = vld [vmem:[%s1381_s27 + $0x40] sm:$0xf] }
  0x27   : > { %212 = vst [vmem:[%s1386_s25 + $0x18] sm:$0xf] %v211_v6  ;;  %214 = vst [vmem:[%s1386_s25 + $0x1c] sm:$0xf] %v213_v7  ;;  %v217_v9 = vld [vmem:[%s1381_s27 + $0x48] sm:$0xf] }
  0x28   : > { %216 = vst [vmem:[%s1386_s25 + $0x20] sm:$0xf] %v215_v8  ;;  %v219_v10 = vld [vmem:[%s1381_s27 + $0x50] sm:$0xf]  ;;  %v221_v11 = vld [vmem:[%s1381_s27 + $0x58] sm:$0xf] }
  0x29   : > { %218 = vst [vmem:[%s1386_s25 + $0x24] sm:$0xf] %v217_v9  ;;  %220 = vst [vmem:[%s1386_s25 + $0x28] sm:$0xf] %v219_v10  ;;  %v223_v12 = vld [vmem:[%s1381_s27 + $0x60] sm:$0xf] }
  0x2a   : > { %222 = vst [vmem:[%s1386_s25 + $0x2c] sm:$0xf] %v221_v11  ;;  %v225_v13 = vld [vmem:[%s1381_s27 + $0x68] sm:$0xf]  ;;  %v227_v14 = vld [vmem:[%s1381_s27 + $0x70] sm:$0xf] }
  0x2b   : > { %224 = vst [vmem:[%s1386_s25 + $0x30] sm:$0xf] %v223_v12  ;;  %226 = vst [vmem:[%s1386_s25 + $0x34] sm:$0xf] %v225_v13  ;;  %v229_v15 = vld [vmem:[%s1381_s27 + $0x78] sm:$0xf] }
  0x2c   : > { %228 = vst [vmem:[%s1386_s25 + $0x38] sm:$0xf] %v227_v14  ;;  %v231_v16 = vld [vmem:[%s1381_s27 + $0x80] sm:$0xf]  ;;  %v233_v17 = vld [vmem:[%s1381_s27 + $0x88] sm:$0xf] }
  0x2d   : > { %230 = vst [vmem:[%s1386_s25 + $0x3c] sm:$0xf] %v229_v15  ;;  %232 = vst [vmem:[%s1386_s25 + $0x40] sm:$0xf] %v231_v16  ;;  %v235_v18 = vld [vmem:[%s1381_s27 + $0x90] sm:$0xf] }
  0x2e   : > { %234 = vst [vmem:[%s1386_s25 + $0x44] sm:$0xf] %v233_v17  ;;  %v237_v19 = vld [vmem:[%s1381_s27 + $0x98] sm:$0xf]  ;;  %v239_v20 = vld [vmem:[%s1381_s27 + $0xa0] sm:$0xf] }
  0x2f   : > { %236 = vst [vmem:[%s1386_s25 + $0x48] sm:$0xf] %v235_v18  ;;  %238 = vst [vmem:[%s1386_s25 + $0x4c] sm:$0xf] %v237_v19  ;;  %v241_v21 = vld [vmem:[%s1381_s27 + $0xa8] sm:$0xf] }
  0x30   : > { %240 = vst [vmem:[%s1386_s25 + $0x50] sm:$0xf] %v239_v20  ;;  %v243_v22 = vld [vmem:[%s1381_s27 + $0xb0] sm:$0xf]  ;;  %v245_v23 = vld [vmem:[%s1381_s27 + $0xb8] sm:$0xf] }
  0x31   : > { %242 = vst [vmem:[%s1386_s25 + $0x54] sm:$0xf] %v241_v21  ;;  %244 = vst [vmem:[%s1386_s25 + $0x58] sm:$0xf] %v243_v22  ;;  %v247_v24 = vld [vmem:[%s1381_s27 + $0xc0] sm:$0xf] }
  0x32   : > { %246 = vst [vmem:[%s1386_s25 + $0x5c] sm:$0xf] %v245_v23  ;;  %v249_v25 = vld [vmem:[%s1381_s27 + $0xc8] sm:$0xf]  ;;  %v251_v26 = vld [vmem:[%s1381_s27 + $0xd0] sm:$0xf] }
  0x33   : > { %248 = vst [vmem:[%s1386_s25 + $0x60] sm:$0xf] %v247_v24  ;;  %250 = vst [vmem:[%s1386_s25 + $0x64] sm:$0xf] %v249_v25  ;;  %v253_v27 = vld [vmem:[%s1381_s27 + $0xd8] sm:$0xf] }
  0x34   : > { %252 = vst [vmem:[%s1386_s25 + $0x68] sm:$0xf] %v251_v26  ;;  %v255_v28 = vld [vmem:[%s1381_s27 + $0xe0] sm:$0xf]  ;;  %v257_v29 = vld [vmem:[%s1381_s27 + $0xe8] sm:$0xf] }
  0x35   : > { %254 = vst [vmem:[%s1386_s25 + $0x6c] sm:$0xf] %v253_v27  ;;  %256 = vst [vmem:[%s1386_s25 + $0x70] sm:$0xf] %v255_v28  ;;  %v259_v30 = vld [vmem:[%s1381_s27 + $0xf0] sm:$0xf] }
  0x36   : > { %258 = vst [vmem:[%s1386_s25 + $0x74] sm:$0xf] %v257_v29  ;;  %v261_v31 = vld [vmem:[%s1381_s27 + $0xf8] sm:$0xf]  ;;  %v263_v32 = vld [vmem:[%s1381_s27 + $0x100] sm:$0xf] }
  0x37   : > { %260 = vst [vmem:[%s1386_s25 + $0x78] sm:$0xf] %v259_v30  ;;  %262 = vst [vmem:[%s1386_s25 + $0x7c] sm:$0xf] %v261_v31  ;;  %v265_v33 = vld [vmem:[%s1381_s27 + $0x108] sm:$0xf] }
  0x38   : > { %264 = vst [vmem:[%s1386_s25 + $0x80] sm:$0xf] %v263_v32  ;;  %v267_v34 = vld [vmem:[%s1381_s27 + $0x110] sm:$0xf]  ;;  %v269_v35 = vld [vmem:[%s1381_s27 + $0x118] sm:$0xf] }
  0x39   : > { %266 = vst [vmem:[%s1386_s25 + $0x84] sm:$0xf] %v265_v33  ;;  %268 = vst [vmem:[%s1386_s25 + $0x88] sm:$0xf] %v267_v34  ;;  %v271_v36 = vld [vmem:[%s1381_s27 + $0x120] sm:$0xf] }
  0x3a   : > { %270 = vst [vmem:[%s1386_s25 + $0x8c] sm:$0xf] %v269_v35  ;;  %v273_v37 = vld [vmem:[%s1381_s27 + $0x128] sm:$0xf]  ;;  %v275_v38 = vld [vmem:[%s1381_s27 + $0x130] sm:$0xf] }
  0x3b   : > { %272 = vst [vmem:[%s1386_s25 + $0x90] sm:$0xf] %v271_v36  ;;  %274 = vst [vmem:[%s1386_s25 + $0x94] sm:$0xf] %v273_v37  ;;  %v277_v39 = vld [vmem:[%s1381_s27 + $0x138] sm:$0xf] }
  0x3c   : > { %276 = vst [vmem:[%s1386_s25 + $0x98] sm:$0xf] %v275_v38  ;;  %v279_v40 = vld [vmem:[%s1381_s27 + $0x140] sm:$0xf]  ;;  %v281_v41 = vld [vmem:[%s1381_s27 + $0x148] sm:$0xf] }
  0x3d   : > { %278 = vst [vmem:[%s1386_s25 + $0x9c] sm:$0xf] %v277_v39  ;;  %280 = vst [vmem:[%s1386_s25 + $0xa0] sm:$0xf] %v279_v40  ;;  %v283_v42 = vld [vmem:[%s1381_s27 + $0x150] sm:$0xf] }
  0x3e   : > { %282 = vst [vmem:[%s1386_s25 + $0xa4] sm:$0xf] %v281_v41  ;;  %v285_v43 = vld [vmem:[%s1381_s27 + $0x158] sm:$0xf]  ;;  %v287_v44 = vld [vmem:[%s1381_s27 + $0x160] sm:$0xf] }
  0x3f   : > { %284 = vst [vmem:[%s1386_s25 + $0xa8] sm:$0xf] %v283_v42  ;;  %286 = vst [vmem:[%s1386_s25 + $0xac] sm:$0xf] %v285_v43  ;;  %v289_v45 = vld [vmem:[%s1381_s27 + $0x168] sm:$0xf] }
  0x40   : > { %288 = vst [vmem:[%s1386_s25 + $0xb0] sm:$0xf] %v287_v44  ;;  %v291_v46 = vld [vmem:[%s1381_s27 + $0x170] sm:$0xf]  ;;  %v293_v47 = vld [vmem:[%s1381_s27 + $0x178] sm:$0xf] }
  0x41   : > { %290 = vst [vmem:[%s1386_s25 + $0xb4] sm:$0xf] %v289_v45  ;;  %292 = vst [vmem:[%s1386_s25 + $0xb8] sm:$0xf] %v291_v46 }
  0x42   : > { %294 = vst [vmem:[%s1386_s25 + $0xbc] sm:$0xf] %v293_v47 }
  0x43 PF: > { %s414_s28 = sand.u32 1, %s1228_s14   ;;  %s950_s30 = sshll.u32 %s1252_s20, 4 }
  0x44   : > { %s1486_s9 = scalar_lea.hbm %s1601_s2, %s950_s30  ;;  %s417_s10 = scalar_lea.vmem [#allocation4], %s414_s28 }
  0x45   : > { %s424_s11 = sshll.u32 %s417_s10, 4  ;;  %s415_s12 = scalar_lea.sflag [#allocation5], %s414_s28  ;;  %s425_s11 = int_to_ptr.vmem [resolvable:$true] %s424_s11 }
  0x46   : > { %s1146_s22 = scalar_lea.hbm %s1486_s9, 16  ;;  %s1150_s25 = scalar_lea.hbm %s1601_s2, 32 }
  0x47   : > { %p1147_p13 = scmp.ne.s32.totalorder %s1486_s9, %s1146_s22  ;;  %p1151_p2 = scmp.lt.u32.totalorder %s1486_s9, %s1601_s2 }
  0x48   : > { %p1152_p3 = scmp.lt.u32.totalorder %s1150_s25, %s1146_s22  ;;  %p1154_p5 = scmp.lt.u32.totalorder %s1146_s22, %s1486_s9 }
  0x49   : > { %p1148_p0 = pnand %p1147_p13, %p1354_p6 }
  0x4a   : > { %p1153_p4 = por %p1152_p3, %p1151_p2 }
  0x4b   : > { %p1149_p1 = pneg %p1148_p0 }
  0x4c   : > { %p1155_p7 = por %p1154_p5, %p1153_p4 }
  0x4e   : > { %p1156_p8 = pnand %p1155_p7, %p1149_p1 }
  0x50   : > { %1159 = shalt.err (!%p1156_p8)
}
  0x51   : > { %s1160_s28 = scalar_lea.vmem %s425_s11, 16  ;;  %s1258_s8 = smov [#allocation4]  }
  0x52   : > { %p1161_p9 = scmp.ne.s32.totalorder %s425_s11, %s1160_s28  ;;  %s1164_s10 = sshll.u32 %s1258_s8, 4  ;;  %s1165_s10 = int_to_ptr.vmem [resolvable:$false] %s1164_s10 }
  0x53   : > { %s1166_s26 = scalar_lea.vmem %s1165_s10, 32  ;;  %p1167_p13 = scmp.lt.s32.totalorder %s425_s11, %s1165_s10 }
  0x54   : > { %p1162_p10 = pnand %p1161_p9, %p1354_p6  ;;  %p1168_p0 = scmp.lt.s32.totalorder %s1166_s26, %s1160_s28 }
  0x56   : > { %p1163_p12 = pneg %p1162_p10  ;;  %p1169_p11 = por %p1168_p0, %p1167_p13 }
  0x58   : > { %p1170_p2 = pnand %p1169_p11, %p1163_p12 }
  0x5a   : > { %1173 = shalt.err (!%p1170_p2)
}
  0x5b   : > { %1036 = dma.hbm_to_vmem [thread:$0]  (%p1354_p6), %s1486_s9, 16, %s425_s11, %s415_s12  }
  0x5c PF: > { %p951_p1 = scmp.ge.s32.totalorder %s1256_s21, 1  ;;  %p429_p3 = scmp.lt.s32.totalorder %s1256_s21, 13 }
  0x5e   : > { %p430_p4 = pnand %p951_p1, %p429_p3 }
  0x5f   : > { %s436_s22 = sand.u32 (!%p430_p4), 1, %s1232_s15   ;;  %s442_s27 = sand.u32 (!%p430_p4), 1, %s1224_s13  }
  0x60   : > { %433 = sbr.rel (%p430_p4) target bundleno = 381 (0x17d), region = 69  ;;  %s443_s30 = scalar_lea.sflag (!%p430_p4), [#allocation5], %s442_s27 }
  0x61   : > { %s1035_s25 = smul.u32 (!%p430_p4), 192, %s436_s22  ;;  %s1511_s28 = scalar_lea.vmem (!%p430_p4), [#allocation4], %s442_s27 }
  0x62   : > { %p1607_p11 = scmp.ne.s32.totalorder (!%p430_p4), %s1606_s5, 0 }
  0x63   : > { %s1509_s4 = scalar_lea.vmem (!%p430_p4), [#allocation3], %s1035_s25 }
  0x67   : > { %1215 = dma.done.wait (%p1607_p11), %s443_s30, 16  }
  0x68   : > { %1217 = vsyncadd (%p1607_p11), %s443_s30, 4294967280  ;;  %s481_s29 = smul.u32 3, %s1240_s17  ;;  %p493_p6 = scmp.lt.s32.totalorder %s1244_s18, 1 }
  0x69   : > { %p952_p7 = scmp.ne.s32.totalorder %s1240_s17, 0 }
  0x6a   : > { %p484_p5 = scmp.lt.s32.totalorder %s481_s29, 17  ;;  %s1624_s18 = smov (!%p493_p6, %s1244_s18), 1  ;;  %v1259_v48 = vmov (!%p952_p7), 0.0  }
  0x6b   : > { %s497_s11 = scalar_lea.vmem %s1602_s3, %s1624_s18  ;;  %502 = sbr.rel (%p952_p7) target bundleno = 114 (0x72), region = 81  ;;  %503 = vst [vmem:[#allocation2] sm:$0x3] (!%p952_p7), %v1259_v48 }
  0x6c   : > { %s1626_s29 = smov (!%p484_p5, %s481_s29), 17 }
  0x6d   : > { %s488_s5 = scalar_lea.vmem %s1599_s0, %s1626_s29 }
  0x72 PF: > { %v1122_v49 = vld [vmem:[%s1509_s4 + $0x40] sm:$0xff]   ;;  %v1260_v50 = vmov 0.0   ;;  %vm1261_vm0 = vmmov 0   ;;  %v1125_v53 = vld [vmem:[%s1509_s4 + $0x48] sm:$0xff]   ;;  %v1128_v56 = vld [vmem:[%s1509_s4 + $0x50] sm:$0xff]   ;;  %v566_v6 = vlaneseq  ;;  %p978_p8 = scmp.ne.s32.totalorder %s1240_s17, 5 }
  0x73   : > { %1014 = vmatprep.subr.bf16.mxu1 %v1260_v50  ;;  %v1123_v51 = vld [vmem:[%s1509_s4] sm:$0xff]   ;;  %983 = vmatprep.subr.bf16.mxu0 %v1122_v49  ;;  %v1126_v54 = vld [vmem:[%s1509_s4 + $0x8] sm:$0xff]   ;;  %v1129_v57 = vld [vmem:[%s1509_s4 + $0x10] sm:$0xff]   ;;  %v1262_v10 = vmov 1966171168  }
  0x74   : > { %v1124_v52 = vld [vmem:[%s1509_s4 + $0x80] sm:$0xff]   ;;  %1030 = vmatprep.mubr.msk.bf16.mxu1 %vm1261_vm0, %v1260_v50  ;;  %984 = vmatpush3.bf16.msra.mxu0 %v1123_v51  ;;  %v1127_v55 = vld [vmem:[%s1509_s4 + $0x88] sm:$0xff]   ;;  %v1130_v58 = vld [vmem:[%s1509_s4 + $0x90] sm:$0xff]   ;;  %v564_v11 = vunpack.c.l.s4 %v1262_v10  ;;  %v567_v12 = vshrl.u32 %v566_v6, 7 }
  0x75   : > { %1015 = vmatpush3.bf16.msra.mxu1 %v1124_v52  ;;  %985 = vmatprep.subr.bf16.mxu0 %v1125_v53  ;;  %v1131_v59 = vld [vmem:[%s1509_s4 + $0x58] sm:$0xff]   ;;  %v1134_v62 = vld [vmem:[%s1509_s4 + $0x60] sm:$0xff]   ;;  %v1137_v1 = vld [vmem:[%s1509_s4 + $0x68] sm:$0xff]  }
  0x76   : > { %1016 = vmatprep.subr.bf16.mxu1 %v1260_v50  ;;  %v1132_v60 = vld [vmem:[%s1509_s4 + $0x18] sm:$0xff]   ;;  %v1135_v63 = vld [vmem:[%s1509_s4 + $0x20] sm:$0xff]   ;;  %v1138_v2 = vld [vmem:[%s1509_s4 + $0x28] sm:$0xff]   ;;  %v565_v15 = vunpack.c.0.s8 %v564_v11 }
  0x77   : > { %v1133_v61 = vld [vmem:[%s1509_s4 + $0x98] sm:$0xff]   ;;  %v1136_v0 = vld [vmem:[%s1509_s4 + $0xa0] sm:$0xff]   ;;  %v1139_v3 = vld [vmem:[%s1509_s4 + $0xa8] sm:$0xff]  }
  0x78   : > { %986 = vmatpush3.bf16.msra.mxu0 %v1126_v54  ;;  %v1140_v4 = vld [vmem:[%s1509_s4 + $0x70] sm:$0xff]   ;;  %v1143_v8 = vld [vmem:[%s1509_s4 + $0x78] sm:$0xff]   ;;  %v568_v17 = vsub.s32 %v565_v15, %v567_v12 }
  0x79   : > { %1017 = vmatpush3.bf16.msra.mxu1 %v1127_v55  ;;  %987 = vmatprep.subr.bf16.mxu0 %v1128_v56  ;;  %v1141_v5 = vld [vmem:[%s1509_s4 + $0x30] sm:$0xff]   ;;  %v953_v9 = vld.sshfl [vmem:[%s488_s5] sm:$0x13 pattern:$0x75316420] }
  0x7a   : > { %1018 = vmatprep.subr.bf16.mxu1 %v1260_v50  ;;  %v1142_v7 = vld [vmem:[%s1509_s4 + $0xb0] sm:$0xff]   ;;  %v1144_v13 = vld [vmem:[%s1509_s4 + $0x38] sm:$0xff]   ;;  %v562_v14 = vcombine.high %v953_v9, %v953_v9  ;;  %v569_v19 = vrot.slane %v953_v9, %v568_v17 }
  0x7b   : > { %v1145_v16 = vld [vmem:[%s1509_s4 + $0xb8] sm:$0xff]  }
  0x7c   : > { %988 = vmatpush3.bf16.msra.mxu0 %v1129_v57  ;;  %v576_v18 = vrot.slane %v562_v14, %v568_v17  ;;  %v577_v20 = vcombine.high %v569_v19, %v569_v19  ;;  %v504_v27 = vld [vmem:[#allocation2] sm:$0x3] }
  0x7d   : > { %1019 = vmatpush3.bf16.msra.mxu1 %v1130_v58  ;;  %989 = vmatprep.subr.bf16.mxu0 %v1131_v59  ;;  %v979_v34 = vld [vmem:[%s1511_s28] ss:$0 sm:$0xff] (!%p978_p8) }
  0x7e   : > { %1020 = vmatprep.subr.bf16.mxu1 %v1260_v50  ;;  %757 = vmatprep.mubr.bf16.mxu0 %v576_v18 }
  0x80   : > { %990 = vmatpush3.bf16.msra.mxu0 %v1132_v60 }
  0x81   : > { %1021 = vmatpush3.bf16.msra.mxu1 %v1133_v61  ;;  %991 = vmatprep.subr.bf16.mxu0 %v1134_v62 }
  0x82   : > { %1022 = vmatprep.subr.bf16.mxu1 %v1260_v50 }
  0x84   : > { %992 = vmatpush3.bf16.msra.mxu0 %v1135_v63 }
  0x85   : > { %1023 = vmatpush3.bf16.msra.mxu1 %v1136_v0  ;;  %993 = vmatprep.subr.bf16.mxu0 %v1137_v1 }
  0x86   : > { %1024 = vmatprep.subr.bf16.mxu1 %v1260_v50 }
  0x88   : > { %994 = vmatpush3.bf16.msra.mxu0 %v1138_v2 }
  0x89   : > { %1025 = vmatpush3.bf16.msra.mxu1 %v1139_v3  ;;  %995 = vmatprep.subr.bf16.mxu0 %v1140_v4 }
  0x8a   : > { %1026 = vmatprep.subr.bf16.mxu1 %v1260_v50 }
  0x8c   : > { %996 = vmatpush3.bf16.msra.mxu0 %v1141_v5 }
  0x8d   : > { %1027 = vmatpush3.bf16.msra.mxu1 %v1142_v7  ;;  %997 = vmatprep.subr.bf16.mxu0 %v1143_v8 }
  0x8e   : > { %1028 = vmatprep.subr.bf16.mxu1 %v1260_v50 }
  0x90   : > { %998 = vmatpush3.bf16.msra.mxu0 %v1144_v13 }
  0x91   : > { %1029 = vmatpush3.bf16.msra.mxu1 %v1145_v16 }
  0x93   : > { %758 = vmatmul.mubr.bf16.vlgmr.msra.gmra.mrb[0].mxu0 %v569_v19 }
  0x94   : > { %1031 = vmatmul.mubr.bf16.vlgmr.msra.gmra.mrb[0].mxu1 %v577_v20 }
 0x166   : > { %v999_v21 = vpop.f32.mrb[0].mxu0 }
 0x167   : > { %v799_v22 = vpop.f32.mrb[0].mxu1  ;;  %v1000_v23 = vpop.f32.mrb[1].mxu0 }
 0x168   : > { %v1001_v24 = vadd.f32 %v1000_v23, %v999_v21  ;;  %v1032_v25 = vpop.f32.mrb[1].mxu1  ;;  %v1002_v26 = vpop.f32.mrb[2].mxu0  ;;  %810 = sbr.rel (%p978_p8) target bundleno = 381 (0x17d), region = 85 }
 0x169   : > { %v802_v28 = vpop.f32.mrb[2].mxu1  ;;  %v1003_v29 = vpop.f32.mrb[3].mxu0 }
 0x16a   : > { %v800_v30 = vadd.f32 %v1001_v24, %v799_v22  ;;  %v1033_v31 = vpop.f32.mrb[3].mxu1 }
 0x16c   : > { %v805_v32 = vadd.f32 %v800_v30, %v504_v27 }
 0x16e   : > { %806 = vst [vmem:[#allocation2] sm:$0x3] %v805_v32 }
 0x175   : > { %v811_v33 = vld [vmem:[#allocation2] sm:$0x3] }
 0x176   : > { %v819_v35 = vadd.f32 %v979_v34, %v811_v33 }
 0x178   : > { %v820_v36 = vmax.f32 %v819_v35, 0.0 }
 0x17a   : > { %v821_v37 = vpack.c.bf16 %v820_v36, %v820_v36 }
 0x17c   : > { %822 = vst [vmem:[%s497_s11] sm:$0x1] %v821_v37 }
 0x17d PF: > { %s16_s21 = sadd.s32 1, %s1256_s21   ;;  %s1608_s12 = smov %s1224_s13 }
 0x17e   : > { %p13_p9 = scmp.ge.s32.totalorder %s16_s21, 14   ;;  %s1609_s13 = smov %s1228_s14 }
 0x17f   : > { %s1610_s14 = smov %s1367_s6  ;;  %s1611_s15 = smov %s1236_s16 }
 0x180   : > { %s1612_s16 = smov %s1370_s7  ;;  %s1613_s17 = smov %s1248_s19 }
 0x181   : > { %s1614_s18 = smov %s1252_s20  ;;  %s1615_s19 = smov %s1618_s23 }
 0x182   : > { %s1616_s20 = smov %s1622_s24  ;;  %15 = sbr.rel (!%p13_p9) target bundleno = 6 (0x6), region = 132 }
 0x189   :  { %848 = vsyncpa [#allocation5], 1 }
 0x18a   :  { %850 = vsyncpa [#allocation5 + $0x1], 1 }

// kernel: custom_model_forward.37
= control target key start
LH: loop header
LB: loop body
LE: loop exit
PB: predicated region body
PF: predicated region fallthrough
CT: control target
= control target key end

     0   :  { %s1826_s0 = inlined_call_operand.vmem [shape: bf16[2,2304], index: 0, kind: input, shape index: {}]   ;;  %s1827_s1 = inlined_call_operand.vmem [shape: bf16[2304,512], index: 1, kind: input, shape index: {}]   ;;  %s1828_s2 = inlined_call_operand.hbm [shape: f32[1,512], index: 2, kind: input, shape index: {}]   ;;  %s1829_s3 = inlined_call_operand.vmem [shape: bf16[2,512], index: 3, kind: output, shape index: {}]  }
   0x1   :  { %1831 = sst [smem:[#allocation7_spill]] %s1827_s1 }
   0x2   :  { %8 = vsyncpa [#allocation5], 0 }
   0x3   :  { %10 = vsyncpa [#allocation5 + $0x1], 0  ;;  %s1474_s12 = smov 0   ;;  %s1476_s13 = smov 0  }
   0x4   :  { %s1478_s14 = smov 0   ;;  %s1480_s15 = smov 0  }
   0x5   :  { %s1482_s16 = smov 0   ;;  %s1484_s17 = smov 0  }
   0x6   :  { %s1486_s18 = smov 0   ;;  %s1488_s19 = smov 0  }
   0x7   :  { %s1490_s20 = smov 0   ;;  %s1492_s21 = smov 0  }
   0x8 LB: > { %s1105_s22 = sadd.s32 4294967295, %s1447_s21   ;;  %s28_s23 = sadd.s32 1, %s1439_s19  ;;  %s1447_s21 = sphi %s1492_s21, %s16_s21   ;;  %s1443_s20 = sphi %s1490_s20, %s1845_s20   ;;  %s1439_s19 = sphi %s1488_s19, %s1844_s19   ;;  %s1435_s18 = sphi %s1486_s18, %s1843_s18   ;;  %s1431_s17 = sphi %s1484_s17, %s1842_s17   ;;  %s1427_s16 = sphi %s1482_s16, %s1841_s16   ;;  %s1423_s15 = sphi %s1480_s15, %s1840_s15   ;;  %s1419_s14 = sphi %s1478_s14, %s1839_s14   ;;  %s1415_s13 = sphi %s1476_s13, %s1838_s13   ;;  %s1411_s12 = sphi %s1474_s12, %s1837_s12  }
   0x9   : > { %p29_p0 = scmp.ge.s32.totalorder %s28_s23, 6  ;;  %s31_s24 = sadd.s32 1, %s1443_s20 }
   0xa   : > { %s72_s25 = sadd.s32 1, %s1427_s16  ;;  %p79_p1 = scmp.ne.s32.totalorder %s1427_s16, %s1423_s15 }
   0xb   : > { %s1847_s23 = smov (%p29_p0, %s28_s23), 0  ;;  %s1849_s24 = smov (!%p29_p0, %s31_s24), %s1443_s20 }
   0xc   : > { %s67_s26 = ssub.s32 %s1439_s19, %s1847_s23  ;;  %p80_p2 = scmp.eq.s32.totalorder %s1447_s21, 0 }
   0xd   : > { %p33_p3 = scmp.ge.s32.totalorder %s1849_s24, 2  ;;  %s98_s27 = sadd.s32 1, %s1419_s14 }
   0xe   : > { %p1537_p4 = por %p80_p2, %p79_p1  ;;  %p105_p5 = scmp.ne.s32.totalorder %s1419_s14, %s1415_s13 }
   0xf   : > { %s1851_s24 = smov (%p33_p3, %s1849_s24), 0  ;;  %p111_p7 = scmp.ne.s32.totalorder %s1415_s13, %s1411_s12 }
  0x10   : > { %p1545_p6 = por %p105_p5, %p80_p2  ;;  %s68_s30 = ssub.s32 %s1443_s20, %s1851_s24 }
  0x11   : > { %p112_p8 = scmp.eq.s32.totalorder %s1105_s22, 0  ;;  %s69_s4 = sor.u32 %s68_s30, %s67_s26 }
  0x12   : > { %p96_p9 = scmp.eq.s32.totalorder %s68_s30, 0  ;;  %p70_p10 = scmp.eq.s32.totalorder %s69_s4, 0 }
  0x13   : > { %p1553_p11 = por %p112_p8, %p111_p7  ;;  %p1108_p12 = scmp.ge.s32.totalorder %s1447_s21, 12 }
  0x14   : > { %s1558_s6 = scalar_select %p96_p9, %s1419_s14, %s98_s27  }
  0x15   : > { %s1834_s5 = scalar_select %p1553_p11, 1, 0 }
  0x16   : > { %s1561_s7 = scalar_select %p70_p10, %s1427_s16, %s72_s25  }
  0x17   : > { %159 = sbr.rel (%p1108_p12) target bundleno = 89 (0x59), region = 16 }
  0x1e   : > { %174 = sbr.rel (!%p1537_p4) target bundleno = 64 (0x40), region = 24  ;;  %s176_s8 = sand.u32 (%p1537_p4), 1, %s1427_s16  }
  0x1f   : > { %s1177_s9 = smul.u32 (%p1537_p4), 384, %s176_s8  ;;  %s1109_s10 = sshll.u32 (%p1537_p4), %s1443_s20, 1 }
  0x20   : > { %s1173_s11 = smul.u32 (%p1537_p4), 192, %s1439_s19  ;;  %s1835_s1 = sld [smem:[#allocation7_spill]] (%p1537_p4) }
  0x21   : > { %s1577_s28 = scalar_lea.vmem (%p1537_p4), [#allocation3], %s1177_s9 }
  0x22   : > { %s182_s12 = sadd.s32 (%p1537_p4), %s1173_s11, %s1109_s10 }
  0x23   : > { %s1111_s22 = sshll.u32 (%p1537_p4), %s182_s12, 2 }
  0x26   : > { %s1572_s25 = scalar_lea.vmem %s1835_s1, %s1111_s22 }
  0x27   : > { %v306_v0 = vld [vmem:[%s1572_s25] sm:$0xff]  ;;  %v308_v1 = vld [vmem:[%s1572_s25 + $0x10] sm:$0xff] }
  0x28   : > { %v310_v2 = vld [vmem:[%s1572_s25 + $0x20] sm:$0xff]  ;;  %307 = vst [vmem:[%s1577_s28] sm:$0xff] %v306_v0  ;;  %309 = vst [vmem:[%s1577_s28 + $0x8] sm:$0xff] %v308_v1  ;;  %v312_v3 = vld [vmem:[%s1572_s25 + $0x30] sm:$0xff] }
  0x29   : > { %311 = vst [vmem:[%s1577_s28 + $0x10] sm:$0xff] %v310_v2  ;;  %v314_v4 = vld [vmem:[%s1572_s25 + $0x40] sm:$0xff]  ;;  %v316_v5 = vld [vmem:[%s1572_s25 + $0x50] sm:$0xff]  ;;  %313 = vst [vmem:[%s1577_s28 + $0x18] sm:$0xff] %v312_v3 }
  0x2a   : > { %315 = vst [vmem:[%s1577_s28 + $0x20] sm:$0xff] %v314_v4  ;;  %317 = vst [vmem:[%s1577_s28 + $0x28] sm:$0xff] %v316_v5  ;;  %v318_v6 = vld [vmem:[%s1572_s25 + $0x60] sm:$0xff]  ;;  %v320_v7 = vld [vmem:[%s1572_s25 + $0x70] sm:$0xff] }
  0x2b   : > { %v322_v8 = vld [vmem:[%s1572_s25 + $0x80] sm:$0xff]  ;;  %319 = vst [vmem:[%s1577_s28 + $0x30] sm:$0xff] %v318_v6  ;;  %321 = vst [vmem:[%s1577_s28 + $0x38] sm:$0xff] %v320_v7  ;;  %v324_v9 = vld [vmem:[%s1572_s25 + $0x90] sm:$0xff] }
  0x2c   : > { %323 = vst [vmem:[%s1577_s28 + $0x40] sm:$0xff] %v322_v8  ;;  %v326_v10 = vld [vmem:[%s1572_s25 + $0xa0] sm:$0xff]  ;;  %v328_v11 = vld [vmem:[%s1572_s25 + $0xb0] sm:$0xff]  ;;  %325 = vst [vmem:[%s1577_s28 + $0x48] sm:$0xff] %v324_v9 }
  0x2d   : > { %327 = vst [vmem:[%s1577_s28 + $0x50] sm:$0xff] %v326_v10  ;;  %329 = vst [vmem:[%s1577_s28 + $0x58] sm:$0xff] %v328_v11  ;;  %v330_v12 = vld [vmem:[%s1572_s25 + $0xc0] sm:$0xff]  ;;  %v332_v13 = vld [vmem:[%s1572_s25 + $0xd0] sm:$0xff] }
  0x2e   : > { %v334_v14 = vld [vmem:[%s1572_s25 + $0xe0] sm:$0xff]  ;;  %331 = vst [vmem:[%s1577_s28 + $0x60] sm:$0xff] %v330_v12  ;;  %333 = vst [vmem:[%s1577_s28 + $0x68] sm:$0xff] %v332_v13  ;;  %v336_v15 = vld [vmem:[%s1572_s25 + $0xf0] sm:$0xff] }
  0x2f   : > { %335 = vst [vmem:[%s1577_s28 + $0x70] sm:$0xff] %v334_v14  ;;  %v338_v16 = vld [vmem:[%s1572_s25 + $0x100] sm:$0xff]  ;;  %v340_v17 = vld [vmem:[%s1572_s25 + $0x110] sm:$0xff]  ;;  %337 = vst [vmem:[%s1577_s28 + $0x78] sm:$0xff] %v336_v15 }
  0x30   : > { %339 = vst [vmem:[%s1577_s28 + $0x80] sm:$0xff] %v338_v16  ;;  %341 = vst [vmem:[%s1577_s28 + $0x88] sm:$0xff] %v340_v17  ;;  %v342_v18 = vld [vmem:[%s1572_s25 + $0x120] sm:$0xff]  ;;  %v344_v19 = vld [vmem:[%s1572_s25 + $0x130] sm:$0xff] }
  0x31   : > { %v346_v20 = vld [vmem:[%s1572_s25 + $0x140] sm:$0xff]  ;;  %343 = vst [vmem:[%s1577_s28 + $0x90] sm:$0xff] %v342_v18  ;;  %345 = vst [vmem:[%s1577_s28 + $0x98] sm:$0xff] %v344_v19  ;;  %v348_v21 = vld [vmem:[%s1572_s25 + $0x150] sm:$0xff] }
  0x32   : > { %347 = vst [vmem:[%s1577_s28 + $0xa0] sm:$0xff] %v346_v20  ;;  %v350_v22 = vld [vmem:[%s1572_s25 + $0x160] sm:$0xff]  ;;  %v352_v23 = vld [vmem:[%s1572_s25 + $0x170] sm:$0xff]  ;;  %349 = vst [vmem:[%s1577_s28 + $0xa8] sm:$0xff] %v348_v21 }
  0x33   : > { %351 = vst [vmem:[%s1577_s28 + $0xb0] sm:$0xff] %v350_v22  ;;  %353 = vst [vmem:[%s1577_s28 + $0xb8] sm:$0xff] %v352_v23  ;;  %v354_v24 = vld [vmem:[%s1572_s25 + $0x180] sm:$0xff]  ;;  %v356_v25 = vld [vmem:[%s1572_s25 + $0x190] sm:$0xff] }
  0x34   : > { %v358_v26 = vld [vmem:[%s1572_s25 + $0x1a0] sm:$0xff]  ;;  %355 = vst [vmem:[%s1577_s28 + $0xc0] sm:$0xff] %v354_v24  ;;  %357 = vst [vmem:[%s1577_s28 + $0xc8] sm:$0xff] %v356_v25  ;;  %v360_v27 = vld [vmem:[%s1572_s25 + $0x1b0] sm:$0xff] }
  0x35   : > { %359 = vst [vmem:[%s1577_s28 + $0xd0] sm:$0xff] %v358_v26  ;;  %v362_v28 = vld [vmem:[%s1572_s25 + $0x1c0] sm:$0xff]  ;;  %v364_v29 = vld [vmem:[%s1572_s25 + $0x1d0] sm:$0xff]  ;;  %361 = vst [vmem:[%s1577_s28 + $0xd8] sm:$0xff] %v360_v27 }
  0x36   : > { %363 = vst [vmem:[%s1577_s28 + $0xe0] sm:$0xff] %v362_v28  ;;  %365 = vst [vmem:[%s1577_s28 + $0xe8] sm:$0xff] %v364_v29  ;;  %v366_v30 = vld [vmem:[%s1572_s25 + $0x1e0] sm:$0xff]  ;;  %v368_v31 = vld [vmem:[%s1572_s25 + $0x1f0] sm:$0xff] }
  0x37   : > { %v370_v32 = vld [vmem:[%s1572_s25 + $0x200] sm:$0xff]  ;;  %367 = vst [vmem:[%s1577_s28 + $0xf0] sm:$0xff] %v366_v30  ;;  %369 = vst [vmem:[%s1577_s28 + $0xf8] sm:$0xff] %v368_v31  ;;  %v372_v33 = vld [vmem:[%s1572_s25 + $0x210] sm:$0xff] }
  0x38   : > { %371 = vst [vmem:[%s1577_s28 + $0x100] sm:$0xff] %v370_v32  ;;  %v374_v34 = vld [vmem:[%s1572_s25 + $0x220] sm:$0xff]  ;;  %v376_v35 = vld [vmem:[%s1572_s25 + $0x230] sm:$0xff]  ;;  %373 = vst [vmem:[%s1577_s28 + $0x108] sm:$0xff] %v372_v33 }
  0x39   : > { %375 = vst [vmem:[%s1577_s28 + $0x110] sm:$0xff] %v374_v34  ;;  %377 = vst [vmem:[%s1577_s28 + $0x118] sm:$0xff] %v376_v35  ;;  %v378_v36 = vld [vmem:[%s1572_s25 + $0x240] sm:$0xff]  ;;  %v380_v37 = vld [vmem:[%s1572_s25 + $0x250] sm:$0xff] }
  0x3a   : > { %v382_v38 = vld [vmem:[%s1572_s25 + $0x260] sm:$0xff]  ;;  %379 = vst [vmem:[%s1577_s28 + $0x120] sm:$0xff] %v378_v36  ;;  %381 = vst [vmem:[%s1577_s28 + $0x128] sm:$0xff] %v380_v37  ;;  %v384_v39 = vld [vmem:[%s1572_s25 + $0x270] sm:$0xff] }
  0x3b   : > { %383 = vst [vmem:[%s1577_s28 + $0x130] sm:$0xff] %v382_v38  ;;  %v386_v40 = vld [vmem:[%s1572_s25 + $0x280] sm:$0xff]  ;;  %v388_v41 = vld [vmem:[%s1572_s25 + $0x290] sm:$0xff]  ;;  %385 = vst [vmem:[%s1577_s28 + $0x138] sm:$0xff] %v384_v39 }
  0x3c   : > { %387 = vst [vmem:[%s1577_s28 + $0x140] sm:$0xff] %v386_v40  ;;  %389 = vst [vmem:[%s1577_s28 + $0x148] sm:$0xff] %v388_v41  ;;  %v390_v42 = vld [vmem:[%s1572_s25 + $0x2a0] sm:$0xff]  ;;  %v392_v43 = vld [vmem:[%s1572_s25 + $0x2b0] sm:$0xff] }
  0x3d   : > { %v394_v44 = vld [vmem:[%s1572_s25 + $0x2c0] sm:$0xff]  ;;  %391 = vst [vmem:[%s1577_s28 + $0x150] sm:$0xff] %v390_v42  ;;  %393 = vst [vmem:[%s1577_s28 + $0x158] sm:$0xff] %v392_v43  ;;  %v396_v45 = vld [vmem:[%s1572_s25 + $0x2d0] sm:$0xff] }
  0x3e   : > { %395 = vst [vmem:[%s1577_s28 + $0x160] sm:$0xff] %v394_v44  ;;  %v398_v46 = vld [vmem:[%s1572_s25 + $0x2e0] sm:$0xff]  ;;  %v400_v47 = vld [vmem:[%s1572_s25 + $0x2f0] sm:$0xff]  ;;  %397 = vst [vmem:[%s1577_s28 + $0x168] sm:$0xff] %v396_v45 }
  0x3f   : > { %399 = vst [vmem:[%s1577_s28 + $0x170] sm:$0xff] %v398_v46  ;;  %401 = vst [vmem:[%s1577_s28 + $0x178] sm:$0xff] %v400_v47 }
  0x40 PF: > { %s408_s30 = sand.u32 1, %s1419_s14   ;;  %s1174_s4 = sshll.u32 %s1443_s20, 5 }
  0x41   : > { %s1112_s8 = sshll.u32 %s408_s30, 1  ;;  %s1677_s11 = scalar_lea.hbm %s1828_s2, %s1174_s4 }
  0x42   : > { %s412_s12 = scalar_lea.vmem [#allocation4], %s1112_s8  ;;  %s409_s26 = scalar_lea.sflag [#allocation5], %s408_s30 }
  0x43   : > { %s420_s22 = sshll.u32 %s412_s12, 4  ;;  %s1337_s27 = scalar_lea.hbm %s1677_s11, 32  ;;  %s421_s22 = int_to_ptr.vmem [resolvable:$true] %s420_s22 }
  0x44   : > { %p1338_p13 = scmp.ne.s32.totalorder %s1677_s11, %s1337_s27  ;;  %s1341_s1 = scalar_lea.hbm %s1828_s2, 64 }
  0x45   : > { %p1342_p2 = scmp.lt.u32.totalorder %s1677_s11, %s1828_s2  ;;  %p1343_p3 = scmp.lt.u32.totalorder %s1341_s1, %s1337_s27 }
  0x46   : > { %p1339_p0 = pnand %p1338_p13, %p1545_p6  ;;  %p1345_p5 = scmp.lt.u32.totalorder %s1337_s27, %s1677_s11 }
  0x47   : > { %p1344_p4 = por %p1343_p3, %p1342_p2 }
  0x48   : > { %p1340_p1 = pneg %p1339_p0 }
  0x49   : > { %p1346_p7 = por %p1345_p5, %p1344_p4 }
  0x4b   : > { %p1347_p8 = pnand %p1346_p7, %p1340_p1 }
  0x4d   : > { %1350 = shalt.err (!%p1347_p8)
}
  0x4e   : > { %s1351_s30 = scalar_lea.vmem %s421_s22, 32  ;;  %s1449_s8 = smov [#allocation4]  }
  0x4f   : > { %p1352_p9 = scmp.ne.s32.totalorder %s421_s22, %s1351_s30  ;;  %s1355_s10 = sshll.u32 %s1449_s8, 4  ;;  %s1356_s10 = int_to_ptr.vmem [resolvable:$false] %s1355_s10 }
  0x50   : > { %s1357_s12 = scalar_lea.vmem %s1356_s10, 64  ;;  %p1358_p13 = scmp.lt.s32.totalorder %s421_s22, %s1356_s10 }
  0x51   : > { %p1353_p10 = pnand %p1352_p9, %p1545_p6  ;;  %p1359_p0 = scmp.lt.s32.totalorder %s1357_s12, %s1351_s30 }
  0x53   : > { %p1354_p12 = pneg %p1353_p10  ;;  %p1360_p11 = por %p1359_p0, %p1358_p13 }
  0x55   : > { %p1361_p2 = pnand %p1360_p11, %p1354_p12 }
  0x57   : > { %1364 = shalt.err (!%p1361_p2)
}
  0x58   : > { %1179 = dma.hbm_to_vmem [thread:$0]  (%p1545_p6), %s1677_s11, 32, %s421_s22, %s409_s26  }
  0x59 PF: > { %p1115_p1 = scmp.ge.s32.totalorder %s1447_s21, 1  ;;  %p425_p3 = scmp.lt.s32.totalorder %s1447_s21, 13 }
  0x5b   : > { %p426_p4 = pnand %p1115_p1, %p425_p3 }
  0x5c   : > { %s432_s1 = sand.u32 (!%p426_p4), 1, %s1423_s15   ;;  %s438_s27 = sand.u32 (!%p426_p4), 1, %s1415_s13  }
  0x5d   : > { %429 = sbr.rel (%p426_p4) target bundleno = 418 (0x1a2), region = 66  ;;  %s1700_s28 = sshll.u32 (!%p426_p4), %s438_s27, 1 }
  0x5e   : > { %s1178_s25 = smul.u32 (!%p426_p4), 384, %s432_s1  ;;  %s439_s29 = scalar_lea.sflag (!%p426_p4), [#allocation5], %s438_s27 }
  0x5f   : > { %s442_s11 = scalar_lea.vmem (!%p426_p4), [#allocation4], %s1700_s28  ;;  %p1836_p6 = scmp.ne.s32.totalorder (!%p426_p4), %s1834_s5, 0 }
  0x60   : > { %s1702_s9 = scalar_lea.vmem (!%p426_p4), [#allocation3], %s1178_s25 }
  0x64   : > { %1406 = dma.done.wait (%p1836_p6), %s439_s29, 32  }
  0x65   : > { %1408 = vsyncadd (%p1836_p6), %s439_s29, 4294967264  ;;  %s480_s22 = smul.u32 3, %s1431_s17  ;;  %s1117_s26 = sshll.u32 %s1435_s18, 1 }
  0x66   : > { %p495_p11 = scmp.lt.s32.totalorder %s1117_s26, 3  ;;  %p1118_p7 = scmp.ne.s32.totalorder %s1431_s17, 0 }
  0x67   : > { %p483_p5 = scmp.lt.s32.totalorder %s480_s22, 17  ;;  %v1450_v48 = vmov (!%p1118_p7), 0.0  }
  0x68   : > { %s1853_s26 = smov (!%p495_p11, %s1117_s26), 3  ;;  %505 = sbr.rel (%p1118_p7) target bundleno = 111 (0x6f), region = 78 }
  0x69   : > { %s1855_s22 = smov (!%p483_p5, %s480_s22), 17  ;;  %s499_s30 = scalar_lea.vmem %s1829_s3, %s1853_s26  ;;  %506 = vst [vmem:[#allocation2] sm:$0xf] (!%p1118_p7), %v1450_v48 }
  0x6a   : > { %s487_s5 = scalar_lea.vmem %s1826_s0, %s1855_s22 }
  0x6f PF: > { %v1265_v49 = vld [vmem:[%s1702_s9 + $0x4] ss:$8 sps:$4 sm:$0xff]   ;;  %v1267_v50 = vld [vmem:[%s1702_s9] ss:$8 sps:$4 sm:$0xff]   ;;  %v1451_v51 = vmov 0   ;;  %v569_v12 = vlaneseq  ;;  %p1168_p8 = scmp.ne.s32.totalorder %s1431_s17, 5 }
  0x70   : > { %897 = vmatprep.mubr.bf16.mxu0 %v1451_v51  ;;  %824 = vmatprep.subr.bf16.mxu1 %v1265_v49  ;;  %v1268_v52 = vld [vmem:[%s1702_s9 + $0x14] ss:$8 sps:$4 sm:$0xff]   ;;  %v1270_v53 = vld [vmem:[%s1702_s9 + $0x10] ss:$8 sps:$4 sm:$0xff]   ;;  %v1271_v54 = vld [vmem:[%s1702_s9 + $0x24] ss:$8 sps:$4 sm:$0xff]  }
  0x71   : > { %825 = vmatpush1.bf16.msra.mxu1 %v1267_v50  ;;  %v1273_v55 = vld [vmem:[%s1702_s9 + $0x20] ss:$8 sps:$4 sm:$0xff]   ;;  %v1274_v56 = vld [vmem:[%s1702_s9 + $0x34] ss:$8 sps:$4 sm:$0xff]   ;;  %v1276_v57 = vld [vmem:[%s1702_s9 + $0x30] ss:$8 sps:$4 sm:$0xff]  }
  0x72   : > { %826 = vmatprep.subr.bf16.mxu1 %v1268_v52  ;;  %v1289_v58 = vld [vmem:[%s1702_s9 + $0x104] ss:$8 sps:$4 sm:$0xff]   ;;  %v1291_v59 = vld [vmem:[%s1702_s9 + $0x100] ss:$8 sps:$4 sm:$0xff]   ;;  %v1295_v61 = vld [vmem:[%s1702_s9 + $0x114] ss:$8 sps:$4 sm:$0xff]  }
  0x73   : > { %v1277_v60 = vld [vmem:[%s1702_s9 + $0x44] ss:$8 sps:$4 sm:$0xff]   ;;  %865 = vmatprep.subr.bf16.mxu0 %v1289_v58  ;;  %v1297_v62 = vld [vmem:[%s1702_s9 + $0x110] ss:$8 sps:$4 sm:$0xff]   ;;  %v1279_v63 = vld [vmem:[%s1702_s9 + $0x40] ss:$8 sps:$4 sm:$0xff]  }
  0x74   : > { %866 = vmatpush1.bf16.msra.mxu0 %v1291_v59  ;;  %v1280_v0 = vld [vmem:[%s1702_s9 + $0x54] ss:$8 sps:$4 sm:$0xff]   ;;  %v1301_v1 = vld [vmem:[%s1702_s9 + $0x124] ss:$8 sps:$4 sm:$0xff]   ;;  %v1303_v2 = vld [vmem:[%s1702_s9 + $0x120] ss:$8 sps:$4 sm:$0xff]  }
  0x75   : > { %827 = vmatpush1.bf16.msra.mxu1 %v1270_v53  ;;  %867 = vmatprep.subr.bf16.mxu0 %v1295_v61  ;;  %v1282_v3 = vld [vmem:[%s1702_s9 + $0x50] ss:$8 sps:$4 sm:$0xff]   ;;  %v1307_v4 = vld [vmem:[%s1702_s9 + $0x134] ss:$8 sps:$4 sm:$0xff]   ;;  %v1283_v5 = vld [vmem:[%s1702_s9 + $0x64] ss:$8 sps:$4 sm:$0xff]  }
  0x76   : > { %828 = vmatprep.subr.bf16.mxu1 %v1271_v54  ;;  %v1309_v6 = vld [vmem:[%s1702_s9 + $0x130] ss:$8 sps:$4 sm:$0xff]   ;;  %v1285_v7 = vld [vmem:[%s1702_s9 + $0x60] ss:$8 sps:$4 sm:$0xff]   ;;  %v1313_v8 = vld [vmem:[%s1702_s9 + $0x144] ss:$8 sps:$4 sm:$0xff]  }
  0x77   : > { %v1286_v9 = vld [vmem:[%s1702_s9 + $0x74] ss:$8 sps:$4 sm:$0xff]   ;;  %v1452_v10 = vmov 1966171168   ;;  %v1315_v13 = vld [vmem:[%s1702_s9 + $0x140] ss:$8 sps:$4 sm:$0xff]  }
  0x78   : > { %868 = vmatpush1.bf16.msra.mxu0 %v1297_v62  ;;  %v567_v11 = vunpack.c.l.s4 %v1452_v10  ;;  %v1288_v14 = vld [vmem:[%s1702_s9 + $0x70] ss:$8 sps:$4 sm:$0xff]   ;;  %v1319_v15 = vld [vmem:[%s1702_s9 + $0x154] ss:$8 sps:$4 sm:$0xff]   ;;  %v1292_v16 = vld [vmem:[%s1702_s9 + $0x84] ss:$8 sps:$4 sm:$0xff]  }
  0x79   : > { %829 = vmatpush1.bf16.msra.mxu1 %v1273_v55  ;;  %869 = vmatprep.subr.bf16.mxu0 %v1301_v1  ;;  %v1752_v18 = vshrl.u32 %v569_v12, 7  ;;  %v1321_v19 = vld [vmem:[%s1702_s9 + $0x150] ss:$8 sps:$4 sm:$0xff]   ;;  %v1294_v20 = vld [vmem:[%s1702_s9 + $0x80] ss:$8 sps:$4 sm:$0xff]  }
  0x7a   : > { %830 = vmatprep.subr.bf16.mxu1 %v1274_v56  ;;  %v568_v17 = vunpack.c.0.s8 %v567_v11  ;;  %v1325_v21 = vld [vmem:[%s1702_s9 + $0x164] ss:$8 sps:$4 sm:$0xff]   ;;  %v1298_v22 = vld [vmem:[%s1702_s9 + $0x94] ss:$8 sps:$4 sm:$0xff]   ;;  %v1327_v26 = vld [vmem:[%s1702_s9 + $0x160] ss:$8 sps:$4 sm:$0xff]  }
  0x7b   : > { %v1119_v23 = vld.sshfl [vmem:[%s487_s5] sm:$0x13 pattern:$0x75316420]  ;;  %v1300_v27 = vld [vmem:[%s1702_s9 + $0x90] ss:$8 sps:$4 sm:$0xff]  }
  0x7c   : > { %870 = vmatpush1.bf16.msra.mxu0 %v1303_v2  ;;  %v1764_v24 = vsub.s32 %v568_v17, %v1752_v18  ;;  %v565_v25 = vcombine.high %v1119_v23, %v1119_v23  ;;  %v1331_v28 = vld [vmem:[%s1702_s9 + $0x174] ss:$8 sps:$4 sm:$0xff]   ;;  %v1304_v30 = vld [vmem:[%s1702_s9 + $0xa4] ss:$8 sps:$4 sm:$0xff]   ;;  %v1333_v32 = vld [vmem:[%s1702_s9 + $0x170] ss:$8 sps:$4 sm:$0xff]  }
  0x7d   : > { %831 = vmatpush1.bf16.msra.mxu1 %v1276_v57  ;;  %871 = vmatprep.subr.bf16.mxu0 %v1307_v4  ;;  %v1306_v33 = vld [vmem:[%s1702_s9 + $0xa0] ss:$8 sps:$4 sm:$0xff]   ;;  %v1310_v34 = vld [vmem:[%s1702_s9 + $0xb4] ss:$8 sps:$4 sm:$0xff]   ;;  %v1312_v36 = vld [vmem:[%s1702_s9 + $0xb0] ss:$8 sps:$4 sm:$0xff]  }
  0x7e   : > { %832 = vmatprep.subr.bf16.mxu1 %v1277_v60  ;;  %v579_v29 = vrot.slane %v565_v25, %v1764_v24  ;;  %v572_v31 = vrot.slane %v1119_v23, %v1764_v24  ;;  %v1316_v37 = vld [vmem:[%s1702_s9 + $0xc4] ss:$8 sps:$4 sm:$0xff]   ;;  %v1318_v38 = vld [vmem:[%s1702_s9 + $0xc0] ss:$8 sps:$4 sm:$0xff]   ;;  %v1322_v39 = vld [vmem:[%s1702_s9 + $0xd4] ss:$8 sps:$4 sm:$0xff]  }
  0x7f   : > { %v1324_v40 = vld [vmem:[%s1702_s9 + $0xd0] ss:$8 sps:$4 sm:$0xff]   ;;  %v1328_v41 = vld [vmem:[%s1702_s9 + $0xe4] ss:$8 sps:$4 sm:$0xff]   ;;  %v1330_v42 = vld [vmem:[%s1702_s9 + $0xe0] ss:$8 sps:$4 sm:$0xff]  }
  0x80   : > { %872 = vmatpush1.bf16.msra.mxu0 %v1309_v6  ;;  %856 = vmatprep.mubr.bf16.mxu1 %v579_v29  ;;  %v580_v35 = vcombine.high %v572_v31, %v572_v31  ;;  %v1334_v43 = vld [vmem:[%s1702_s9 + $0xf4] ss:$8 sps:$4 sm:$0xff]   ;;  %v1336_v44 = vld [vmem:[%s1702_s9 + $0xf0] ss:$8 sps:$4 sm:$0xff]   ;;  %v1453_v49 = vmov 1983009808  }
  0x81   : > { %833 = vmatpush1.bf16.msra.mxu1 %v1279_v63  ;;  %873 = vmatprep.subr.bf16.mxu0 %v1313_v8  ;;  %v910_v50 = vunpack.c.l.s4 %v1453_v49  ;;  %v507_v60 = vld [vmem:[#allocation2] sm:$0xf]  ;;  %v924_v63 = vld [vmem:[%s442_s11] sm:$0x3] (!%p1168_p8)  ;;  %v932_v1 = vsub.s32 (!%p1168_p8), 1, %v1752_v18 }
  0x82   : > { %834 = vmatprep.subr.bf16.mxu1 %v1280_v0  ;;  %v928_v0 = vsub.s32 (!%p1168_p8), 0, %v1752_v18 }
  0x83   : > { %v911_v51 = vunpack.c.0.s8 %v910_v50 }
  0x84   : > { %874 = vmatpush1.bf16.msra.mxu0 %v1315_v13  ;;  %v929_v2 = vrot.slane (!%p1168_p8), %v924_v63, %v928_v0 }
  0x85   : > { %835 = vmatpush1.bf16.msra.mxu1 %v1282_v3  ;;  %875 = vmatprep.subr.bf16.mxu0 %v1319_v15  ;;  %v914_v56 = vsub.s32 %v911_v51, %v1752_v18  ;;  %v933_v3 = vrot.slane (!%p1168_p8), %v924_v63, %v932_v1 }
  0x86   : > { %836 = vmatprep.subr.bf16.mxu1 %v1283_v5 }
  0x87   : > { %v934_v4 = vcombine.low (!%p1168_p8), %v929_v2, %v933_v3 }
  0x88   : > { %876 = vmatpush1.bf16.msra.mxu0 %v1321_v19 }
  0x89   : > { %837 = vmatpush1.bf16.msra.mxu1 %v1285_v7  ;;  %877 = vmatprep.subr.bf16.mxu0 %v1325_v21  ;;  %v941_v6 = vrot.slane (!%p1168_p8), %v934_v4, %v914_v56 }
  0x8a   : > { %838 = vmatprep.subr.bf16.mxu1 %v1286_v9 }
  0x8c   : > { %878 = vmatpush1.bf16.msra.mxu0 %v1327_v26 }
  0x8d   : > { %839 = vmatpush1.bf16.msra.mxu1 %v1288_v14  ;;  %879 = vmatprep.subr.bf16.mxu0 %v1331_v28 }
  0x8e   : > { %840 = vmatprep.subr.bf16.mxu1 %v1292_v16 }
  0x90   : > { %880 = vmatpush1.bf16.msra.mxu0 %v1333_v32 }
  0x91   : > { %841 = vmatpush1.bf16.msra.mxu1 %v1294_v20 }
  0x92   : > { %842 = vmatprep.subr.bf16.mxu1 %v1298_v22 }
  0x93   : > { %898 = vmatmul.mubr.bf16.vlgmr.msra.gmra.mrb[0].mxu0 %v580_v35 }
  0x95   : > { %843 = vmatpush1.bf16.msra.mxu1 %v1300_v27 }
  0x96   : > { %844 = vmatprep.subr.bf16.mxu1 %v1304_v30 }
  0x99   : > { %845 = vmatpush1.bf16.msra.mxu1 %v1306_v33 }
  0x9a   : > { %846 = vmatprep.subr.bf16.mxu1 %v1310_v34 }
  0x9d   : > { %847 = vmatpush1.bf16.msra.mxu1 %v1312_v36 }
  0x9e   : > { %848 = vmatprep.subr.bf16.mxu1 %v1316_v37 }
  0xa1   : > { %849 = vmatpush1.bf16.msra.mxu1 %v1318_v38 }
  0xa2   : > { %850 = vmatprep.subr.bf16.mxu1 %v1322_v39 }
  0xa5   : > { %851 = vmatpush1.bf16.msra.mxu1 %v1324_v40 }
  0xa6   : > { %852 = vmatprep.subr.bf16.mxu1 %v1328_v41 }
  0xa9   : > { %853 = vmatpush1.bf16.msra.mxu1 %v1330_v42 }
  0xaa   : > { %854 = vmatprep.subr.bf16.mxu1 %v1334_v43 }
  0xad   : > { %855 = vmatpush1.bf16.msra.mxu1 %v1336_v44 }
  0xb0   : > { %857 = vmatmul.mubr.bf16.vlgmr.msra.gmra.mrb[0].mxu1 %v572_v31 }
 0x166   : > { %v899_v45 = vpop.f32.mrb[0].mxu0 }
 0x167   : > { %v901_v46 = vpop.f32.mrb[1].mxu0 }
 0x168   : > { %v903_v47 = vpop.f32.mrb[2].mxu0 }
 0x169   : > { %v904_v48 = vpop.f32.mrb[3].mxu0 }
 0x183   : > { %v858_v52 = vpop.f32.mrb[0].mxu1 }
 0x184   : > { %v900_v53 = vadd.f32 %v899_v45, %v858_v52  ;;  %v860_v54 = vpop.f32.mrb[1].mxu1 }
 0x185   : > { %v902_v55 = vadd.f32 %v901_v46, %v860_v54  ;;  %v862_v57 = vpop.f32.mrb[2].mxu1 }
 0x186   : > { %v863_v58 = vpop.f32.mrb[3].mxu1 }
 0x187   : > { %v908_v59 = vcombine.low %v900_v53, %v902_v55  ;;  %922 = sbr.rel (%p1168_p8) target bundleno = 418 (0x1a2), region = 82 }
 0x189   : > { %v915_v61 = vrot.slane %v908_v59, %v914_v56 }
 0x18b   : > { %v917_v62 = vadd.f32 %v915_v61, %v507_v60 }
 0x18d   : > { %918 = vst [vmem:[#allocation2] sm:$0xf] %v917_v62 }
 0x194   : > { %v923_v5 = vld [vmem:[#allocation2] sm:$0xf] }
 0x195   : > { %v943_v7 = vadd.f32 %v941_v6, %v923_v5 }
 0x197   : > { %v944_v8 = vmax.f32 %v943_v7, 0.0 }
 0x199   : > { %v952_v9 = vrot.slane %v944_v8, %v914_v56 }
 0x19b   : > { %v953_v10 = vcombine.high %v952_v9, %v952_v9 }
 0x19d   : > { %v1169_v11 = vpack.c.bf16 %v953_v10, %v952_v9 }
 0x19f   : > { %v967_v12 = vrot.slane %v1169_v11, %v1764_v24 }
 0x1a1   : > { %1170 = vst.sshfl [vmem:[%s499_s30] sm:$0x5 pattern:$0x73625140] %v967_v12 }
 0x1a2 PF: > { %s16_s21 = sadd.s32 1, %s1447_s21   ;;  %s1837_s12 = smov %s1415_s13 }
 0x1a3   : > { %p13_p9 = scmp.ge.s32.totalorder %s16_s21, 14   ;;  %s1838_s13 = smov %s1419_s14 }
 0x1a4   : > { %s1839_s14 = smov %s1558_s6  ;;  %s1840_s15 = smov %s1427_s16 }
 0x1a5   : > { %s1841_s16 = smov %s1561_s7  ;;  %s1842_s17 = smov %s1439_s19 }
 0x1a6   : > { %s1843_s18 = smov %s1443_s20  ;;  %s1844_s19 = smov %s1847_s23 }
 0x1a7   : > { %s1845_s20 = smov %s1851_s24  ;;  %15 = sbr.rel (!%p13_p9) target bundleno = 8 (0x8), region = 129 }
 0x1ae   :  { %1005 = vsyncpa [#allocation5], 1 }
 0x1af   :  { %1007 = vsyncpa [#allocation5 + $0x1], 1 }

// kernel: custom_model_forward.38
= control target key start
LH: loop header
LB: loop body
LE: loop exit
PB: predicated region body
PF: predicated region fallthrough
CT: control target
= control target key end

     0   :  { %8 = vsyncpa [#allocation5], 0  ;;  %s1388_s0 = inlined_call_operand.vmem [shape: bf16[2,256], index: 0, kind: input, shape index: {}]   ;;  %s1389_s1 = inlined_call_operand.vmem [shape: bf16[256,512], index: 1, kind: input, shape index: {}]   ;;  %s1390_s2 = inlined_call_operand.hbm [shape: f32[1,512], index: 2, kind: input, shape index: {}]   ;;  %s1391_s3 = inlined_call_operand.vmem [shape: bf16[2,512], index: 3, kind: output, shape index: {}]  }
   0x1   :  { %10 = vsyncpa [#allocation5 + $0x1], 0  ;;  %s1158_s12 = smov 0   ;;  %s1160_s13 = smov 0  }
   0x2   :  { %s1162_s14 = smov 0   ;;  %s1164_s15 = smov 0  }
   0x3   :  { %s1166_s16 = smov 0   ;;  %s1168_s17 = smov 0  }
   0x4 LB: > { %s899_s18 = sadd.s32 4294967295, %s1132_s17   ;;  %s31_s19 = sadd.s32 1, %s1128_s16  ;;  %s1132_s17 = sphi %s1168_s17, %s16_s17   ;;  %s1128_s16 = sphi %s1166_s16, %s1400_s16   ;;  %s1124_s15 = sphi %s1164_s15, %s1399_s15   ;;  %s1120_s14 = sphi %s1162_s14, %s1398_s14   ;;  %s1116_s13 = sphi %s1160_s13, %s1397_s13   ;;  %s1112_s12 = sphi %s1158_s12, %s1396_s12  }
   0x5   : > { %p33_p0 = scmp.ge.s32.totalorder %s31_s19, 2  ;;  %s72_s20 = sadd.s32 1, %s1120_s14 }
   0x6   : > { %p79_p1 = scmp.ne.s32.totalorder %s1120_s14, %s1116_s13  ;;  %p80_p2 = scmp.eq.s32.totalorder %s1132_s17, 0 }
   0x7   : > { %s1402_s19 = smov (%p33_p0, %s31_s19), 0  ;;  %p111_p4 = scmp.ne.s32.totalorder %s1116_s13, %s1112_s12 }
   0x8   : > { %p1194_p3 = por %p80_p2, %p79_p1  ;;  %s68_s22 = ssub.s32 %s1128_s16, %s1402_s19 }
   0x9   : > { %p112_p5 = scmp.eq.s32.totalorder %s899_s18, 0  ;;  %p70_p6 = scmp.eq.s32.totalorder %s68_s22, 0 }
   0xa   : > { %p903_p8 = scmp.ge.s32.totalorder %s1132_s17, 2 }
   0xb   : > { %p1201_p7 = por %p112_p5, %p111_p4 }
   0xc   : > { %s1206_s24 = scalar_select %p70_p6, %s1120_s14, %s72_s20  }
   0xd   : > { %s1394_s23 = scalar_select %p1201_p7, 1, 0 }
   0xe   : > { %171 = sbr.rel (%p903_p8) target bundleno = 66 (0x42), region = 20 }
  0x15   : > { %174 = sbr.rel (!%p1194_p3) target bundleno = 41 (0x29), region = 24  ;;  %s176_s25 = sand.u32 (%p1194_p3), 1, %s1120_s14  }
  0x16   : > { %s951_s26 = sshll.u32 (%p1194_p3), %s1128_s16, 3  ;;  %s904_s27 = sshll.u32 (%p1194_p3), %s176_s25, 8 }
  0x17   : > { %s1216_s30 = scalar_lea.vmem (%p1194_p3), %s1389_s1, %s951_s26  ;;  %s1221_s4 = scalar_lea.vmem (%p1194_p3), [#allocation3], %s904_s27 }
  0x18   : > { %v274_v0 = vld [vmem:[%s1216_s30] sm:$0xff] (%p1194_p3)  ;;  %v276_v1 = vld [vmem:[%s1216_s30 + $0x10] sm:$0xff] (%p1194_p3) }
  0x19   : > { %v278_v2 = vld [vmem:[%s1216_s30 + $0x20] sm:$0xff] (%p1194_p3)  ;;  %275 = vst [vmem:[%s1221_s4] sm:$0xff] (%p1194_p3), %v274_v0  ;;  %277 = vst [vmem:[%s1221_s4 + $0x8] sm:$0xff] (%p1194_p3), %v276_v1  ;;  %v280_v3 = vld [vmem:[%s1216_s30 + $0x30] sm:$0xff] (%p1194_p3) }
  0x1a   : > { %279 = vst [vmem:[%s1221_s4 + $0x10] sm:$0xff] (%p1194_p3), %v278_v2  ;;  %v282_v4 = vld [vmem:[%s1216_s30 + $0x40] sm:$0xff] (%p1194_p3)  ;;  %v284_v5 = vld [vmem:[%s1216_s30 + $0x50] sm:$0xff] (%p1194_p3)  ;;  %281 = vst [vmem:[%s1221_s4 + $0x18] sm:$0xff] (%p1194_p3), %v280_v3 }
  0x1b   : > { %283 = vst [vmem:[%s1221_s4 + $0x20] sm:$0xff] (%p1194_p3), %v282_v4  ;;  %285 = vst [vmem:[%s1221_s4 + $0x28] sm:$0xff] (%p1194_p3), %v284_v5  ;;  %v286_v6 = vld [vmem:[%s1216_s30 + $0x60] sm:$0xff] (%p1194_p3)  ;;  %v288_v7 = vld [vmem:[%s1216_s30 + $0x70] sm:$0xff] (%p1194_p3) }
  0x1c   : > { %v290_v8 = vld [vmem:[%s1216_s30 + $0x80] sm:$0xff]  ;;  %287 = vst [vmem:[%s1221_s4 + $0x30] sm:$0xff] %v286_v6  ;;  %289 = vst [vmem:[%s1221_s4 + $0x38] sm:$0xff] %v288_v7  ;;  %v292_v9 = vld [vmem:[%s1216_s30 + $0x90] sm:$0xff] }
  0x1d   : > { %291 = vst [vmem:[%s1221_s4 + $0x40] sm:$0xff] %v290_v8  ;;  %v294_v10 = vld [vmem:[%s1216_s30 + $0xa0] sm:$0xff]  ;;  %v296_v11 = vld [vmem:[%s1216_s30 + $0xb0] sm:$0xff]  ;;  %293 = vst [vmem:[%s1221_s4 + $0x48] sm:$0xff] %v292_v9 }
  0x1e   : > { %295 = vst [vmem:[%s1221_s4 + $0x50] sm:$0xff] %v294_v10  ;;  %297 = vst [vmem:[%s1221_s4 + $0x58] sm:$0xff] %v296_v11  ;;  %v298_v12 = vld [vmem:[%s1216_s30 + $0xc0] sm:$0xff]  ;;  %v300_v13 = vld [vmem:[%s1216_s30 + $0xd0] sm:$0xff] }
  0x1f   : > { %v302_v14 = vld [vmem:[%s1216_s30 + $0xe0] sm:$0xff]  ;;  %299 = vst [vmem:[%s1221_s4 + $0x60] sm:$0xff] %v298_v12  ;;  %301 = vst [vmem:[%s1221_s4 + $0x68] sm:$0xff] %v300_v13  ;;  %v304_v15 = vld [vmem:[%s1216_s30 + $0xf0] sm:$0xff] }
  0x20   : > { %303 = vst [vmem:[%s1221_s4 + $0x70] sm:$0xff] %v302_v14  ;;  %v306_v16 = vld [vmem:[%s1216_s30 + $0x100] sm:$0xff]  ;;  %v308_v17 = vld [vmem:[%s1216_s30 + $0x110] sm:$0xff]  ;;  %305 = vst [vmem:[%s1221_s4 + $0x78] sm:$0xff] %v304_v15 }
  0x21   : > { %307 = vst [vmem:[%s1221_s4 + $0x80] sm:$0xff] %v306_v16  ;;  %309 = vst [vmem:[%s1221_s4 + $0x88] sm:$0xff] %v308_v17  ;;  %v310_v18 = vld [vmem:[%s1216_s30 + $0x120] sm:$0xff]  ;;  %v312_v19 = vld [vmem:[%s1216_s30 + $0x130] sm:$0xff] }
  0x22   : > { %v314_v20 = vld [vmem:[%s1216_s30 + $0x140] sm:$0xff]  ;;  %311 = vst [vmem:[%s1221_s4 + $0x90] sm:$0xff] %v310_v18  ;;  %313 = vst [vmem:[%s1221_s4 + $0x98] sm:$0xff] %v312_v19  ;;  %v316_v21 = vld [vmem:[%s1216_s30 + $0x150] sm:$0xff] }
  0x23   : > { %315 = vst [vmem:[%s1221_s4 + $0xa0] sm:$0xff] %v314_v20  ;;  %v318_v22 = vld [vmem:[%s1216_s30 + $0x160] sm:$0xff]  ;;  %v320_v23 = vld [vmem:[%s1216_s30 + $0x170] sm:$0xff]  ;;  %317 = vst [vmem:[%s1221_s4 + $0xa8] sm:$0xff] %v316_v21 }
  0x24   : > { %319 = vst [vmem:[%s1221_s4 + $0xb0] sm:$0xff] %v318_v22  ;;  %321 = vst [vmem:[%s1221_s4 + $0xb8] sm:$0xff] %v320_v23  ;;  %v322_v24 = vld [vmem:[%s1216_s30 + $0x180] sm:$0xff]  ;;  %v324_v25 = vld [vmem:[%s1216_s30 + $0x190] sm:$0xff] }
  0x25   : > { %v326_v26 = vld [vmem:[%s1216_s30 + $0x1a0] sm:$0xff]  ;;  %323 = vst [vmem:[%s1221_s4 + $0xc0] sm:$0xff] %v322_v24  ;;  %325 = vst [vmem:[%s1221_s4 + $0xc8] sm:$0xff] %v324_v25  ;;  %v328_v27 = vld [vmem:[%s1216_s30 + $0x1b0] sm:$0xff] }
  0x26   : > { %327 = vst [vmem:[%s1221_s4 + $0xd0] sm:$0xff] %v326_v26  ;;  %v330_v28 = vld [vmem:[%s1216_s30 + $0x1c0] sm:$0xff]  ;;  %v332_v29 = vld [vmem:[%s1216_s30 + $0x1d0] sm:$0xff]  ;;  %329 = vst [vmem:[%s1221_s4 + $0xd8] sm:$0xff] %v328_v27 }
  0x27   : > { %331 = vst [vmem:[%s1221_s4 + $0xe0] sm:$0xff] %v330_v28  ;;  %333 = vst [vmem:[%s1221_s4 + $0xe8] sm:$0xff] %v332_v29  ;;  %v334_v30 = vld [vmem:[%s1216_s30 + $0x1e0] sm:$0xff]  ;;  %v336_v31 = vld [vmem:[%s1216_s30 + $0x1f0] sm:$0xff] }
  0x28   : > { %335 = vst [vmem:[%s1221_s4 + $0xf0] sm:$0xff] %v334_v30  ;;  %337 = vst [vmem:[%s1221_s4 + $0xf8] sm:$0xff] %v336_v31 }
  0x29 PF: > { %s344_s5 = sand.u32 1, %s1120_s14   ;;  %s952_s6 = sshll.u32 %s1128_s16, 5 }
  0x2a   : > { %s907_s7 = sshll.u32 %s344_s5, 1  ;;  %s1289_s10 = scalar_lea.hbm %s1390_s2, %s952_s6 }
  0x2b   : > { %s348_s11 = scalar_lea.vmem [#allocation4], %s907_s7  ;;  %s345_s18 = scalar_lea.sflag [#allocation5], %s344_s5 }
  0x2c   : > { %s356_s12 = sshll.u32 %s348_s11, 4  ;;  %s1054_s20 = scalar_lea.hbm %s1289_s10, 32  ;;  %s357_s12 = int_to_ptr.vmem [resolvable:$true] %s356_s12 }
  0x2d   : > { %p1055_p9 = scmp.ne.s32.totalorder %s1289_s10, %s1054_s20  ;;  %s1058_s26 = scalar_lea.hbm %s1390_s2, 64 }
  0x2e   : > { %p1059_p12 = scmp.lt.u32.totalorder %s1289_s10, %s1390_s2  ;;  %p1060_p13 = scmp.lt.u32.totalorder %s1058_s26, %s1054_s20 }
  0x2f   : > { %p1056_p10 = pnand %p1055_p9, %p1194_p3  ;;  %p1062_p1 = scmp.lt.u32.totalorder %s1054_s20, %s1289_s10 }
  0x30   : > { %p1061_p0 = por %p1060_p13, %p1059_p12 }
  0x31   : > { %p1057_p11 = pneg %p1056_p10 }
  0x32   : > { %p1063_p2 = por %p1062_p1, %p1061_p0 }
  0x34   : > { %p1064_p4 = pnand %p1063_p2, %p1057_p11 }
  0x36   : > { %1067 = shalt.err (!%p1064_p4)
}
  0x37   : > { %s1068_s29 = scalar_lea.vmem %s357_s12, 32  ;;  %s1134_s30 = smov [#allocation4]  }
  0x38   : > { %p1069_p5 = scmp.ne.s32.totalorder %s357_s12, %s1068_s29  ;;  %s1072_s4 = sshll.u32 %s1134_s30, 4  ;;  %s1073_s4 = int_to_ptr.vmem [resolvable:$false] %s1072_s4 }
  0x39   : > { %s1074_s5 = scalar_lea.vmem %s1073_s4, 64  ;;  %p1075_p9 = scmp.lt.s32.totalorder %s357_s12, %s1073_s4 }
  0x3a   : > { %p1070_p6 = pnand %p1069_p5, %p1194_p3  ;;  %p1076_p10 = scmp.lt.s32.totalorder %s1074_s5, %s1068_s29 }
  0x3c   : > { %p1071_p8 = pneg %p1070_p6  ;;  %p1077_p7 = por %p1076_p10, %p1075_p9 }
  0x3e   : > { %p1078_p12 = pnand %p1077_p7, %p1071_p8 }
  0x40   : > { %1081 = shalt.err (!%p1078_p12)
}
  0x41   : > { %953 = dma.hbm_to_vmem [thread:$0]  (%p1194_p3), %s1289_s10, 32, %s357_s12, %s345_s18  }
  0x42 PF: > { %p910_p11 = scmp.ge.s32.totalorder %s1132_s17, 1  ;;  %p361_p13 = scmp.lt.s32.totalorder %s1132_s17, 3 }
  0x44   : > { %p362_p0 = pnand %p910_p11, %p361_p13 }
  0x45   : > { %s368_s6 = sand.u32 (!%p362_p0), 1, %s1116_s13   ;;  %p1395_p7 = scmp.ne.s32.totalorder (!%p362_p0), %s1394_s23, 0 }
  0x46   : > { %365 = sbr.rel (%p362_p0) target bundleno = 381 (0x17d), region = 66  ;;  %s911_s7 = sshll.u32 (!%p362_p0), %s368_s6, 8 }
  0x47   : > { %s912_s8 = sshll.u32 (!%p362_p0), %s368_s6, 1  ;;  %s1311_s9 = scalar_lea.vmem (!%p362_p0), [#allocation3], %s911_s7 }
  0x48   : > { %s375_s11 = scalar_lea.sflag (!%p362_p0), [#allocation5], %s368_s6  ;;  %s1313_s20 = scalar_lea.vmem (!%p362_p0), [#allocation4], %s912_s8 }
  0x4d   : > { %1107 = dma.done.wait (%p1395_p7), %s375_s11, 32  }
  0x4e   : > { %1109 = vsyncadd (%p1395_p7), %s375_s11, 4294967264  ;;  %v1006_v32 = vld [vmem:[%s1311_s9 + $0x4] ss:$8 sps:$4 sm:$0xff]   ;;  %v1008_v33 = vld [vmem:[%s1311_s9] ss:$8 sps:$4 sm:$0xff]   ;;  %v488_v43 = vlaneseq  ;;  %v1136_v10 = vmov 0.0  }
  0x4f   : > { %661 = vmatprep.subr.bf16.mxu0 %v1006_v32  ;;  %v1009_v34 = vld [vmem:[%s1311_s9 + $0x14] ss:$8 sps:$4 sm:$0xff]   ;;  %v1011_v35 = vld [vmem:[%s1311_s9 + $0x10] ss:$8 sps:$4 sm:$0xff]   ;;  %v1012_v36 = vld [vmem:[%s1311_s9 + $0x24] ss:$8 sps:$4 sm:$0xff]  }
  0x50   : > { %662 = vmatpush1.bf16.msra.mxu0 %v1008_v33  ;;  %v1014_v37 = vld [vmem:[%s1311_s9 + $0x20] ss:$8 sps:$4 sm:$0xff]   ;;  %v1015_v38 = vld [vmem:[%s1311_s9 + $0x34] ss:$8 sps:$4 sm:$0xff]   ;;  %v1017_v39 = vld [vmem:[%s1311_s9 + $0x30] ss:$8 sps:$4 sm:$0xff]  }
  0x51   : > { %663 = vmatprep.subr.bf16.mxu0 %v1009_v34  ;;  %v1018_v40 = vld [vmem:[%s1311_s9 + $0x44] ss:$8 sps:$4 sm:$0xff]   ;;  %v1135_v41 = vmov 1966171168   ;;  %v1020_v44 = vld [vmem:[%s1311_s9 + $0x40] ss:$8 sps:$4 sm:$0xff]  }
  0x52   : > { %v486_v42 = vunpack.c.l.s4 %v1135_v41  ;;  %v1021_v45 = vld [vmem:[%s1311_s9 + $0x54] ss:$8 sps:$4 sm:$0xff]   ;;  %v1330_v47 = vshrl.u32 %v488_v43, 7  ;;  %v1023_v48 = vld [vmem:[%s1311_s9 + $0x50] ss:$8 sps:$4 sm:$0xff]   ;;  %s913_s10 = sshll.u32 %s1124_s15, 1 }
  0x53   : > { %v1024_v49 = vld [vmem:[%s1311_s9 + $0x64] ss:$8 sps:$4 sm:$0xff]   ;;  %v914_v51 = vld.sshfl [vmem:[%s1388_s0] sm:$0x11 pattern:$0x75316420] }
  0x54   : > { %664 = vmatpush1.bf16.msra.mxu0 %v1011_v35  ;;  %v487_v46 = vunpack.c.0.s8 %v486_v42  ;;  %v484_v52 = vcombine.high %v914_v51, %v914_v51  ;;  %v1026_v53 = vld [vmem:[%s1311_s9 + $0x60] ss:$8 sps:$4 sm:$0xff]   ;;  %v1027_v54 = vld [vmem:[%s1311_s9 + $0x74] ss:$8 sps:$4 sm:$0xff]   ;;  %v1029_v56 = vld [vmem:[%s1311_s9 + $0x70] ss:$8 sps:$4 sm:$0xff]  }
  0x55   : > { %665 = vmatprep.subr.bf16.mxu0 %v1012_v36  ;;  %v1030_v57 = vld [vmem:[%s1311_s9 + $0x84] ss:$8 sps:$4 sm:$0xff]   ;;  %v1032_v58 = vld [vmem:[%s1311_s9 + $0x80] ss:$8 sps:$4 sm:$0xff]   ;;  %v1033_v59 = vld [vmem:[%s1311_s9 + $0x94] ss:$8 sps:$4 sm:$0xff]  }
  0x56   : > { %v1335_v50 = vsub.s32 %v487_v46, %v1330_v47  ;;  %v1035_v60 = vld [vmem:[%s1311_s9 + $0x90] ss:$8 sps:$4 sm:$0xff]   ;;  %v1036_v61 = vld [vmem:[%s1311_s9 + $0xa4] ss:$8 sps:$4 sm:$0xff]   ;;  %v1038_v62 = vld [vmem:[%s1311_s9 + $0xa0] ss:$8 sps:$4 sm:$0xff]  }
  0x57   : > { %v1039_v63 = vld [vmem:[%s1311_s9 + $0xb4] ss:$8 sps:$4 sm:$0xff]   ;;  %v1041_v0 = vld [vmem:[%s1311_s9 + $0xb0] ss:$8 sps:$4 sm:$0xff]   ;;  %v1042_v1 = vld [vmem:[%s1311_s9 + $0xc4] ss:$8 sps:$4 sm:$0xff]  }
  0x58   : > { %666 = vmatpush1.bf16.msra.mxu0 %v1014_v37  ;;  %v498_v55 = vrot.slane %v484_v52, %v1335_v50  ;;  %v1044_v2 = vld [vmem:[%s1311_s9 + $0xc0] ss:$8 sps:$4 sm:$0xff]   ;;  %v1045_v3 = vld [vmem:[%s1311_s9 + $0xd4] ss:$8 sps:$4 sm:$0xff]   ;;  %v1047_v4 = vld [vmem:[%s1311_s9 + $0xd0] ss:$8 sps:$4 sm:$0xff]   ;;  %v491_v9 = vrot.slane %v914_v51, %v1335_v50 }
  0x59   : > { %667 = vmatprep.subr.bf16.mxu0 %v1015_v38  ;;  %v1048_v5 = vld [vmem:[%s1311_s9 + $0xe4] ss:$8 sps:$4 sm:$0xff]   ;;  %v1050_v6 = vld [vmem:[%s1311_s9 + $0xe0] ss:$8 sps:$4 sm:$0xff]   ;;  %v1051_v7 = vld [vmem:[%s1311_s9 + $0xf4] ss:$8 sps:$4 sm:$0xff]  }
  0x5a   : > { %693 = vmatprep.mubr.bf16.mxu0 %v498_v55  ;;  %v1053_v8 = vld [vmem:[%s1311_s9 + $0xf0] ss:$8 sps:$4 sm:$0xff]   ;;  %441 = vst [vmem:[#allocation2] sm:$0xf] %v1136_v10  ;;  %v1137_v11 = vmov 1983009808  }
  0x5b   : > { %v706_v12 = vunpack.c.l.s4 %v1137_v11  ;;  %v723_v16 = vsub.s32 0, %v1330_v47  ;;  %v727_v17 = vsub.s32 1, %v1330_v47  ;;  %v719_v19 = vld [vmem:[%s1313_s20] sm:$0x3]  ;;  %p431_p3 = scmp.lt.s32.totalorder %s913_s10, 3 }
  0x5c   : > { %668 = vmatpush1.bf16.msra.mxu0 %v1017_v39 }
  0x5d   : > { %669 = vmatprep.subr.bf16.mxu0 %v1018_v40  ;;  %v707_v13 = vunpack.c.0.s8 %v706_v12  ;;  %v724_v25 = vrot.slane %v719_v19, %v723_v16  ;;  %v728_v26 = vrot.slane %v719_v19, %v727_v17  ;;  %s1404_s10 = smov (!%p431_p3, %s913_s10), 3 }
  0x5e   : > { %s435_s22 = scalar_lea.vmem %s1391_s3, %s1404_s10 }
  0x5f   : > { %v710_v15 = vsub.s32 %v707_v13, %v1330_v47  ;;  %v729_v28 = vcombine.low %v724_v25, %v728_v26 }
  0x60   : > { %670 = vmatpush1.bf16.msra.mxu0 %v1020_v44 }
  0x61   : > { %671 = vmatprep.subr.bf16.mxu0 %v1021_v45  ;;  %v442_v22 = vld [vmem:[#allocation2] sm:$0xf]  ;;  %v736_v29 = vrot.slane %v729_v28, %v710_v15 }
  0x64   : > { %672 = vmatpush1.bf16.msra.mxu0 %v1023_v48 }
  0x65   : > { %673 = vmatprep.subr.bf16.mxu0 %v1024_v49 }
  0x68   : > { %674 = vmatpush1.bf16.msra.mxu0 %v1026_v53 }
  0x69   : > { %675 = vmatprep.subr.bf16.mxu0 %v1027_v54 }
  0x6c   : > { %676 = vmatpush1.bf16.msra.mxu0 %v1029_v56 }
  0x6d   : > { %677 = vmatprep.subr.bf16.mxu0 %v1030_v57 }
  0x70   : > { %678 = vmatpush1.bf16.msra.mxu0 %v1032_v58 }
  0x71   : > { %679 = vmatprep.subr.bf16.mxu0 %v1033_v59 }
  0x74   : > { %680 = vmatpush1.bf16.msra.mxu0 %v1035_v60 }
  0x75   : > { %681 = vmatprep.subr.bf16.mxu0 %v1036_v61 }
  0x78   : > { %682 = vmatpush1.bf16.msra.mxu0 %v1038_v62 }
  0x79   : > { %683 = vmatprep.subr.bf16.mxu0 %v1039_v63 }
  0x7c   : > { %684 = vmatpush1.bf16.msra.mxu0 %v1041_v0 }
  0x7d   : > { %685 = vmatprep.subr.bf16.mxu0 %v1042_v1 }
  0x80   : > { %686 = vmatpush1.bf16.msra.mxu0 %v1044_v2 }
  0x81   : > { %687 = vmatprep.subr.bf16.mxu0 %v1045_v3 }
  0x84   : > { %688 = vmatpush1.bf16.msra.mxu0 %v1047_v4 }
  0x85   : > { %689 = vmatprep.subr.bf16.mxu0 %v1048_v5 }
  0x88   : > { %690 = vmatpush1.bf16.msra.mxu0 %v1050_v6 }
  0x89   : > { %691 = vmatprep.subr.bf16.mxu0 %v1051_v7 }
  0x8c   : > { %692 = vmatpush1.bf16.msra.mxu0 %v1053_v8 }
  0x8f   : > { %694 = vmatmul.mubr.bf16.vlgmr.msra.gmra.mrb[0].mxu0 %v491_v9 }
 0x162   : > { %v695_v14 = vpop.f32.mrb[0].mxu0 }
 0x163   : > { %v697_v18 = vpop.f32.mrb[1].mxu0 }
 0x164   : > { %v704_v20 = vcombine.low %v695_v14, %v697_v18  ;;  %v699_v21 = vpop.f32.mrb[2].mxu0 }
 0x165   : > { %v700_v23 = vpop.f32.mrb[3].mxu0 }
 0x166   : > { %v711_v24 = vrot.slane %v704_v20, %v710_v15 }
 0x168   : > { %v713_v27 = vadd.f32 %v711_v24, %v442_v22 }
 0x16a   : > { %714 = vst [vmem:[#allocation2] sm:$0xf] %v713_v27 }
 0x171   : > { %v718_v30 = vld [vmem:[#allocation2] sm:$0xf] }
 0x172   : > { %v738_v31 = vadd.f32 %v736_v29, %v718_v30 }
 0x174   : > { %v746_v32 = vrot.slane %v738_v31, %v710_v15 }
 0x176   : > { %v747_v33 = vcombine.high %v746_v32, %v746_v32 }
 0x178   : > { %v947_v34 = vpack.c.bf16 %v747_v33, %v746_v32 }
 0x17a   : > { %v761_v35 = vrot.slane %v947_v34, %v1335_v50 }
 0x17c   : > { %948 = vst.sshfl [vmem:[%s435_s22] sm:$0x5 pattern:$0x73625140] %v761_v35 }
 0x17d PF: > { %s16_s17 = sadd.s32 1, %s1132_s17   ;;  %s1396_s12 = smov %s1116_s13 }
 0x17e   : > { %p13_p1 = scmp.ge.s32.totalorder %s16_s17, 4   ;;  %s1397_s13 = smov %s1120_s14 }
 0x17f   : > { %s1398_s14 = smov %s1206_s24  ;;  %s1399_s15 = smov %s1128_s16 }
 0x180   : > { %s1400_s16 = smov %s1402_s19  ;;  %15 = sbr.rel (!%p13_p1) target bundleno = 4 (0x4), region = 129 }
 0x187   :  { %799 = vsyncpa [#allocation5], 1 }
 0x188   :  { %801 = vsyncpa [#allocation5 + $0x1], 1 }

// kernel: custom_model_forward.40
= control target key start
LH: loop header
LB: loop body
LE: loop exit
PB: predicated region body
PF: predicated region fallthrough
CT: control target
= control target key end

     0   :  { %s1554_s12 = smov 0   ;;  %s1556_s13 = smov 0   ;;  %s1882_s0 = inlined_call_operand.vmem [shape: bf16[2,4608], index: 0, kind: input, shape index: {}]   ;;  %s1883_s1 = inlined_call_operand.vmem [shape: bf16[4608,512], index: 1, kind: input, shape index: {}]   ;;  %s1884_s2 = inlined_call_operand.vmem [shape: f32[1,512], index: 2, kind: input, shape index: {}]   ;;  %s1885_s3 = inlined_call_operand.vmem [shape: bf16[2,512], index: 3, kind: output, shape index: {}]  }
   0x1   :  { %s1558_s14 = smov 0   ;;  %s1560_s15 = smov 0  }
   0x2   :  { %s1562_s16 = smov 0   ;;  %s1564_s17 = smov 0  }
   0x3   :  { %s1566_s18 = smov 0  }
   0x4 LB: > { %s25_s19 = sadd.s32 1, %s1521_s16  ;;  %s28_s20 = sadd.s32 1, %s1525_s17  ;;  %s1529_s18 = sphi %s1566_s18, %s13_s18   ;;  %s1525_s17 = sphi %s1564_s17, %s1891_s17   ;;  %s1521_s16 = sphi %s1562_s16, %s1890_s16   ;;  %s1517_s15 = sphi %s1560_s15, %s1889_s15   ;;  %s1513_s14 = sphi %s1558_s14, %s1888_s14   ;;  %s1509_s13 = sphi %s1556_s13, %s1887_s13   ;;  %s1505_s12 = sphi %s1554_s12, %s1886_s12  }
   0x5   : > { %p26_p0 = scmp.ge.s32.totalorder %s25_s19, 9  ;;  %p76_p1 = scmp.ne.s32.totalorder %s1509_s13, %s1505_s12 }
   0x6   : > { %p77_p2 = scmp.eq.s32.totalorder %s1529_s18, 0  ;;  %s69_s24 = sadd.s32 1, %s1509_s13 }
   0x7   : > { %s1893_s19 = smov (%p26_p0, %s25_s19), 0  ;;  %s1895_s20 = smov (!%p26_p0, %s28_s20), %s1525_s17 }
   0x8   : > { %p78_p3 = por %p77_p2, %p76_p1  ;;  %p30_p4 = scmp.ge.s32.totalorder %s1895_s20, 2 }
   0x9   : > { %s64_s21 = ssub.s32 %s1521_s16, %s1893_s19  ;;  %p1235_p6 = scmp.ge.s32.totalorder %s1529_s18, 18 }
   0xa   : > { %s1897_s20 = smov (%p30_p4, %s1895_s20), 0 }
   0xb   : > { %s65_s22 = ssub.s32 %s1525_s17, %s1897_s20  ;;  %156 = sbr.rel (%p1235_p6) target bundleno = 57 (0x39), region = 16 }
   0xc   : > { %s66_s23 = sor.u32 %s65_s22, %s64_s21 }
   0xd   : > { %p67_p5 = scmp.eq.s32.totalorder %s66_s23, 0 }
   0xf   : > { %s1605_s25 = scalar_select %p67_p5, %s1509_s13, %s69_s24  }
  0x12   : > { %171 = sbr.rel (!%p78_p3) target bundleno = 57 (0x39), region = 24  ;;  %s173_s26 = sand.u32 (%p78_p3), 1, %s1509_s13  }
  0x13   : > { %s1238_s27 = sshll.u32 (%p78_p3), %s1525_s17, 1  ;;  %s1236_s28 = sshll.u32 (%p78_p3), %s173_s26, 9 }
  0x14   : > { %s1317_s29 = sshll.u32 (%p78_p3), %s1521_s16, 8  ;;  %s1619_s8 = scalar_lea.vmem (%p78_p3), [#allocation3], %s1236_s28 }
  0x15   : > { %s179_s30 = sadd.s32 (%p78_p3), %s1317_s29, %s1238_s27 }
  0x16   : > { %s1240_s4 = sshll.u32 (%p78_p3), %s179_s30, 2 }
  0x17   : > { %s1614_s7 = scalar_lea.vmem (%p78_p3), %s1883_s1, %s1240_s4 }
  0x18   : > { %v335_v0 = vld [vmem:[%s1614_s7] sm:$0xff] (%p78_p3)  ;;  %v337_v1 = vld [vmem:[%s1614_s7 + $0x10] sm:$0xff] (%p78_p3) }
  0x19   : > { %v339_v2 = vld [vmem:[%s1614_s7 + $0x20] sm:$0xff]  ;;  %336 = vst [vmem:[%s1619_s8] sm:$0xff] %v335_v0  ;;  %338 = vst [vmem:[%s1619_s8 + $0x8] sm:$0xff] %v337_v1  ;;  %v341_v3 = vld [vmem:[%s1614_s7 + $0x30] sm:$0xff] }
  0x1a   : > { %340 = vst [vmem:[%s1619_s8 + $0x10] sm:$0xff] %v339_v2  ;;  %v343_v4 = vld [vmem:[%s1614_s7 + $0x40] sm:$0xff]  ;;  %v345_v5 = vld [vmem:[%s1614_s7 + $0x50] sm:$0xff]  ;;  %342 = vst [vmem:[%s1619_s8 + $0x18] sm:$0xff] %v341_v3 }
  0x1b   : > { %344 = vst [vmem:[%s1619_s8 + $0x20] sm:$0xff] %v343_v4  ;;  %346 = vst [vmem:[%s1619_s8 + $0x28] sm:$0xff] %v345_v5  ;;  %v347_v6 = vld [vmem:[%s1614_s7 + $0x60] sm:$0xff]  ;;  %v349_v7 = vld [vmem:[%s1614_s7 + $0x70] sm:$0xff] }
  0x1c   : > { %v351_v8 = vld [vmem:[%s1614_s7 + $0x80] sm:$0xff]  ;;  %348 = vst [vmem:[%s1619_s8 + $0x30] sm:$0xff] %v347_v6  ;;  %350 = vst [vmem:[%s1619_s8 + $0x38] sm:$0xff] %v349_v7  ;;  %v353_v9 = vld [vmem:[%s1614_s7 + $0x90] sm:$0xff] }
  0x1d   : > { %352 = vst [vmem:[%s1619_s8 + $0x40] sm:$0xff] %v351_v8  ;;  %v355_v10 = vld [vmem:[%s1614_s7 + $0xa0] sm:$0xff]  ;;  %v357_v11 = vld [vmem:[%s1614_s7 + $0xb0] sm:$0xff]  ;;  %354 = vst [vmem:[%s1619_s8 + $0x48] sm:$0xff] %v353_v9 }
  0x1e   : > { %356 = vst [vmem:[%s1619_s8 + $0x50] sm:$0xff] %v355_v10  ;;  %358 = vst [vmem:[%s1619_s8 + $0x58] sm:$0xff] %v357_v11  ;;  %v359_v12 = vld [vmem:[%s1614_s7 + $0xc0] sm:$0xff]  ;;  %v361_v13 = vld [vmem:[%s1614_s7 + $0xd0] sm:$0xff] }
  0x1f   : > { %v363_v14 = vld [vmem:[%s1614_s7 + $0xe0] sm:$0xff]  ;;  %360 = vst [vmem:[%s1619_s8 + $0x60] sm:$0xff] %v359_v12  ;;  %362 = vst [vmem:[%s1619_s8 + $0x68] sm:$0xff] %v361_v13  ;;  %v365_v15 = vld [vmem:[%s1614_s7 + $0xf0] sm:$0xff] }
  0x20   : > { %364 = vst [vmem:[%s1619_s8 + $0x70] sm:$0xff] %v363_v14  ;;  %v367_v16 = vld [vmem:[%s1614_s7 + $0x100] sm:$0xff]  ;;  %v369_v17 = vld [vmem:[%s1614_s7 + $0x110] sm:$0xff]  ;;  %366 = vst [vmem:[%s1619_s8 + $0x78] sm:$0xff] %v365_v15 }
  0x21   : > { %368 = vst [vmem:[%s1619_s8 + $0x80] sm:$0xff] %v367_v16  ;;  %370 = vst [vmem:[%s1619_s8 + $0x88] sm:$0xff] %v369_v17  ;;  %v371_v18 = vld [vmem:[%s1614_s7 + $0x120] sm:$0xff]  ;;  %v373_v19 = vld [vmem:[%s1614_s7 + $0x130] sm:$0xff] }
  0x22   : > { %v375_v20 = vld [vmem:[%s1614_s7 + $0x140] sm:$0xff]  ;;  %372 = vst [vmem:[%s1619_s8 + $0x90] sm:$0xff] %v371_v18  ;;  %374 = vst [vmem:[%s1619_s8 + $0x98] sm:$0xff] %v373_v19  ;;  %v377_v21 = vld [vmem:[%s1614_s7 + $0x150] sm:$0xff] }
  0x23   : > { %376 = vst [vmem:[%s1619_s8 + $0xa0] sm:$0xff] %v375_v20  ;;  %v379_v22 = vld [vmem:[%s1614_s7 + $0x160] sm:$0xff]  ;;  %v381_v23 = vld [vmem:[%s1614_s7 + $0x170] sm:$0xff]  ;;  %378 = vst [vmem:[%s1619_s8 + $0xa8] sm:$0xff] %v377_v21 }
  0x24   : > { %380 = vst [vmem:[%s1619_s8 + $0xb0] sm:$0xff] %v379_v22  ;;  %382 = vst [vmem:[%s1619_s8 + $0xb8] sm:$0xff] %v381_v23  ;;  %v383_v24 = vld [vmem:[%s1614_s7 + $0x180] sm:$0xff]  ;;  %v385_v25 = vld [vmem:[%s1614_s7 + $0x190] sm:$0xff] }
  0x25   : > { %v387_v26 = vld [vmem:[%s1614_s7 + $0x1a0] sm:$0xff]  ;;  %384 = vst [vmem:[%s1619_s8 + $0xc0] sm:$0xff] %v383_v24  ;;  %386 = vst [vmem:[%s1619_s8 + $0xc8] sm:$0xff] %v385_v25  ;;  %v389_v27 = vld [vmem:[%s1614_s7 + $0x1b0] sm:$0xff] }
  0x26   : > { %388 = vst [vmem:[%s1619_s8 + $0xd0] sm:$0xff] %v387_v26  ;;  %v391_v28 = vld [vmem:[%s1614_s7 + $0x1c0] sm:$0xff]  ;;  %v393_v29 = vld [vmem:[%s1614_s7 + $0x1d0] sm:$0xff]  ;;  %390 = vst [vmem:[%s1619_s8 + $0xd8] sm:$0xff] %v389_v27 }
  0x27   : > { %392 = vst [vmem:[%s1619_s8 + $0xe0] sm:$0xff] %v391_v28  ;;  %394 = vst [vmem:[%s1619_s8 + $0xe8] sm:$0xff] %v393_v29  ;;  %v395_v30 = vld [vmem:[%s1614_s7 + $0x1e0] sm:$0xff]  ;;  %v397_v31 = vld [vmem:[%s1614_s7 + $0x1f0] sm:$0xff] }
  0x28   : > { %v399_v32 = vld [vmem:[%s1614_s7 + $0x200] sm:$0xff]  ;;  %396 = vst [vmem:[%s1619_s8 + $0xf0] sm:$0xff] %v395_v30  ;;  %398 = vst [vmem:[%s1619_s8 + $0xf8] sm:$0xff] %v397_v31  ;;  %v401_v33 = vld [vmem:[%s1614_s7 + $0x210] sm:$0xff] }
  0x29   : > { %400 = vst [vmem:[%s1619_s8 + $0x100] sm:$0xff] %v399_v32  ;;  %v403_v34 = vld [vmem:[%s1614_s7 + $0x220] sm:$0xff]  ;;  %v405_v35 = vld [vmem:[%s1614_s7 + $0x230] sm:$0xff]  ;;  %402 = vst [vmem:[%s1619_s8 + $0x108] sm:$0xff] %v401_v33 }
  0x2a   : > { %404 = vst [vmem:[%s1619_s8 + $0x110] sm:$0xff] %v403_v34  ;;  %406 = vst [vmem:[%s1619_s8 + $0x118] sm:$0xff] %v405_v35  ;;  %v407_v36 = vld [vmem:[%s1614_s7 + $0x240] sm:$0xff]  ;;  %v409_v37 = vld [vmem:[%s1614_s7 + $0x250] sm:$0xff] }
  0x2b   : > { %v411_v38 = vld [vmem:[%s1614_s7 + $0x260] sm:$0xff]  ;;  %408 = vst [vmem:[%s1619_s8 + $0x120] sm:$0xff] %v407_v36  ;;  %410 = vst [vmem:[%s1619_s8 + $0x128] sm:$0xff] %v409_v37  ;;  %v413_v39 = vld [vmem:[%s1614_s7 + $0x270] sm:$0xff] }
  0x2c   : > { %412 = vst [vmem:[%s1619_s8 + $0x130] sm:$0xff] %v411_v38  ;;  %v415_v40 = vld [vmem:[%s1614_s7 + $0x280] sm:$0xff]  ;;  %v417_v41 = vld [vmem:[%s1614_s7 + $0x290] sm:$0xff]  ;;  %414 = vst [vmem:[%s1619_s8 + $0x138] sm:$0xff] %v413_v39 }
  0x2d   : > { %416 = vst [vmem:[%s1619_s8 + $0x140] sm:$0xff] %v415_v40  ;;  %418 = vst [vmem:[%s1619_s8 + $0x148] sm:$0xff] %v417_v41  ;;  %v419_v42 = vld [vmem:[%s1614_s7 + $0x2a0] sm:$0xff]  ;;  %v421_v43 = vld [vmem:[%s1614_s7 + $0x2b0] sm:$0xff] }
  0x2e   : > { %v423_v44 = vld [vmem:[%s1614_s7 + $0x2c0] sm:$0xff]  ;;  %420 = vst [vmem:[%s1619_s8 + $0x150] sm:$0xff] %v419_v42  ;;  %422 = vst [vmem:[%s1619_s8 + $0x158] sm:$0xff] %v421_v43  ;;  %v425_v45 = vld [vmem:[%s1614_s7 + $0x2d0] sm:$0xff] }
  0x2f   : > { %424 = vst [vmem:[%s1619_s8 + $0x160] sm:$0xff] %v423_v44  ;;  %v427_v46 = vld [vmem:[%s1614_s7 + $0x2e0] sm:$0xff]  ;;  %v429_v47 = vld [vmem:[%s1614_s7 + $0x2f0] sm:$0xff]  ;;  %426 = vst [vmem:[%s1619_s8 + $0x168] sm:$0xff] %v425_v45 }
  0x30   : > { %428 = vst [vmem:[%s1619_s8 + $0x170] sm:$0xff] %v427_v46  ;;  %430 = vst [vmem:[%s1619_s8 + $0x178] sm:$0xff] %v429_v47  ;;  %v431_v48 = vld [vmem:[%s1614_s7 + $0x300] sm:$0xff]  ;;  %v433_v49 = vld [vmem:[%s1614_s7 + $0x310] sm:$0xff] }
  0x31   : > { %v435_v50 = vld [vmem:[%s1614_s7 + $0x320] sm:$0xff]  ;;  %432 = vst [vmem:[%s1619_s8 + $0x180] sm:$0xff] %v431_v48  ;;  %434 = vst [vmem:[%s1619_s8 + $0x188] sm:$0xff] %v433_v49  ;;  %v437_v51 = vld [vmem:[%s1614_s7 + $0x330] sm:$0xff] }
  0x32   : > { %436 = vst [vmem:[%s1619_s8 + $0x190] sm:$0xff] %v435_v50  ;;  %v439_v52 = vld [vmem:[%s1614_s7 + $0x340] sm:$0xff]  ;;  %v441_v53 = vld [vmem:[%s1614_s7 + $0x350] sm:$0xff]  ;;  %438 = vst [vmem:[%s1619_s8 + $0x198] sm:$0xff] %v437_v51 }
  0x33   : > { %440 = vst [vmem:[%s1619_s8 + $0x1a0] sm:$0xff] %v439_v52  ;;  %442 = vst [vmem:[%s1619_s8 + $0x1a8] sm:$0xff] %v441_v53  ;;  %v443_v54 = vld [vmem:[%s1614_s7 + $0x360] sm:$0xff]  ;;  %v445_v55 = vld [vmem:[%s1614_s7 + $0x370] sm:$0xff] }
  0x34   : > { %v447_v56 = vld [vmem:[%s1614_s7 + $0x380] sm:$0xff]  ;;  %444 = vst [vmem:[%s1619_s8 + $0x1b0] sm:$0xff] %v443_v54  ;;  %446 = vst [vmem:[%s1619_s8 + $0x1b8] sm:$0xff] %v445_v55  ;;  %v449_v57 = vld [vmem:[%s1614_s7 + $0x390] sm:$0xff] }
  0x35   : > { %448 = vst [vmem:[%s1619_s8 + $0x1c0] sm:$0xff] %v447_v56  ;;  %v451_v58 = vld [vmem:[%s1614_s7 + $0x3a0] sm:$0xff]  ;;  %v453_v59 = vld [vmem:[%s1614_s7 + $0x3b0] sm:$0xff]  ;;  %450 = vst [vmem:[%s1619_s8 + $0x1c8] sm:$0xff] %v449_v57 }
  0x36   : > { %452 = vst [vmem:[%s1619_s8 + $0x1d0] sm:$0xff] %v451_v58  ;;  %454 = vst [vmem:[%s1619_s8 + $0x1d8] sm:$0xff] %v453_v59  ;;  %v455_v60 = vld [vmem:[%s1614_s7 + $0x3c0] sm:$0xff]  ;;  %v457_v61 = vld [vmem:[%s1614_s7 + $0x3d0] sm:$0xff] }
  0x37   : > { %v459_v62 = vld [vmem:[%s1614_s7 + $0x3e0] sm:$0xff]  ;;  %456 = vst [vmem:[%s1619_s8 + $0x1e0] sm:$0xff] %v455_v60  ;;  %458 = vst [vmem:[%s1619_s8 + $0x1e8] sm:$0xff] %v457_v61  ;;  %v461_v63 = vld [vmem:[%s1614_s7 + $0x3f0] sm:$0xff] }
  0x38   : > { %460 = vst [vmem:[%s1619_s8 + $0x1f0] sm:$0xff] %v459_v62  ;;  %462 = vst [vmem:[%s1619_s8 + $0x1f8] sm:$0xff] %v461_v63 }
  0x39 PF: > { %p1241_p7 = scmp.ge.s32.totalorder %s1529_s18, 1  ;;  %p475_p8 = scmp.lt.s32.totalorder %s1529_s18, 19 }
  0x3b   : > { %p476_p9 = pnand %p1241_p7, %p475_p8 }
  0x3c   : > { %s482_s9 = sand.u32 (!%p476_p9), 1, %s1505_s12   ;;  %s1243_s10 = sshll.u32 (!%p476_p9), %s1513_s14, 2 }
  0x3d   : > { %479 = sbr.rel (%p476_p9) target bundleno = 385 (0x181), region = 66  ;;  %s1242_s11 = sshll.u32 (!%p476_p9), %s482_s9, 9 }
  0x3e   : > { %p523_p10 = scmp.lt.s32.totalorder (!%p476_p9), %s1243_s10, 35  ;;  %s1244_s21 = sshll.u32 (!%p476_p9), %s1517_s15, 1 }
  0x3f   : > { %p532_p11 = scmp.lt.s32.totalorder (!%p476_p9), %s1244_s21, 3  ;;  %s1767_s30 = scalar_lea.vmem (!%p476_p9), [#allocation3], %s1242_s11 }
  0x40   : > { %p1246_p12 = scmp.ne.s32.totalorder (!%p476_p9), %s1513_s14, 0 }
  0x44   : > { %s1899_s10 = smov (!%p523_p10, %s1243_s10), 35  ;;  %s1901_s21 = smov (!%p532_p11, %s1244_s21), 3 }
  0x45   : > { %s527_s24 = scalar_lea.vmem %s1882_s0, %s1899_s10  ;;  %s534_s12 = scalar_lea.vmem %s1884_s2, %s1901_s21  ;;  %v1531_v0 = vmov (!%p1246_p12), 0.0  }
  0x46   : > { %s543_s15 = scalar_lea.vmem %s1885_s3, %s1901_s21  ;;  %548 = sbr.rel (%p1246_p12) target bundleno = 77 (0x4d), region = 74  ;;  %549 = vst [vmem:[#allocation2] sm:$0xf] (!%p1246_p12), %v1531_v0 }
  0x4d PF: > { %v1379_v1 = vld [vmem:[%s1767_s30 + $0x4] ss:$8 sps:$4 sm:$0xff]   ;;  %v1383_v3 = vld [vmem:[%s1767_s30] ss:$8 sps:$4 sm:$0xff]   ;;  %v1385_v5 = vld [vmem:[%s1767_s30 + $0x14] ss:$8 sps:$4 sm:$0xff]   ;;  %v628_v41 = vlaneseq }
  0x4e   : > { %v1381_v2 = vld [vmem:[%s1767_s30 + $0x104] ss:$8 sps:$4 sm:$0xff]   ;;  %965 = vmatprep.subr.bf16.mxu1 %v1379_v1  ;;  %v1384_v4 = vld [vmem:[%s1767_s30 + $0x100] ss:$8 sps:$4 sm:$0xff]   ;;  %v1387_v6 = vld [vmem:[%s1767_s30 + $0x114] ss:$8 sps:$4 sm:$0xff]  }
  0x4f   : > { %1006 = vmatprep.subr.bf16.mxu0 %v1381_v2  ;;  %966 = vmatpush1.bf16.msra.mxu1 %v1383_v3  ;;  %v1389_v7 = vld [vmem:[%s1767_s30 + $0x10] ss:$8 sps:$4 sm:$0xff]   ;;  %v1391_v9 = vld [vmem:[%s1767_s30 + $0x24] ss:$8 sps:$4 sm:$0xff]   ;;  %v1395_v11 = vld [vmem:[%s1767_s30 + $0x20] ss:$8 sps:$4 sm:$0xff]  }
  0x50   : > { %1007 = vmatpush1.bf16.msra.mxu0 %v1384_v4  ;;  %967 = vmatprep.subr.bf16.mxu1 %v1385_v5  ;;  %v1390_v8 = vld [vmem:[%s1767_s30 + $0x110] ss:$8 sps:$4 sm:$0xff]   ;;  %v1393_v10 = vld [vmem:[%s1767_s30 + $0x124] ss:$8 sps:$4 sm:$0xff]   ;;  %v1396_v12 = vld [vmem:[%s1767_s30 + $0x120] ss:$8 sps:$4 sm:$0xff]  }
  0x51   : > { %1008 = vmatprep.subr.bf16.mxu0 %v1387_v6  ;;  %v1397_v13 = vld [vmem:[%s1767_s30 + $0x34] ss:$8 sps:$4 sm:$0xff]   ;;  %v1401_v15 = vld [vmem:[%s1767_s30 + $0x30] ss:$8 sps:$4 sm:$0xff]   ;;  %v1403_v17 = vld [vmem:[%s1767_s30 + $0x44] ss:$8 sps:$4 sm:$0xff]  }
  0x52   : > { %v1399_v14 = vld [vmem:[%s1767_s30 + $0x134] ss:$8 sps:$4 sm:$0xff]   ;;  %v1402_v16 = vld [vmem:[%s1767_s30 + $0x130] ss:$8 sps:$4 sm:$0xff]   ;;  %v1405_v18 = vld [vmem:[%s1767_s30 + $0x144] ss:$8 sps:$4 sm:$0xff]  }
  0x53   : > { %968 = vmatpush1.bf16.msra.mxu1 %v1389_v7  ;;  %v1407_v19 = vld [vmem:[%s1767_s30 + $0x40] ss:$8 sps:$4 sm:$0xff]   ;;  %v1409_v21 = vld [vmem:[%s1767_s30 + $0x54] ss:$8 sps:$4 sm:$0xff]   ;;  %v1413_v23 = vld [vmem:[%s1767_s30 + $0x50] ss:$8 sps:$4 sm:$0xff]  }
  0x54   : > { %1009 = vmatpush1.bf16.msra.mxu0 %v1390_v8  ;;  %969 = vmatprep.subr.bf16.mxu1 %v1391_v9  ;;  %v1408_v20 = vld [vmem:[%s1767_s30 + $0x140] ss:$8 sps:$4 sm:$0xff]   ;;  %v1411_v22 = vld [vmem:[%s1767_s30 + $0x154] ss:$8 sps:$4 sm:$0xff]   ;;  %v1414_v24 = vld [vmem:[%s1767_s30 + $0x150] ss:$8 sps:$4 sm:$0xff]  }
  0x55   : > { %1010 = vmatprep.subr.bf16.mxu0 %v1393_v10  ;;  %v1415_v25 = vld [vmem:[%s1767_s30 + $0x64] ss:$8 sps:$4 sm:$0xff]   ;;  %v1419_v27 = vld [vmem:[%s1767_s30 + $0x60] ss:$8 sps:$4 sm:$0xff]   ;;  %v1421_v29 = vld [vmem:[%s1767_s30 + $0x74] ss:$8 sps:$4 sm:$0xff]  }
  0x56   : > { %v1417_v26 = vld [vmem:[%s1767_s30 + $0x164] ss:$8 sps:$4 sm:$0xff]   ;;  %v1420_v28 = vld [vmem:[%s1767_s30 + $0x160] ss:$8 sps:$4 sm:$0xff]   ;;  %v1423_v30 = vld [vmem:[%s1767_s30 + $0x174] ss:$8 sps:$4 sm:$0xff]  }
  0x57   : > { %970 = vmatpush1.bf16.msra.mxu1 %v1395_v11  ;;  %v1425_v31 = vld [vmem:[%s1767_s30 + $0x70] ss:$8 sps:$4 sm:$0xff]   ;;  %v1427_v33 = vld [vmem:[%s1767_s30 + $0x84] ss:$8 sps:$4 sm:$0xff]   ;;  %v1431_v35 = vld [vmem:[%s1767_s30 + $0x80] ss:$8 sps:$4 sm:$0xff]  }
  0x58   : > { %1011 = vmatpush1.bf16.msra.mxu0 %v1396_v12  ;;  %971 = vmatprep.subr.bf16.mxu1 %v1397_v13  ;;  %v1426_v32 = vld [vmem:[%s1767_s30 + $0x170] ss:$8 sps:$4 sm:$0xff]   ;;  %v1429_v34 = vld [vmem:[%s1767_s30 + $0x184] ss:$8 sps:$4 sm:$0xff]   ;;  %v1432_v36 = vld [vmem:[%s1767_s30 + $0x180] ss:$8 sps:$4 sm:$0xff]  }
  0x59   : > { %1012 = vmatprep.subr.bf16.mxu0 %v1399_v14  ;;  %v1433_v37 = vld [vmem:[%s1767_s30 + $0x94] ss:$8 sps:$4 sm:$0xff]   ;;  %v1532_v39 = vmov 1966171168   ;;  %v1437_v42 = vld [vmem:[%s1767_s30 + $0x90] ss:$8 sps:$4 sm:$0xff]  }
  0x5a   : > { %v1435_v38 = vld [vmem:[%s1767_s30 + $0x194] ss:$8 sps:$4 sm:$0xff]   ;;  %v626_v40 = vunpack.c.l.s4 %v1532_v39  ;;  %v1438_v43 = vld [vmem:[%s1767_s30 + $0x190] ss:$8 sps:$4 sm:$0xff]   ;;  %v1439_v44 = vld [vmem:[%s1767_s30 + $0xa4] ss:$8 sps:$4 sm:$0xff]  }
  0x5b   : > { %972 = vmatpush1.bf16.msra.mxu1 %v1401_v15  ;;  %v1441_v45 = vld [vmem:[%s1767_s30 + $0x1a4] ss:$8 sps:$4 sm:$0xff]   ;;  %v1812_v47 = vshrl.u32 %v628_v41, 7  ;;  %v1443_v48 = vld [vmem:[%s1767_s30 + $0xa0] ss:$8 sps:$4 sm:$0xff]   ;;  %p1312_p13 = scmp.ne.s32.totalorder %s1513_s14, 8 }
  0x5c   : > { %1013 = vmatpush1.bf16.msra.mxu0 %v1402_v16  ;;  %973 = vmatprep.subr.bf16.mxu1 %v1403_v17  ;;  %v627_v46 = vunpack.c.0.s8 %v626_v40  ;;  %v1444_v49 = vld [vmem:[%s1767_s30 + $0x1a0] ss:$8 sps:$4 sm:$0xff]   ;;  %v1445_v50 = vld [vmem:[%s1767_s30 + $0xb4] ss:$8 sps:$4 sm:$0xff]   ;;  %v1449_v54 = vld [vmem:[%s1767_s30 + $0xb0] ss:$8 sps:$4 sm:$0xff]  }
  0x5d   : > { %1014 = vmatprep.subr.bf16.mxu0 %v1405_v18  ;;  %v1447_v51 = vld [vmem:[%s1767_s30 + $0x1b4] ss:$8 sps:$4 sm:$0xff]   ;;  %v1450_v55 = vld [vmem:[%s1767_s30 + $0x1b0] ss:$8 sps:$4 sm:$0xff]   ;;  %v1451_v57 = vld [vmem:[%s1767_s30 + $0xc4] ss:$8 sps:$4 sm:$0xff]  }
  0x5e   : > { %v1819_v52 = vsub.s32 %v627_v46, %v1812_v47  ;;  %v1247_v53 = vld.sshfl [vmem:[%s527_s24] sm:$0x33 pattern:$0x75316420]  ;;  %v1453_v58 = vld [vmem:[%s1767_s30 + $0x1c4] ss:$8 sps:$4 sm:$0xff]  }
  0x5f   : > { %974 = vmatpush1.bf16.msra.mxu1 %v1407_v19  ;;  %v624_v56 = vcombine.high %v1247_v53, %v1247_v53  ;;  %v1455_v60 = vld [vmem:[%s1767_s30 + $0xc0] ss:$8 sps:$4 sm:$0xff]   ;;  %v1457_v63 = vld [vmem:[%s1767_s30 + $0xd4] ss:$8 sps:$4 sm:$0xff]   ;;  %v1461_v1 = vld [vmem:[%s1767_s30 + $0xd0] ss:$8 sps:$4 sm:$0xff]  }
  0x60   : > { %1015 = vmatpush1.bf16.msra.mxu0 %v1408_v20  ;;  %975 = vmatprep.subr.bf16.mxu1 %v1409_v21  ;;  %v1456_v61 = vld [vmem:[%s1767_s30 + $0x1c0] ss:$8 sps:$4 sm:$0xff]   ;;  %v1459_v0 = vld [vmem:[%s1767_s30 + $0x1d4] ss:$8 sps:$4 sm:$0xff]   ;;  %v1462_v2 = vld [vmem:[%s1767_s30 + $0x1d0] ss:$8 sps:$4 sm:$0xff]   ;;  %v631_v9 = vrot.slane %v1247_v53, %v1819_v52 }
  0x61   : > { %1016 = vmatprep.subr.bf16.mxu0 %v1411_v22  ;;  %v638_v59 = vrot.slane %v624_v56, %v1819_v52  ;;  %v1463_v3 = vld [vmem:[%s1767_s30 + $0xe4] ss:$8 sps:$4 sm:$0xff]   ;;  %v1467_v5 = vld [vmem:[%s1767_s30 + $0xe0] ss:$8 sps:$4 sm:$0xff]   ;;  %v1469_v7 = vld [vmem:[%s1767_s30 + $0xf4] ss:$8 sps:$4 sm:$0xff]  }
  0x62   : > { %v1465_v4 = vld [vmem:[%s1767_s30 + $0x1e4] ss:$8 sps:$4 sm:$0xff]   ;;  %v1468_v6 = vld [vmem:[%s1767_s30 + $0x1e0] ss:$8 sps:$4 sm:$0xff]   ;;  %v1471_v8 = vld [vmem:[%s1767_s30 + $0x1f4] ss:$8 sps:$4 sm:$0xff]   ;;  %v639_v12 = vcombine.high %v631_v9, %v631_v9 }
  0x63   : > { %976 = vmatpush1.bf16.msra.mxu1 %v1413_v23  ;;  %v640_v62 = vcombine.high %v638_v59, %v638_v59  ;;  %997 = vmatprep.mubr.bf16.mxu1 %v638_v59  ;;  %v1473_v10 = vld [vmem:[%s1767_s30 + $0xf0] ss:$8 sps:$4 sm:$0xff]   ;;  %v1533_v13 = vmov 1983009808  }
  0x64   : > { %1017 = vmatpush1.bf16.msra.mxu0 %v1414_v24  ;;  %977 = vmatprep.subr.bf16.mxu1 %v1415_v25  ;;  %v1474_v11 = vld [vmem:[%s1767_s30 + $0x1f0] ss:$8 sps:$4 sm:$0xff]   ;;  %v1051_v14 = vunpack.c.l.s4 %v1533_v13 }
  0x65   : > { %1018 = vmatprep.subr.bf16.mxu0 %v1417_v26  ;;  %1038 = vmatprep.mubr.bf16.mxu0 %v640_v62 }
  0x66   : > { %v1052_v15 = vunpack.c.0.s8 %v1051_v14 }
  0x67   : > { %978 = vmatpush1.bf16.msra.mxu1 %v1419_v27 }
  0x68   : > { %1019 = vmatpush1.bf16.msra.mxu0 %v1420_v28  ;;  %979 = vmatprep.subr.bf16.mxu1 %v1421_v29  ;;  %v1055_v22 = vsub.s32 %v1052_v15, %v1812_v47  ;;  %v550_v28 = vld [vmem:[#allocation2] sm:$0xf] }
  0x69   : > { %1020 = vmatprep.subr.bf16.mxu0 %v1423_v30 }
  0x6b   : > { %980 = vmatpush1.bf16.msra.mxu1 %v1425_v31  ;;  %v1065_v31 = vld [vmem:[%s534_s12] sm:$0x3] (!%p1312_p13) }
  0x6c   : > { %1021 = vmatpush1.bf16.msra.mxu0 %v1426_v32  ;;  %981 = vmatprep.subr.bf16.mxu1 %v1427_v33  ;;  %v1069_v32 = vsub.s32 (!%p1312_p13), 0, %v1812_v47  ;;  %v1073_v33 = vsub.s32 (!%p1312_p13), 1, %v1812_v47 }
  0x6d   : > { %1022 = vmatprep.subr.bf16.mxu0 %v1429_v34 }
  0x6e   : > { %v1070_v34 = vrot.slane (!%p1312_p13), %v1065_v31, %v1069_v32 }
  0x6f   : > { %982 = vmatpush1.bf16.msra.mxu1 %v1431_v35  ;;  %v1074_v35 = vrot.slane (!%p1312_p13), %v1065_v31, %v1073_v33 }
  0x70   : > { %1023 = vmatpush1.bf16.msra.mxu0 %v1432_v36  ;;  %983 = vmatprep.subr.bf16.mxu1 %v1433_v37 }
  0x71   : > { %1024 = vmatprep.subr.bf16.mxu0 %v1435_v38  ;;  %v1075_v36 = vcombine.low (!%p1312_p13), %v1070_v34, %v1074_v35 }
  0x73   : > { %984 = vmatpush1.bf16.msra.mxu1 %v1437_v42  ;;  %v1082_v38 = vrot.slane (!%p1312_p13), %v1075_v36, %v1055_v22 }
  0x74   : > { %1025 = vmatpush1.bf16.msra.mxu0 %v1438_v43  ;;  %985 = vmatprep.subr.bf16.mxu1 %v1439_v44 }
  0x75   : > { %1026 = vmatprep.subr.bf16.mxu0 %v1441_v45 }
  0x77   : > { %986 = vmatpush1.bf16.msra.mxu1 %v1443_v48 }
  0x78   : > { %1027 = vmatpush1.bf16.msra.mxu0 %v1444_v49  ;;  %987 = vmatprep.subr.bf16.mxu1 %v1445_v50 }
  0x79   : > { %1028 = vmatprep.subr.bf16.mxu0 %v1447_v51 }
  0x7b   : > { %988 = vmatpush1.bf16.msra.mxu1 %v1449_v54 }
  0x7c   : > { %1029 = vmatpush1.bf16.msra.mxu0 %v1450_v55  ;;  %989 = vmatprep.subr.bf16.mxu1 %v1451_v57 }
  0x7d   : > { %1030 = vmatprep.subr.bf16.mxu0 %v1453_v58 }
  0x7f   : > { %990 = vmatpush1.bf16.msra.mxu1 %v1455_v60 }
  0x80   : > { %1031 = vmatpush1.bf16.msra.mxu0 %v1456_v61  ;;  %991 = vmatprep.subr.bf16.mxu1 %v1457_v63 }
  0x81   : > { %1032 = vmatprep.subr.bf16.mxu0 %v1459_v0 }
  0x83   : > { %992 = vmatpush1.bf16.msra.mxu1 %v1461_v1 }
  0x84   : > { %1033 = vmatpush1.bf16.msra.mxu0 %v1462_v2  ;;  %993 = vmatprep.subr.bf16.mxu1 %v1463_v3 }
  0x85   : > { %1034 = vmatprep.subr.bf16.mxu0 %v1465_v4 }
  0x87   : > { %994 = vmatpush1.bf16.msra.mxu1 %v1467_v5 }
  0x88   : > { %1035 = vmatpush1.bf16.msra.mxu0 %v1468_v6  ;;  %995 = vmatprep.subr.bf16.mxu1 %v1469_v7 }
  0x89   : > { %1036 = vmatprep.subr.bf16.mxu0 %v1471_v8 }
  0x8b   : > { %996 = vmatpush1.bf16.msra.mxu1 %v1473_v10 }
  0x8c   : > { %1037 = vmatpush1.bf16.msra.mxu0 %v1474_v11 }
  0x8e   : > { %998 = vmatmul.mubr.bf16.vlgmr.msra.gmra.mrb[0].mxu1 %v631_v9 }
  0x8f   : > { %1039 = vmatmul.mubr.bf16.vlgmr.msra.gmra.mrb[0].mxu0 %v639_v12 }
 0x161   : > { %v999_v16 = vpop.f32.mrb[0].mxu1 }
 0x162   : > { %v1040_v17 = vpop.f32.mrb[0].mxu0  ;;  %v1001_v19 = vpop.f32.mrb[1].mxu1 }
 0x163   : > { %v1041_v18 = vadd.f32 %v1040_v17, %v999_v16  ;;  %v1042_v20 = vpop.f32.mrb[1].mxu0  ;;  %v1003_v23 = vpop.f32.mrb[2].mxu1 }
 0x164   : > { %v1043_v21 = vadd.f32 %v1042_v20, %v1001_v19  ;;  %v1044_v24 = vpop.f32.mrb[2].mxu0  ;;  %v1004_v25 = vpop.f32.mrb[3].mxu1 }
 0x165   : > { %v1045_v26 = vpop.f32.mrb[3].mxu0 }
 0x166   : > { %v1049_v27 = vcombine.low %v1041_v18, %v1043_v21  ;;  %1063 = sbr.rel (%p1312_p13) target bundleno = 385 (0x181), region = 78 }
 0x168   : > { %v1056_v29 = vrot.slane %v1049_v27, %v1055_v22 }
 0x16a   : > { %v1058_v30 = vadd.f32 %v1056_v29, %v550_v28 }
 0x16c   : > { %1059 = vst [vmem:[#allocation2] sm:$0xf] %v1058_v30 }
 0x173   : > { %v1064_v37 = vld [vmem:[#allocation2] sm:$0xf] }
 0x174   : > { %v1084_v39 = vadd.f32 %v1082_v38, %v1064_v37 }
 0x176   : > { %v1085_v40 = vmax.f32 %v1084_v39, 0.0 }
 0x178   : > { %v1093_v41 = vrot.slane %v1085_v40, %v1055_v22 }
 0x17a   : > { %v1094_v42 = vcombine.high %v1093_v41, %v1093_v41 }
 0x17c   : > { %v1313_v43 = vpack.c.bf16 %v1094_v42, %v1093_v41 }
 0x17e   : > { %v1108_v44 = vrot.slane %v1313_v43, %v1819_v52 }
 0x180   : > { %1314 = vst.sshfl [vmem:[%s543_s15] sm:$0x5 pattern:$0x73625140] %v1108_v44 }
 0x181 PF: > { %s13_s18 = sadd.s32 1, %s1529_s18   ;;  %s1886_s12 = smov %s1509_s13 }
 0x182   : > { %p10_p0 = scmp.ge.s32.totalorder %s13_s18, 20   ;;  %s1887_s13 = smov %s1605_s25 }
 0x183   : > { %s1888_s14 = smov %s1521_s16  ;;  %s1889_s15 = smov %s1525_s17 }
 0x184   : > { %s1890_s16 = smov %s1893_s19  ;;  %s1891_s17 = smov %s1897_s20 }
 0x185   :  { %12 = sbr.rel (!%p10_p0) target bundleno = 4 (0x4), region = 119 }

// kernel: custom_model_forward.39
= control target key start
LH: loop header
LB: loop body
LE: loop exit
PB: predicated region body
PF: predicated region fallthrough
CT: control target
= control target key end

     0   :  { %s2168_s0 = inlined_call_operand.vmem [shape: bf16[2,4608], index: 0, kind: input, shape index: {}]   ;;  %s2169_s1 = inlined_call_operand.vmem [shape: bf16[4608,512], index: 1, kind: input, shape index: {}]   ;;  %s2170_s2 = inlined_call_operand.hbm [shape: f32[1,512], index: 2, kind: input, shape index: {}]   ;;  %s2171_s3 = inlined_call_operand.vmem [shape: bf16[2,512], index: 3, kind: input, shape index: {}]   ;;  %s2172_s4 = inlined_call_operand.vmem [shape: bf16[2,512], index: 4, kind: output, shape index: {}]  }
   0x1   :  { %2175 = sst [smem:[#allocation8_spill]] %s2169_s1 }
   0x2   :  { %9 = vsyncpa [#allocation5], 0 }
   0x3   :  { %11 = vsyncpa [#allocation5 + $0x1], 0  ;;  %s1759_s15 = smov 0   ;;  %s1761_s16 = smov 0  }
   0x4   :  { %s1763_s17 = smov 0   ;;  %s1765_s18 = smov 0  }
   0x5   :  { %s1767_s19 = smov 0   ;;  %s1769_s20 = smov 0  }
   0x6   :  { %s1771_s21 = smov 0   ;;  %s1773_s22 = smov 0  }
   0x7   :  { %s1775_s23 = smov 0   ;;  %s1777_s24 = smov 0  }
   0x8 LB: > { %s1344_s25 = sadd.s32 4294967295, %s1728_s24   ;;  %s29_s26 = sadd.s32 1, %s1720_s22  ;;  %s1728_s24 = sphi %s1777_s24, %s17_s24   ;;  %s1724_s23 = sphi %s1775_s23, %s2191_s23   ;;  %s1720_s22 = sphi %s1773_s22, %s2190_s22   ;;  %s1716_s21 = sphi %s1771_s21, %s2189_s21   ;;  %s1712_s20 = sphi %s1769_s20, %s2188_s20   ;;  %s1708_s19 = sphi %s1767_s19, %s2187_s19   ;;  %s1704_s18 = sphi %s1765_s18, %s2186_s18   ;;  %s1700_s17 = sphi %s1763_s17, %s2185_s17   ;;  %s1696_s16 = sphi %s1761_s16, %s2184_s16   ;;  %s1692_s15 = sphi %s1759_s15, %s2183_s15  }
   0x9   : > { %p30_p0 = scmp.ge.s32.totalorder %s29_s26, 9  ;;  %s32_s27 = sadd.s32 1, %s1724_s23 }
   0xa   : > { %s73_s28 = sadd.s32 1, %s1708_s19  ;;  %p80_p1 = scmp.ne.s32.totalorder %s1708_s19, %s1704_s18 }
   0xb   : > { %s2193_s26 = smov (%p30_p0, %s29_s26), 0  ;;  %s2195_s27 = smov (!%p30_p0, %s32_s27), %s1724_s23 }
   0xc   : > { %s68_s29 = ssub.s32 %s1720_s22, %s2193_s26  ;;  %p81_p2 = scmp.eq.s32.totalorder %s1728_s24, 0 }
   0xd   : > { %p34_p3 = scmp.ge.s32.totalorder %s2195_s27, 2  ;;  %s99_s30 = sadd.s32 1, %s1700_s17 }
   0xe   : > { %p1822_p4 = por %p81_p2, %p80_p1  ;;  %p106_p5 = scmp.ne.s32.totalorder %s1700_s17, %s1696_s16 }
   0xf   : > { %s2197_s27 = smov (%p34_p3, %s2195_s27), 0  ;;  %p112_p7 = scmp.ne.s32.totalorder %s1696_s16, %s1692_s15 }
  0x10   : > { %2177 = sst [smem:[#allocation7_spill]] %s2197_s27  ;;  %p1830_p6 = por %p106_p5, %p81_p2 }
  0x11   : > { %s69_s7 = ssub.s32 %s1724_s23, %s2197_s27  ;;  %p113_p8 = scmp.eq.s32.totalorder %s1344_s25, 0 }
  0x12   : > { %s70_s8 = sor.u32 %s69_s7, %s68_s29  ;;  %p97_p9 = scmp.eq.s32.totalorder %s69_s7, 0 }
  0x13   : > { %p71_p10 = scmp.eq.s32.totalorder %s70_s8, 0  ;;  %p1838_p11 = por %p113_p8, %p112_p7 }
  0x14   : > { %s1843_s10 = scalar_select %p97_p9, %s1700_s17, %s99_s30  }
  0x15   : > { %s2179_s9 = scalar_select %p1838_p11, 1, 0 }
  0x16   : > { %s1846_s11 = scalar_select %p71_p10, %s1708_s19, %s73_s28  }
  0x17   : > { %p1347_p12 = scmp.ge.s32.totalorder %s1728_s24, 18 }
  0x19   : > { %188 = sbr.rel (%p1347_p12) target bundleno = 99 (0x63), region = 16 }
  0x20   : > { %203 = sbr.rel (!%p1822_p4) target bundleno = 74 (0x4a), region = 24  ;;  %s205_s12 = sand.u32 (%p1822_p4), 1, %s1708_s19  }
  0x21   : > { %s1350_s13 = sshll.u32 (%p1822_p4), %s1724_s23, 1  ;;  %s1348_s14 = sshll.u32 (%p1822_p4), %s205_s12, 9 }
  0x22   : > { %s1433_s15 = sshll.u32 (%p1822_p4), %s1720_s22, 8  ;;  %s2180_s1 = sld [smem:[#allocation8_spill]] (%p1822_p4) }
  0x23   : > { %s211_s25 = sadd.s32 (%p1822_p4), %s1433_s15, %s1350_s13  ;;  %s1862_s5 = scalar_lea.vmem (%p1822_p4), [#allocation3], %s1348_s14 }
  0x24   : > { %s1352_s29 = sshll.u32 (%p1822_p4), %s211_s25, 2 }
  0x28   : > { %s1857_s28 = scalar_lea.vmem %s2180_s1, %s1352_s29 }
  0x29   : > { %v367_v0 = vld [vmem:[%s1857_s28] sm:$0xff]  ;;  %v369_v1 = vld [vmem:[%s1857_s28 + $0x10] sm:$0xff] }
  0x2a   : > { %v371_v2 = vld [vmem:[%s1857_s28 + $0x20] sm:$0xff]  ;;  %368 = vst [vmem:[%s1862_s5] sm:$0xff] %v367_v0  ;;  %370 = vst [vmem:[%s1862_s5 + $0x8] sm:$0xff] %v369_v1  ;;  %v373_v3 = vld [vmem:[%s1857_s28 + $0x30] sm:$0xff] }
  0x2b   : > { %372 = vst [vmem:[%s1862_s5 + $0x10] sm:$0xff] %v371_v2  ;;  %v375_v4 = vld [vmem:[%s1857_s28 + $0x40] sm:$0xff]  ;;  %v377_v5 = vld [vmem:[%s1857_s28 + $0x50] sm:$0xff]  ;;  %374 = vst [vmem:[%s1862_s5 + $0x18] sm:$0xff] %v373_v3 }
  0x2c   : > { %376 = vst [vmem:[%s1862_s5 + $0x20] sm:$0xff] %v375_v4  ;;  %378 = vst [vmem:[%s1862_s5 + $0x28] sm:$0xff] %v377_v5  ;;  %v379_v6 = vld [vmem:[%s1857_s28 + $0x60] sm:$0xff]  ;;  %v381_v7 = vld [vmem:[%s1857_s28 + $0x70] sm:$0xff] }
  0x2d   : > { %v383_v8 = vld [vmem:[%s1857_s28 + $0x80] sm:$0xff]  ;;  %380 = vst [vmem:[%s1862_s5 + $0x30] sm:$0xff] %v379_v6  ;;  %382 = vst [vmem:[%s1862_s5 + $0x38] sm:$0xff] %v381_v7  ;;  %v385_v9 = vld [vmem:[%s1857_s28 + $0x90] sm:$0xff] }
  0x2e   : > { %384 = vst [vmem:[%s1862_s5 + $0x40] sm:$0xff] %v383_v8  ;;  %v387_v10 = vld [vmem:[%s1857_s28 + $0xa0] sm:$0xff]  ;;  %v389_v11 = vld [vmem:[%s1857_s28 + $0xb0] sm:$0xff]  ;;  %386 = vst [vmem:[%s1862_s5 + $0x48] sm:$0xff] %v385_v9 }
  0x2f   : > { %388 = vst [vmem:[%s1862_s5 + $0x50] sm:$0xff] %v387_v10  ;;  %390 = vst [vmem:[%s1862_s5 + $0x58] sm:$0xff] %v389_v11  ;;  %v391_v12 = vld [vmem:[%s1857_s28 + $0xc0] sm:$0xff]  ;;  %v393_v13 = vld [vmem:[%s1857_s28 + $0xd0] sm:$0xff] }
  0x30   : > { %v395_v14 = vld [vmem:[%s1857_s28 + $0xe0] sm:$0xff]  ;;  %392 = vst [vmem:[%s1862_s5 + $0x60] sm:$0xff] %v391_v12  ;;  %394 = vst [vmem:[%s1862_s5 + $0x68] sm:$0xff] %v393_v13  ;;  %v397_v15 = vld [vmem:[%s1857_s28 + $0xf0] sm:$0xff] }
  0x31   : > { %396 = vst [vmem:[%s1862_s5 + $0x70] sm:$0xff] %v395_v14  ;;  %v399_v16 = vld [vmem:[%s1857_s28 + $0x100] sm:$0xff]  ;;  %v401_v17 = vld [vmem:[%s1857_s28 + $0x110] sm:$0xff]  ;;  %398 = vst [vmem:[%s1862_s5 + $0x78] sm:$0xff] %v397_v15 }
  0x32   : > { %400 = vst [vmem:[%s1862_s5 + $0x80] sm:$0xff] %v399_v16  ;;  %402 = vst [vmem:[%s1862_s5 + $0x88] sm:$0xff] %v401_v17  ;;  %v403_v18 = vld [vmem:[%s1857_s28 + $0x120] sm:$0xff]  ;;  %v405_v19 = vld [vmem:[%s1857_s28 + $0x130] sm:$0xff] }
  0x33   : > { %v407_v20 = vld [vmem:[%s1857_s28 + $0x140] sm:$0xff]  ;;  %404 = vst [vmem:[%s1862_s5 + $0x90] sm:$0xff] %v403_v18  ;;  %406 = vst [vmem:[%s1862_s5 + $0x98] sm:$0xff] %v405_v19  ;;  %v409_v21 = vld [vmem:[%s1857_s28 + $0x150] sm:$0xff] }
  0x34   : > { %408 = vst [vmem:[%s1862_s5 + $0xa0] sm:$0xff] %v407_v20  ;;  %v411_v22 = vld [vmem:[%s1857_s28 + $0x160] sm:$0xff]  ;;  %v413_v23 = vld [vmem:[%s1857_s28 + $0x170] sm:$0xff]  ;;  %410 = vst [vmem:[%s1862_s5 + $0xa8] sm:$0xff] %v409_v21 }
  0x35   : > { %412 = vst [vmem:[%s1862_s5 + $0xb0] sm:$0xff] %v411_v22  ;;  %414 = vst [vmem:[%s1862_s5 + $0xb8] sm:$0xff] %v413_v23  ;;  %v415_v24 = vld [vmem:[%s1857_s28 + $0x180] sm:$0xff]  ;;  %v417_v25 = vld [vmem:[%s1857_s28 + $0x190] sm:$0xff] }
  0x36   : > { %v419_v26 = vld [vmem:[%s1857_s28 + $0x1a0] sm:$0xff]  ;;  %416 = vst [vmem:[%s1862_s5 + $0xc0] sm:$0xff] %v415_v24  ;;  %418 = vst [vmem:[%s1862_s5 + $0xc8] sm:$0xff] %v417_v25  ;;  %v421_v27 = vld [vmem:[%s1857_s28 + $0x1b0] sm:$0xff] }
  0x37   : > { %420 = vst [vmem:[%s1862_s5 + $0xd0] sm:$0xff] %v419_v26  ;;  %v423_v28 = vld [vmem:[%s1857_s28 + $0x1c0] sm:$0xff]  ;;  %v425_v29 = vld [vmem:[%s1857_s28 + $0x1d0] sm:$0xff]  ;;  %422 = vst [vmem:[%s1862_s5 + $0xd8] sm:$0xff] %v421_v27 }
  0x38   : > { %424 = vst [vmem:[%s1862_s5 + $0xe0] sm:$0xff] %v423_v28  ;;  %426 = vst [vmem:[%s1862_s5 + $0xe8] sm:$0xff] %v425_v29  ;;  %v427_v30 = vld [vmem:[%s1857_s28 + $0x1e0] sm:$0xff]  ;;  %v429_v31 = vld [vmem:[%s1857_s28 + $0x1f0] sm:$0xff] }
  0x39   : > { %v431_v32 = vld [vmem:[%s1857_s28 + $0x200] sm:$0xff]  ;;  %428 = vst [vmem:[%s1862_s5 + $0xf0] sm:$0xff] %v427_v30  ;;  %430 = vst [vmem:[%s1862_s5 + $0xf8] sm:$0xff] %v429_v31  ;;  %v433_v33 = vld [vmem:[%s1857_s28 + $0x210] sm:$0xff] }
  0x3a   : > { %432 = vst [vmem:[%s1862_s5 + $0x100] sm:$0xff] %v431_v32  ;;  %v435_v34 = vld [vmem:[%s1857_s28 + $0x220] sm:$0xff]  ;;  %v437_v35 = vld [vmem:[%s1857_s28 + $0x230] sm:$0xff]  ;;  %434 = vst [vmem:[%s1862_s5 + $0x108] sm:$0xff] %v433_v33 }
  0x3b   : > { %436 = vst [vmem:[%s1862_s5 + $0x110] sm:$0xff] %v435_v34  ;;  %438 = vst [vmem:[%s1862_s5 + $0x118] sm:$0xff] %v437_v35  ;;  %v439_v36 = vld [vmem:[%s1857_s28 + $0x240] sm:$0xff]  ;;  %v441_v37 = vld [vmem:[%s1857_s28 + $0x250] sm:$0xff] }
  0x3c   : > { %v443_v38 = vld [vmem:[%s1857_s28 + $0x260] sm:$0xff]  ;;  %440 = vst [vmem:[%s1862_s5 + $0x120] sm:$0xff] %v439_v36  ;;  %442 = vst [vmem:[%s1862_s5 + $0x128] sm:$0xff] %v441_v37  ;;  %v445_v39 = vld [vmem:[%s1857_s28 + $0x270] sm:$0xff] }
  0x3d   : > { %444 = vst [vmem:[%s1862_s5 + $0x130] sm:$0xff] %v443_v38  ;;  %v447_v40 = vld [vmem:[%s1857_s28 + $0x280] sm:$0xff]  ;;  %v449_v41 = vld [vmem:[%s1857_s28 + $0x290] sm:$0xff]  ;;  %446 = vst [vmem:[%s1862_s5 + $0x138] sm:$0xff] %v445_v39 }
  0x3e   : > { %448 = vst [vmem:[%s1862_s5 + $0x140] sm:$0xff] %v447_v40  ;;  %450 = vst [vmem:[%s1862_s5 + $0x148] sm:$0xff] %v449_v41  ;;  %v451_v42 = vld [vmem:[%s1857_s28 + $0x2a0] sm:$0xff]  ;;  %v453_v43 = vld [vmem:[%s1857_s28 + $0x2b0] sm:$0xff] }
  0x3f   : > { %v455_v44 = vld [vmem:[%s1857_s28 + $0x2c0] sm:$0xff]  ;;  %452 = vst [vmem:[%s1862_s5 + $0x150] sm:$0xff] %v451_v42  ;;  %454 = vst [vmem:[%s1862_s5 + $0x158] sm:$0xff] %v453_v43  ;;  %v457_v45 = vld [vmem:[%s1857_s28 + $0x2d0] sm:$0xff] }
  0x40   : > { %456 = vst [vmem:[%s1862_s5 + $0x160] sm:$0xff] %v455_v44  ;;  %v459_v46 = vld [vmem:[%s1857_s28 + $0x2e0] sm:$0xff]  ;;  %v461_v47 = vld [vmem:[%s1857_s28 + $0x2f0] sm:$0xff]  ;;  %458 = vst [vmem:[%s1862_s5 + $0x168] sm:$0xff] %v457_v45 }
  0x41   : > { %460 = vst [vmem:[%s1862_s5 + $0x170] sm:$0xff] %v459_v46  ;;  %462 = vst [vmem:[%s1862_s5 + $0x178] sm:$0xff] %v461_v47  ;;  %v463_v48 = vld [vmem:[%s1857_s28 + $0x300] sm:$0xff]  ;;  %v465_v49 = vld [vmem:[%s1857_s28 + $0x310] sm:$0xff] }
  0x42   : > { %v467_v50 = vld [vmem:[%s1857_s28 + $0x320] sm:$0xff]  ;;  %464 = vst [vmem:[%s1862_s5 + $0x180] sm:$0xff] %v463_v48  ;;  %466 = vst [vmem:[%s1862_s5 + $0x188] sm:$0xff] %v465_v49  ;;  %v469_v51 = vld [vmem:[%s1857_s28 + $0x330] sm:$0xff] }
  0x43   : > { %468 = vst [vmem:[%s1862_s5 + $0x190] sm:$0xff] %v467_v50  ;;  %v471_v52 = vld [vmem:[%s1857_s28 + $0x340] sm:$0xff]  ;;  %v473_v53 = vld [vmem:[%s1857_s28 + $0x350] sm:$0xff]  ;;  %470 = vst [vmem:[%s1862_s5 + $0x198] sm:$0xff] %v469_v51 }
  0x44   : > { %472 = vst [vmem:[%s1862_s5 + $0x1a0] sm:$0xff] %v471_v52  ;;  %474 = vst [vmem:[%s1862_s5 + $0x1a8] sm:$0xff] %v473_v53  ;;  %v475_v54 = vld [vmem:[%s1857_s28 + $0x360] sm:$0xff]  ;;  %v477_v55 = vld [vmem:[%s1857_s28 + $0x370] sm:$0xff] }
  0x45   : > { %v479_v56 = vld [vmem:[%s1857_s28 + $0x380] sm:$0xff]  ;;  %476 = vst [vmem:[%s1862_s5 + $0x1b0] sm:$0xff] %v475_v54  ;;  %478 = vst [vmem:[%s1862_s5 + $0x1b8] sm:$0xff] %v477_v55  ;;  %v481_v57 = vld [vmem:[%s1857_s28 + $0x390] sm:$0xff] }
  0x46   : > { %480 = vst [vmem:[%s1862_s5 + $0x1c0] sm:$0xff] %v479_v56  ;;  %v483_v58 = vld [vmem:[%s1857_s28 + $0x3a0] sm:$0xff]  ;;  %v485_v59 = vld [vmem:[%s1857_s28 + $0x3b0] sm:$0xff]  ;;  %482 = vst [vmem:[%s1862_s5 + $0x1c8] sm:$0xff] %v481_v57 }
  0x47   : > { %484 = vst [vmem:[%s1862_s5 + $0x1d0] sm:$0xff] %v483_v58  ;;  %486 = vst [vmem:[%s1862_s5 + $0x1d8] sm:$0xff] %v485_v59  ;;  %v487_v60 = vld [vmem:[%s1857_s28 + $0x3c0] sm:$0xff]  ;;  %v489_v61 = vld [vmem:[%s1857_s28 + $0x3d0] sm:$0xff] }
  0x48   : > { %v491_v62 = vld [vmem:[%s1857_s28 + $0x3e0] sm:$0xff]  ;;  %488 = vst [vmem:[%s1862_s5 + $0x1e0] sm:$0xff] %v487_v60  ;;  %490 = vst [vmem:[%s1862_s5 + $0x1e8] sm:$0xff] %v489_v61  ;;  %v493_v63 = vld [vmem:[%s1857_s28 + $0x3f0] sm:$0xff] }
  0x49   : > { %492 = vst [vmem:[%s1862_s5 + $0x1f0] sm:$0xff] %v491_v62  ;;  %494 = vst [vmem:[%s1862_s5 + $0x1f8] sm:$0xff] %v493_v63 }
  0x4a PF: > { %s501_s8 = sand.u32 1, %s1700_s17   ;;  %s1434_s12 = sshll.u32 %s1724_s23, 5 }
  0x4b   : > { %s1353_s13 = sshll.u32 %s501_s8, 1  ;;  %s1994_s25 = scalar_lea.hbm %s2170_s2, %s1434_s12 }
  0x4c   : > { %s505_s29 = scalar_lea.vmem [#allocation4], %s1353_s13  ;;  %s502_s30 = scalar_lea.sflag [#allocation5], %s501_s8 }
  0x4d   : > { %s513_s7 = sshll.u32 %s505_s29, 4  ;;  %s1618_s28 = scalar_lea.hbm %s1994_s25, 32  ;;  %s514_s7 = int_to_ptr.vmem [resolvable:$true] %s513_s7 }
  0x4e   : > { %p1619_p13 = scmp.ne.s32.totalorder %s1994_s25, %s1618_s28  ;;  %s1622_s27 = scalar_lea.hbm %s2170_s2, 64 }
  0x4f   : > { %p1623_p2 = scmp.lt.u32.totalorder %s1994_s25, %s2170_s2  ;;  %p1624_p3 = scmp.lt.u32.totalorder %s1622_s27, %s1618_s28 }
  0x50   : > { %p1620_p0 = pnand %p1619_p13, %p1830_p6  ;;  %p1626_p5 = scmp.lt.u32.totalorder %s1618_s28, %s1994_s25 }
  0x51   : > { %p1625_p4 = por %p1624_p3, %p1623_p2 }
  0x52   : > { %p1621_p1 = pneg %p1620_p0 }
  0x53   : > { %p1627_p7 = por %p1626_p5, %p1625_p4 }
  0x55   : > { %p1628_p8 = pnand %p1627_p7, %p1621_p1 }
  0x57   : > { %1631 = shalt.err (!%p1628_p8)
}
  0x58   : > { %s1632_s8 = scalar_lea.vmem %s514_s7, 32  ;;  %s1730_s13 = smov [#allocation4]  }
  0x59   : > { %p1633_p9 = scmp.ne.s32.totalorder %s514_s7, %s1632_s8  ;;  %s1636_s15 = sshll.u32 %s1730_s13, 4  ;;  %s1637_s15 = int_to_ptr.vmem [resolvable:$false] %s1636_s15 }
  0x5a   : > { %s1638_s1 = scalar_lea.vmem %s1637_s15, 64  ;;  %p1639_p13 = scmp.lt.s32.totalorder %s514_s7, %s1637_s15 }
  0x5b   : > { %p1634_p10 = pnand %p1633_p9, %p1830_p6  ;;  %p1640_p0 = scmp.lt.s32.totalorder %s1638_s1, %s1632_s8 }
  0x5d   : > { %p1635_p12 = pneg %p1634_p10  ;;  %p1641_p11 = por %p1640_p0, %p1639_p13 }
  0x5f   : > { %p1642_p2 = pnand %p1641_p11, %p1635_p12 }
  0x61   : > { %1645 = shalt.err (!%p1642_p2)
}
  0x62   : > { %1437 = dma.hbm_to_vmem [thread:$0]  (%p1830_p6), %s1994_s25, 32, %s514_s7, %s502_s30  }
  0x63 PF: > { %p1356_p1 = scmp.ge.s32.totalorder %s1728_s24, 1  ;;  %p530_p3 = scmp.lt.s32.totalorder %s1728_s24, 19 }
  0x65   : > { %p531_p4 = pnand %p1356_p1, %p530_p3 }
  0x66   : > { %s537_s27 = sand.u32 (!%p531_p4), 1, %s1704_s18   ;;  %s543_s29 = sand.u32 (!%p531_p4), 1, %s1696_s16  }
  0x67   : > { %534 = sbr.rel (%p531_p4) target bundleno = 433 (0x1b1), region = 70  ;;  %s1357_s28 = sshll.u32 (!%p531_p4), %s537_s27, 9 }
  0x68   : > { %s2017_s5 = sshll.u32 (!%p531_p4), %s543_s29, 1  ;;  %s2019_s14 = scalar_lea.vmem (!%p531_p4), [#allocation3], %s1357_s28 }
  0x69   : > { %s544_s6 = scalar_lea.sflag (!%p531_p4), [#allocation5], %s543_s29  ;;  %s547_s25 = scalar_lea.vmem (!%p531_p4), [#allocation4], %s2017_s5 }
  0x6a   : > { %p2181_p6 = scmp.ne.s32.totalorder (!%p531_p4), %s2179_s9, 0 }
  0x6e   : > { %1687 = dma.done.wait (%p2181_p6), %s544_s6, 32  }
  0x6f   : > { %1689 = vsyncadd (%p2181_p6), %s544_s6, 4294967264  ;;  %s1359_s7 = sshll.u32 %s1712_s20, 2  ;;  %s1360_s30 = sshll.u32 %s1716_s21, 1 }
  0x70   : > { %p598_p11 = scmp.lt.s32.totalorder %s1359_s7, 35  ;;  %p610_p5 = scmp.lt.s32.totalorder %s1360_s30, 3 }
  0x71   : > { %p1362_p7 = scmp.ne.s32.totalorder %s1712_s20, 0 }
  0x72   : > { %s2199_s7 = smov (!%p598_p11, %s1359_s7), 35  ;;  %s2201_s30 = smov (!%p610_p5, %s1360_s30), 3 }
  0x73   : > { %s602_s8 = scalar_lea.vmem %s2168_s0, %s2199_s7  ;;  %s614_s15 = scalar_lea.vmem %s2171_s3, %s2201_s30  ;;  %v1731_v0 = vmov (!%p1362_p7), 0.0  }
  0x74   : > { %s623_s21 = scalar_lea.vmem %s2172_s4, %s2201_s30  ;;  %628 = sbr.rel (%p1362_p7) target bundleno = 123 (0x7b), region = 82  ;;  %629 = vst [vmem:[#allocation2] sm:$0xf] (!%p1362_p7), %v1731_v0 }
  0x7b PF: > { %v1522_v1 = vld [vmem:[%s2019_s14 + $0x4] ss:$8 sps:$4 sm:$0xff]   ;;  %v1526_v3 = vld [vmem:[%s2019_s14] ss:$8 sps:$4 sm:$0xff]   ;;  %v1528_v5 = vld [vmem:[%s2019_s14 + $0x14] ss:$8 sps:$4 sm:$0xff]   ;;  %v708_v41 = vlaneseq }
  0x7c   : > { %v1524_v2 = vld [vmem:[%s2019_s14 + $0x104] ss:$8 sps:$4 sm:$0xff]   ;;  %1045 = vmatprep.subr.bf16.mxu1 %v1522_v1  ;;  %v1527_v4 = vld [vmem:[%s2019_s14 + $0x100] ss:$8 sps:$4 sm:$0xff]   ;;  %v1530_v6 = vld [vmem:[%s2019_s14 + $0x114] ss:$8 sps:$4 sm:$0xff]  }
  0x7d   : > { %1086 = vmatprep.subr.bf16.mxu0 %v1524_v2  ;;  %1046 = vmatpush1.bf16.msra.mxu1 %v1526_v3  ;;  %v1532_v7 = vld [vmem:[%s2019_s14 + $0x10] ss:$8 sps:$4 sm:$0xff]   ;;  %v1534_v9 = vld [vmem:[%s2019_s14 + $0x24] ss:$8 sps:$4 sm:$0xff]   ;;  %v1538_v11 = vld [vmem:[%s2019_s14 + $0x20] ss:$8 sps:$4 sm:$0xff]  }
  0x7e   : > { %1087 = vmatpush1.bf16.msra.mxu0 %v1527_v4  ;;  %1047 = vmatprep.subr.bf16.mxu1 %v1528_v5  ;;  %v1533_v8 = vld [vmem:[%s2019_s14 + $0x110] ss:$8 sps:$4 sm:$0xff]   ;;  %v1536_v10 = vld [vmem:[%s2019_s14 + $0x124] ss:$8 sps:$4 sm:$0xff]   ;;  %v1539_v12 = vld [vmem:[%s2019_s14 + $0x120] ss:$8 sps:$4 sm:$0xff]  }
  0x7f   : > { %1088 = vmatprep.subr.bf16.mxu0 %v1530_v6  ;;  %v1540_v13 = vld [vmem:[%s2019_s14 + $0x34] ss:$8 sps:$4 sm:$0xff]   ;;  %v1544_v15 = vld [vmem:[%s2019_s14 + $0x30] ss:$8 sps:$4 sm:$0xff]   ;;  %v1546_v17 = vld [vmem:[%s2019_s14 + $0x44] ss:$8 sps:$4 sm:$0xff]  }
  0x80   : > { %v1542_v14 = vld [vmem:[%s2019_s14 + $0x134] ss:$8 sps:$4 sm:$0xff]   ;;  %v1545_v16 = vld [vmem:[%s2019_s14 + $0x130] ss:$8 sps:$4 sm:$0xff]   ;;  %v1548_v18 = vld [vmem:[%s2019_s14 + $0x144] ss:$8 sps:$4 sm:$0xff]  }
  0x81   : > { %1048 = vmatpush1.bf16.msra.mxu1 %v1532_v7  ;;  %v1550_v19 = vld [vmem:[%s2019_s14 + $0x40] ss:$8 sps:$4 sm:$0xff]   ;;  %v1552_v21 = vld [vmem:[%s2019_s14 + $0x54] ss:$8 sps:$4 sm:$0xff]   ;;  %v1556_v23 = vld [vmem:[%s2019_s14 + $0x50] ss:$8 sps:$4 sm:$0xff]  }
  0x82   : > { %1089 = vmatpush1.bf16.msra.mxu0 %v1533_v8  ;;  %1049 = vmatprep.subr.bf16.mxu1 %v1534_v9  ;;  %v1551_v20 = vld [vmem:[%s2019_s14 + $0x140] ss:$8 sps:$4 sm:$0xff]   ;;  %v1554_v22 = vld [vmem:[%s2019_s14 + $0x154] ss:$8 sps:$4 sm:$0xff]   ;;  %v1557_v24 = vld [vmem:[%s2019_s14 + $0x150] ss:$8 sps:$4 sm:$0xff]  }
  0x83   : > { %1090 = vmatprep.subr.bf16.mxu0 %v1536_v10  ;;  %v1558_v25 = vld [vmem:[%s2019_s14 + $0x64] ss:$8 sps:$4 sm:$0xff]   ;;  %v1562_v27 = vld [vmem:[%s2019_s14 + $0x60] ss:$8 sps:$4 sm:$0xff]   ;;  %v1564_v29 = vld [vmem:[%s2019_s14 + $0x74] ss:$8 sps:$4 sm:$0xff]  }
  0x84   : > { %v1560_v26 = vld [vmem:[%s2019_s14 + $0x164] ss:$8 sps:$4 sm:$0xff]   ;;  %v1563_v28 = vld [vmem:[%s2019_s14 + $0x160] ss:$8 sps:$4 sm:$0xff]   ;;  %v1566_v30 = vld [vmem:[%s2019_s14 + $0x174] ss:$8 sps:$4 sm:$0xff]  }
  0x85   : > { %1050 = vmatpush1.bf16.msra.mxu1 %v1538_v11  ;;  %v1568_v31 = vld [vmem:[%s2019_s14 + $0x70] ss:$8 sps:$4 sm:$0xff]   ;;  %v1570_v33 = vld [vmem:[%s2019_s14 + $0x84] ss:$8 sps:$4 sm:$0xff]   ;;  %v1574_v35 = vld [vmem:[%s2019_s14 + $0x80] ss:$8 sps:$4 sm:$0xff]  }
  0x86   : > { %1091 = vmatpush1.bf16.msra.mxu0 %v1539_v12  ;;  %1051 = vmatprep.subr.bf16.mxu1 %v1540_v13  ;;  %v1569_v32 = vld [vmem:[%s2019_s14 + $0x170] ss:$8 sps:$4 sm:$0xff]   ;;  %v1572_v34 = vld [vmem:[%s2019_s14 + $0x184] ss:$8 sps:$4 sm:$0xff]   ;;  %v1575_v36 = vld [vmem:[%s2019_s14 + $0x180] ss:$8 sps:$4 sm:$0xff]  }
  0x87   : > { %1092 = vmatprep.subr.bf16.mxu0 %v1542_v14  ;;  %v1576_v37 = vld [vmem:[%s2019_s14 + $0x94] ss:$8 sps:$4 sm:$0xff]   ;;  %v1732_v39 = vmov 1966171168   ;;  %v1580_v42 = vld [vmem:[%s2019_s14 + $0x90] ss:$8 sps:$4 sm:$0xff]  }
  0x88   : > { %v1578_v38 = vld [vmem:[%s2019_s14 + $0x194] ss:$8 sps:$4 sm:$0xff]   ;;  %v706_v40 = vunpack.c.l.s4 %v1732_v39  ;;  %v1581_v43 = vld [vmem:[%s2019_s14 + $0x190] ss:$8 sps:$4 sm:$0xff]   ;;  %v1582_v44 = vld [vmem:[%s2019_s14 + $0xa4] ss:$8 sps:$4 sm:$0xff]  }
  0x89   : > { %1052 = vmatpush1.bf16.msra.mxu1 %v1544_v15  ;;  %v1584_v45 = vld [vmem:[%s2019_s14 + $0x1a4] ss:$8 sps:$4 sm:$0xff]   ;;  %v2087_v47 = vshrl.u32 %v708_v41, 7  ;;  %v1586_v48 = vld [vmem:[%s2019_s14 + $0xa0] ss:$8 sps:$4 sm:$0xff]   ;;  %p1428_p8 = scmp.ne.s32.totalorder %s1712_s20, 8 }
  0x8a   : > { %1093 = vmatpush1.bf16.msra.mxu0 %v1545_v16  ;;  %1053 = vmatprep.subr.bf16.mxu1 %v1546_v17  ;;  %v707_v46 = vunpack.c.0.s8 %v706_v40  ;;  %v1587_v49 = vld [vmem:[%s2019_s14 + $0x1a0] ss:$8 sps:$4 sm:$0xff]   ;;  %v1588_v50 = vld [vmem:[%s2019_s14 + $0xb4] ss:$8 sps:$4 sm:$0xff]   ;;  %v1592_v54 = vld [vmem:[%s2019_s14 + $0xb0] ss:$8 sps:$4 sm:$0xff]  }
  0x8b   : > { %1094 = vmatprep.subr.bf16.mxu0 %v1548_v18  ;;  %v1590_v51 = vld [vmem:[%s2019_s14 + $0x1b4] ss:$8 sps:$4 sm:$0xff]   ;;  %v1593_v55 = vld [vmem:[%s2019_s14 + $0x1b0] ss:$8 sps:$4 sm:$0xff]   ;;  %v1594_v57 = vld [vmem:[%s2019_s14 + $0xc4] ss:$8 sps:$4 sm:$0xff]  }
  0x8c   : > { %v2094_v52 = vsub.s32 %v707_v46, %v2087_v47  ;;  %v1363_v53 = vld.sshfl [vmem:[%s602_s8] sm:$0x33 pattern:$0x75316420]  ;;  %v1596_v58 = vld [vmem:[%s2019_s14 + $0x1c4] ss:$8 sps:$4 sm:$0xff]  }
  0x8d   : > { %1054 = vmatpush1.bf16.msra.mxu1 %v1550_v19  ;;  %v704_v56 = vcombine.high %v1363_v53, %v1363_v53  ;;  %v1598_v60 = vld [vmem:[%s2019_s14 + $0xc0] ss:$8 sps:$4 sm:$0xff]   ;;  %v1600_v63 = vld [vmem:[%s2019_s14 + $0xd4] ss:$8 sps:$4 sm:$0xff]   ;;  %v1604_v1 = vld [vmem:[%s2019_s14 + $0xd0] ss:$8 sps:$4 sm:$0xff]  }
  0x8e   : > { %1095 = vmatpush1.bf16.msra.mxu0 %v1551_v20  ;;  %1055 = vmatprep.subr.bf16.mxu1 %v1552_v21  ;;  %v1599_v61 = vld [vmem:[%s2019_s14 + $0x1c0] ss:$8 sps:$4 sm:$0xff]   ;;  %v1602_v0 = vld [vmem:[%s2019_s14 + $0x1d4] ss:$8 sps:$4 sm:$0xff]   ;;  %v1605_v2 = vld [vmem:[%s2019_s14 + $0x1d0] ss:$8 sps:$4 sm:$0xff]   ;;  %v711_v9 = vrot.slane %v1363_v53, %v2094_v52 }
  0x8f   : > { %1096 = vmatprep.subr.bf16.mxu0 %v1554_v22  ;;  %v718_v59 = vrot.slane %v704_v56, %v2094_v52  ;;  %v1606_v3 = vld [vmem:[%s2019_s14 + $0xe4] ss:$8 sps:$4 sm:$0xff]   ;;  %v1610_v5 = vld [vmem:[%s2019_s14 + $0xe0] ss:$8 sps:$4 sm:$0xff]   ;;  %v1612_v7 = vld [vmem:[%s2019_s14 + $0xf4] ss:$8 sps:$4 sm:$0xff]  }
  0x90   : > { %v1608_v4 = vld [vmem:[%s2019_s14 + $0x1e4] ss:$8 sps:$4 sm:$0xff]   ;;  %v1611_v6 = vld [vmem:[%s2019_s14 + $0x1e0] ss:$8 sps:$4 sm:$0xff]   ;;  %v1614_v8 = vld [vmem:[%s2019_s14 + $0x1f4] ss:$8 sps:$4 sm:$0xff]   ;;  %v719_v12 = vcombine.high %v711_v9, %v711_v9 }
  0x91   : > { %1056 = vmatpush1.bf16.msra.mxu1 %v1556_v23  ;;  %v720_v62 = vcombine.high %v718_v59, %v718_v59  ;;  %1077 = vmatprep.mubr.bf16.mxu1 %v718_v59  ;;  %v1616_v10 = vld [vmem:[%s2019_s14 + $0xf0] ss:$8 sps:$4 sm:$0xff]   ;;  %v1733_v13 = vmov 1983009808  }
  0x92   : > { %1097 = vmatpush1.bf16.msra.mxu0 %v1557_v24  ;;  %1057 = vmatprep.subr.bf16.mxu1 %v1558_v25  ;;  %v1617_v11 = vld [vmem:[%s2019_s14 + $0x1f0] ss:$8 sps:$4 sm:$0xff]   ;;  %v1131_v14 = vunpack.c.l.s4 %v1733_v13 }
  0x93   : > { %1098 = vmatprep.subr.bf16.mxu0 %v1560_v26  ;;  %1118 = vmatprep.mubr.bf16.mxu0 %v720_v62 }
  0x94   : > { %v1132_v15 = vunpack.c.0.s8 %v1131_v14 }
  0x95   : > { %1058 = vmatpush1.bf16.msra.mxu1 %v1562_v27 }
  0x96   : > { %1099 = vmatpush1.bf16.msra.mxu0 %v1563_v28  ;;  %1059 = vmatprep.subr.bf16.mxu1 %v1564_v29  ;;  %v1135_v22 = vsub.s32 %v1132_v15, %v2087_v47  ;;  %v630_v28 = vld [vmem:[#allocation2] sm:$0xf] }
  0x97   : > { %1100 = vmatprep.subr.bf16.mxu0 %v1566_v30 }
  0x99   : > { %1060 = vmatpush1.bf16.msra.mxu1 %v1568_v31  ;;  %v1145_v31 = vld [vmem:[%s547_s25] sm:$0x3] (!%p1428_p8) }
  0x9a   : > { %1101 = vmatpush1.bf16.msra.mxu0 %v1569_v32  ;;  %1061 = vmatprep.subr.bf16.mxu1 %v1570_v33  ;;  %v1149_v32 = vsub.s32 (!%p1428_p8), 0, %v2087_v47  ;;  %v1153_v33 = vsub.s32 (!%p1428_p8), 1, %v2087_v47 }
  0x9b   : > { %1102 = vmatprep.subr.bf16.mxu0 %v1572_v34 }
  0x9c   : > { %v1150_v34 = vrot.slane (!%p1428_p8), %v1145_v31, %v1149_v32 }
  0x9d   : > { %1062 = vmatpush1.bf16.msra.mxu1 %v1574_v35  ;;  %v1154_v35 = vrot.slane (!%p1428_p8), %v1145_v31, %v1153_v33 }
  0x9e   : > { %1103 = vmatpush1.bf16.msra.mxu0 %v1575_v36  ;;  %1063 = vmatprep.subr.bf16.mxu1 %v1576_v37  ;;  %v1165_v36 = vld [vmem:[%s614_s15] sm:$0x3] (!%p1428_p8) }
  0x9f   : > { %1104 = vmatprep.subr.bf16.mxu0 %v1578_v38  ;;  %v1155_v37 = vcombine.low (!%p1428_p8), %v1150_v34, %v1154_v35  ;;  %v1166_v40 = vunpack.c.l.bf16 (!%p1428_p8), %v1165_v36 }
  0xa1   : > { %1064 = vmatpush1.bf16.msra.mxu1 %v1580_v42  ;;  %v1162_v39 = vrot.slane (!%p1428_p8), %v1155_v37, %v1135_v22 }
  0xa2   : > { %1105 = vmatpush1.bf16.msra.mxu0 %v1581_v43  ;;  %1065 = vmatprep.subr.bf16.mxu1 %v1582_v44 }
  0xa3   : > { %1106 = vmatprep.subr.bf16.mxu0 %v1584_v45 }
  0xa5   : > { %1066 = vmatpush1.bf16.msra.mxu1 %v1586_v48 }
  0xa6   : > { %1107 = vmatpush1.bf16.msra.mxu0 %v1587_v49  ;;  %1067 = vmatprep.subr.bf16.mxu1 %v1588_v50 }
  0xa7   : > { %1108 = vmatprep.subr.bf16.mxu0 %v1590_v51 }
  0xa9   : > { %1068 = vmatpush1.bf16.msra.mxu1 %v1592_v54 }
  0xaa   : > { %1109 = vmatpush1.bf16.msra.mxu0 %v1593_v55  ;;  %1069 = vmatprep.subr.bf16.mxu1 %v1594_v57 }
  0xab   : > { %1110 = vmatprep.subr.bf16.mxu0 %v1596_v58 }
  0xad   : > { %1070 = vmatpush1.bf16.msra.mxu1 %v1598_v60 }
  0xae   : > { %1111 = vmatpush1.bf16.msra.mxu0 %v1599_v61  ;;  %1071 = vmatprep.subr.bf16.mxu1 %v1600_v63 }
  0xaf   : > { %1112 = vmatprep.subr.bf16.mxu0 %v1602_v0 }
  0xb1   : > { %1072 = vmatpush1.bf16.msra.mxu1 %v1604_v1 }
  0xb2   : > { %1113 = vmatpush1.bf16.msra.mxu0 %v1605_v2  ;;  %1073 = vmatprep.subr.bf16.mxu1 %v1606_v3 }
  0xb3   : > { %1114 = vmatprep.subr.bf16.mxu0 %v1608_v4 }
  0xb5   : > { %1074 = vmatpush1.bf16.msra.mxu1 %v1610_v5 }
  0xb6   : > { %1115 = vmatpush1.bf16.msra.mxu0 %v1611_v6  ;;  %1075 = vmatprep.subr.bf16.mxu1 %v1612_v7 }
  0xb7   : > { %1116 = vmatprep.subr.bf16.mxu0 %v1614_v8 }
  0xb9   : > { %1076 = vmatpush1.bf16.msra.mxu1 %v1616_v10 }
  0xba   : > { %1117 = vmatpush1.bf16.msra.mxu0 %v1617_v11 }
  0xbc   : > { %1078 = vmatmul.mubr.bf16.vlgmr.msra.gmra.mrb[0].mxu1 %v711_v9 }
  0xbd   : > { %1119 = vmatmul.mubr.bf16.vlgmr.msra.gmra.mrb[0].mxu0 %v719_v12 }
 0x18f   : > { %v1079_v16 = vpop.f32.mrb[0].mxu1 }
 0x190   : > { %v1120_v17 = vpop.f32.mrb[0].mxu0  ;;  %v1081_v19 = vpop.f32.mrb[1].mxu1 }
 0x191   : > { %v1121_v18 = vadd.f32 %v1120_v17, %v1079_v16  ;;  %v1122_v20 = vpop.f32.mrb[1].mxu0  ;;  %v1083_v23 = vpop.f32.mrb[2].mxu1 }
 0x192   : > { %v1123_v21 = vadd.f32 %v1122_v20, %v1081_v19  ;;  %v1124_v24 = vpop.f32.mrb[2].mxu0  ;;  %v1084_v25 = vpop.f32.mrb[3].mxu1 }
 0x193   : > { %v1125_v26 = vpop.f32.mrb[3].mxu0 }
 0x194   : > { %v1129_v27 = vcombine.low %v1121_v18, %v1123_v21  ;;  %1143 = sbr.rel (%p1428_p8) target bundleno = 433 (0x1b1), region = 86 }
 0x196   : > { %v1136_v29 = vrot.slane %v1129_v27, %v1135_v22 }
 0x198   : > { %v1138_v30 = vadd.f32 %v1136_v29, %v630_v28 }
 0x19a   : > { %1139 = vst [vmem:[#allocation2] sm:$0xf] %v1138_v30 }
 0x1a1   : > { %v1144_v38 = vld [vmem:[#allocation2] sm:$0xf] }
 0x1a2   : > { %v1164_v41 = vadd.f32 %v1162_v39, %v1144_v38 }
 0x1a4   : > { %v1167_v42 = vadd.f32 %v1166_v40, %v1164_v41 }
 0x1a6   : > { %v1168_v43 = vmax.f32 %v1167_v42, 0.0 }
 0x1a8   : > { %v1176_v44 = vrot.slane %v1168_v43, %v1135_v22 }
 0x1aa   : > { %v1177_v45 = vcombine.high %v1176_v44, %v1176_v44 }
 0x1ac   : > { %v1429_v46 = vpack.c.bf16 %v1177_v45, %v1176_v44 }
 0x1ae   : > { %v1191_v48 = vrot.slane %v1429_v46, %v2094_v52 }
 0x1b0   : > { %1430 = vst.sshfl [vmem:[%s623_s21] sm:$0x5 pattern:$0x73625140] %v1191_v48 }
 0x1b1 PF: > { %s17_s24 = sadd.s32 1, %s1728_s24   ;;  %s2182_s25 = sld [smem:[#allocation7_spill]] }
 0x1b2   : > { %p14_p9 = scmp.ge.s32.totalorder %s17_s24, 20   ;;  %s2183_s15 = smov %s1696_s16 }
 0x1b3   : > { %s2184_s16 = smov %s1700_s17  ;;  %s2185_s17 = smov %s1843_s10 }
 0x1b4   : > { %s2186_s18 = smov %s1708_s19  ;;  %s2187_s19 = smov %s1846_s11 }
 0x1b5   : > { %s2188_s20 = smov %s1720_s22  ;;  %s2189_s21 = smov %s1724_s23 }
 0x1b6   : > { %s2190_s22 = smov %s2193_s26  ;;  %16 = sbr.rel (!%p14_p9) target bundleno = 8 (0x8), region = 136 }
 0x1b7   : > { %s2191_s23 = smov %s2182_s25 }
 0x1bd   :  { %1229 = vsyncpa [#allocation5], 1 }
 0x1be   :  { %1231 = vsyncpa [#allocation5 + $0x1], 1 }

// kernel: custom_model_forward.41
= control target key start
LH: loop header
LB: loop body
LE: loop exit
PB: predicated region body
PF: predicated region fallthrough
CT: control target
= control target key end

     0   :  { %s1638_s15 = smov 0   ;;  %s1640_s16 = smov 0   ;;  %s1975_s0 = inlined_call_operand.vmem [shape: bf16[2,4608], index: 0, kind: input, shape index: {}]   ;;  %s1976_s1 = inlined_call_operand.vmem [shape: bf16[4608,512], index: 1, kind: input, shape index: {}]   ;;  %s1977_s2 = inlined_call_operand.vmem [shape: f32[1,512], index: 2, kind: input, shape index: {}]   ;;  %s1978_s3 = inlined_call_operand.vmem [shape: bf16[2,512], index: 3, kind: input, shape index: {}]   ;;  %s1979_s4 = inlined_call_operand.vmem [shape: bf16[2,512], index: 4, kind: output, shape index: {}]  }
   0x1   :  { %s1642_s17 = smov 0   ;;  %s1644_s18 = smov 0  }
   0x2   :  { %s1646_s19 = smov 0   ;;  %s1648_s20 = smov 0  }
   0x3   :  { %s1650_s21 = smov 0  }
   0x4 LB: > { %s26_s22 = sadd.s32 1, %s1600_s19  ;;  %s29_s23 = sadd.s32 1, %s1604_s20  ;;  %s1608_s21 = sphi %s1650_s21, %s14_s21   ;;  %s1604_s20 = sphi %s1648_s20, %s1985_s20   ;;  %s1600_s19 = sphi %s1646_s19, %s1984_s19   ;;  %s1596_s18 = sphi %s1644_s18, %s1983_s18   ;;  %s1592_s17 = sphi %s1642_s17, %s1982_s17   ;;  %s1588_s16 = sphi %s1640_s16, %s1981_s16   ;;  %s1584_s15 = sphi %s1638_s15, %s1980_s15  }
   0x5   : > { %p27_p0 = scmp.ge.s32.totalorder %s26_s22, 9  ;;  %p77_p1 = scmp.ne.s32.totalorder %s1588_s16, %s1584_s15 }
   0x6   : > { %p78_p2 = scmp.eq.s32.totalorder %s1608_s21, 0  ;;  %s70_s27 = sadd.s32 1, %s1588_s16 }
   0x7   : > { %s1987_s22 = smov (%p27_p0, %s26_s22), 0  ;;  %s1989_s23 = smov (!%p27_p0, %s29_s23), %s1604_s20 }
   0x8   : > { %p79_p3 = por %p78_p2, %p77_p1  ;;  %p31_p4 = scmp.ge.s32.totalorder %s1989_s23, 2 }
   0x9   : > { %s65_s24 = ssub.s32 %s1600_s19, %s1987_s22  ;;  %p1313_p6 = scmp.ge.s32.totalorder %s1608_s21, 18 }
   0xa   : > { %s1991_s23 = smov (%p31_p4, %s1989_s23), 0 }
   0xb   : > { %s66_s25 = ssub.s32 %s1604_s20, %s1991_s23  ;;  %185 = sbr.rel (%p1313_p6) target bundleno = 57 (0x39), region = 16 }
   0xc   : > { %s67_s26 = sor.u32 %s66_s25, %s65_s24 }
   0xd   : > { %p68_p5 = scmp.eq.s32.totalorder %s67_s26, 0 }
   0xf   : > { %s1689_s28 = scalar_select %p68_p5, %s1588_s16, %s70_s27  }
  0x12   : > { %200 = sbr.rel (!%p79_p3) target bundleno = 57 (0x39), region = 24  ;;  %s202_s29 = sand.u32 (%p79_p3), 1, %s1588_s16  }
  0x13   : > { %s1316_s30 = sshll.u32 (%p79_p3), %s1604_s20, 1  ;;  %s1314_s5 = sshll.u32 (%p79_p3), %s202_s29, 9 }
  0x14   : > { %s1396_s6 = sshll.u32 (%p79_p3), %s1600_s19, 8  ;;  %s1703_s12 = scalar_lea.vmem (%p79_p3), [#allocation3], %s1314_s5 }
  0x15   : > { %s208_s7 = sadd.s32 (%p79_p3), %s1396_s6, %s1316_s30 }
  0x16   : > { %s1318_s8 = sshll.u32 (%p79_p3), %s208_s7, 2 }
  0x17   : > { %s1698_s11 = scalar_lea.vmem (%p79_p3), %s1976_s1, %s1318_s8 }
  0x18   : > { %v364_v0 = vld [vmem:[%s1698_s11] sm:$0xff] (%p79_p3)  ;;  %v366_v1 = vld [vmem:[%s1698_s11 + $0x10] sm:$0xff] (%p79_p3) }
  0x19   : > { %v368_v2 = vld [vmem:[%s1698_s11 + $0x20] sm:$0xff]  ;;  %365 = vst [vmem:[%s1703_s12] sm:$0xff] %v364_v0  ;;  %367 = vst [vmem:[%s1703_s12 + $0x8] sm:$0xff] %v366_v1  ;;  %v370_v3 = vld [vmem:[%s1698_s11 + $0x30] sm:$0xff] }
  0x1a   : > { %369 = vst [vmem:[%s1703_s12 + $0x10] sm:$0xff] %v368_v2  ;;  %v372_v4 = vld [vmem:[%s1698_s11 + $0x40] sm:$0xff]  ;;  %v374_v5 = vld [vmem:[%s1698_s11 + $0x50] sm:$0xff]  ;;  %371 = vst [vmem:[%s1703_s12 + $0x18] sm:$0xff] %v370_v3 }
  0x1b   : > { %373 = vst [vmem:[%s1703_s12 + $0x20] sm:$0xff] %v372_v4  ;;  %375 = vst [vmem:[%s1703_s12 + $0x28] sm:$0xff] %v374_v5  ;;  %v376_v6 = vld [vmem:[%s1698_s11 + $0x60] sm:$0xff]  ;;  %v378_v7 = vld [vmem:[%s1698_s11 + $0x70] sm:$0xff] }
  0x1c   : > { %v380_v8 = vld [vmem:[%s1698_s11 + $0x80] sm:$0xff]  ;;  %377 = vst [vmem:[%s1703_s12 + $0x30] sm:$0xff] %v376_v6  ;;  %379 = vst [vmem:[%s1703_s12 + $0x38] sm:$0xff] %v378_v7  ;;  %v382_v9 = vld [vmem:[%s1698_s11 + $0x90] sm:$0xff] }
  0x1d   : > { %381 = vst [vmem:[%s1703_s12 + $0x40] sm:$0xff] %v380_v8  ;;  %v384_v10 = vld [vmem:[%s1698_s11 + $0xa0] sm:$0xff]  ;;  %v386_v11 = vld [vmem:[%s1698_s11 + $0xb0] sm:$0xff]  ;;  %383 = vst [vmem:[%s1703_s12 + $0x48] sm:$0xff] %v382_v9 }
  0x1e   : > { %385 = vst [vmem:[%s1703_s12 + $0x50] sm:$0xff] %v384_v10  ;;  %387 = vst [vmem:[%s1703_s12 + $0x58] sm:$0xff] %v386_v11  ;;  %v388_v12 = vld [vmem:[%s1698_s11 + $0xc0] sm:$0xff]  ;;  %v390_v13 = vld [vmem:[%s1698_s11 + $0xd0] sm:$0xff] }
  0x1f   : > { %v392_v14 = vld [vmem:[%s1698_s11 + $0xe0] sm:$0xff]  ;;  %389 = vst [vmem:[%s1703_s12 + $0x60] sm:$0xff] %v388_v12  ;;  %391 = vst [vmem:[%s1703_s12 + $0x68] sm:$0xff] %v390_v13  ;;  %v394_v15 = vld [vmem:[%s1698_s11 + $0xf0] sm:$0xff] }
  0x20   : > { %393 = vst [vmem:[%s1703_s12 + $0x70] sm:$0xff] %v392_v14  ;;  %v396_v16 = vld [vmem:[%s1698_s11 + $0x100] sm:$0xff]  ;;  %v398_v17 = vld [vmem:[%s1698_s11 + $0x110] sm:$0xff]  ;;  %395 = vst [vmem:[%s1703_s12 + $0x78] sm:$0xff] %v394_v15 }
  0x21   : > { %397 = vst [vmem:[%s1703_s12 + $0x80] sm:$0xff] %v396_v16  ;;  %399 = vst [vmem:[%s1703_s12 + $0x88] sm:$0xff] %v398_v17  ;;  %v400_v18 = vld [vmem:[%s1698_s11 + $0x120] sm:$0xff]  ;;  %v402_v19 = vld [vmem:[%s1698_s11 + $0x130] sm:$0xff] }
  0x22   : > { %v404_v20 = vld [vmem:[%s1698_s11 + $0x140] sm:$0xff]  ;;  %401 = vst [vmem:[%s1703_s12 + $0x90] sm:$0xff] %v400_v18  ;;  %403 = vst [vmem:[%s1703_s12 + $0x98] sm:$0xff] %v402_v19  ;;  %v406_v21 = vld [vmem:[%s1698_s11 + $0x150] sm:$0xff] }
  0x23   : > { %405 = vst [vmem:[%s1703_s12 + $0xa0] sm:$0xff] %v404_v20  ;;  %v408_v22 = vld [vmem:[%s1698_s11 + $0x160] sm:$0xff]  ;;  %v410_v23 = vld [vmem:[%s1698_s11 + $0x170] sm:$0xff]  ;;  %407 = vst [vmem:[%s1703_s12 + $0xa8] sm:$0xff] %v406_v21 }
  0x24   : > { %409 = vst [vmem:[%s1703_s12 + $0xb0] sm:$0xff] %v408_v22  ;;  %411 = vst [vmem:[%s1703_s12 + $0xb8] sm:$0xff] %v410_v23  ;;  %v412_v24 = vld [vmem:[%s1698_s11 + $0x180] sm:$0xff]  ;;  %v414_v25 = vld [vmem:[%s1698_s11 + $0x190] sm:$0xff] }
  0x25   : > { %v416_v26 = vld [vmem:[%s1698_s11 + $0x1a0] sm:$0xff]  ;;  %413 = vst [vmem:[%s1703_s12 + $0xc0] sm:$0xff] %v412_v24  ;;  %415 = vst [vmem:[%s1703_s12 + $0xc8] sm:$0xff] %v414_v25  ;;  %v418_v27 = vld [vmem:[%s1698_s11 + $0x1b0] sm:$0xff] }
  0x26   : > { %417 = vst [vmem:[%s1703_s12 + $0xd0] sm:$0xff] %v416_v26  ;;  %v420_v28 = vld [vmem:[%s1698_s11 + $0x1c0] sm:$0xff]  ;;  %v422_v29 = vld [vmem:[%s1698_s11 + $0x1d0] sm:$0xff]  ;;  %419 = vst [vmem:[%s1703_s12 + $0xd8] sm:$0xff] %v418_v27 }
  0x27   : > { %421 = vst [vmem:[%s1703_s12 + $0xe0] sm:$0xff] %v420_v28  ;;  %423 = vst [vmem:[%s1703_s12 + $0xe8] sm:$0xff] %v422_v29  ;;  %v424_v30 = vld [vmem:[%s1698_s11 + $0x1e0] sm:$0xff]  ;;  %v426_v31 = vld [vmem:[%s1698_s11 + $0x1f0] sm:$0xff] }
  0x28   : > { %v428_v32 = vld [vmem:[%s1698_s11 + $0x200] sm:$0xff]  ;;  %425 = vst [vmem:[%s1703_s12 + $0xf0] sm:$0xff] %v424_v30  ;;  %427 = vst [vmem:[%s1703_s12 + $0xf8] sm:$0xff] %v426_v31  ;;  %v430_v33 = vld [vmem:[%s1698_s11 + $0x210] sm:$0xff] }
  0x29   : > { %429 = vst [vmem:[%s1703_s12 + $0x100] sm:$0xff] %v428_v32  ;;  %v432_v34 = vld [vmem:[%s1698_s11 + $0x220] sm:$0xff]  ;;  %v434_v35 = vld [vmem:[%s1698_s11 + $0x230] sm:$0xff]  ;;  %431 = vst [vmem:[%s1703_s12 + $0x108] sm:$0xff] %v430_v33 }
  0x2a   : > { %433 = vst [vmem:[%s1703_s12 + $0x110] sm:$0xff] %v432_v34  ;;  %435 = vst [vmem:[%s1703_s12 + $0x118] sm:$0xff] %v434_v35  ;;  %v436_v36 = vld [vmem:[%s1698_s11 + $0x240] sm:$0xff]  ;;  %v438_v37 = vld [vmem:[%s1698_s11 + $0x250] sm:$0xff] }
  0x2b   : > { %v440_v38 = vld [vmem:[%s1698_s11 + $0x260] sm:$0xff]  ;;  %437 = vst [vmem:[%s1703_s12 + $0x120] sm:$0xff] %v436_v36  ;;  %439 = vst [vmem:[%s1703_s12 + $0x128] sm:$0xff] %v438_v37  ;;  %v442_v39 = vld [vmem:[%s1698_s11 + $0x270] sm:$0xff] }
  0x2c   : > { %441 = vst [vmem:[%s1703_s12 + $0x130] sm:$0xff] %v440_v38  ;;  %v444_v40 = vld [vmem:[%s1698_s11 + $0x280] sm:$0xff]  ;;  %v446_v41 = vld [vmem:[%s1698_s11 + $0x290] sm:$0xff]  ;;  %443 = vst [vmem:[%s1703_s12 + $0x138] sm:$0xff] %v442_v39 }
  0x2d   : > { %445 = vst [vmem:[%s1703_s12 + $0x140] sm:$0xff] %v444_v40  ;;  %447 = vst [vmem:[%s1703_s12 + $0x148] sm:$0xff] %v446_v41  ;;  %v448_v42 = vld [vmem:[%s1698_s11 + $0x2a0] sm:$0xff]  ;;  %v450_v43 = vld [vmem:[%s1698_s11 + $0x2b0] sm:$0xff] }
  0x2e   : > { %v452_v44 = vld [vmem:[%s1698_s11 + $0x2c0] sm:$0xff]  ;;  %449 = vst [vmem:[%s1703_s12 + $0x150] sm:$0xff] %v448_v42  ;;  %451 = vst [vmem:[%s1703_s12 + $0x158] sm:$0xff] %v450_v43  ;;  %v454_v45 = vld [vmem:[%s1698_s11 + $0x2d0] sm:$0xff] }
  0x2f   : > { %453 = vst [vmem:[%s1703_s12 + $0x160] sm:$0xff] %v452_v44  ;;  %v456_v46 = vld [vmem:[%s1698_s11 + $0x2e0] sm:$0xff]  ;;  %v458_v47 = vld [vmem:[%s1698_s11 + $0x2f0] sm:$0xff]  ;;  %455 = vst [vmem:[%s1703_s12 + $0x168] sm:$0xff] %v454_v45 }
  0x30   : > { %457 = vst [vmem:[%s1703_s12 + $0x170] sm:$0xff] %v456_v46  ;;  %459 = vst [vmem:[%s1703_s12 + $0x178] sm:$0xff] %v458_v47  ;;  %v460_v48 = vld [vmem:[%s1698_s11 + $0x300] sm:$0xff]  ;;  %v462_v49 = vld [vmem:[%s1698_s11 + $0x310] sm:$0xff] }
  0x31   : > { %v464_v50 = vld [vmem:[%s1698_s11 + $0x320] sm:$0xff]  ;;  %461 = vst [vmem:[%s1703_s12 + $0x180] sm:$0xff] %v460_v48  ;;  %463 = vst [vmem:[%s1703_s12 + $0x188] sm:$0xff] %v462_v49  ;;  %v466_v51 = vld [vmem:[%s1698_s11 + $0x330] sm:$0xff] }
  0x32   : > { %465 = vst [vmem:[%s1703_s12 + $0x190] sm:$0xff] %v464_v50  ;;  %v468_v52 = vld [vmem:[%s1698_s11 + $0x340] sm:$0xff]  ;;  %v470_v53 = vld [vmem:[%s1698_s11 + $0x350] sm:$0xff]  ;;  %467 = vst [vmem:[%s1703_s12 + $0x198] sm:$0xff] %v466_v51 }
  0x33   : > { %469 = vst [vmem:[%s1703_s12 + $0x1a0] sm:$0xff] %v468_v52  ;;  %471 = vst [vmem:[%s1703_s12 + $0x1a8] sm:$0xff] %v470_v53  ;;  %v472_v54 = vld [vmem:[%s1698_s11 + $0x360] sm:$0xff]  ;;  %v474_v55 = vld [vmem:[%s1698_s11 + $0x370] sm:$0xff] }
  0x34   : > { %v476_v56 = vld [vmem:[%s1698_s11 + $0x380] sm:$0xff]  ;;  %473 = vst [vmem:[%s1703_s12 + $0x1b0] sm:$0xff] %v472_v54  ;;  %475 = vst [vmem:[%s1703_s12 + $0x1b8] sm:$0xff] %v474_v55  ;;  %v478_v57 = vld [vmem:[%s1698_s11 + $0x390] sm:$0xff] }
  0x35   : > { %477 = vst [vmem:[%s1703_s12 + $0x1c0] sm:$0xff] %v476_v56  ;;  %v480_v58 = vld [vmem:[%s1698_s11 + $0x3a0] sm:$0xff]  ;;  %v482_v59 = vld [vmem:[%s1698_s11 + $0x3b0] sm:$0xff]  ;;  %479 = vst [vmem:[%s1703_s12 + $0x1c8] sm:$0xff] %v478_v57 }
  0x36   : > { %481 = vst [vmem:[%s1703_s12 + $0x1d0] sm:$0xff] %v480_v58  ;;  %483 = vst [vmem:[%s1703_s12 + $0x1d8] sm:$0xff] %v482_v59  ;;  %v484_v60 = vld [vmem:[%s1698_s11 + $0x3c0] sm:$0xff]  ;;  %v486_v61 = vld [vmem:[%s1698_s11 + $0x3d0] sm:$0xff] }
  0x37   : > { %v488_v62 = vld [vmem:[%s1698_s11 + $0x3e0] sm:$0xff]  ;;  %485 = vst [vmem:[%s1703_s12 + $0x1e0] sm:$0xff] %v484_v60  ;;  %487 = vst [vmem:[%s1703_s12 + $0x1e8] sm:$0xff] %v486_v61  ;;  %v490_v63 = vld [vmem:[%s1698_s11 + $0x3f0] sm:$0xff] }
  0x38   : > { %489 = vst [vmem:[%s1703_s12 + $0x1f0] sm:$0xff] %v488_v62  ;;  %491 = vst [vmem:[%s1703_s12 + $0x1f8] sm:$0xff] %v490_v63 }
  0x39 PF: > { %p1319_p7 = scmp.ge.s32.totalorder %s1608_s21, 1  ;;  %p516_p8 = scmp.lt.s32.totalorder %s1608_s21, 19 }
  0x3b   : > { %p517_p9 = pnand %p1319_p7, %p516_p8 }
  0x3c   : > { %s523_s13 = sand.u32 (!%p517_p9), 1, %s1584_s15   ;;  %s1321_s14 = sshll.u32 (!%p517_p9), %s1592_s17, 2 }
  0x3d   : > { %520 = sbr.rel (%p517_p9) target bundleno = 388 (0x184), region = 70  ;;  %s1320_s24 = sshll.u32 (!%p517_p9), %s523_s13, 9 }
  0x3e   : > { %p574_p10 = scmp.lt.s32.totalorder (!%p517_p9), %s1321_s14, 35  ;;  %s1322_s25 = sshll.u32 (!%p517_p9), %s1596_s18, 1 }
  0x3f   : > { %p583_p11 = scmp.lt.s32.totalorder (!%p517_p9), %s1322_s25, 3  ;;  %s1855_s11 = scalar_lea.vmem (!%p517_p9), [#allocation3], %s1320_s24 }
  0x40   : > { %p1325_p12 = scmp.ne.s32.totalorder (!%p517_p9), %s1592_s17, 0 }
  0x44   : > { %s1993_s14 = smov (!%p574_p10, %s1321_s14), 35  ;;  %s1995_s25 = smov (!%p583_p11, %s1322_s25), 3 }
  0x45   : > { %s578_s29 = scalar_lea.vmem %s1975_s0, %s1993_s14  ;;  %s585_s15 = scalar_lea.vmem %s1977_s2, %s1995_s25  ;;  %v1610_v0 = vmov (!%p1325_p12), 0.0  }
  0x46   : > { %s594_s18 = scalar_lea.vmem %s1978_s3, %s1995_s25  ;;  %s603_s10 = scalar_lea.vmem %s1979_s4, %s1995_s25  ;;  %609 = vst [vmem:[#allocation2] sm:$0xf] (!%p1325_p12), %v1610_v0 }
  0x47   : > { %608 = sbr.rel (%p1325_p12) target bundleno = 78 (0x4e), region = 78 }
  0x4e PF: > { %v1458_v1 = vld [vmem:[%s1855_s11 + $0x4] ss:$8 sps:$4 sm:$0xff]   ;;  %v1462_v3 = vld [vmem:[%s1855_s11] ss:$8 sps:$4 sm:$0xff]   ;;  %v1464_v5 = vld [vmem:[%s1855_s11 + $0x14] ss:$8 sps:$4 sm:$0xff]   ;;  %v688_v41 = vlaneseq }
  0x4f   : > { %v1460_v2 = vld [vmem:[%s1855_s11 + $0x104] ss:$8 sps:$4 sm:$0xff]   ;;  %1025 = vmatprep.subr.bf16.mxu1 %v1458_v1  ;;  %v1463_v4 = vld [vmem:[%s1855_s11 + $0x100] ss:$8 sps:$4 sm:$0xff]   ;;  %v1466_v6 = vld [vmem:[%s1855_s11 + $0x114] ss:$8 sps:$4 sm:$0xff]  }
  0x50   : > { %1066 = vmatprep.subr.bf16.mxu0 %v1460_v2  ;;  %1026 = vmatpush1.bf16.msra.mxu1 %v1462_v3  ;;  %v1468_v7 = vld [vmem:[%s1855_s11 + $0x10] ss:$8 sps:$4 sm:$0xff]   ;;  %v1470_v9 = vld [vmem:[%s1855_s11 + $0x24] ss:$8 sps:$4 sm:$0xff]   ;;  %v1474_v11 = vld [vmem:[%s1855_s11 + $0x20] ss:$8 sps:$4 sm:$0xff]  }
  0x51   : > { %1067 = vmatpush1.bf16.msra.mxu0 %v1463_v4  ;;  %1027 = vmatprep.subr.bf16.mxu1 %v1464_v5  ;;  %v1469_v8 = vld [vmem:[%s1855_s11 + $0x110] ss:$8 sps:$4 sm:$0xff]   ;;  %v1472_v10 = vld [vmem:[%s1855_s11 + $0x124] ss:$8 sps:$4 sm:$0xff]   ;;  %v1475_v12 = vld [vmem:[%s1855_s11 + $0x120] ss:$8 sps:$4 sm:$0xff]  }
  0x52   : > { %1068 = vmatprep.subr.bf16.mxu0 %v1466_v6  ;;  %v1476_v13 = vld [vmem:[%s1855_s11 + $0x34] ss:$8 sps:$4 sm:$0xff]   ;;  %v1480_v15 = vld [vmem:[%s1855_s11 + $0x30] ss:$8 sps:$4 sm:$0xff]   ;;  %v1482_v17 = vld [vmem:[%s1855_s11 + $0x44] ss:$8 sps:$4 sm:$0xff]  }
  0x53   : > { %v1478_v14 = vld [vmem:[%s1855_s11 + $0x134] ss:$8 sps:$4 sm:$0xff]   ;;  %v1481_v16 = vld [vmem:[%s1855_s11 + $0x130] ss:$8 sps:$4 sm:$0xff]   ;;  %v1484_v18 = vld [vmem:[%s1855_s11 + $0x144] ss:$8 sps:$4 sm:$0xff]  }
  0x54   : > { %1028 = vmatpush1.bf16.msra.mxu1 %v1468_v7  ;;  %v1486_v19 = vld [vmem:[%s1855_s11 + $0x40] ss:$8 sps:$4 sm:$0xff]   ;;  %v1488_v21 = vld [vmem:[%s1855_s11 + $0x54] ss:$8 sps:$4 sm:$0xff]   ;;  %v1492_v23 = vld [vmem:[%s1855_s11 + $0x50] ss:$8 sps:$4 sm:$0xff]  }
  0x55   : > { %1069 = vmatpush1.bf16.msra.mxu0 %v1469_v8  ;;  %1029 = vmatprep.subr.bf16.mxu1 %v1470_v9  ;;  %v1487_v20 = vld [vmem:[%s1855_s11 + $0x140] ss:$8 sps:$4 sm:$0xff]   ;;  %v1490_v22 = vld [vmem:[%s1855_s11 + $0x154] ss:$8 sps:$4 sm:$0xff]   ;;  %v1493_v24 = vld [vmem:[%s1855_s11 + $0x150] ss:$8 sps:$4 sm:$0xff]  }
  0x56   : > { %1070 = vmatprep.subr.bf16.mxu0 %v1472_v10  ;;  %v1494_v25 = vld [vmem:[%s1855_s11 + $0x64] ss:$8 sps:$4 sm:$0xff]   ;;  %v1498_v27 = vld [vmem:[%s1855_s11 + $0x60] ss:$8 sps:$4 sm:$0xff]   ;;  %v1500_v29 = vld [vmem:[%s1855_s11 + $0x74] ss:$8 sps:$4 sm:$0xff]  }
  0x57   : > { %v1496_v26 = vld [vmem:[%s1855_s11 + $0x164] ss:$8 sps:$4 sm:$0xff]   ;;  %v1499_v28 = vld [vmem:[%s1855_s11 + $0x160] ss:$8 sps:$4 sm:$0xff]   ;;  %v1502_v30 = vld [vmem:[%s1855_s11 + $0x174] ss:$8 sps:$4 sm:$0xff]  }
  0x58   : > { %1030 = vmatpush1.bf16.msra.mxu1 %v1474_v11  ;;  %v1504_v31 = vld [vmem:[%s1855_s11 + $0x70] ss:$8 sps:$4 sm:$0xff]   ;;  %v1506_v33 = vld [vmem:[%s1855_s11 + $0x84] ss:$8 sps:$4 sm:$0xff]   ;;  %v1510_v35 = vld [vmem:[%s1855_s11 + $0x80] ss:$8 sps:$4 sm:$0xff]  }
  0x59   : > { %1071 = vmatpush1.bf16.msra.mxu0 %v1475_v12  ;;  %1031 = vmatprep.subr.bf16.mxu1 %v1476_v13  ;;  %v1505_v32 = vld [vmem:[%s1855_s11 + $0x170] ss:$8 sps:$4 sm:$0xff]   ;;  %v1508_v34 = vld [vmem:[%s1855_s11 + $0x184] ss:$8 sps:$4 sm:$0xff]   ;;  %v1511_v36 = vld [vmem:[%s1855_s11 + $0x180] ss:$8 sps:$4 sm:$0xff]  }
  0x5a   : > { %1072 = vmatprep.subr.bf16.mxu0 %v1478_v14  ;;  %v1512_v37 = vld [vmem:[%s1855_s11 + $0x94] ss:$8 sps:$4 sm:$0xff]   ;;  %v1611_v39 = vmov 1966171168   ;;  %v1516_v42 = vld [vmem:[%s1855_s11 + $0x90] ss:$8 sps:$4 sm:$0xff]  }
  0x5b   : > { %v1514_v38 = vld [vmem:[%s1855_s11 + $0x194] ss:$8 sps:$4 sm:$0xff]   ;;  %v686_v40 = vunpack.c.l.s4 %v1611_v39  ;;  %v1517_v43 = vld [vmem:[%s1855_s11 + $0x190] ss:$8 sps:$4 sm:$0xff]   ;;  %v1518_v44 = vld [vmem:[%s1855_s11 + $0xa4] ss:$8 sps:$4 sm:$0xff]  }
  0x5c   : > { %1032 = vmatpush1.bf16.msra.mxu1 %v1480_v15  ;;  %v1520_v45 = vld [vmem:[%s1855_s11 + $0x1a4] ss:$8 sps:$4 sm:$0xff]   ;;  %v1900_v47 = vshrl.u32 %v688_v41, 7  ;;  %v1522_v48 = vld [vmem:[%s1855_s11 + $0xa0] ss:$8 sps:$4 sm:$0xff]   ;;  %p1391_p13 = scmp.ne.s32.totalorder %s1592_s17, 8 }
  0x5d   : > { %1073 = vmatpush1.bf16.msra.mxu0 %v1481_v16  ;;  %1033 = vmatprep.subr.bf16.mxu1 %v1482_v17  ;;  %v687_v46 = vunpack.c.0.s8 %v686_v40  ;;  %v1523_v49 = vld [vmem:[%s1855_s11 + $0x1a0] ss:$8 sps:$4 sm:$0xff]   ;;  %v1524_v50 = vld [vmem:[%s1855_s11 + $0xb4] ss:$8 sps:$4 sm:$0xff]   ;;  %v1528_v54 = vld [vmem:[%s1855_s11 + $0xb0] ss:$8 sps:$4 sm:$0xff]  }
  0x5e   : > { %1074 = vmatprep.subr.bf16.mxu0 %v1484_v18  ;;  %v1526_v51 = vld [vmem:[%s1855_s11 + $0x1b4] ss:$8 sps:$4 sm:$0xff]   ;;  %v1529_v55 = vld [vmem:[%s1855_s11 + $0x1b0] ss:$8 sps:$4 sm:$0xff]   ;;  %v1530_v57 = vld [vmem:[%s1855_s11 + $0xc4] ss:$8 sps:$4 sm:$0xff]  }
  0x5f   : > { %v1907_v52 = vsub.s32 %v687_v46, %v1900_v47  ;;  %v1326_v53 = vld.sshfl [vmem:[%s578_s29] sm:$0x33 pattern:$0x75316420]  ;;  %v1532_v58 = vld [vmem:[%s1855_s11 + $0x1c4] ss:$8 sps:$4 sm:$0xff]  }
  0x60   : > { %1034 = vmatpush1.bf16.msra.mxu1 %v1486_v19  ;;  %v684_v56 = vcombine.high %v1326_v53, %v1326_v53  ;;  %v1534_v60 = vld [vmem:[%s1855_s11 + $0xc0] ss:$8 sps:$4 sm:$0xff]   ;;  %v1536_v63 = vld [vmem:[%s1855_s11 + $0xd4] ss:$8 sps:$4 sm:$0xff]   ;;  %v1540_v1 = vld [vmem:[%s1855_s11 + $0xd0] ss:$8 sps:$4 sm:$0xff]  }
  0x61   : > { %1075 = vmatpush1.bf16.msra.mxu0 %v1487_v20  ;;  %1035 = vmatprep.subr.bf16.mxu1 %v1488_v21  ;;  %v1535_v61 = vld [vmem:[%s1855_s11 + $0x1c0] ss:$8 sps:$4 sm:$0xff]   ;;  %v1538_v0 = vld [vmem:[%s1855_s11 + $0x1d4] ss:$8 sps:$4 sm:$0xff]   ;;  %v1541_v2 = vld [vmem:[%s1855_s11 + $0x1d0] ss:$8 sps:$4 sm:$0xff]   ;;  %v691_v9 = vrot.slane %v1326_v53, %v1907_v52 }
  0x62   : > { %1076 = vmatprep.subr.bf16.mxu0 %v1490_v22  ;;  %v698_v59 = vrot.slane %v684_v56, %v1907_v52  ;;  %v1542_v3 = vld [vmem:[%s1855_s11 + $0xe4] ss:$8 sps:$4 sm:$0xff]   ;;  %v1546_v5 = vld [vmem:[%s1855_s11 + $0xe0] ss:$8 sps:$4 sm:$0xff]   ;;  %v1548_v7 = vld [vmem:[%s1855_s11 + $0xf4] ss:$8 sps:$4 sm:$0xff]  }
  0x63   : > { %v1544_v4 = vld [vmem:[%s1855_s11 + $0x1e4] ss:$8 sps:$4 sm:$0xff]   ;;  %v1547_v6 = vld [vmem:[%s1855_s11 + $0x1e0] ss:$8 sps:$4 sm:$0xff]   ;;  %v1550_v8 = vld [vmem:[%s1855_s11 + $0x1f4] ss:$8 sps:$4 sm:$0xff]   ;;  %v699_v12 = vcombine.high %v691_v9, %v691_v9 }
  0x64   : > { %1036 = vmatpush1.bf16.msra.mxu1 %v1492_v23  ;;  %v700_v62 = vcombine.high %v698_v59, %v698_v59  ;;  %1057 = vmatprep.mubr.bf16.mxu1 %v698_v59  ;;  %v1552_v10 = vld [vmem:[%s1855_s11 + $0xf0] ss:$8 sps:$4 sm:$0xff]   ;;  %v1612_v13 = vmov 1983009808  }
  0x65   : > { %1077 = vmatpush1.bf16.msra.mxu0 %v1493_v24  ;;  %1037 = vmatprep.subr.bf16.mxu1 %v1494_v25  ;;  %v1553_v11 = vld [vmem:[%s1855_s11 + $0x1f0] ss:$8 sps:$4 sm:$0xff]   ;;  %v1111_v14 = vunpack.c.l.s4 %v1612_v13 }
  0x66   : > { %1078 = vmatprep.subr.bf16.mxu0 %v1496_v26  ;;  %1098 = vmatprep.mubr.bf16.mxu0 %v700_v62 }
  0x67   : > { %v1112_v15 = vunpack.c.0.s8 %v1111_v14 }
  0x68   : > { %1038 = vmatpush1.bf16.msra.mxu1 %v1498_v27 }
  0x69   : > { %1079 = vmatpush1.bf16.msra.mxu0 %v1499_v28  ;;  %1039 = vmatprep.subr.bf16.mxu1 %v1500_v29  ;;  %v1115_v22 = vsub.s32 %v1112_v15, %v1900_v47  ;;  %v610_v28 = vld [vmem:[#allocation2] sm:$0xf] }
  0x6a   : > { %1080 = vmatprep.subr.bf16.mxu0 %v1502_v30 }
  0x6c   : > { %1040 = vmatpush1.bf16.msra.mxu1 %v1504_v31  ;;  %v1125_v31 = vld [vmem:[%s585_s15] sm:$0x3] (!%p1391_p13) }
  0x6d   : > { %1081 = vmatpush1.bf16.msra.mxu0 %v1505_v32  ;;  %1041 = vmatprep.subr.bf16.mxu1 %v1506_v33  ;;  %v1129_v32 = vsub.s32 (!%p1391_p13), 0, %v1900_v47  ;;  %v1133_v33 = vsub.s32 (!%p1391_p13), 1, %v1900_v47 }
  0x6e   : > { %1082 = vmatprep.subr.bf16.mxu0 %v1508_v34 }
  0x6f   : > { %v1130_v34 = vrot.slane (!%p1391_p13), %v1125_v31, %v1129_v32 }
  0x70   : > { %1042 = vmatpush1.bf16.msra.mxu1 %v1510_v35  ;;  %v1134_v35 = vrot.slane (!%p1391_p13), %v1125_v31, %v1133_v33 }
  0x71   : > { %1083 = vmatpush1.bf16.msra.mxu0 %v1511_v36  ;;  %1043 = vmatprep.subr.bf16.mxu1 %v1512_v37  ;;  %v1145_v36 = vld [vmem:[%s594_s18] sm:$0x3] (!%p1391_p13) }
  0x72   : > { %1084 = vmatprep.subr.bf16.mxu0 %v1514_v38  ;;  %v1135_v37 = vcombine.low (!%p1391_p13), %v1130_v34, %v1134_v35  ;;  %v1146_v40 = vunpack.c.l.bf16 (!%p1391_p13), %v1145_v36 }
  0x74   : > { %1044 = vmatpush1.bf16.msra.mxu1 %v1516_v42  ;;  %v1142_v39 = vrot.slane (!%p1391_p13), %v1135_v37, %v1115_v22 }
  0x75   : > { %1085 = vmatpush1.bf16.msra.mxu0 %v1517_v43  ;;  %1045 = vmatprep.subr.bf16.mxu1 %v1518_v44 }
  0x76   : > { %1086 = vmatprep.subr.bf16.mxu0 %v1520_v45 }
  0x78   : > { %1046 = vmatpush1.bf16.msra.mxu1 %v1522_v48 }
  0x79   : > { %1087 = vmatpush1.bf16.msra.mxu0 %v1523_v49  ;;  %1047 = vmatprep.subr.bf16.mxu1 %v1524_v50 }
  0x7a   : > { %1088 = vmatprep.subr.bf16.mxu0 %v1526_v51 }
  0x7c   : > { %1048 = vmatpush1.bf16.msra.mxu1 %v1528_v54 }
  0x7d   : > { %1089 = vmatpush1.bf16.msra.mxu0 %v1529_v55  ;;  %1049 = vmatprep.subr.bf16.mxu1 %v1530_v57 }
  0x7e   : > { %1090 = vmatprep.subr.bf16.mxu0 %v1532_v58 }
  0x80   : > { %1050 = vmatpush1.bf16.msra.mxu1 %v1534_v60 }
  0x81   : > { %1091 = vmatpush1.bf16.msra.mxu0 %v1535_v61  ;;  %1051 = vmatprep.subr.bf16.mxu1 %v1536_v63 }
  0x82   : > { %1092 = vmatprep.subr.bf16.mxu0 %v1538_v0 }
  0x84   : > { %1052 = vmatpush1.bf16.msra.mxu1 %v1540_v1 }
  0x85   : > { %1093 = vmatpush1.bf16.msra.mxu0 %v1541_v2  ;;  %1053 = vmatprep.subr.bf16.mxu1 %v1542_v3 }
  0x86   : > { %1094 = vmatprep.subr.bf16.mxu0 %v1544_v4 }
  0x88   : > { %1054 = vmatpush1.bf16.msra.mxu1 %v1546_v5 }
  0x89   : > { %1095 = vmatpush1.bf16.msra.mxu0 %v1547_v6  ;;  %1055 = vmatprep.subr.bf16.mxu1 %v1548_v7 }
  0x8a   : > { %1096 = vmatprep.subr.bf16.mxu0 %v1550_v8 }
  0x8c   : > { %1056 = vmatpush1.bf16.msra.mxu1 %v1552_v10 }
  0x8d   : > { %1097 = vmatpush1.bf16.msra.mxu0 %v1553_v11 }
  0x8f   : > { %1058 = vmatmul.mubr.bf16.vlgmr.msra.gmra.mrb[0].mxu1 %v691_v9 }
  0x90   : > { %1099 = vmatmul.mubr.bf16.vlgmr.msra.gmra.mrb[0].mxu0 %v699_v12 }
 0x162   : > { %v1059_v16 = vpop.f32.mrb[0].mxu1 }
 0x163   : > { %v1100_v17 = vpop.f32.mrb[0].mxu0  ;;  %v1061_v19 = vpop.f32.mrb[1].mxu1 }
 0x164   : > { %v1101_v18 = vadd.f32 %v1100_v17, %v1059_v16  ;;  %v1102_v20 = vpop.f32.mrb[1].mxu0  ;;  %v1063_v23 = vpop.f32.mrb[2].mxu1 }
 0x165   : > { %v1103_v21 = vadd.f32 %v1102_v20, %v1061_v19  ;;  %v1104_v24 = vpop.f32.mrb[2].mxu0  ;;  %v1064_v25 = vpop.f32.mrb[3].mxu1 }
 0x166   : > { %v1105_v26 = vpop.f32.mrb[3].mxu0 }
 0x167   : > { %v1109_v27 = vcombine.low %v1101_v18, %v1103_v21  ;;  %1123 = sbr.rel (%p1391_p13) target bundleno = 388 (0x184), region = 82 }
 0x169   : > { %v1116_v29 = vrot.slane %v1109_v27, %v1115_v22 }
 0x16b   : > { %v1118_v30 = vadd.f32 %v1116_v29, %v610_v28 }
 0x16d   : > { %1119 = vst [vmem:[#allocation2] sm:$0xf] %v1118_v30 }
 0x174   : > { %v1124_v38 = vld [vmem:[#allocation2] sm:$0xf] }
 0x175   : > { %v1144_v41 = vadd.f32 %v1142_v39, %v1124_v38 }
 0x177   : > { %v1147_v42 = vadd.f32 %v1146_v40, %v1144_v41 }
 0x179   : > { %v1148_v43 = vmax.f32 %v1147_v42, 0.0 }
 0x17b   : > { %v1156_v44 = vrot.slane %v1148_v43, %v1115_v22 }
 0x17d   : > { %v1157_v45 = vcombine.high %v1156_v44, %v1156_v44 }
 0x17f   : > { %v1392_v46 = vpack.c.bf16 %v1157_v45, %v1156_v44 }
 0x181   : > { %v1171_v48 = vrot.slane %v1392_v46, %v1907_v52 }
 0x183   : > { %1393 = vst.sshfl [vmem:[%s603_s10] sm:$0x5 pattern:$0x73625140] %v1171_v48 }
 0x184 PF: > { %s14_s21 = sadd.s32 1, %s1608_s21   ;;  %s1980_s15 = smov %s1588_s16 }
 0x185   : > { %p11_p0 = scmp.ge.s32.totalorder %s14_s21, 20   ;;  %s1981_s16 = smov %s1689_s28 }
 0x186   : > { %s1982_s17 = smov %s1600_s19  ;;  %s1983_s18 = smov %s1604_s20 }
 0x187   : > { %s1984_s19 = smov %s1987_s22  ;;  %s1985_s20 = smov %s1991_s23 }
 0x188   :  { %13 = sbr.rel (!%p11_p0) target bundleno = 4 (0x4), region = 126 }

// kernel: custom_model_forward.42
= control target key start
LH: loop header
LB: loop body
LE: loop exit
PB: predicated region body
PF: predicated region fallthrough
CT: control target
= control target key end

     0   :  { %v522_v22 = vmov 1966171168   ;;  %v99_v24 = vlaneseq  ;;  %vm19_vm0 = vcmask 254976   ;;  %v523_v44 = vmov 0.0   ;;  %s651_s1 = inlined_call_operand.vmem [shape: bf16[512,32], index: 1, kind: input, shape index: {}]   ;;  %s652_s0 = inlined_call_operand.vmem [shape: bf16[2,512], index: 0, kind: input, shape index: {}]   ;;  %s653_s2 = inlined_call_operand.vmem [shape: f32[1,32], index: 2, kind: input, shape index: {}]   ;;  %s654_s3 = inlined_call_operand.vmem [shape: bf16[2,32], index: 3, kind: output, shape index: {}]  }
   0x1   :  { %v490_v0 = vld [vmem:[%s651_s1 + $0x40] sm:$0xff]   ;;  %v494_v4 = vld [vmem:[%s651_s1 + $0x48] sm:$0xff]   ;;  %v498_v8 = vld [vmem:[%s651_s1 + $0x50] sm:$0xff]   ;;  %v97_v23 = vunpack.c.l.s4 %v522_v22  ;;  %20 = vst.msk [vmem:[#allocation2] sm:$0x3] %vm19_vm0, %v523_v44  ;;  %vm404_vm1 = vcmask 253952  }
   0x2   :  { %v491_v1 = vld [vmem:[%s651_s1 + $0xc0] sm:$0xff]   ;;  %444 = vmatprep.subr.bf16.mxu0 %v490_v0  ;;  %v495_v5 = vld [vmem:[%s651_s1 + $0xc8] sm:$0xff]   ;;  %v499_v9 = vld [vmem:[%s651_s1 + $0xd0] sm:$0xff]   ;;  %v100_v30 = vshrl.u32 %v99_v24, 7 }
   0x3   :  { %v492_v2 = vld [vmem:[%s651_s1] sm:$0xff]   ;;  %466 = vmatprep.subr.bf16.mxu1 %v491_v1  ;;  %v496_v6 = vld [vmem:[%s651_s1 + $0x8] sm:$0xff]   ;;  %v500_v10 = vld [vmem:[%s651_s1 + $0x10] sm:$0xff]   ;;  %v98_v29 = vunpack.c.0.s8 %v97_v23 }
   0x4   :  { %v493_v3 = vld [vmem:[%s651_s1 + $0x80] sm:$0xff]   ;;  %445 = vmatpush3.bf16.msra.mxu0 %v492_v2  ;;  %v497_v7 = vld [vmem:[%s651_s1 + $0x88] sm:$0xff]   ;;  %v501_v11 = vld [vmem:[%s651_s1 + $0x90] sm:$0xff]  }
   0x5   :  { %467 = vmatpush3.bf16.msra.mxu1 %v493_v3  ;;  %446 = vmatprep.subr.bf16.mxu0 %v494_v4  ;;  %v502_v12 = vld [vmem:[%s651_s1 + $0x58] sm:$0xff]   ;;  %v506_v16 = vld [vmem:[%s651_s1 + $0x60] sm:$0xff]   ;;  %v510_v20 = vld [vmem:[%s651_s1 + $0x68] sm:$0xff]   ;;  %v101_v35 = vsub.s32 %v98_v29, %v100_v30 }
   0x6   :  { %468 = vmatprep.subr.bf16.mxu1 %v495_v5  ;;  %v503_v13 = vld [vmem:[%s651_s1 + $0xd8] sm:$0xff]   ;;  %v507_v17 = vld [vmem:[%s651_s1 + $0xe0] sm:$0xff]   ;;  %v511_v21 = vld [vmem:[%s651_s1 + $0xe8] sm:$0xff]  }
   0x7   :  { %v504_v14 = vld [vmem:[%s651_s1 + $0x18] sm:$0xff]   ;;  %v508_v18 = vld [vmem:[%s651_s1 + $0x20] sm:$0xff]   ;;  %v512_v25 = vld [vmem:[%s651_s1 + $0x28] sm:$0xff]  }
   0x8   :  { %447 = vmatpush3.bf16.msra.mxu0 %v496_v6  ;;  %v505_v15 = vld [vmem:[%s651_s1 + $0x98] sm:$0xff]   ;;  %v509_v19 = vld [vmem:[%s651_s1 + $0xa0] sm:$0xff]   ;;  %v513_v26 = vld [vmem:[%s651_s1 + $0xa8] sm:$0xff]  }
   0x9   :  { %469 = vmatpush3.bf16.msra.mxu1 %v497_v7  ;;  %448 = vmatprep.subr.bf16.mxu0 %v498_v8  ;;  %v514_v27 = vld [vmem:[%s651_s1 + $0x70] sm:$0xff]   ;;  %v518_v33 = vld [vmem:[%s651_s1 + $0x78] sm:$0xff]   ;;  %v410_v38 = vld.sshfl [vmem:[%s652_s0] sm:$0x33 pattern:$0x75316420] }
   0xa   :  { %470 = vmatprep.subr.bf16.mxu1 %v499_v9  ;;  %v515_v28 = vld [vmem:[%s651_s1 + $0xf0] sm:$0xff]   ;;  %v519_v34 = vld [vmem:[%s651_s1 + $0xf8] sm:$0xff]   ;;  %v95_v39 = vcombine.high %v410_v38, %v410_v38  ;;  %v102_v40 = vrot.slane %v410_v38, %v101_v35  ;;  %v21_v54 = vld [vmem:[#allocation2] sm:$0x3] }
   0xb   :  { %v516_v31 = vld [vmem:[%s651_s1 + $0x30] sm:$0xff]   ;;  %v520_v36 = vld [vmem:[%s651_s1 + $0x38] sm:$0xff]   ;;  %v443_v58 = vld [vmem:[%s653_s2] ss:$0 sm:$0xff] }
   0xc   :  { %449 = vmatpush3.bf16.msra.mxu0 %v500_v10  ;;  %v517_v32 = vld [vmem:[%s651_s1 + $0xb0] sm:$0xff]   ;;  %v521_v37 = vld [vmem:[%s651_s1 + $0xb8] sm:$0xff]   ;;  %v109_v41 = vrot.slane %v95_v39, %v101_v35  ;;  %v110_v42 = vcombine.high %v102_v40, %v102_v40 }
   0xd   :  { %471 = vmatpush3.bf16.msra.mxu1 %v501_v11  ;;  %450 = vmatprep.subr.bf16.mxu0 %v502_v12 }
   0xe   :  { %472 = vmatprep.subr.bf16.mxu1 %v503_v13  ;;  %340 = vmatprep.mubr.bf16.mxu0 %v109_v41  ;;  %v111_v43 = vcombine.high %v109_v41, %v109_v41 }
  0x10   :  { %451 = vmatpush3.bf16.msra.mxu0 %v504_v14  ;;  %380 = vmatprep.mubr.bf16.mxu1 %v111_v43 }
  0x11   :  { %473 = vmatpush3.bf16.msra.mxu1 %v505_v15  ;;  %452 = vmatprep.subr.bf16.mxu0 %v506_v16 }
  0x12   :  { %474 = vmatprep.subr.bf16.mxu1 %v507_v17 }
  0x14   :  { %453 = vmatpush3.bf16.msra.mxu0 %v508_v18 }
  0x15   :  { %475 = vmatpush3.bf16.msra.mxu1 %v509_v19  ;;  %454 = vmatprep.subr.bf16.mxu0 %v510_v20 }
  0x16   :  { %476 = vmatprep.subr.bf16.mxu1 %v511_v21 }
  0x18   :  { %455 = vmatpush3.bf16.msra.mxu0 %v512_v25 }
  0x19   :  { %477 = vmatpush3.bf16.msra.mxu1 %v513_v26  ;;  %456 = vmatprep.subr.bf16.mxu0 %v514_v27 }
  0x1a   :  { %478 = vmatprep.subr.bf16.mxu1 %v515_v28 }
  0x1c   :  { %457 = vmatpush3.bf16.msra.mxu0 %v516_v31 }
  0x1d   :  { %479 = vmatpush3.bf16.msra.mxu1 %v517_v32  ;;  %458 = vmatprep.subr.bf16.mxu0 %v518_v33 }
  0x1e   :  { %480 = vmatprep.subr.bf16.mxu1 %v519_v34 }
  0x20   :  { %459 = vmatpush3.bf16.msra.mxu0 %v520_v36 }
  0x21   :  { %481 = vmatpush3.bf16.msra.mxu1 %v521_v37 }
  0x23   :  { %341 = vmatmul.mubr.bf16.vlgmr.msra.gmra.mrb[0].mxu0 %v102_v40 }
  0x24   :  { %381 = vmatmul.mubr.bf16.vlgmr.msra.gmra.mrb[0].mxu1 %v110_v42 }
  0xf6   :  { %v460_v45 = vpop.f32.mrb[0].mxu0 }
  0xf7   :  { %v461_v46 = vpop.f32.mrb[1].mxu0  ;;  %v482_v47 = vpop.f32.mrb[0].mxu1 }
  0xf8   :  { %v462_v48 = vadd.f32 %v461_v46, %v460_v45  ;;  %v463_v49 = vpop.f32.mrb[2].mxu0  ;;  %v483_v50 = vpop.f32.mrb[1].mxu1 }
  0xf9   :  { %v464_v51 = vpop.f32.mrb[3].mxu0  ;;  %v484_v52 = vadd.f32 %v483_v50, %v482_v47  ;;  %v485_v53 = vpop.f32.mrb[2].mxu1 }
  0xfa   :  { %v486_v55 = vpop.f32.mrb[3].mxu1 }
  0xfb   :  { %v383_v56 = vadd.f32 %v484_v52, %v462_v48 }
  0xfd   :  { %v388_v57 = vadd.f32 %v383_v56, %v21_v54 }
  0xff   :  { %390 = vst.msk [vmem:[#allocation2] sm:$0x3] %vm19_vm0, %v388_v57 }
 0x106   :  { %v394_v59 = vld [vmem:[#allocation2] sm:$0x3] }
 0x107   :  { %v402_v60 = vadd.f32 %v443_v58, %v394_v59 }
 0x109   :  { %v403_v61 = vpack.c.bf16 %v402_v60, %v402_v60 }
 0x10b   :  { %405 = vst.msk [vmem:[%s654_s3] sm:$0x1] %vm404_vm1, %v403_v61 }

// kernel: custom_model_forward.43
= control target key start
LH: loop header
LB: loop body
LE: loop exit
PB: predicated region body
PF: predicated region fallthrough
CT: control target
= control target key end

     0   :  { %v399_v1 = vmov 0.0   ;;  %vm400_vm0 = vmmov 0   ;;  %vm61_vm1 = vcmask 261120   ;;  %s492_s0 = inlined_call_operand.vmem [shape: bf16[16,32], index: 0, kind: input, shape index: {}]   ;;  %s493_s1 = inlined_call_operand.vmem [shape: bf16[16,32], index: 1, kind: input, shape index: {}]   ;;  %s494_s2 = inlined_call_operand.vmem [shape: bf16[32,32], index: 2, kind: input, shape index: {}]   ;;  %s495_s3 = inlined_call_operand.vmem [shape: bf16[32,32], index: 3, kind: input, shape index: {}]   ;;  %s496_s4 = inlined_call_operand.vmem [shape: f32[1,32], index: 4, kind: input, shape index: {}]   ;;  %s497_s5 = inlined_call_operand.vmem [shape: bf16[32,50], index: 5, kind: input, shape index: {}]   ;;  %s498_s6 = inlined_call_operand.vmem [shape: f32[1,50], index: 6, kind: input, shape index: {}]   ;;  %s499_s7 = inlined_call_operand.hbm [shape: f32[16,50], index: 7, kind: output, shape index: {}]  }
   0x1   :  { %v369_v0 = vld [vmem:[%s495_s3] sm:$0xff]   ;;  %329 = vmatprep.subr.bf16.mxu0 %v399_v1  ;;  %337 = vmatprep.subr.bf16.mxu1 %v399_v1  ;;  %v371_v3 = vld [vmem:[%s495_s3 + $0x8] sm:$0xff]  }
   0x2   :  { %v370_v2 = vld [vmem:[%s494_s2] sm:$0xff]   ;;  %330 = vmatpush3.bf16.msra.mxu0 %v369_v0  ;;  %333 = vmatprep.mubr.msk.bf16.mxu0 %vm400_vm0, %v399_v1  ;;  %v372_v4 = vld [vmem:[%s494_s2 + $0x8] sm:$0xff]  }
   0x3   :  { %338 = vmatpush3.bf16.msra.mxu1 %v370_v2  ;;  %331 = vmatprep.subr.bf16.mxu0 %v399_v1  ;;  %v373_v5 = vld [vmem:[%s493_s1] sm:$0xff]  }
   0x4   :  { %339 = vmatprep.subr.bf16.mxu1 %v399_v1  ;;  %341 = vmatprep.mubr.msk.bf16.mxu1 %vm400_vm0, %v399_v1  ;;  %v374_v6 = vld [vmem:[%s492_s0] sm:$0xff]  }
   0x6   :  { %332 = vmatpush3.bf16.msra.mxu0 %v371_v3 }
   0x7   :  { %12 = vsyncpa [#allocation4], 0  ;;  %340 = vmatpush3.bf16.msra.mxu1 %v372_v4  ;;  %v309_v7 = vld [vmem:[%s497_s5] sm:$0xff]   ;;  %v316_v8 = vld [vmem:[%s497_s5 + $0x8] sm:$0xff]   ;;  %s401_s15 = smov [#allocation3]   ;;  %vm277_vm2 = vcmask 408576  }
   0x8   :  { %357 = vmatprep.subr.bf16.mxu0 %v309_v7  ;;  %v304_v11 = vld [vmem:[%s496_s4] ss:$0 sm:$0xff]  ;;  %s285_s16 = sshll.u32 %s401_s15, 4  ;;  %s286_s16 = int_to_ptr.vmem [resolvable:$true] %s285_s16 }
   0x9   :  { %334 = vmatmul.mubr.msk.bf16.vlgmr.msra.gmra.mrb[0].mxu0 %vm61_vm1, %v373_v5  ;;  %v305_v24 = vld [vmem:[%s498_s6] ss:$0 sm:$0xff]  ;;  %s375_s17 = scalar_lea.vmem %s286_s16, 256  ;;  %p380_p1 = scmp.lt.s32.totalorder %s286_s16, %s286_s16 }
   0xa   :  { %342 = vmatmul.mubr.msk.bf16.vlgmr.msra.gmra.mrb[0].mxu1 %vm61_vm1, %v374_v6  ;;  %359 = vmatpush3.bf16.msra.mxu0 %v309_v7  ;;  %p376_p0 = scmp.ne.s32.totalorder %s286_s16, %s375_s17  ;;  %p381_p2 = scmp.lt.s32.totalorder %s375_s17, %s375_s17 }
   0xb   :  { %361 = vmatprep.subr.bf16.mxu0 %v316_v8 }
   0xc   :  { %p382_p3 = por %p381_p2, %p380_p1 }
   0xe   :  { %363 = vmatpush3.bf16.msra.mxu0 %v316_v8  ;;  %p383_p4 = pnand %p382_p3, %p376_p0 }
  0xdc   :  { %v99_v9 = vpop.f32.mrb[0].mxu0 }
  0xdd   :  { %v160_v10 = vpop.f32.mrb[0].mxu1  ;;  %v335_v12 = vpop.f32.mrb[1].mxu0 }
  0xde   :  { %v161_v13 = vadd.f32 %v160_v10, %v99_v9  ;;  %v343_v14 = vpop.f32.mrb[1].mxu1  ;;  %v102_v15 = vpop.f32.mrb[2].mxu0 }
  0xdf   :  { %v163_v16 = vpop.f32.mrb[2].mxu1  ;;  %v336_v17 = vpop.f32.mrb[3].mxu0 }
  0xe0   :  { %v174_v18 = vadd.f32 %v304_v11, %v161_v13  ;;  %v164_v19 = vadd.f32 %v163_v16, %v102_v15  ;;  %v344_v20 = vpop.f32.mrb[3].mxu1 }
  0xe2   :  { %176 = vst.msk [vmem:[#allocation2] sm:$0xff] %vm61_vm1, %v174_v18  ;;  %v175_v21 = vadd.f32 %v304_v11, %v164_v19 }
  0xe4   :  { %177 = vst.msk [vmem:[#allocation2 + $0x8] sm:$0xff] %vm61_vm1, %v175_v21 }
  0xe9   :  { %v178_v22 = vld [vmem:[#allocation2] sm:$0xff] }
  0xea   :  { %353 = vmatprep.mubr.msk.f32.mxu0 %vm61_vm1, %v178_v22 }
  0xeb   :  { %v179_v23 = vld [vmem:[#allocation2 + $0x8] sm:$0xff] }
  0xec   :  { %354 = vmatmul.mubr.msk.f32.vlgmr.msra.gmra.mrb[4].mxu0 %vm61_vm1, %v179_v23 }
 0x1bf   :  { %v355_v25 = vpop.f32.mrb[4].mxu0 }
 0x1c0   :  { %v274_v26 = vadd.f32 %v355_v25, %v305_v24  ;;  %v268_v27 = vpop.f32.mrb[5].mxu0 }
 0x1c1   :  { %v269_v28 = vadd.f32 %v305_v24, %v268_v27 }
 0x1c2   :  { %279 = vst.msk [vmem:[#allocation3 + $0x8] sm:$0xff] %vm277_vm2, %v274_v26 }
 0x1c3   :  { %278 = vst.msk [vmem:[#allocation3] sm:$0xff] %vm277_vm2, %v269_v28 }
 0x1c4   :  { %386 = shalt.err (!%p383_p4)
}
 0x1c5   :  { %s387_s6 = scalar_lea.hbm %s499_s7, 256 }
 0x1c6   :  { %p388_p5 = scmp.ne.s32.totalorder %s499_s7, %s387_s6  ;;  %p391_p6 = scmp.lt.u32.totalorder %s387_s6, %s499_s7 }
 0x1c8   :  { %p393_p7 = pnand %p391_p6, %p388_p5 }
 0x1ca   :  { %396 = shalt.err (!%p393_p7)
}
 0x1cb   :  { %s402_s24 = smov 128   ;;  %s403_s25 = smov 8  }
 0x1cc   :  { %291 = dma.vmem_to_hbm [thread:$0]  %s286_s16, 256, %s499_s7, [#allocation4], %s402_s24, %s402_s24, %s403_s25  }
 0x1cd   :  { %397 = dma.done.wait [#allocation4], 256  }
 0x1ce   :  { %398 = vsyncadd [#allocation4], 4294967040 }
 0x1cf   :  { %295 = vsyncpa [#allocation4], 1 }

</bundles_post_ra>
